<compile_context>
chip_gen: v7x
topology: tpu7x:2x2x1
jax: 0.10.0
libtpu: 0.0.40
codegen_flags: <defaults>
</compile_context>

<pallas_src>
import functools

import jax
import jax.numpy as jnp
from jax.experimental import pallas as pl
from jax.experimental.pallas import tpu as pltpu

EPS = 1e-5  # nn.BatchNorm2d default eps


def _vmem_limit_bytes():
    # v7x: 64 MiB VMEM per TensorCore; v5e/v6e: 128 MiB.  Derive, don't hardcode.
    try:
        cap = int(getattr(pltpu.get_tpu_info(), "vmem_capacity_bytes",
                          64 * 1024 * 1024))
    except Exception:
        cap = 64 * 1024 * 1024
    return max(16 * 1024 * 1024, min((cap * 3) // 4, 96 * 1024 * 1024))


_VMEM_LIMIT = _vmem_limit_bytes()


def _round_up(x, m):
    return (x + m - 1) // m * m


def _grid_rows(m):
    """Row-tile size, padded row count and #row-tiles for M rows."""
    tm = min(512, _round_up(m, 8))
    mp = _round_up(m, tm)
    return tm, mp, mp // tm


def _pad_cols(x, nc):
    if x.shape[-1] == nc:
        return x
    pads = [(0, 0)] * (x.ndim - 1) + [(0, nc - x.shape[-1])]
    return jnp.pad(x, pads)


def _params(sem):
    return pltpu.CompilerParams(dimension_semantics=sem,
                                vmem_limit_bytes=_VMEM_LIMIT)


# --------------------------- Pallas kernels ---------------------------------

def _linear_layer1_kernel(x_ref, lw_ref, lb_ref, w1_ref, o_ref):
    # h = x @ linW^T + b ; y = h @ W1  (direct-GEMM form of the 1x1-input ConvT)
    h = jnp.dot(x_ref[...], lw_ref[...],
                preferred_element_type=jnp.float32) + lb_ref[...]
    o_ref[...] = jnp.dot(h.astype(w1_ref.dtype), w1_ref[...],
                         preferred_element_type=jnp.float32)


def _row_stats_kernel(y_ref, stats_ref):
    # Per-channel partial [sum, sum-of-squares] for one row tile.
    y = y_ref[...]
    stats_ref[0:1, :] = jnp.sum(y, axis=0, keepdims=True)
    stats_ref[1:2, :] = jnp.sum(y * y, axis=0, keepdims=True)


def _phase_gemm_stats_kernel(x_ref, w_ref, y_ref, stats_ref):
    # Sub-pixel phase GEMM + fused per-channel stats accumulation across phases.
    y = jnp.dot(x_ref[...], w_ref[...], preferred_element_type=jnp.float32)
    y_ref[...] = y
    s = jnp.sum(y, axis=0, keepdims=True)
    q = jnp.sum(y * y, axis=0, keepdims=True)

    @pl.when(pl.program_id(1) == 0)
    def _():
        stats_ref[0:1, :] = s
        stats_ref[1:2, :] = q

    @pl.when(pl.program_id(1) != 0)
    def _():
        stats_ref[0:1, :] += s
        stats_ref[1:2, :] += q


def _bn_relu_kernel(count, y_ref, stats_ref, g_ref, b_ref, o_ref):
    inv_n = 1.0 / count
    mean = stats_ref[0:1, :] * inv_n
    var = stats_ref[1:2, :] * inv_n - mean * mean      # E[y^2] - mean^2
    inv = jax.lax.rsqrt(var + EPS)
    yn = (y_ref[...] - mean) * (inv * g_ref[...]) + b_ref[...]
    o_ref[...] = jnp.maximum(yn, 0.0).astype(o_ref.dtype)


def _phase_gemm_tanh_kernel(x_ref, w_ref, o_ref):
    y = jnp.dot(x_ref[...], w_ref[...], preferred_element_type=jnp.float32)
    o_ref[...] = jnp.tanh(y)


# ------------------------------ wrappers -------------------------------------

def _linear_layer1(x, lin_w, lin_b, w1):
    """Fused Linear(110->384)+bias and layer-1 ConvTranspose as a direct GEMM.
    Returns raw (pre-BN) activations reshaped to (B*16, 192) float32."""
    B, K = x.shape
    C, O, k, _ = w1.shape                        # (384, 192, 4, 4)
    N = k * k * O                                # 3072, column order (i, j, o)
    tm, Bp, gm = _grid_rows(B)

    xb = jnp.zeros((Bp, K), jnp.bfloat16).at[:B].set(x.astype(jnp.bfloat16))
    lwt = lin_w.T.astype(jnp.bfloat16)           # (110, 384)
    lb = lin_b.reshape(1, -1).astype(jnp.float32)
    w1m = w1.transpose(0, 2, 3, 1).reshape(C, N).astype(jnp.bfloat16)

    y = pl.pallas_call(
        _linear_layer1_kernel,
        grid=(gm,),
        out_shape=jax.ShapeDtypeStruct((Bp, N), jnp.float32),
        in_specs=[
            pl.BlockSpec((tm, K), lambda m: (m, 0)),
            pl.BlockSpec(lwt.shape, lambda m: (0, 0)),
            pl.BlockSpec(lb.shape, lambda m: (0, 0)),
            pl.BlockSpec(w1m.shape, lambda m: (0, 0)),
        ],
        out_specs=pl.BlockSpec((tm, N), lambda m: (m, 0)),
        compiler_params=_params(("parallel",)),
        cost_estimate=pl.CostEstimate(
            flops=2 * Bp * (K * lwt.shape[1] + C * N),
            transcendentals=0,
            bytes_accessed=xb.size * 2 + lwt.size * 2 + lb.size * 4
            + w1m.size * 2 + Bp * N * 4),
    )(xb, lwt, lb, w1m)
    # rows = (b, i, j), cols = output channel
    return y[:B].reshape(B * k * k, O)


def _normalize_relu(yp, stats, gamma, beta, count):
    """Pass 2: normalize + affine + ReLU, bf16 output (rows x channels)."""
    M, Np = yp.shape
    tm, Mp, gm = _grid_rows(M)
    if Mp != M:
        yp = jnp.zeros((Mp, Np), jnp.float32).at[:M].set(yp)
    out = pl.pallas_call(
        functools.partial(_bn_relu_kernel, float(count)),
        grid=(gm,),
        out_shape=jax.ShapeDtypeStruct((Mp, Np), jnp.bfloat16),
        in_specs=[
            pl.BlockSpec((tm, Np), lambda m: (m, 0)),
            pl.BlockSpec((2, Np), lambda m: (0, 0)),
            pl.BlockSpec((1, Np), lambda m: (0, 0)),
            pl.BlockSpec((1, Np), lambda m: (0, 0)),
        ],
        out_specs=pl.BlockSpec((tm, Np), lambda m: (m, 0)),
        compiler_params=_params(("parallel",)),
    )(yp, stats, gamma, beta)
    return out[:M]


def _batchnorm_relu(y, gamma, beta, count):
    """Train-mode BatchNorm (batch stats) + ReLU over rows of y (rows=N*H*W)."""
    M, N = y.shape
    Np = _round_up(N, 128)
    tm, Mp, gm = _grid_rows(M)
    yp = y
    if (Mp, Np) != (M, N):
        yp = jnp.zeros((Mp, Np), jnp.float32).at[:M, :N].set(y)

    pstats = pl.pallas_call(
        _row_stats_kernel,
        grid=(gm,),
        out_shape=jax.ShapeDtypeStruct((gm, 2, Np), jnp.float32),
        in_specs=[pl.BlockSpec((tm, Np), lambda m: (m, 0))],
        out_specs=pl.BlockSpec((None, 2, Np), lambda m: (m, 0, 0)),
        compiler_params=_params(("parallel",)),
    )(yp)
    stats = jnp.sum(pstats, axis=0)              # (2, Np): [sum, sum of squares]

    g = _pad_cols(gamma.reshape(1, N).astype(jnp.float32), Np)
    b = _pad_cols(beta.reshape(1, N).astype(jnp.float32), Np)
    out = _normalize_relu(yp, stats, g, b, count)
    return out[:M, :N]


def _subpixel_cols(a):
    """Per-phase im2col for ConvTranspose2d(k=4, s=2, p=1).
    a: (B,H,W,C) NHWC -> (4, B*H*W, 4*C); phase p = ri*2+rj,
    column = (dy*2+dx)*C + c, value = x[b, iy+ri+dy-1, ix+rj+dx-1, c]."""
    B, H, W, C = a.shape
    a = a.astype(jnp.bfloat16)
    ap = jnp.pad(a, ((0, 0), (1, 1), (1, 1), (0, 0)))
    phases = []
    for ri in range(2):
        for rj in range(2):
            taps = [ap[:, ri + dy:ri + dy + H, rj + dx:rj + dx + W, :]
                    for dy in range(2) for dx in range(2)]
            xc = jnp.stack(taps, axis=3)                 # (B, H, W, 4, C)
            phases.append(xc.reshape(B * H * W, 4 * C))
    return jnp.stack(phases, axis=0)                     # (4, B*H*W, 4*C)


def _subpixel_weights(w_t):
    """Per-phase weights for ConvTranspose2d(k=4, s=2, p=1).
    w_t: (Cin, Cout, 4, 4) PyTorch layout -> (4, 4*Cin, Cout); tap (ri, dy)
    uses kernel row ky = 3 - ri - 2*dy (likewise for columns)."""
    C, O, _, _ = w_t.shape
    phases = []
    for ri in range(2):
        for rj in range(2):
            taps = [w_t[:, :, 3 - ri - 2 * dy, 3 - rj - 2 * dx]
                    for dy in range(2) for dx in range(2)]       # each (C, O)
            phases.append(jnp.stack(taps, axis=0).reshape(4 * C, O))
    return jnp.stack(phases, axis=0).astype(jnp.bfloat16)        # (4, 4*C, O)


def _interleave_phases(y, B, H, W, O):
    """(4, B*H*W, O) phase outputs -> (B, 2H, 2W, O)."""
    y = y.reshape(2, 2, B, H, W, O)                  # (ri, rj, b, iy, ix, o)
    y = y.transpose(2, 3, 0, 4, 1, 5)                # (b, iy, ri, ix, rj, o)
    return y.reshape(B, 2 * H, 2 * W, O)


def _prep_phases(a, w_t):
    B, H, W, _ = a.shape
    O = w_t.shape[1]
    xph = _subpixel_cols(a)                          # (4, M, 4C) bf16
    wph = _subpixel_weights(w_t)                     # (4, 4C, O) bf16
    P, M, K = xph.shape
    Np = _round_up(O, 128)
    tm, Mp, gm = _grid_rows(M)
    if Mp != M:
        xph = jnp.zeros((P, Mp, K), xph.dtype).at[:, :M].set(xph)
    if Np != O:
        wph = jnp.zeros((P, K, Np), wph.dtype).at[:, :, :O].set(wph)
    return xph, wph, (P, M, Mp, K, O, Np, tm, gm)


def _deconv_s2_bn_relu(a, w_t, gamma, beta):
    """ConvTranspose2d(k=4, s=2, p=1, bias=False) + BatchNorm + ReLU (NHWC)."""
    B, H, W, _ = a.shape
    xph, wph, (P, M, Mp, K, O, Np, tm, gm) = _prep_phases(a, w_t)

    y_raw, pstats = pl.pallas_call(
        _phase_gemm_stats_kernel,
        grid=(gm, P),
        out_shape=(jax.ShapeDtypeStruct((P, Mp, Np), jnp.float32),
                   jax.ShapeDtypeStruct((gm, 2, Np), jnp.float32)),
        in_specs=[
            pl.BlockSpec((None, tm, K), lambda m, p: (p, m, 0)),
            pl.BlockSpec((None, K, Np), lambda m, p: (p, 0, 0)),
        ],
        out_specs=(
            pl.BlockSpec((None, tm, Np), lambda m, p: (p, m, 0)),
            pl.BlockSpec((None, 2, Np), lambda m, p: (m, 0, 0)),
        ),
        compiler_params=_params(("parallel", "arbitrary")),
        cost_estimate=pl.CostEstimate(
            flops=2 * P * Mp * K * Np,
            transcendentals=0,
            bytes_accessed=xph.size * 2 + wph.size * 2
            + P * Mp * Np * 4 + gm * 2 * Np * 4),
    )(xph, wph)

    stats = jnp.sum(pstats, axis=0)                  # (2, Np)
    count = P * M                                    # true elements per channel
    g = _pad_cols(gamma.reshape(1, O).astype(jnp.float32), Np)
    bb = _pad_cols(beta.reshape(1, O).astype(jnp.float32), Np)
    yn = _normalize_relu(y_raw.reshape(P * Mp, Np), stats, g, bb, count)
    yn = yn.reshape(P, Mp, Np)[:, :M, :O]
    return _interleave_phases(yn, B, H, W, O)        # (B, 2H, 2W, O) bf16


def _deconv_s2_tanh(a, w_t):
    """ConvTranspose2d(k=4, s=2, p=1, bias=False) + Tanh (NHWC, f32 out)."""
    B, H, W, _ = a.shape
    xph, wph, (P, M, Mp, K, O, Np, tm, gm) = _prep_phases(a, w_t)
    y = pl.pallas_call(
        _phase_gemm_tanh_kernel,
        grid=(gm, P),
        out_shape=jax.ShapeDtypeStruct((P, Mp, Np), jnp.float32),
        in_specs=[
            pl.BlockSpec((None, tm, K), lambda m, p: (p, m, 0)),
            pl.BlockSpec((None, K, Np), lambda m, p: (p, 0, 0)),
        ],
        out_specs=pl.BlockSpec((None, tm, Np), lambda m, p: (p, m, 0)),
        compiler_params=_params(("parallel", "parallel")),
        cost_estimate=pl.CostEstimate(
            flops=2 * P * Mp * K * Np,
            transcendentals=P * Mp * Np,
            bytes_accessed=xph.size * 2 + wph.size * 2 + P * Mp * Np * 4),
    )(xph, wph)
    y = y[:, :M, :O]
    return _interleave_phases(y, B, H, W, O)


# ----------------------------- model glue ------------------------------------

def init_params(key):
    ks = jax.random.split(key, 6)
    scale = 0.05
    return {
        "lin_w": jax.random.normal(ks[0], (384, 110), jnp.float32) * scale,
        "lin_b": jax.random.normal(ks[1], (384,), jnp.float32) * scale,
        "w1": jax.random.normal(ks[2], (384, 192, 4, 4), jnp.float32) * scale,
        "w2": jax.random.normal(ks[3], (192, 96, 4, 4), jnp.float32) * scale,
        "w3": jax.random.normal(ks[4], (96, 48, 4, 4), jnp.float32) * scale,
        "w4": jax.random.normal(ks[5], (48, 3, 4, 4), jnp.float32) * scale,
        # BatchNorm affine params at nn.BatchNorm2d init values (gamma=1, beta=0).
        "g1": jnp.ones((192,), jnp.float32), "b1": jnp.zeros((192,), jnp.float32),
        "g2": jnp.ones((96,), jnp.float32), "b2": jnp.zeros((96,), jnp.float32),
        "g3": jnp.ones((48,), jnp.float32), "b3": jnp.zeros((48,), jnp.float32),
    }


def generator_forward(params, x):
    # TODO(synk): eval-mode BatchNorm (running_mean/running_var) is not
    # implemented; this matches the module's default .train() behaviour
    # (batch statistics with learnable gamma/beta).
    x = x.reshape(-1, 110)
    B = x.shape[0]

    # Linear(110,384)+bias fused with ConvT(384->192, 1x1 in, k4 s1 p0) GEMM.
    y1 = _linear_layer1(x, params["lin_w"], params["lin_b"], params["w1"])
    a = _batchnorm_relu(y1, params["g1"], params["b1"], count=B * 16)
    a = a.reshape(B, 4, 4, 192)                                           # NHWC

    a = _deconv_s2_bn_relu(a, params["w2"], params["g2"], params["b2"])   # (B,8,8,96)
    a = _deconv_s2_bn_relu(a, params["w3"], params["g3"], params["b3"])   # (B,16,16,48)
    out = _deconv_s2_tanh(a, params["w4"])                                # (B,32,32,3)
    return out.transpose(0, 3, 1, 2).astype(jnp.float32)                  # NCHW


if __name__ == "__main__":
    key = jax.random.PRNGKey(0)
    kp, kx = jax.random.split(key)
    params = init_params(kp)
    x = jax.random.normal(kx, (2, 110, 1, 1), jnp.float32)  # AC-GAN noise+label

    out = jax.jit(generator_forward)(params, x)
    out = jax.block_until_ready(out)

    assert out.shape == (2, 3, 32, 32), out.shape
    assert out.dtype == jnp.float32
    assert bool(jnp.all(jnp.isfinite(out)))
    assert bool(jnp.all(jnp.abs(out) <= 1.0))  # tanh range
    print("KERNEL_OK")
</pallas_src>

<mosaic_0001>
module attributes {stable_mosaic.version = 11 : i64} {
  func.func @_linear_layer1_kernel(%arg0: i32, %arg1: memref<8x110xbf16, #tpu.memory_space<vmem>>, %arg2: memref<110x384xbf16, #tpu.memory_space<vmem>>, %arg3: memref<1x384xf32, #tpu.memory_space<vmem>>, %arg4: memref<384x3072xbf16, #tpu.memory_space<vmem>>, %arg5: memref<8x3072xf32, #tpu.memory_space<vmem>>) attributes {dimension_semantics = [#tpu.dimension_semantics<parallel>], iteration_bounds = array<i64: 1>, scalar_prefetch = 0 : i64, scratch_operands = 0 : i64, tpu.core_type = #tpu.core_type<tc>, window_params = [{transform_indices = @transform_0, window_bounds = array<i64: 8, 110>}, {pipeline_mode = #tpu.pipeline_mode<synchronous>, transform_indices = @transform_1, window_bounds = array<i64: 110, 384>}, {pipeline_mode = #tpu.pipeline_mode<synchronous>, transform_indices = @transform_2, window_bounds = array<i64: 1, 384>}, {pipeline_mode = #tpu.pipeline_mode<synchronous>, transform_indices = @transform_3, window_bounds = array<i64: 384, 3072>}, {transform_indices = @transform_4, window_bounds = array<i64: 8, 3072>}]} {
    %c0 = arith.constant 0 : index
    %c0_0 = arith.constant 0 : index
    %0 = vector.load %arg1[%c0, %c0_0] : memref<8x110xbf16, #tpu.memory_space<vmem>>, vector<8x110xbf16>
    %c0_1 = arith.constant 0 : index
    %c0_2 = arith.constant 0 : index
    %1 = vector.load %arg2[%c0_1, %c0_2] : memref<110x384xbf16, #tpu.memory_space<vmem>>, vector<110x384xbf16>
    %cst = arith.constant dense<0.000000e+00> : vector<8x384xf32>
    %2 = tpu.matmul %0, %1, %cst {dimension_numbers = #tpu.dot_dimension_numbers<[1], [0], [0], [1], [0, 0, 1, 1], [], []>} : vector<8x110xbf16>, vector<110x384xbf16>, vector<8x384xf32> -> vector<8x384xf32>
    %c0_3 = arith.constant 0 : index
    %c0_4 = arith.constant 0 : index
    %3 = vector.load %arg3[%c0_3, %c0_4] : memref<1x384xf32, #tpu.memory_space<vmem>>, vector<1x384xf32>
    %4 = vector.broadcast %3 : vector<1x384xf32> to vector<8x384xf32>
    %5 = arith.addf %2, %4 : vector<8x384xf32>
    %6 = arith.truncf %5 : vector<8x384xf32> to vector<8x384xbf16>
    %c0_5 = arith.constant 0 : index
    %c0_6 = arith.constant 0 : index
    %7 = vector.load %arg4[%c0_5, %c0_6] : memref<384x3072xbf16, #tpu.memory_space<vmem>>, vector<384x3072xbf16>
    %cst_7 = arith.constant dense<0.000000e+00> : vector<8x3072xf32>
    %8 = tpu.matmul %6, %7, %cst_7 {dimension_numbers = #tpu.dot_dimension_numbers<[1], [0], [0], [1], [0, 0, 1, 1], [], []>} : vector<8x384xbf16>, vector<384x3072xbf16>, vector<8x3072xf32> -> vector<8x3072xf32>
    %c0_8 = arith.constant 0 : index
    %c0_9 = arith.constant 0 : index
    %9 = vector.load %arg5[%c0_8, %c0_9] : memref<8x3072xf32, #tpu.memory_space<vmem>>, vector<8x3072xf32>
    tpu.vector_store %arg5[%c0_8, %c0_9], %8 {strides = array<i32>} : memref<8x3072xf32, #tpu.memory_space<vmem>>, vector<8x3072xf32>,
    return
  }
  func.func @transform_0(%arg0: i32) -> (i32, i32) {
    %c0_i32 = arith.constant 0 : i32
    %c0_i32_0 = arith.constant 0 : i32
    return %arg0, %c0_i32 : i32, i32
  }
  func.func @transform_1(%arg0: i32) -> (i32, i32) {
    %c0_i32 = arith.constant 0 : i32
    %c0_i32_0 = arith.constant 0 : i32
    %c0_i32_1 = arith.constant 0 : i32
    return %c0_i32, %c0_i32_0 : i32, i32
  }
  func.func @transform_2(%arg0: i32) -> (i32, i32) {
    %c0_i32 = arith.constant 0 : i32
    %c0_i32_0 = arith.constant 0 : i32
    %c0_i32_1 = arith.constant 0 : i32
    return %c0_i32, %c0_i32_0 : i32, i32
  }
  func.func @transform_3(%arg0: i32) -> (i32, i32) {
    %c0_i32 = arith.constant 0 : i32
    %c0_i32_0 = arith.constant 0 : i32
    %c0_i32_1 = arith.constant 0 : i32
    return %c0_i32, %c0_i32_0 : i32, i32
  }
  func.func @transform_4(%arg0: i32) -> (i32, i32) {
    %c0_i32 = arith.constant 0 : i32
    %c0_i32_0 = arith.constant 0 : i32
    return %arg0, %c0_i32 : i32, i32
  }
}

module attributes {stable_mosaic.version = 11 : i64} {
  func.func @_row_stats_kernel(%arg0: i32, %arg1: memref<32x256xf32, #tpu.memory_space<vmem>>, %arg2: memref<1x2x256xf32, #tpu.memory_space<vmem>>) attributes {dimension_semantics = [#tpu.dimension_semantics<parallel>], iteration_bounds = array<i64: 1>, scalar_prefetch = 0 : i64, scratch_operands = 0 : i64, tpu.core_type = #tpu.core_type<tc>, window_params = [{transform_indices = @transform_0, window_bounds = array<i64: 32, 256>}, {transform_indices = @transform_1, window_bounds = array<i64: 1, 2, 256>}]} {
    %c0 = arith.constant 0 : index
    %c0_0 = arith.constant 0 : index
    %0 = vector.load %arg1[%c0, %c0_0] : memref<32x256xf32, #tpu.memory_space<vmem>>, vector<32x256xf32>
    %cst = arith.constant dense<0.000000e+00> : vector<256xf32>
    %1 = vector.multi_reduction <add>, %0, %cst [0] : vector<32x256xf32> to vector<256xf32>
    %2 = vector.shape_cast %1 : vector<256xf32> to vector<1x256xf32>
    %c0_1 = arith.constant 0 : index
    %c0_2 = arith.constant 0 : index
    %c0_3 = arith.constant 0 : index
    %3 = vector.load %arg2[%c0_1, %c0_2, %c0_3] : memref<1x2x256xf32, #tpu.memory_space<vmem>>, vector<1x1x256xf32>
    %4 = vector.shape_cast %3 : vector<1x1x256xf32> to vector<1x256xf32>
    %5 = vector.shape_cast %2 : vector<1x256xf32> to vector<1x1x256xf32>
    tpu.vector_store %arg2[%c0_1, %c0_2, %c0_3], %5 {strides = array<i32>} : memref<1x2x256xf32, #tpu.memory_space<vmem>>, vector<1x1x256xf32>,
    %6 = arith.mulf %0, %0 : vector<32x256xf32>
    %cst_4 = arith.constant dense<0.000000e+00> : vector<256xf32>
    %7 = vector.multi_reduction <add>, %6, %cst_4 [0] : vector<32x256xf32> to vector<256xf32>
    %8 = vector.shape_cast %7 : vector<256xf32> to vector<1x256xf32>
    %c0_5 = arith.constant 0 : index
    %c1 = arith.constant 1 : index
    %c0_6 = arith.constant 0 : index
    %9 = vector.load %arg2[%c0_5, %c1, %c0_6] : memref<1x2x256xf32, #tpu.memory_space<vmem>>, vector<1x1x256xf32>
    %10 = vector.shape_cast %9 : vector<1x1x256xf32> to vector<1x256xf32>
    %11 = vector.shape_cast %8 : vector<1x256xf32> to vector<1x1x256xf32>
    tpu.vector_store %arg2[%c0_5, %c1, %c0_6], %11 {strides = array<i32>} : memref<1x2x256xf32, #tpu.memory_space<vmem>>, vector<1x1x256xf32>,
    return
  }
  func.func @transform_0(%arg0: i32) -> (i32, i32) {
    %c0_i32 = arith.constant 0 : i32
    %c0_i32_0 = arith.constant 0 : i32
    return %arg0, %c0_i32 : i32, i32
  }
  func.func @transform_1(%arg0: i32) -> (i32, i32, i32) {
    %c0_i32 = arith.constant 0 : i32
    %c0_i32_0 = arith.constant 0 : i32
    %c0_i32_1 = arith.constant 0 : i32
    return %arg0, %c0_i32, %c0_i32_0 : i32, i32, i32
  }
}

module attributes {stable_mosaic.version = 11 : i64} {
  func.func @_bn_relu_kernel(%arg0: i32, %arg1: memref<32x256xf32, #tpu.memory_space<vmem>>, %arg2: memref<2x256xf32, #tpu.memory_space<vmem>>, %arg3: memref<1x256xf32, #tpu.memory_space<vmem>>, %arg4: memref<1x256xf32, #tpu.memory_space<vmem>>, %arg5: memref<32x256xbf16, #tpu.memory_space<vmem>>) attributes {dimension_semantics = [#tpu.dimension_semantics<parallel>], iteration_bounds = array<i64: 1>, scalar_prefetch = 0 : i64, scratch_operands = 0 : i64, tpu.core_type = #tpu.core_type<tc>, window_params = [{transform_indices = @transform_0, window_bounds = array<i64: 32, 256>}, {pipeline_mode = #tpu.pipeline_mode<synchronous>, transform_indices = @transform_1, window_bounds = array<i64: 2, 256>}, {pipeline_mode = #tpu.pipeline_mode<synchronous>, transform_indices = @transform_2, window_bounds = array<i64: 1, 256>}, {pipeline_mode = #tpu.pipeline_mode<synchronous>, transform_indices = @transform_3, window_bounds = array<i64: 1, 256>}, {transform_indices = @transform_4, window_bounds = array<i64: 32, 256>}]} {
    %c0 = arith.constant 0 : index
    %c0_0 = arith.constant 0 : index
    %0 = vector.load %arg2[%c0, %c0_0] : memref<2x256xf32, #tpu.memory_space<vmem>>, vector<1x256xf32>
    %cst = arith.constant 3.125000e-02 : f32
    %1 = vector.broadcast %cst : f32 to vector<1x256xf32>
    %2 = arith.mulf %0, %1 : vector<1x256xf32>
    %c1 = arith.constant 1 : index
    %c0_1 = arith.constant 0 : index
    %3 = vector.load %arg2[%c1, %c0_1] : memref<2x256xf32, #tpu.memory_space<vmem>>, vector<1x256xf32>
    %cst_2 = arith.constant 3.125000e-02 : f32
    %4 = vector.broadcast %cst_2 : f32 to vector<1x256xf32>
    %5 = arith.mulf %3, %4 : vector<1x256xf32>
    %6 = arith.mulf %2, %2 : vector<1x256xf32>
    %7 = arith.subf %5, %6 : vector<1x256xf32>
    %cst_3 = arith.constant 9.99999974E-6 : f32
    %8 = vector.broadcast %cst_3 : f32 to vector<1x256xf32>
    %9 = arith.addf %7, %8 : vector<1x256xf32>
    %10 = math.rsqrt %9 : vector<1x256xf32>
    %c0_4 = arith.constant 0 : index
    %c0_5 = arith.constant 0 : index
    %11 = vector.load %arg1[%c0_4, %c0_5] : memref<32x256xf32, #tpu.memory_space<vmem>>, vector<32x256xf32>
    %12 = vector.broadcast %2 : vector<1x256xf32> to vector<32x256xf32>
    %13 = arith.subf %11, %12 : vector<32x256xf32>
    %c0_6 = arith.constant 0 : index
    %c0_7 = arith.constant 0 : index
    %14 = vector.load %arg3[%c0_6, %c0_7] : memref<1x256xf32, #tpu.memory_space<vmem>>, vector<1x256xf32>
    %15 = arith.mulf %10, %14 : vector<1x256xf32>
    %16 = vector.broadcast %15 : vector<1x256xf32> to vector<32x256xf32>
    %17 = arith.mulf %13, %16 : vector<32x256xf32>
    %c0_8 = arith.constant 0 : index
    %c0_9 = arith.constant 0 : index
    %18 = vector.load %arg4[%c0_8, %c0_9] : memref<1x256xf32, #tpu.memory_space<vmem>>, vector<1x256xf32>
    %19 = vector.broadcast %18 : vector<1x256xf32> to vector<32x256xf32>
    %20 = arith.addf %17, %19 : vector<32x256xf32>
    %cst_10 = arith.constant 0.000000e+00 : f32
    %21 = vector.broadcast %cst_10 : f32 to vector<32x256xf32>
    %22 = arith.maximumf %20, %21 : vector<32x256xf32>
    %23 = arith.truncf %22 : vector<32x256xf32> to vector<32x256xbf16>
    %c0_11 = arith.constant 0 : index
    %c0_12 = arith.constant 0 : index
    %24 = vector.load %arg5[%c0_11, %c0_12] : memref<32x256xbf16, #tpu.memory_space<vmem>>, vector<32x256xbf16>
    tpu.vector_store %arg5[%c0_11, %c0_12], %23 {strides = array<i32>} : memref<32x256xbf16, #tpu.memory_space<vmem>>, vector<32x256xbf16>,
    return
  }
  func.func @transform_0(%arg0: i32) -> (i32, i32) {
    %c0_i32 = arith.constant 0 : i32
    %c0_i32_0 = arith.constant 0 : i32
    return %arg0, %c0_i32 : i32, i32
  }
  func.func @transform_1(%arg0: i32) -> (i32, i32) {
    %c0_i32 = arith.constant 0 : i32
    %c0_i32_0 = arith.constant 0 : i32
    %c0_i32_1 = arith.constant 0 : i32
    return %c0_i32, %c0_i32_0 : i32, i32
  }
  func.func @transform_2(%arg0: i32) -> (i32, i32) {
    %c0_i32 = arith.constant 0 : i32
    %c0_i32_0 = arith.constant 0 : i32
    %c0_i32_1 = arith.constant 0 : i32
    return %c0_i32, %c0_i32_0 : i32, i32
  }
  func.func @transform_3(%arg0: i32) -> (i32, i32) {
    %c0_i32 = arith.constant 0 : i32
    %c0_i32_0 = arith.constant 0 : i32
    %c0_i32_1 = arith.constant 0 : i32
    return %c0_i32, %c0_i32_0 : i32, i32
  }
  func.func @transform_4(%arg0: i32) -> (i32, i32) {
    %c0_i32 = arith.constant 0 : i32
    %c0_i32_0 = arith.constant 0 : i32
    return %arg0, %c0_i32 : i32, i32
  }
}

module attributes {stable_mosaic.version = 11 : i64} {
  func.func @_phase_gemm_stats_kernel(%arg0: i32, %arg1: i32, %arg2: memref<1x32x768xbf16, #tpu.memory_space<vmem>>, %arg3: memref<1x768x128xbf16, #tpu.memory_space<vmem>>, %arg4: memref<1x32x128xf32, #tpu.memory_space<vmem>>, %arg5: memref<1x2x128xf32, #tpu.memory_space<vmem>>) attributes {dimension_semantics = [#tpu.dimension_semantics<parallel>, #tpu.dimension_semantics<arbitrary>], iteration_bounds = array<i64: 1, 4>, scalar_prefetch = 0 : i64, scratch_operands = 0 : i64, tpu.core_type = #tpu.core_type<tc>, window_params = [{transform_indices = @transform_0, window_bounds = array<i64: 1, 32, 768>}, {transform_indices = @transform_1, window_bounds = array<i64: 1, 768, 128>}, {transform_indices = @transform_2, window_bounds = array<i64: 1, 32, 128>}, {transform_indices = @transform_3, window_bounds = array<i64: 1, 2, 128>}]} {
    %c0 = arith.constant 0 : index
    %c0_0 = arith.constant 0 : index
    %c0_1 = arith.constant 0 : index
    %0 = vector.load %arg2[%c0, %c0_0, %c0_1] : memref<1x32x768xbf16, #tpu.memory_space<vmem>>, vector<1x32x768xbf16>
    %1 = vector.shape_cast %0 : vector<1x32x768xbf16> to vector<32x768xbf16>
    %c0_2 = arith.constant 0 : index
    %c0_3 = arith.constant 0 : index
    %c0_4 = arith.constant 0 : index
    %2 = vector.load %arg3[%c0_2, %c0_3, %c0_4] : memref<1x768x128xbf16, #tpu.memory_space<vmem>>, vector<1x768x128xbf16>
    %3 = vector.shape_cast %2 : vector<1x768x128xbf16> to vector<768x128xbf16>
    %cst = arith.constant dense<0.000000e+00> : vector<32x128xf32>
    %4 = tpu.matmul %1, %3, %cst {dimension_numbers = #tpu.dot_dimension_numbers<[1], [0], [0], [1], [0, 0, 1, 1], [], []>} : vector<32x768xbf16>, vector<768x128xbf16>, vector<32x128xf32> -> vector<32x128xf32>
    %c0_5 = arith.constant 0 : index
    %c0_6 = arith.constant 0 : index
    %c0_7 = arith.constant 0 : index
    %5 = vector.load %arg4[%c0_5, %c0_6, %c0_7] : memref<1x32x128xf32, #tpu.memory_space<vmem>>, vector<1x32x128xf32>
    %6 = vector.shape_cast %5 : vector<1x32x128xf32> to vector<32x128xf32>
    %7 = vector.shape_cast %4 : vector<32x128xf32> to vector<1x32x128xf32>
    tpu.vector_store %arg4[%c0_5, %c0_6, %c0_7], %7 {strides = array<i32>} : memref<1x32x128xf32, #tpu.memory_space<vmem>>, vector<1x32x128xf32>,
    %cst_8 = arith.constant dense<0.000000e+00> : vector<128xf32>
    %8 = vector.multi_reduction <add>, %4, %cst_8 [0] : vector<32x128xf32> to vector<128xf32>
    %9 = vector.shape_cast %8 : vector<128xf32> to vector<1x128xf32>
    %10 = arith.mulf %4, %4 : vector<32x128xf32>
    %cst_9 = arith.constant dense<0.000000e+00> : vector<128xf32>
    %11 = vector.multi_reduction <add>, %10, %cst_9 [0] : vector<32x128xf32> to vector<128xf32>
    %12 = vector.shape_cast %11 : vector<128xf32> to vector<1x128xf32>
    %c0_i32 = arith.constant 0 : i32
    %13 = arith.cmpi eq, %arg1, %c0_i32 : i32
    %14 = arith.extui %13 : i1 to i32
    %c0_i32_10 = arith.constant 0 : i32
    %15 = arith.cmpi ne, %14, %c0_i32_10 : i32
    scf.if %15 {
      %c0_13 = arith.constant 0 : index
      %c0_14 = arith.constant 0 : index
      %c0_15 = arith.constant 0 : index
      %19 = vector.load %arg5[%c0_13, %c0_14, %c0_15] : memref<1x2x128xf32, #tpu.memory_space<vmem>>, vector<1x1x128xf32>
      %20 = vector.shape_cast %19 : vector<1x1x128xf32> to vector<1x128xf32>
      %21 = vector.shape_cast %9 : vector<1x128xf32> to vector<1x1x128xf32>
      tpu.vector_store %arg5[%c0_13, %c0_14, %c0_15], %21 {strides = array<i32>} : memref<1x2x128xf32, #tpu.memory_space<vmem>>, vector<1x1x128xf32>,
      %c0_16 = arith.constant 0 : index
      %c1 = arith.constant 1 : index
      %c0_17 = arith.constant 0 : index
      %22 = vector.load %arg5[%c0_16, %c1, %c0_17] : memref<1x2x128xf32, #tpu.memory_space<vmem>>, vector<1x1x128xf32>
      %23 = vector.shape_cast %22 : vector<1x1x128xf32> to vector<1x128xf32>
      %24 = vector.shape_cast %12 : vector<1x128xf32> to vector<1x1x128xf32>
      tpu.vector_store %arg5[%c0_16, %c1, %c0_17], %24 {strides = array<i32>} : memref<1x2x128xf32, #tpu.memory_space<vmem>>, vector<1x1x128xf32>,
    } else {
    }
    %c0_i32_11 = arith.constant 0 : i32
    %16 = arith.cmpi ne, %arg1, %c0_i32_11 : i32
    %17 = arith.extui %16 : i1 to i32
    %c0_i32_12 = arith.constant 0 : i32
    %18 = arith.cmpi ne, %17, %c0_i32_12 : i32
    scf.if %18 {
      %c0_13 = arith.constant 0 : index
      %c0_14 = arith.constant 0 : index
      %c0_15 = arith.constant 0 : index
      %19 = vector.load %arg5[%c0_13, %c0_14, %c0_15] : memref<1x2x128xf32, #tpu.memory_space<vmem>>, vector<1x1x128xf32>
      %20 = vector.shape_cast %19 : vector<1x1x128xf32> to vector<1x128xf32>
      %21 = arith.addf %20, %9 : vector<1x128xf32>
      %c0_16 = arith.constant 0 : index
      %c0_17 = arith.constant 0 : index
      %c0_18 = arith.constant 0 : index
      %22 = vector.load %arg5[%c0_16, %c0_17, %c0_18] : memref<1x2x128xf32, #tpu.memory_space<vmem>>, vector<1x1x128xf32>
      %23 = vector.shape_cast %22 : vector<1x1x128xf32> to vector<1x128xf32>
      %24 = vector.shape_cast %21 : vector<1x128xf32> to vector<1x1x128xf32>
      tpu.vector_store %arg5[%c0_16, %c0_17, %c0_18], %24 {strides = array<i32>} : memref<1x2x128xf32, #tpu.memory_space<vmem>>, vector<1x1x128xf32>,
      %c0_19 = arith.constant 0 : index
      %c1 = arith.constant 1 : index
      %c0_20 = arith.constant 0 : index
      %25 = vector.load %arg5[%c0_19, %c1, %c0_20] : memref<1x2x128xf32, #tpu.memory_space<vmem>>, vector<1x1x128xf32>
      %26 = vector.shape_cast %25 : vector<1x1x128xf32> to vector<1x128xf32>
      %27 = arith.addf %26, %12 : vector<1x128xf32>
      %c0_21 = arith.constant 0 : index
      %c1_22 = arith.constant 1 : index
      %c0_23 = arith.constant 0 : index
      %28 = vector.load %arg5[%c0_21, %c1_22, %c0_23] : memref<1x2x128xf32, #tpu.memory_space<vmem>>, vector<1x1x128xf32>
      %29 = vector.shape_cast %28 : vector<1x1x128xf32> to vector<1x128xf32>
      %30 = vector.shape_cast %27 : vector<1x128xf32> to vector<1x1x128xf32>
      tpu.vector_store %arg5[%c0_21, %c1_22, %c0_23], %30 {strides = array<i32>} : memref<1x2x128xf32, #tpu.memory_space<vmem>>, vector<1x1x128xf32>,
    } else {
    }
    return
  }
  func.func @transform_0(%arg0: i32, %arg1: i32) -> (i32, i32, i32) {
    %c0_i32 = arith.constant 0 : i32
    %c0_i32_0 = arith.constant 0 : i32
    return %arg1, %arg0, %c0_i32 : i32, i32, i32
  }
  func.func @transform_1(%arg0: i32, %arg1: i32) -> (i32, i32, i32) {
    %c0_i32 = arith.constant 0 : i32
    %c0_i32_0 = arith.constant 0 : i32
    %c0_i32_1 = arith.constant 0 : i32
    return %arg1, %c0_i32, %c0_i32_0 : i32, i32, i32
  }
  func.func @transform_2(%arg0: i32, %arg1: i32) -> (i32, i32, i32) {
    %c0_i32 = arith.constant 0 : i32
    %c0_i32_0 = arith.constant 0 : i32
    return %arg1, %arg0, %c0_i32 : i32, i32, i32
  }
  func.func @transform_3(%arg0: i32, %arg1: i32) -> (i32, i32, i32) {
    %c0_i32 = arith.constant 0 : i32
    %c0_i32_0 = arith.constant 0 : i32
    %c0_i32_1 = arith.constant 0 : i32
    return %arg0, %c0_i32, %c0_i32_0 : i32, i32, i32
  }
}

module attributes {stable_mosaic.version = 11 : i64} {
  func.func @_bn_relu_kernel(%arg0: i32, %arg1: memref<128x128xf32, #tpu.memory_space<vmem>>, %arg2: memref<2x128xf32, #tpu.memory_space<vmem>>, %arg3: memref<1x128xf32, #tpu.memory_space<vmem>>, %arg4: memref<1x128xf32, #tpu.memory_space<vmem>>, %arg5: memref<128x128xbf16, #tpu.memory_space<vmem>>) attributes {dimension_semantics = [#tpu.dimension_semantics<parallel>], iteration_bounds = array<i64: 1>, scalar_prefetch = 0 : i64, scratch_operands = 0 : i64, tpu.core_type = #tpu.core_type<tc>, window_params = [{transform_indices = @transform_0, window_bounds = array<i64: 128, 128>}, {pipeline_mode = #tpu.pipeline_mode<synchronous>, transform_indices = @transform_1, window_bounds = array<i64: 2, 128>}, {pipeline_mode = #tpu.pipeline_mode<synchronous>, transform_indices = @transform_2, window_bounds = array<i64: 1, 128>}, {pipeline_mode = #tpu.pipeline_mode<synchronous>, transform_indices = @transform_3, window_bounds = array<i64: 1, 128>}, {transform_indices = @transform_4, window_bounds = array<i64: 128, 128>}]} {
    %c0 = arith.constant 0 : index
    %c0_0 = arith.constant 0 : index
    %0 = vector.load %arg2[%c0, %c0_0] : memref<2x128xf32, #tpu.memory_space<vmem>>, vector<1x128xf32>
    %cst = arith.constant 7.812500e-03 : f32
    %1 = vector.broadcast %cst : f32 to vector<1x128xf32>
    %2 = arith.mulf %0, %1 : vector<1x128xf32>
    %c1 = arith.constant 1 : index
    %c0_1 = arith.constant 0 : index
    %3 = vector.load %arg2[%c1, %c0_1] : memref<2x128xf32, #tpu.memory_space<vmem>>, vector<1x128xf32>
    %cst_2 = arith.constant 7.812500e-03 : f32
    %4 = vector.broadcast %cst_2 : f32 to vector<1x128xf32>
    %5 = arith.mulf %3, %4 : vector<1x128xf32>
    %6 = arith.mulf %2, %2 : vector<1x128xf32>
    %7 = arith.subf %5, %6 : vector<1x128xf32>
    %cst_3 = arith.constant 9.99999974E-6 : f32
    %8 = vector.broadcast %cst_3 : f32 to vector<1x128xf32>
    %9 = arith.addf %7, %8 : vector<1x128xf32>
    %10 = math.rsqrt %9 : vector<1x128xf32>
    %c0_4 = arith.constant 0 : index
    %c0_5 = arith.constant 0 : index
    %11 = vector.load %arg1[%c0_4, %c0_5] : memref<128x128xf32, #tpu.memory_space<vmem>>, vector<128x128xf32>
    %12 = vector.broadcast %2 : vector<1x128xf32> to vector<128x128xf32>
    %13 = arith.subf %11, %12 : vector<128x128xf32>
    %c0_6 = arith.constant 0 : index
    %c0_7 = arith.constant 0 : index
    %14 = vector.load %arg3[%c0_6, %c0_7] : memref<1x128xf32, #tpu.memory_space<vmem>>, vector<1x128xf32>
    %15 = arith.mulf %10, %14 : vector<1x128xf32>
    %16 = vector.broadcast %15 : vector<1x128xf32> to vector<128x128xf32>
    %17 = arith.mulf %13, %16 : vector<128x128xf32>
    %c0_8 = arith.constant 0 : index
    %c0_9 = arith.constant 0 : index
    %18 = vector.load %arg4[%c0_8, %c0_9] : memref<1x128xf32, #tpu.memory_space<vmem>>, vector<1x128xf32>
    %19 = vector.broadcast %18 : vector<1x128xf32> to vector<128x128xf32>
    %20 = arith.addf %17, %19 : vector<128x128xf32>
    %cst_10 = arith.constant 0.000000e+00 : f32
    %21 = vector.broadcast %cst_10 : f32 to vector<128x128xf32>
    %22 = arith.maximumf %20, %21 : vector<128x128xf32>
    %23 = arith.truncf %22 : vector<128x128xf32> to vector<128x128xbf16>
    %c0_11 = arith.constant 0 : index
    %c0_12 = arith.constant 0 : index
    %24 = vector.load %arg5[%c0_11, %c0_12] : memref<128x128xbf16, #tpu.memory_space<vmem>>, vector<128x128xbf16>
    tpu.vector_store %arg5[%c0_11, %c0_12], %23 {strides = array<i32>} : memref<128x128xbf16, #tpu.memory_space<vmem>>, vector<128x128xbf16>,
    return
  }
  func.func @transform_0(%arg0: i32) -> (i32, i32) {
    %c0_i32 = arith.constant 0 : i32
    %c0_i32_0 = arith.constant 0 : i32
    return %arg0, %c0_i32 : i32, i32
  }
  func.func @transform_1(%arg0: i32) -> (i32, i32) {
    %c0_i32 = arith.constant 0 : i32
    %c0_i32_0 = arith.constant 0 : i32
    %c0_i32_1 = arith.constant 0 : i32
    return %c0_i32, %c0_i32_0 : i32, i32
  }
  func.func @transform_2(%arg0: i32) -> (i32, i32) {
    %c0_i32 = arith.constant 0 : i32
    %c0_i32_0 = arith.constant 0 : i32
    %c0_i32_1 = arith.constant 0 : i32
    return %c0_i32, %c0_i32_0 : i32, i32
  }
  func.func @transform_3(%arg0: i32) -> (i32, i32) {
    %c0_i32 = arith.constant 0 : i32
    %c0_i32_0 = arith.constant 0 : i32
    %c0_i32_1 = arith.constant 0 : i32
    return %c0_i32, %c0_i32_0 : i32, i32
  }
  func.func @transform_4(%arg0: i32) -> (i32, i32) {
    %c0_i32 = arith.constant 0 : i32
    %c0_i32_0 = arith.constant 0 : i32
    return %arg0, %c0_i32 : i32, i32
  }
}

module attributes {stable_mosaic.version = 11 : i64} {
  func.func @_phase_gemm_stats_kernel(%arg0: i32, %arg1: i32, %arg2: memref<1x128x384xbf16, #tpu.memory_space<vmem>>, %arg3: memref<1x384x128xbf16, #tpu.memory_space<vmem>>, %arg4: memref<1x128x128xf32, #tpu.memory_space<vmem>>, %arg5: memref<1x2x128xf32, #tpu.memory_space<vmem>>) attributes {dimension_semantics = [#tpu.dimension_semantics<parallel>, #tpu.dimension_semantics<arbitrary>], iteration_bounds = array<i64: 1, 4>, scalar_prefetch = 0 : i64, scratch_operands = 0 : i64, tpu.core_type = #tpu.core_type<tc>, window_params = [{transform_indices = @transform_0, window_bounds = array<i64: 1, 128, 384>}, {transform_indices = @transform_1, window_bounds = array<i64: 1, 384, 128>}, {transform_indices = @transform_2, window_bounds = array<i64: 1, 128, 128>}, {transform_indices = @transform_3, window_bounds = array<i64: 1, 2, 128>}]} {
    %c0 = arith.constant 0 : index
    %c0_0 = arith.constant 0 : index
    %c0_1 = arith.constant 0 : index
    %0 = vector.load %arg2[%c0, %c0_0, %c0_1] : memref<1x128x384xbf16, #tpu.memory_space<vmem>>, vector<1x128x384xbf16>
    %1 = vector.shape_cast %0 : vector<1x128x384xbf16> to vector<128x384xbf16>
    %c0_2 = arith.constant 0 : index
    %c0_3 = arith.constant 0 : index
    %c0_4 = arith.constant 0 : index
    %2 = vector.load %arg3[%c0_2, %c0_3, %c0_4] : memref<1x384x128xbf16, #tpu.memory_space<vmem>>, vector<1x384x128xbf16>
    %3 = vector.shape_cast %2 : vector<1x384x128xbf16> to vector<384x128xbf16>
    %cst = arith.constant dense<0.000000e+00> : vector<128x128xf32>
    %4 = tpu.matmul %1, %3, %cst {dimension_numbers = #tpu.dot_dimension_numbers<[1], [0], [0], [1], [0, 0, 1, 1], [], []>} : vector<128x384xbf16>, vector<384x128xbf16>, vector<128x128xf32> -> vector<128x128xf32>
    %c0_5 = arith.constant 0 : index
    %c0_6 = arith.constant 0 : index
    %c0_7 = arith.constant 0 : index
    %5 = vector.load %arg4[%c0_5, %c0_6, %c0_7] : memref<1x128x128xf32, #tpu.memory_space<vmem>>, vector<1x128x128xf32>
    %6 = vector.shape_cast %5 : vector<1x128x128xf32> to vector<128x128xf32>
    %7 = vector.shape_cast %4 : vector<128x128xf32> to vector<1x128x128xf32>
    tpu.vector_store %arg4[%c0_5, %c0_6, %c0_7], %7 {strides = array<i32>} : memref<1x128x128xf32, #tpu.memory_space<vmem>>, vector<1x128x128xf32>,
    %cst_8 = arith.constant dense<0.000000e+00> : vector<128xf32>
    %8 = vector.multi_reduction <add>, %4, %cst_8 [0] : vector<128x128xf32> to vector<128xf32>
    %9 = vector.shape_cast %8 : vector<128xf32> to vector<1x128xf32>
    %10 = arith.mulf %4, %4 : vector<128x128xf32>
    %cst_9 = arith.constant dense<0.000000e+00> : vector<128xf32>
    %11 = vector.multi_reduction <add>, %10, %cst_9 [0] : vector<128x128xf32> to vector<128xf32>
    %12 = vector.shape_cast %11 : vector<128xf32> to vector<1x128xf32>
    %c0_i32 = arith.constant 0 : i32
    %13 = arith.cmpi eq, %arg1, %c0_i32 : i32
    %14 = arith.extui %13 : i1 to i32
    %c0_i32_10 = arith.constant 0 : i32
    %15 = arith.cmpi ne, %14, %c0_i32_10 : i32
    scf.if %15 {
      %c0_13 = arith.constant 0 : index
      %c0_14 = arith.constant 0 : index
      %c0_15 = arith.constant 0 : index
      %19 = vector.load %arg5[%c0_13, %c0_14, %c0_15] : memref<1x2x128xf32, #tpu.memory_space<vmem>>, vector<1x1x128xf32>
      %20 = vector.shape_cast %19 : vector<1x1x128xf32> to vector<1x128xf32>
      %21 = vector.shape_cast %9 : vector<1x128xf32> to vector<1x1x128xf32>
      tpu.vector_store %arg5[%c0_13, %c0_14, %c0_15], %21 {strides = array<i32>} : memref<1x2x128xf32, #tpu.memory_space<vmem>>, vector<1x1x128xf32>,
      %c0_16 = arith.constant 0 : index
      %c1 = arith.constant 1 : index
      %c0_17 = arith.constant 0 : index
      %22 = vector.load %arg5[%c0_16, %c1, %c0_17] : memref<1x2x128xf32, #tpu.memory_space<vmem>>, vector<1x1x128xf32>
      %23 = vector.shape_cast %22 : vector<1x1x128xf32> to vector<1x128xf32>
      %24 = vector.shape_cast %12 : vector<1x128xf32> to vector<1x1x128xf32>
      tpu.vector_store %arg5[%c0_16, %c1, %c0_17], %24 {strides = array<i32>} : memref<1x2x128xf32, #tpu.memory_space<vmem>>, vector<1x1x128xf32>,
    } else {
    }
    %c0_i32_11 = arith.constant 0 : i32
    %16 = arith.cmpi ne, %arg1, %c0_i32_11 : i32
    %17 = arith.extui %16 : i1 to i32
    %c0_i32_12 = arith.constant 0 : i32
    %18 = arith.cmpi ne, %17, %c0_i32_12 : i32
    scf.if %18 {
      %c0_13 = arith.constant 0 : index
      %c0_14 = arith.constant 0 : index
      %c0_15 = arith.constant 0 : index
      %19 = vector.load %arg5[%c0_13, %c0_14, %c0_15] : memref<1x2x128xf32, #tpu.memory_space<vmem>>, vector<1x1x128xf32>
      %20 = vector.shape_cast %19 : vector<1x1x128xf32> to vector<1x128xf32>
      %21 = arith.addf %20, %9 : vector<1x128xf32>
      %c0_16 = arith.constant 0 : index
      %c0_17 = arith.constant 0 : index
      %c0_18 = arith.constant 0 : index
      %22 = vector.load %arg5[%c0_16, %c0_17, %c0_18] : memref<1x2x128xf32, #tpu.memory_space<vmem>>, vector<1x1x128xf32>
      %23 = vector.shape_cast %22 : vector<1x1x128xf32> to vector<1x128xf32>
      %24 = vector.shape_cast %21 : vector<1x128xf32> to vector<1x1x128xf32>
      tpu.vector_store %arg5[%c0_16, %c0_17, %c0_18], %24 {strides = array<i32>} : memref<1x2x128xf32, #tpu.memory_space<vmem>>, vector<1x1x128xf32>,
      %c0_19 = arith.constant 0 : index
      %c1 = arith.constant 1 : index
      %c0_20 = arith.constant 0 : index
      %25 = vector.load %arg5[%c0_19, %c1, %c0_20] : memref<1x2x128xf32, #tpu.memory_space<vmem>>, vector<1x1x128xf32>
      %26 = vector.shape_cast %25 : vector<1x1x128xf32> to vector<1x128xf32>
      %27 = arith.addf %26, %12 : vector<1x128xf32>
      %c0_21 = arith.constant 0 : index
      %c1_22 = arith.constant 1 : index
      %c0_23 = arith.constant 0 : index
      %28 = vector.load %arg5[%c0_21, %c1_22, %c0_23] : memref<1x2x128xf32, #tpu.memory_space<vmem>>, vector<1x1x128xf32>
      %29 = vector.shape_cast %28 : vector<1x1x128xf32> to vector<1x128xf32>
      %30 = vector.shape_cast %27 : vector<1x128xf32> to vector<1x1x128xf32>
      tpu.vector_store %arg5[%c0_21, %c1_22, %c0_23], %30 {strides = array<i32>} : memref<1x2x128xf32, #tpu.memory_space<vmem>>, vector<1x1x128xf32>,
    } else {
    }
    return
  }
  func.func @transform_0(%arg0: i32, %arg1: i32) -> (i32, i32, i32) {
    %c0_i32 = arith.constant 0 : i32
    %c0_i32_0 = arith.constant 0 : i32
    return %arg1, %arg0, %c0_i32 : i32, i32, i32
  }
  func.func @transform_1(%arg0: i32, %arg1: i32) -> (i32, i32, i32) {
    %c0_i32 = arith.constant 0 : i32
    %c0_i32_0 = arith.constant 0 : i32
    %c0_i32_1 = arith.constant 0 : i32
    return %arg1, %c0_i32, %c0_i32_0 : i32, i32, i32
  }
  func.func @transform_2(%arg0: i32, %arg1: i32) -> (i32, i32, i32) {
    %c0_i32 = arith.constant 0 : i32
    %c0_i32_0 = arith.constant 0 : i32
    return %arg1, %arg0, %c0_i32 : i32, i32, i32
  }
  func.func @transform_3(%arg0: i32, %arg1: i32) -> (i32, i32, i32) {
    %c0_i32 = arith.constant 0 : i32
    %c0_i32_0 = arith.constant 0 : i32
    %c0_i32_1 = arith.constant 0 : i32
    return %arg0, %c0_i32, %c0_i32_0 : i32, i32, i32
  }
}

module attributes {stable_mosaic.version = 11 : i64} {
  func.func @_bn_relu_kernel(%arg0: i32, %arg1: memref<512x128xf32, #tpu.memory_space<vmem>>, %arg2: memref<2x128xf32, #tpu.memory_space<vmem>>, %arg3: memref<1x128xf32, #tpu.memory_space<vmem>>, %arg4: memref<1x128xf32, #tpu.memory_space<vmem>>, %arg5: memref<512x128xbf16, #tpu.memory_space<vmem>>) attributes {dimension_semantics = [#tpu.dimension_semantics<parallel>], iteration_bounds = array<i64: 1>, scalar_prefetch = 0 : i64, scratch_operands = 0 : i64, tpu.core_type = #tpu.core_type<tc>, window_params = [{transform_indices = @transform_0, window_bounds = array<i64: 512, 128>}, {pipeline_mode = #tpu.pipeline_mode<synchronous>, transform_indices = @transform_1, window_bounds = array<i64: 2, 128>}, {pipeline_mode = #tpu.pipeline_mode<synchronous>, transform_indices = @transform_2, window_bounds = array<i64: 1, 128>}, {pipeline_mode = #tpu.pipeline_mode<synchronous>, transform_indices = @transform_3, window_bounds = array<i64: 1, 128>}, {transform_indices = @transform_4, window_bounds = array<i64: 512, 128>}]} {
    %c0 = arith.constant 0 : index
    %c0_0 = arith.constant 0 : index
    %0 = vector.load %arg2[%c0, %c0_0] : memref<2x128xf32, #tpu.memory_space<vmem>>, vector<1x128xf32>
    %cst = arith.constant 0.001953125 : f32
    %1 = vector.broadcast %cst : f32 to vector<1x128xf32>
    %2 = arith.mulf %0, %1 : vector<1x128xf32>
    %c1 = arith.constant 1 : index
    %c0_1 = arith.constant 0 : index
    %3 = vector.load %arg2[%c1, %c0_1] : memref<2x128xf32, #tpu.memory_space<vmem>>, vector<1x128xf32>
    %cst_2 = arith.constant 0.001953125 : f32
    %4 = vector.broadcast %cst_2 : f32 to vector<1x128xf32>
    %5 = arith.mulf %3, %4 : vector<1x128xf32>
    %6 = arith.mulf %2, %2 : vector<1x128xf32>
    %7 = arith.subf %5, %6 : vector<1x128xf32>
    %cst_3 = arith.constant 9.99999974E-6 : f32
    %8 = vector.broadcast %cst_3 : f32 to vector<1x128xf32>
    %9 = arith.addf %7, %8 : vector<1x128xf32>
    %10 = math.rsqrt %9 : vector<1x128xf32>
    %c0_4 = arith.constant 0 : index
    %c0_5 = arith.constant 0 : index
    %11 = vector.load %arg1[%c0_4, %c0_5] : memref<512x128xf32, #tpu.memory_space<vmem>>, vector<512x128xf32>
    %12 = vector.broadcast %2 : vector<1x128xf32> to vector<512x128xf32>
    %13 = arith.subf %11, %12 : vector<512x128xf32>
    %c0_6 = arith.constant 0 : index
    %c0_7 = arith.constant 0 : index
    %14 = vector.load %arg3[%c0_6, %c0_7] : memref<1x128xf32, #tpu.memory_space<vmem>>, vector<1x128xf32>
    %15 = arith.mulf %10, %14 : vector<1x128xf32>
    %16 = vector.broadcast %15 : vector<1x128xf32> to vector<512x128xf32>
    %17 = arith.mulf %13, %16 : vector<512x128xf32>
    %c0_8 = arith.constant 0 : index
    %c0_9 = arith.constant 0 : index
    %18 = vector.load %arg4[%c0_8, %c0_9] : memref<1x128xf32, #tpu.memory_space<vmem>>, vector<1x128xf32>
    %19 = vector.broadcast %18 : vector<1x128xf32> to vector<512x128xf32>
    %20 = arith.addf %17, %19 : vector<512x128xf32>
    %cst_10 = arith.constant 0.000000e+00 : f32
    %21 = vector.broadcast %cst_10 : f32 to vector<512x128xf32>
    %22 = arith.maximumf %20, %21 : vector<512x128xf32>
    %23 = arith.truncf %22 : vector<512x128xf32> to vector<512x128xbf16>
    %c0_11 = arith.constant 0 : index
    %c0_12 = arith.constant 0 : index
    %24 = vector.load %arg5[%c0_11, %c0_12] : memref<512x128xbf16, #tpu.memory_space<vmem>>, vector<512x128xbf16>
    tpu.vector_store %arg5[%c0_11, %c0_12], %23 {strides = array<i32>} : memref<512x128xbf16, #tpu.memory_space<vmem>>, vector<512x128xbf16>,
    return
  }
  func.func @transform_0(%arg0: i32) -> (i32, i32) {
    %c0_i32 = arith.constant 0 : i32
    %c0_i32_0 = arith.constant 0 : i32
    return %arg0, %c0_i32 : i32, i32
  }
  func.func @transform_1(%arg0: i32) -> (i32, i32) {
    %c0_i32 = arith.constant 0 : i32
    %c0_i32_0 = arith.constant 0 : i32
    %c0_i32_1 = arith.constant 0 : i32
    return %c0_i32, %c0_i32_0 : i32, i32
  }
  func.func @transform_2(%arg0: i32) -> (i32, i32) {
    %c0_i32 = arith.constant 0 : i32
    %c0_i32_0 = arith.constant 0 : i32
    %c0_i32_1 = arith.constant 0 : i32
    return %c0_i32, %c0_i32_0 : i32, i32
  }
  func.func @transform_3(%arg0: i32) -> (i32, i32) {
    %c0_i32 = arith.constant 0 : i32
    %c0_i32_0 = arith.constant 0 : i32
    %c0_i32_1 = arith.constant 0 : i32
    return %c0_i32, %c0_i32_0 : i32, i32
  }
  func.func @transform_4(%arg0: i32) -> (i32, i32) {
    %c0_i32 = arith.constant 0 : i32
    %c0_i32_0 = arith.constant 0 : i32
    return %arg0, %c0_i32 : i32, i32
  }
}

module attributes {stable_mosaic.version = 11 : i64} {
  func.func @_phase_gemm_tanh_kernel(%arg0: i32, %arg1: i32, %arg2: memref<1x512x192xbf16, #tpu.memory_space<vmem>>, %arg3: memref<1x192x128xbf16, #tpu.memory_space<vmem>>, %arg4: memref<1x512x128xf32, #tpu.memory_space<vmem>>) attributes {dimension_semantics = [#tpu.dimension_semantics<parallel>, #tpu.dimension_semantics<parallel>], iteration_bounds = array<i64: 1, 4>, scalar_prefetch = 0 : i64, scratch_operands = 0 : i64, tpu.core_type = #tpu.core_type<tc>, window_params = [{transform_indices = @transform_0, window_bounds = array<i64: 1, 512, 192>}, {transform_indices = @transform_1, window_bounds = array<i64: 1, 192, 128>}, {transform_indices = @transform_2, window_bounds = array<i64: 1, 512, 128>}]} {
    %c0 = arith.constant 0 : index
    %c0_0 = arith.constant 0 : index
    %c0_1 = arith.constant 0 : index
    %0 = vector.load %arg2[%c0, %c0_0, %c0_1] : memref<1x512x192xbf16, #tpu.memory_space<vmem>>, vector<1x512x192xbf16>
    %1 = vector.shape_cast %0 : vector<1x512x192xbf16> to vector<512x192xbf16>
    %c0_2 = arith.constant 0 : index
    %c0_3 = arith.constant 0 : index
    %c0_4 = arith.constant 0 : index
    %2 = vector.load %arg3[%c0_2, %c0_3, %c0_4] : memref<1x192x128xbf16, #tpu.memory_space<vmem>>, vector<1x192x128xbf16>
    %3 = vector.shape_cast %2 : vector<1x192x128xbf16> to vector<192x128xbf16>
    %cst = arith.constant dense<0.000000e+00> : vector<512x128xf32>
    %4 = tpu.matmul %1, %3, %cst {dimension_numbers = #tpu.dot_dimension_numbers<[1], [0], [0], [1], [0, 0, 1, 1], [], []>} : vector<512x192xbf16>, vector<192x128xbf16>, vector<512x128xf32> -> vector<512x128xf32>
    %5 = math.tanh %4 : vector<512x128xf32>
    %c0_5 = arith.constant 0 : index
    %c0_6 = arith.constant 0 : index
    %c0_7 = arith.constant 0 : index
    %6 = vector.load %arg4[%c0_5, %c0_6, %c0_7] : memref<1x512x128xf32, #tpu.memory_space<vmem>>, vector<1x512x128xf32>
    %7 = vector.shape_cast %6 : vector<1x512x128xf32> to vector<512x128xf32>
    %8 = vector.shape_cast %5 : vector<512x128xf32> to vector<1x512x128xf32>
    tpu.vector_store %arg4[%c0_5, %c0_6, %c0_7], %8 {strides = array<i32>} : memref<1x512x128xf32, #tpu.memory_space<vmem>>, vector<1x512x128xf32>,
    return
  }
  func.func @transform_0(%arg0: i32, %arg1: i32) -> (i32, i32, i32) {
    %c0_i32 = arith.constant 0 : i32
    %c0_i32_0 = arith.constant 0 : i32
    return %arg1, %arg0, %c0_i32 : i32, i32, i32
  }
  func.func @transform_1(%arg0: i32, %arg1: i32) -> (i32, i32, i32) {
    %c0_i32 = arith.constant 0 : i32
    %c0_i32_0 = arith.constant 0 : i32
    %c0_i32_1 = arith.constant 0 : i32
    return %arg1, %c0_i32, %c0_i32_0 : i32, i32, i32
  }
  func.func @transform_2(%arg0: i32, %arg1: i32) -> (i32, i32, i32) {
    %c0_i32 = arith.constant 0 : i32
    %c0_i32_0 = arith.constant 0 : i32
    return %arg1, %arg0, %c0_i32 : i32, i32, i32
  }
}

</mosaic_0001>

<bundles_post_ra>
// kernel: generator_forward.9
= control target key start
LH: loop header
LB: loop body
LE: loop exit
PB: predicated region body
PF: predicated region fallthrough
CT: control target
= control target key end

     0   :  { %v109_v32 = vmov 1966171168   ;;  %v40_v34 = vlaneseq  ;;  %s150_s0 = inlined_call_operand.vmem [shape: f32[32,256], index: 0, kind: input, shape index: {}]   ;;  %s151_s1 = inlined_call_operand.vmem [shape: f32[1,2,256], index: 1, kind: output, shape index: {}]  }
   0x1   :  { %v8_v0 = vld [vmem:[%s150_s0] sm:$0xff]  ;;  %v9_v1 = vld [vmem:[%s150_s0 + $0x8] sm:$0xff]  ;;  %v10_v2 = vld [vmem:[%s150_s0 + $0x10] sm:$0xff]  ;;  %v38_v33 = vunpack.c.l.s4 %v109_v32 }
   0x2   :  { %v11_v3 = vld [vmem:[%s150_s0 + $0x18] sm:$0xff]  ;;  %v12_v4 = vld [vmem:[%s150_s0 + $0x20] sm:$0xff]  ;;  %v13_v5 = vld [vmem:[%s150_s0 + $0x28] sm:$0xff]  ;;  %v16_v6 = vadd.f32 %v10_v2, %v8_v0  ;;  %v57_v7 = vmul.f32 %v8_v0, %v8_v0  ;;  %v58_v11 = vmul.f32 %v9_v1, %v9_v1  ;;  %v59_v12 = vmul.f32 %v10_v2, %v10_v2 }
   0x3   :  { %v14_v8 = vld [vmem:[%s150_s0 + $0x30] sm:$0xff]  ;;  %v15_v9 = vld [vmem:[%s150_s0 + $0x38] sm:$0xff]  ;;  %v25_v10 = vadd.f32 %v11_v3, %v9_v1  ;;  %v60_v14 = vmul.f32 %v11_v3, %v11_v3  ;;  %v61_v15 = vmul.f32 %v12_v4, %v12_v4  ;;  %v62_v16 = vmul.f32 %v13_v5, %v13_v5 }
   0x4   :  { %v17_v13 = vadd.f32 %v16_v6, %v12_v4  ;;  %v63_v18 = vmul.f32 %v14_v8, %v14_v8  ;;  %v64_v20 = vmul.f32 %v15_v9, %v15_v9  ;;  %v65_v21 = vadd.f32 %v59_v12, %v57_v7 }
   0x5   :  { %v26_v17 = vadd.f32 %v25_v10, %v13_v5  ;;  %v74_v22 = vadd.f32 %v60_v14, %v58_v11  ;;  %v39_v43 = vunpack.c.0.s8 %v38_v33  ;;  %v41_v44 = vshrl.u32 %v40_v34, 7 }
   0x6   :  { %v18_v19 = vadd.f32 %v17_v13, %v14_v8  ;;  %v66_v25 = vadd.f32 %v65_v21, %v61_v15  ;;  %vm54_vm0 = vcmp.lt.s32.totalorder %v40_v34, 256 }
   0x7   :  { %v27_v23 = vadd.f32 %v26_v17, %v15_v9  ;;  %v75_v26 = vadd.f32 %v74_v22, %v62_v16  ;;  %v42_v53 = vsub.s32 %v39_v43, %v41_v44 }
   0x8   :  { %v19_v24 = vrot.slane %v18_v19, 4  ;;  %v67_v29 = vadd.f32 %v66_v25, %v63_v18 }
   0x9   :  { %v28_v27 = vrot.slane %v27_v23, 4  ;;  %v76_v30 = vadd.f32 %v75_v26, %v64_v20 }
   0xa   :  { %v20_v28 = vadd.f32 %v19_v24, %v18_v19  ;;  %v68_v36 = vrot.slane %v67_v29, 4 }
   0xb   :  { %v29_v31 = vadd.f32 %v28_v27, %v27_v23  ;;  %v77_v37 = vrot.slane %v76_v30, 4 }
   0xc   :  { %v21_v35 = vrot.slane %v20_v28, 2  ;;  %v69_v40 = vadd.f32 %v68_v36, %v67_v29 }
   0xd   :  { %v30_v38 = vrot.slane %v29_v31, 2  ;;  %v78_v41 = vadd.f32 %v77_v37, %v76_v30 }
   0xe   :  { %v22_v39 = vadd.f32 %v21_v35, %v20_v28  ;;  %v70_v46 = vrot.slane %v69_v40, 2 }
   0xf   :  { %v31_v42 = vadd.f32 %v30_v38, %v29_v31  ;;  %v79_v47 = vrot.slane %v78_v41, 2 }
  0x10   :  { %v23_v45 = vrot.slane %v22_v39, 1  ;;  %v71_v50 = vadd.f32 %v70_v46, %v69_v40 }
  0x11   :  { %v32_v48 = vrot.slane %v31_v42, 1  ;;  %v80_v51 = vadd.f32 %v79_v47, %v78_v41 }
  0x12   :  { %v24_v49 = vadd.f32 %v23_v45, %v22_v39  ;;  %v72_v54 = vrot.slane %v71_v50, 1 }
  0x13   :  { %v33_v52 = vadd.f32 %v32_v48, %v31_v42  ;;  %v81_v55 = vrot.slane %v80_v51, 1 }
  0x14   :  { %v73_v57 = vadd.f32 %v72_v54, %v71_v50 }
  0x15   :  { %v36_v56 = vcombine.low %v24_v49, %v33_v52  ;;  %v82_v58 = vadd.f32 %v81_v55, %v80_v51 }
  0x17   :  { %v43_v59 = vrot.slane %v36_v56, %v42_v53  ;;  %v85_v60 = vcombine.low %v73_v57, %v82_v58 }
  0x19   :  { %v50_v61 = vrot.slane %v43_v59, %v42_v53  ;;  %v92_v62 = vrot.slane %v85_v60, %v42_v53 }
  0x1b   :  { %56 = vst.msk [vmem:[%s151_s1] ss:$2 sm:$0x3] %vm54_vm0, %v50_v61  ;;  %v99_v63 = vrot.slane %v92_v62, %v42_v53 }
  0x1d   :  { %107 = vst.msk [vmem:[%s151_s1 + $0x1] ss:$2 sm:$0x3] %vm54_vm0, %v99_v63 }

// kernel: generator_forward.10
= control target key start
LH: loop header
LB: loop body
LE: loop exit
PB: predicated region body
PF: predicated region fallthrough
CT: control target
= control target key end

     0   :  { %v35_v5 = vlaneseq  ;;  %s218_s1 = inlined_call_operand.vmem [shape: f32[2,256], index: 1, kind: input, shape index: {}]   ;;  %s219_s0 = inlined_call_operand.vmem [shape: f32[32,256], index: 0, kind: input, shape index: {}]   ;;  %s220_s2 = inlined_call_operand.vmem [shape: f32[1,256], index: 2, kind: input, shape index: {}]   ;;  %s221_s3 = inlined_call_operand.vmem [shape: f32[1,256], index: 3, kind: input, shape index: {}]   ;;  %s222_s4 = inlined_call_operand.vmem [shape: bf16[32,256], index: 4, kind: output, shape index: {}]  }
   0x1   :  { %v17_v0 = vld [vmem:[%s218_s1] ss:$2 sm:$0x3]  ;;  %v134_v1 = vld [vmem:[%s218_s1 + $0x1] ss:$2 sm:$0x3] }
   0x2   :  { %v18_v2 = vmul.f32 0.03125, %v17_v0  ;;  %v21_v3 = vmul.f32 0.03125, %v134_v1  ;;  %v36_v8 = vshrl.u32 %v35_v5, 7  ;;  %v26_v12 = vld [vmem:[%s219_s0] sm:$0xff]  ;;  %v27_v13 = vld [vmem:[%s219_s0 + $0x8] sm:$0xff]  ;;  %v28_v15 = vld [vmem:[%s219_s0 + $0x10] sm:$0xff] }
   0x3   :  { %v53_v16 = vld [vmem:[%s220_s2] sm:$0x3]  ;;  %v29_v17 = vld [vmem:[%s219_s0 + $0x18] sm:$0xff]  ;;  %v31_v19 = vld [vmem:[%s219_s0 + $0x28] sm:$0xff] }
   0x4   :  { %v22_v4 = vmul.f32 %v18_v2, %v18_v2  ;;  %v37_v9 = vsub.s32 0, %v36_v8  ;;  %v41_v10 = vsub.s32 1, %v36_v8  ;;  %v30_v18 = vld [vmem:[%s219_s0 + $0x20] sm:$0xff]  ;;  %v32_v20 = vld [vmem:[%s219_s0 + $0x30] sm:$0xff]  ;;  %v33_v21 = vld [vmem:[%s219_s0 + $0x38] sm:$0xff] }
   0x5   :  { %v74_v24 = vld [vmem:[%s221_s3] sm:$0x3] }
   0x6   :  { %v23_v6 = vsub.f32 %v21_v3, %v22_v4  ;;  %v38_v11 = vrot.slane %v18_v2, %v37_v9  ;;  %v42_v14 = vrot.slane %v18_v2, %v41_v10  ;;  %v79_v35 = vrot.slane %v74_v24, %v37_v9 }
   0x7   :  { %v83_v36 = vrot.slane %v74_v24, %v41_v10 }
   0x8   :  { %v24_v7 = vadd.f32 1e-05, %v23_v6  ;;  %v45_v23 = vsub.f32 %v26_v12, %v38_v11  ;;  %v46_v25 = vsub.f32 %v27_v13, %v42_v14  ;;  %v47_v27 = vsub.f32 %v28_v15, %v38_v11 }
   0x9   :  { %v48_v28 = vsub.f32 %v29_v17, %v42_v14  ;;  %v49_v29 = vsub.f32 %v30_v18, %v38_v11  ;;  %v50_v30 = vsub.f32 %v31_v19, %v42_v14  ;;  %v51_v31 = vsub.f32 %v32_v20, %v38_v11 }
   0xa   :  { %143 = vrsqrt.f32 %v24_v7  ;;  %v52_v32 = vsub.f32 %v33_v21, %v42_v14 }
  0x14   :  { %v144_v22 = vpop.eup %143 }
  0x15   :  { %v54_v26 = vmul.f32 %v144_v22, %v53_v16 }
  0x17   :  { %v59_v33 = vrot.slane %v54_v26, %v37_v9  ;;  %v63_v34 = vrot.slane %v54_v26, %v41_v10 }
  0x19   :  { %v66_v37 = vmul.f32 %v59_v33, %v45_v23  ;;  %v67_v38 = vmul.f32 %v63_v34, %v46_v25  ;;  %v68_v39 = vmul.f32 %v59_v33, %v47_v27  ;;  %v69_v40 = vmul.f32 %v63_v34, %v48_v28 }
  0x1a   :  { %v70_v41 = vmul.f32 %v59_v33, %v49_v29  ;;  %v71_v42 = vmul.f32 %v63_v34, %v50_v30  ;;  %v72_v43 = vmul.f32 %v59_v33, %v51_v31  ;;  %v73_v44 = vmul.f32 %v63_v34, %v52_v32 }
  0x1b   :  { %v86_v45 = vadd.f32 %v79_v35, %v66_v37  ;;  %v87_v46 = vadd.f32 %v83_v36, %v67_v38  ;;  %v88_v47 = vadd.f32 %v79_v35, %v68_v39  ;;  %v89_v48 = vadd.f32 %v83_v36, %v69_v40 }
  0x1c   :  { %v90_v49 = vadd.f32 %v79_v35, %v70_v41  ;;  %v91_v50 = vadd.f32 %v83_v36, %v71_v42  ;;  %v92_v51 = vadd.f32 %v79_v35, %v72_v43  ;;  %v93_v52 = vadd.f32 %v83_v36, %v73_v44 }
  0x1d   :  { %v94_v53 = vmax.f32 %v86_v45, 0.0  ;;  %v95_v54 = vmax.f32 %v87_v46, 0.0  ;;  %v96_v55 = vmax.f32 %v88_v47, 0.0  ;;  %v97_v56 = vmax.f32 %v89_v48, 0.0 }
  0x1e   :  { %v98_v57 = vmax.f32 %v90_v49, 0.0  ;;  %v99_v58 = vmax.f32 %v91_v50, 0.0  ;;  %v100_v59 = vmax.f32 %v92_v51, 0.0  ;;  %v101_v60 = vmax.f32 %v93_v52, 0.0 }
  0x1f   :  { %v139_v61 = vpack.c.bf16 %v95_v54, %v94_v53  ;;  %v140_v62 = vpack.c.bf16 %v97_v56, %v96_v55 }
  0x20   :  { %v141_v63 = vpack.c.bf16 %v99_v58, %v98_v57  ;;  %v142_v0 = vpack.c.bf16 %v101_v60, %v100_v59 }
  0x21   :  { %126 = vst [vmem:[%s222_s4] sm:$0xff] %v139_v61  ;;  %127 = vst [vmem:[%s222_s4 + $0x8] sm:$0xff] %v140_v62 }
  0x22   :  { %128 = vst [vmem:[%s222_s4 + $0x10] sm:$0xff] %v141_v63  ;;  %129 = vst [vmem:[%s222_s4 + $0x18] sm:$0xff] %v142_v0 }

// kernel: generator_forward.8
= control target key start
LH: loop header
LB: loop body
LE: loop exit
PB: predicated region body
PF: predicated region fallthrough
CT: control target
= control target key end

     0   :  { %v5444_v1 = vmov 0   ;;  %v5445_v2 = vmov 0.0   ;;  %vm5446_vm0 = vmmov 0   ;;  %vm177_vm1 = vcmask 1046528   ;;  %s7422_s1 = inlined_call_operand.vmem [shape: bf16[110,384], index: 1, kind: input, shape index: {}]   ;;  %s7423_s3 = inlined_call_operand.vmem [shape: bf16[384,3072], index: 3, kind: input, shape index: {}]   ;;  %s7424_s0 = inlined_call_operand.vmem [shape: bf16[8,110], index: 0, kind: input, shape index: {}]   ;;  %s7425_s2 = inlined_call_operand.vmem [shape: f32[1,384], index: 2, kind: input, shape index: {}]   ;;  %s7426_s4 = inlined_call_operand.vmem [shape: f32[8,3072], index: 4, kind: output, shape index: {}]  }
   0x1   :  { %v5416_v0 = vld [vmem:[%s7422_s1 + $0x4] ss:$12 sps:$4 sm:$0xff]   ;;  %219 = vmatprep.mubr.bf16.mxu0 %v5444_v1  ;;  %5347 = vmatprep.subr.bf16.mxu1 %v5445_v2  ;;  %v5418_v3 = vld [vmem:[%s7422_s1] ss:$12 sps:$4 sm:$0xff]   ;;  %v5419_v4 = vld [vmem:[%s7422_s1 + $0x1c] ss:$12 sps:$4 sm:$0xff]  }
   0x2   :  { %5361 = vmatprep.mubr.msk.bf16.mxu1 %vm5446_vm0, %v5445_v2  ;;  %187 = vmatprep.subr.bf16.mxu0 %v5416_v0  ;;  %v5421_v5 = vld [vmem:[%s7422_s1 + $0x18] ss:$12 sps:$4 sm:$0xff]   ;;  %v5422_v6 = vld [vmem:[%s7422_s1 + $0x34] ss:$12 sps:$4 sm:$0xff]   ;;  %v5424_v7 = vld [vmem:[%s7422_s1 + $0x30] ss:$12 sps:$4 sm:$0xff]  }
   0x3   :  { %188 = vmatpush1.bf16.msra.mxu0 %v5418_v3  ;;  %v5425_v8 = vld [vmem:[%s7422_s1 + $0x4c] ss:$12 sps:$4 sm:$0xff]   ;;  %v5427_v9 = vld [vmem:[%s7422_s1 + $0x48] ss:$12 sps:$4 sm:$0xff]   ;;  %v5428_v11 = vld [vmem:[%s7422_s1 + $0x64] ss:$12 sps:$4 sm:$0xff]  }
   0x4   :  { %189 = vmatprep.subr.bf16.mxu0 %v5419_v4  ;;  %v5437_v10 = vld [vmem:[%s7422_s1 + $0x8] ss:$12 sps:$4 sm:$0xff]   ;;  %v5438_v12 = vld [vmem:[%s7422_s1 + $0x20] ss:$12 sps:$4 sm:$0xff]   ;;  %v5439_v15 = vld [vmem:[%s7422_s1 + $0x38] ss:$12 sps:$4 sm:$0xff]  }
   0x5   :  { %5348 = vmatpush3.bf16.msra.mxu1 %v5437_v10  ;;  %v5430_v13 = vld [vmem:[%s7422_s1 + $0x60] ss:$12 sps:$4 sm:$0xff]   ;;  %v5431_v14 = vld [vmem:[%s7422_s1 + $0x7c] ss:$12 sps:$4 sm:$0xff]   ;;  %v5433_v16 = vld [vmem:[%s7422_s1 + $0x78] ss:$12 sps:$4 sm:$0xff]  }
   0x6   :  { %5349 = vmatprep.subr.bf16.mxu1 %v5445_v2  ;;  %v5434_v17 = vld [vmem:[%s7422_s1 + $0x94] ss:$12 sps:$4 sm:$0x7f]   ;;  %v5436_v18 = vld [vmem:[%s7422_s1 + $0x90] ss:$12 sps:$4 sm:$0x7f]  }
   0x7   :  { %190 = vmatpush1.bf16.msra.mxu0 %v5421_v5  ;;  %v5440_v19 = vld [vmem:[%s7422_s1 + $0x50] ss:$12 sps:$4 sm:$0xff]   ;;  %v271_v20 = vld [vmem:[%s7423_s3] sm:$0xff]  ;;  %v179_v22 = vsel %vm177_vm1, %v5436_v18, 0  ;;  %v5441_v23 = vld [vmem:[%s7422_s1 + $0x68] ss:$12 sps:$4 sm:$0xff]  }
   0x8   :  { %191 = vmatprep.subr.bf16.mxu0 %v5422_v6  ;;  %v283_v21 = vld [vmem:[%s7423_s3 + $0x60] sm:$0xff]  ;;  %vm173_vm2 = vcmask 900096   ;;  %v272_v34 = vld [vmem:[%s7423_s3 + $0x8] sm:$0xff] }
   0x9   :  { %5350 = vmatpush3.bf16.msra.mxu1 %v5438_v12  ;;  %v4764_v24 = vcombine.high %v271_v20, %v283_v21  ;;  %v295_v25 = vld [vmem:[%s7423_s3 + $0xc0] sm:$0xff]  ;;  %v4763_v28 = vcombine.low %v271_v20, %v283_v21  ;;  %v284_v35 = vld [vmem:[%s7423_s3 + $0x68] sm:$0xff] }
   0xa   :  { %5351 = vmatprep.subr.bf16.mxu1 %v5445_v2  ;;  %v307_v26 = vld [vmem:[%s7423_s3 + $0x120] sm:$0xff]  ;;  %v4766_v39 = vcombine.high %v272_v34, %v284_v35  ;;  %v296_v42 = vld [vmem:[%s7423_s3 + $0xc8] sm:$0xff]  ;;  %v4765_v45 = vcombine.low %v272_v34, %v284_v35 }
   0xb   :  { %192 = vmatpush1.bf16.msra.mxu0 %v5424_v7  ;;  %v18_v27 = vld [vmem:[%s7424_s0] sm:$0xf]  ;;  %v4788_v30 = vcombine.high %v295_v25, %v307_v26  ;;  %v5443_v31 = vld [vmem:[%s7422_s1 + $0x98] ss:$12 sps:$4 sm:$0x7f]   ;;  %v4787_v36 = vcombine.low %v295_v25, %v307_v26  ;;  %v308_v43 = vld [vmem:[%s7423_s3 + $0x128] sm:$0xff] }
   0xc   :  { %193 = vmatprep.subr.bf16.mxu0 %v5425_v8  ;;  %v5442_v29 = vld [vmem:[%s7422_s1 + $0x80] ss:$12 sps:$4 sm:$0xff]   ;;  %v185_v38 = vsel %vm177_vm1, %v5443_v31, 0  ;;  %v4790_v47 = vcombine.high %v296_v42, %v308_v43  ;;  %v4789_v53 = vcombine.low %v296_v42, %v308_v43 }
   0xd   :  { %5352 = vmatpush3.bf16.msra.mxu1 %v5439_v15  ;;  %v319_v32 = vld [vmem:[%s7423_s3 + $0x180] sm:$0xff]  ;;  %v320_v50 = vld [vmem:[%s7423_s3 + $0x188] sm:$0xff] }
   0xe   :  { %5353 = vmatprep.subr.bf16.mxu1 %v5445_v2  ;;  %v331_v33 = vld [vmem:[%s7423_s3 + $0x1e0] sm:$0xff]  ;;  %v332_v51 = vld [vmem:[%s7423_s3 + $0x1e8] sm:$0xff] }
   0xf   :  { %194 = vmatpush1.bf16.msra.mxu0 %v5427_v9  ;;  %v4812_v37 = vcombine.high %v319_v32, %v331_v33  ;;  %v343_v40 = vld [vmem:[%s7423_s3 + $0x240] sm:$0xff]  ;;  %v4811_v44 = vcombine.low %v319_v32, %v331_v33  ;;  %v4814_v55 = vcombine.high %v320_v50, %v332_v51  ;;  %v344_v58 = vld [vmem:[%s7423_s3 + $0x248] sm:$0xff]  ;;  %v4813_v61 = vcombine.low %v320_v50, %v332_v51 }
  0x10   :  { %195 = vmatprep.subr.bf16.mxu0 %v5428_v11  ;;  %v355_v41 = vld [vmem:[%s7423_s3 + $0x2a0] sm:$0xff]  ;;  %v356_v59 = vld [vmem:[%s7423_s3 + $0x2a8] sm:$0xff] }
  0x11   :  { %5354 = vmatpush3.bf16.msra.mxu1 %v5440_v19  ;;  %v4836_v46 = vcombine.high %v343_v40, %v355_v41  ;;  %v367_v48 = vld [vmem:[%s7423_s3 + $0x300] sm:$0xff]  ;;  %v4835_v52 = vcombine.low %v343_v40, %v355_v41  ;;  %v4838_v63 = vcombine.high %v344_v58, %v356_v59  ;;  %v368_v3 = vld [vmem:[%s7423_s3 + $0x308] sm:$0xff]  ;;  %v4837_v6 = vcombine.low %v344_v58, %v356_v59 }
  0x12   :  { %5355 = vmatprep.subr.bf16.mxu1 %v5445_v2  ;;  %v379_v49 = vld [vmem:[%s7423_s3 + $0x360] sm:$0xff]  ;;  %v380_v4 = vld [vmem:[%s7423_s3 + $0x368] sm:$0xff] }
  0x13   :  { %196 = vmatpush1.bf16.msra.mxu0 %v5430_v13  ;;  %v4860_v54 = vcombine.high %v367_v48, %v379_v49  ;;  %v391_v56 = vld [vmem:[%s7423_s3 + $0x3c0] sm:$0xff]  ;;  %v4859_v60 = vcombine.low %v367_v48, %v379_v49  ;;  %v4862_v8 = vcombine.high %v368_v3, %v380_v4  ;;  %v392_v11 = vld [vmem:[%s7423_s3 + $0x3c8] sm:$0xff] }
  0x14   :  { %197 = vmatprep.subr.bf16.mxu0 %v5431_v14  ;;  %v403_v57 = vld [vmem:[%s7423_s3 + $0x420] sm:$0xff]  ;;  %v404_v12 = vld [vmem:[%s7423_s3 + $0x428] sm:$0xff]  ;;  %v4861_v14 = vcombine.low %v368_v3, %v380_v4 }
  0x15   :  { %5356 = vmatpush3.bf16.msra.mxu1 %v5441_v23  ;;  %v4884_v62 = vcombine.high %v391_v56, %v403_v57  ;;  %v415_v0 = vld [vmem:[%s7423_s3 + $0x480] sm:$0xff]  ;;  %v4883_v5 = vcombine.low %v391_v56, %v403_v57  ;;  %v416_v19 = vld [vmem:[%s7423_s3 + $0x488] sm:$0xff] }
  0x16   :  { %5357 = vmatprep.subr.bf16.mxu1 %v5445_v2  ;;  %v439_v9 = vld [vmem:[%s7423_s3 + $0x540] sm:$0xff]  ;;  %v428_v20 = vld [vmem:[%s7423_s3 + $0x4e8] sm:$0xff] }
  0x17   :  { %198 = vmatpush1.bf16.msra.mxu0 %v5433_v16  ;;  %v451_v10 = vld [vmem:[%s7423_s3 + $0x5a0] sm:$0xff]  ;;  %v4886_v16 = vcombine.high %v392_v11, %v404_v12  ;;  %v464_v35 = vld [vmem:[%s7423_s3 + $0x608] sm:$0xff] }
  0x18   :  { %4760 = vmatprep.subr.msk.bf16.mxu0 %vm177_vm1, %v5434_v17  ;;  %v4932_v15 = vcombine.high %v439_v9, %v451_v10  ;;  %v463_v17 = vld [vmem:[%s7423_s3 + $0x600] sm:$0xff]  ;;  %v4931_v21 = vcombine.low %v439_v9, %v451_v10  ;;  %v488_v43 = vld [vmem:[%s7423_s3 + $0x6c8] sm:$0xff] }
  0x19   :  { %5358 = vmatpush3.bf16.msra.mxu1 %v5442_v29  ;;  %v475_v18 = vld [vmem:[%s7423_s3 + $0x660] sm:$0xff]  ;;  %v512_v51 = vld [vmem:[%s7423_s3 + $0x788] sm:$0xff] }
  0x1a   :  { %5359 = vmatprep.subr.bf16.mxu1 %v5445_v2  ;;  %v427_v2 = vld [vmem:[%s7423_s3 + $0x4e0] sm:$0xff]  ;;  %v4956_v23 = vcombine.high %v463_v17, %v475_v18  ;;  %v4955_v29 = vcombine.low %v463_v17, %v475_v18  ;;  %v536_v59 = vld [vmem:[%s7423_s3 + $0x848] sm:$0xff] }
  0x1b   :  { %200 = vmatpush1.bf16.msra.mxu0 %v179_v22  ;;  %v4908_v7 = vcombine.high %v415_v0, %v427_v2  ;;  %v4907_v13 = vcombine.low %v415_v0, %v427_v2  ;;  %v4885_v22 = vcombine.low %v392_v11, %v404_v12  ;;  %v487_v25 = vld [vmem:[%s7423_s3 + $0x6c0] sm:$0xff]  ;;  %v560_v4 = vld [vmem:[%s7423_s3 + $0x908] sm:$0xff] }
  0x1c   :  { %3727 = vmatprep.subr.bf16.mxu0 %v4764_v24  ;;  %v4910_v24 = vcombine.high %v416_v19, %v428_v20  ;;  %v499_v26 = vld [vmem:[%s7423_s3 + $0x720] sm:$0xff]  ;;  %v584_v10 = vld [vmem:[%s7423_s3 + $0x9c8] sm:$0xff] }
  0x1d   :  { %5360 = vmatpush3.bf16.msra.mxu1 %v185_v38  ;;  %v4980_v31 = vcombine.high %v487_v25, %v499_v26  ;;  %v511_v33 = vld [vmem:[%s7423_s3 + $0x780] sm:$0xff]  ;;  %v596_v11 = vld [vmem:[%s7423_s3 + $0xa28] sm:$0xff] }
  0x1e   :  { %4761 = vmatmul.mubr.msk.bf16.vlgmr.msra.gmra.mrb[0].mxu0 %vm173_vm2, %v18_v27  ;;  %3809 = vmatprep.subr.bf16.mxu1 %v4766_v39  ;;  %v523_v34 = vld [vmem:[%s7423_s3 + $0x7e0] sm:$0xff]  ;;  %v5077_v17 = vcombine.low %v584_v10, %v596_v11 }
  0x1f   :  { %3728 = vmatpush1.bf16.msra.mxu0 %v4763_v28  ;;  %v452_v28 = vld [vmem:[%s7423_s3 + $0x5a8] sm:$0xff]  ;;  %v5004_v39 = vcombine.high %v511_v33, %v523_v34  ;;  %v535_v41 = vld [vmem:[%s7423_s3 + $0x840] sm:$0xff] }
  0x20   :  { %3729 = vmatprep.subr.bf16.mxu0 %v4788_v30  ;;  %5362 = vmatmul.mubr.msk.bf16.vlgmr.msra.gmra.mrb[0].mxu1 %vm173_vm2, %v18_v27  ;;  %v440_v27 = vld [vmem:[%s7423_s3 + $0x548] sm:$0xff]  ;;  %v4909_v30 = vcombine.low %v416_v19, %v428_v20  ;;  %v547_v42 = vld [vmem:[%s7423_s3 + $0x8a0] sm:$0xff] }
  0x21   :  { %3810 = vmatpush1.bf16.msra.mxu1 %v4765_v45  ;;  %v4934_v32 = vcombine.high %v440_v27, %v452_v28  ;;  %v4933_v38 = vcombine.low %v440_v27, %v452_v28  ;;  %v5003_v45 = vcombine.low %v511_v33, %v523_v34  ;;  %v559_v49 = vld [vmem:[%s7423_s3 + $0x900] sm:$0xff] }
  0x22   :  { %3811 = vmatprep.subr.bf16.mxu1 %v4790_v47  ;;  %v5028_v47 = vcombine.high %v535_v41, %v547_v42  ;;  %v571_v50 = vld [vmem:[%s7423_s3 + $0x960] sm:$0xff] }
  0x23   :  { %3730 = vmatpush1.bf16.msra.mxu0 %v4787_v36  ;;  %v476_v36 = vld [vmem:[%s7423_s3 + $0x668] sm:$0xff]  ;;  %v583_v57 = vld [vmem:[%s7423_s3 + $0x9c0] sm:$0xff] }
  0x24   :  { %3731 = vmatprep.subr.bf16.mxu0 %v4812_v37  ;;  %v4979_v37 = vcombine.low %v487_v25, %v499_v26  ;;  %v4958_v40 = vcombine.high %v464_v35, %v476_v36  ;;  %v595_v58 = vld [vmem:[%s7423_s3 + $0xa20] sm:$0xff] }
  0x25   :  { %3812 = vmatpush1.bf16.msra.mxu1 %v4789_v53  ;;  %v5027_v53 = vcombine.low %v535_v41, %v547_v42  ;;  %v607_v2 = vld [vmem:[%s7423_s3 + $0xa80] sm:$0xff] }
  0x26   :  { %3813 = vmatprep.subr.bf16.mxu1 %v4814_v55  ;;  %v5052_v55 = vcombine.high %v559_v49, %v571_v50  ;;  %v619_v3 = vld [vmem:[%s7423_s3 + $0xae0] sm:$0xff] }
  0x27   :  { %3732 = vmatpush1.bf16.msra.mxu0 %v4811_v44  ;;  %v500_v44 = vld [vmem:[%s7423_s3 + $0x728] sm:$0xff]  ;;  %v5099_v12 = vcombine.low %v607_v2, %v619_v3  ;;  %v631_v20 = vld [vmem:[%s7423_s3 + $0xb40] sm:$0xff] }
  0x28   :  { %3733 = vmatprep.subr.bf16.mxu0 %v4836_v46  ;;  %v4957_v46 = vcombine.low %v464_v35, %v476_v36  ;;  %v4982_v48 = vcombine.high %v488_v43, %v500_v44  ;;  %v655_v28 = vld [vmem:[%s7423_s3 + $0xc00] sm:$0xff]  ;;  %v49_v36 = vlaneseq }
  0x29   :  { %3814 = vmatpush1.bf16.msra.mxu1 %v4813_v61  ;;  %v5051_v61 = vcombine.low %v559_v49, %v571_v50  ;;  %v691_v49 = vld [vmem:[%s7423_s3 + $0xd20] sm:$0xff]  ;;  %v680_v50 = vld [vmem:[%s7423_s3 + $0xcc8] sm:$0xff] }
  0x2a   :  { %3815 = vmatprep.subr.bf16.mxu1 %v4838_v63  ;;  %v5076_v63 = vcombine.high %v583_v57, %v595_v58 }
  0x2b   :  { %3734 = vmatpush1.bf16.msra.mxu0 %v4835_v52  ;;  %v524_v52 = vld [vmem:[%s7423_s3 + $0x7e8] sm:$0xff] }
  0x2c   :  { %3735 = vmatprep.subr.bf16.mxu0 %v4860_v54  ;;  %v4981_v54 = vcombine.low %v488_v43, %v500_v44  ;;  %v5006_v56 = vcombine.high %v512_v51, %v524_v52 }
  0x2d   :  { %3816 = vmatpush1.bf16.msra.mxu1 %v4837_v6  ;;  %v5075_v6 = vcombine.low %v583_v57, %v595_v58  ;;  %v703_v57 = vld [vmem:[%s7423_s3 + $0xd80] sm:$0xff] }
  0x2e   :  { %3817 = vmatprep.subr.bf16.mxu1 %v4862_v8  ;;  %v5100_v8 = vcombine.high %v607_v2, %v619_v3  ;;  %v715_v58 = vld [vmem:[%s7423_s3 + $0xde0] sm:$0xff] }
  0x2f   :  { %3736 = vmatpush1.bf16.msra.mxu0 %v4859_v60  ;;  %v548_v60 = vld [vmem:[%s7423_s3 + $0x8a8] sm:$0xff]  ;;  %v727_v2 = vld [vmem:[%s7423_s3 + $0xe40] sm:$0xff] }
  0x30   :  { %3737 = vmatprep.subr.bf16.mxu0 %v4884_v62  ;;  %v5005_v62 = vcombine.low %v512_v51, %v524_v52  ;;  %v5030_v0 = vcombine.high %v536_v59, %v548_v60  ;;  %v692_v51 = vld [vmem:[%s7423_s3 + $0xd28] sm:$0xff] }
  0x31   :  { %3818 = vmatpush1.bf16.msra.mxu1 %v4861_v14  ;;  %v5078_v14 = vcombine.high %v584_v10, %v596_v11 }
  0x32   :  { %3819 = vmatprep.subr.bf16.mxu1 %v4886_v16  ;;  %v620_v16 = vld [vmem:[%s7423_s3 + $0xae8] sm:$0xff] }
  0x33   :  { %3738 = vmatpush1.bf16.msra.mxu0 %v4883_v5  ;;  %v572_v5 = vld [vmem:[%s7423_s3 + $0x968] sm:$0xff] }
  0x34   :  { %3739 = vmatprep.subr.bf16.mxu0 %v4908_v7  ;;  %v5029_v7 = vcombine.low %v536_v59, %v548_v60  ;;  %v5054_v9 = vcombine.high %v560_v4, %v572_v5  ;;  %v704_v59 = vld [vmem:[%s7423_s3 + $0xd88] sm:$0xff] }
  0x35   :  { %3820 = vmatpush1.bf16.msra.mxu1 %v4885_v22  ;;  %v632_v22 = vld [vmem:[%s7423_s3 + $0xb48] sm:$0xff] }
  0x36   :  { %3821 = vmatprep.subr.bf16.mxu1 %v4910_v24  ;;  %v644_v24 = vld [vmem:[%s7423_s3 + $0xba8] sm:$0xff] }
  0x37   :  { %3740 = vmatpush1.bf16.msra.mxu0 %v4907_v13  ;;  %v5053_v13 = vcombine.low %v560_v4, %v572_v5  ;;  %v5125_v26 = vcombine.low %v632_v22, %v644_v24  ;;  %v5126_v27 = vcombine.high %v632_v22, %v644_v24  ;;  %v716_v60 = vld [vmem:[%s7423_s3 + $0xde8] sm:$0xff]  ;;  %v739_v4 = vld [vmem:[%s7423_s3 + $0xea0] sm:$0xff] }
  0x38   :  { %3741 = vmatprep.subr.bf16.mxu0 %v4932_v15  ;;  %v608_v15 = vld [vmem:[%s7423_s3 + $0xa88] sm:$0xff]  ;;  %v5197_v10 = vcombine.low %v704_v59, %v716_v60  ;;  %v775_v22 = vld [vmem:[%s7423_s3 + $0xfc0] sm:$0xff] }
  0x39   :  { %3822 = vmatpush1.bf16.msra.mxu1 %v4909_v30  ;;  %v5102_v18 = vcombine.high %v608_v15, %v620_v16  ;;  %v5101_v19 = vcombine.low %v608_v15, %v620_v16  ;;  %v656_v30 = vld [vmem:[%s7423_s3 + $0xc08] sm:$0xff]  ;;  %v763_v15 = vld [vmem:[%s7423_s3 + $0xf60] sm:$0xff] }
  0x3a   :  { %3823 = vmatprep.subr.bf16.mxu1 %v4934_v32  ;;  %v668_v32 = vld [vmem:[%s7423_s3 + $0xc68] sm:$0xff] }
  0x3b   :  { %3742 = vmatpush1.bf16.msra.mxu0 %v4931_v21  ;;  %v643_v21 = vld [vmem:[%s7423_s3 + $0xba0] sm:$0xff]  ;;  %v5149_v34 = vcombine.low %v656_v30, %v668_v32  ;;  %v5150_v35 = vcombine.high %v656_v30, %v668_v32  ;;  %v728_v5 = vld [vmem:[%s7423_s3 + $0xe48] sm:$0xff] }
  0x3c   :  { %3743 = vmatprep.subr.bf16.mxu0 %v4956_v23  ;;  %v5124_v23 = vcombine.high %v631_v20, %v643_v21  ;;  %v5123_v25 = vcombine.low %v631_v20, %v643_v21  ;;  %v752_v16 = vld [vmem:[%s7423_s3 + $0xf08] sm:$0xff]  ;;  %v799_v30 = vld [vmem:[%s7423_s3 + $0x1080] sm:$0xff] }
  0x3d   :  { %3824 = vmatpush1.bf16.msra.mxu1 %v4933_v38  ;;  %v776_v24 = vld [vmem:[%s7423_s3 + $0xfc8] sm:$0xff] }
  0x3e   :  { %3825 = vmatprep.subr.bf16.mxu1 %v4958_v40  ;;  %v800_v32 = vld [vmem:[%s7423_s3 + $0x1088] sm:$0xff] }
  0x3f   :  { %3744 = vmatpush1.bf16.msra.mxu0 %v4955_v29  ;;  %v667_v29 = vld [vmem:[%s7423_s3 + $0xc60] sm:$0xff] }
  0x40   :  { %3745 = vmatprep.subr.bf16.mxu0 %v4980_v31  ;;  %v5148_v31 = vcombine.high %v655_v28, %v667_v29  ;;  %v5147_v33 = vcombine.low %v655_v28, %v667_v29 }
  0x41   :  { %3826 = vmatpush1.bf16.msra.mxu1 %v4957_v46  ;;  %v679_v46 = vld [vmem:[%s7423_s3 + $0xcc0] sm:$0xff] }
  0x42   :  { %3827 = vmatprep.subr.bf16.mxu1 %v4982_v48 }
  0x43   :  { %3746 = vmatpush1.bf16.msra.mxu0 %v4979_v37  ;;  %v5756_v37 = vshrl.u32 %v49_v36, 7 }
  0x44   :  { %3747 = vmatprep.subr.bf16.mxu0 %v5004_v39  ;;  %v5762_v39 = vld [vmem:[%s7425_s2] sm:$0x7] }
  0x45   :  { %3828 = vmatpush1.bf16.msra.mxu1 %v4981_v54  ;;  %v51_v38 = vsub.s32 0, %v5756_v37  ;;  %v55_v40 = vsub.s32 1, %v5756_v37 }
  0x46   :  { %3829 = vmatprep.subr.bf16.mxu1 %v5006_v56  ;;  %v5174_v56 = vcombine.high %v680_v50, %v692_v51 }
  0x47   :  { %3748 = vmatpush1.bf16.msra.mxu0 %v5003_v45  ;;  %v52_v41 = vrot.slane %v5762_v39, %v51_v38  ;;  %v56_v42 = vrot.slane %v5762_v39, %v55_v40 }
  0x48   :  { %3749 = vmatprep.subr.bf16.mxu0 %v5028_v47 }
  0x49   :  { %3830 = vmatpush1.bf16.msra.mxu1 %v5005_v62  ;;  %v5173_v62 = vcombine.low %v680_v50, %v692_v51  ;;  %v285_v50 = vld [vmem:[%s7423_s3 + $0x70] sm:$0xff]  ;;  %v286_v51 = vld [vmem:[%s7423_s3 + $0x78] sm:$0xff] }
  0x4a   :  { %3831 = vmatprep.subr.bf16.mxu1 %v5030_v0  ;;  %v5198_v0 = vcombine.high %v704_v59, %v716_v60  ;;  %v297_v59 = vld [vmem:[%s7423_s3 + $0xd0] sm:$0xff] }
  0x4b   :  { %3750 = vmatpush1.bf16.msra.mxu0 %v5027_v53 }
  0x4c   :  { %3751 = vmatprep.subr.bf16.mxu0 %v5052_v55  ;;  %v5172_v55 = vcombine.high %v679_v46, %v691_v49 }
  0x4d   :  { %3832 = vmatpush1.bf16.msra.mxu1 %v5029_v7 }
  0x4e   :  { %3833 = vmatprep.subr.bf16.mxu1 %v5054_v9  ;;  %v5195_v9 = vcombine.low %v703_v57, %v715_v58 }
  0x4f   :  { %3752 = vmatpush1.bf16.msra.mxu0 %v5051_v61  ;;  %v5171_v61 = vcombine.low %v679_v46, %v691_v49  ;;  %v273_v49 = vld [vmem:[%s7423_s3 + $0x10] sm:$0xff] }
  0x50   :  { %3753 = vmatprep.subr.bf16.mxu0 %v5076_v63  ;;  %v5196_v63 = vcombine.high %v703_v57, %v715_v58  ;;  %v4768_v57 = vcombine.high %v273_v49, %v285_v50 }
  0x51   :  { %3834 = vmatpush1.bf16.msra.mxu1 %v5053_v13 }
  0x52   :  { %3835 = vmatprep.subr.bf16.mxu1 %v5078_v14  ;;  %v751_v14 = vld [vmem:[%s7423_s3 + $0xf00] sm:$0xff] }
  0x53   :  { %3754 = vmatpush1.bf16.msra.mxu0 %v5075_v6  ;;  %v740_v6 = vld [vmem:[%s7423_s3 + $0xea8] sm:$0xff]  ;;  %v5244_v20 = vcombine.high %v751_v14, %v763_v15 }
  0x54   :  { %3755 = vmatprep.subr.bf16.mxu0 %v5100_v8  ;;  %v5222_v13 = vcombine.high %v728_v5, %v740_v6 }
  0x55   :  { %3836 = vmatpush1.bf16.msra.mxu1 %v5077_v17  ;;  %v764_v17 = vld [vmem:[%s7423_s3 + $0xf68] sm:$0xff] }
  0x56   :  { %3837 = vmatprep.subr.bf16.mxu1 %v5102_v18  ;;  %v5219_v18 = vcombine.low %v727_v2, %v739_v4  ;;  %v5246_v21 = vcombine.high %v752_v16, %v764_v17 }
  0x57   :  { %3756 = vmatpush1.bf16.msra.mxu0 %v5099_v12  ;;  %v5220_v12 = vcombine.high %v727_v2, %v739_v4 }
  0x58   :  { %3757 = vmatprep.subr.bf16.mxu0 %v5124_v23  ;;  %v787_v23 = vld [vmem:[%s7423_s3 + $0x1020] sm:$0xff] }
  0x59   :  { %3838 = vmatpush1.bf16.msra.mxu1 %v5101_v19  ;;  %v5221_v19 = vcombine.low %v728_v5, %v740_v6  ;;  %v5268_v28 = vcombine.high %v775_v22, %v787_v23  ;;  %v321_v5 = vld [vmem:[%s7423_s3 + $0x190] sm:$0xff] }
  0x5a   :  { %3839 = vmatprep.subr.bf16.mxu1 %v5126_v27  ;;  %v5245_v27 = vcombine.low %v752_v16, %v764_v17  ;;  %v333_v6 = vld [vmem:[%s7423_s3 + $0x1f0] sm:$0xff]  ;;  %v358_v16 = vld [vmem:[%s7423_s3 + $0x2b8] sm:$0xff] }
  0x5b   :  { %3758 = vmatpush1.bf16.msra.mxu0 %v5123_v25  ;;  %v788_v25 = vld [vmem:[%s7423_s3 + $0x1028] sm:$0xff]  ;;  %v4815_v17 = vcombine.low %v321_v5, %v333_v6 }
  0x5c   :  { %3768 = vmatprep.subr.bf16.mxu0 %v5148_v31  ;;  %v5270_v29 = vcombine.high %v776_v24, %v788_v25  ;;  %v811_v31 = vld [vmem:[%s7423_s3 + $0x10e0] sm:$0xff]  ;;  %v5269_v36 = vcombine.low %v776_v24, %v788_v25  ;;  %v382_v24 = vld [vmem:[%s7423_s3 + $0x378] sm:$0xff] }
  0x5d   :  { %3840 = vmatpush1.bf16.msra.mxu1 %v5125_v26  ;;  %v5243_v26 = vcombine.low %v751_v14, %v763_v15  ;;  %v5292_v38 = vcombine.high %v799_v30, %v811_v31  ;;  %v357_v14 = vld [vmem:[%s7423_s3 + $0x2b0] sm:$0xff]  ;;  %v346_v15 = vld [vmem:[%s7423_s3 + $0x258] sm:$0xff] }
  0x5e   :  { %3850 = vmatprep.subr.bf16.mxu1 %v5150_v35  ;;  %v5267_v35 = vcombine.low %v775_v22, %v787_v23  ;;  %v381_v22 = vld [vmem:[%s7423_s3 + $0x370] sm:$0xff]  ;;  %v370_v23 = vld [vmem:[%s7423_s3 + $0x318] sm:$0xff] }
  0xf1   :  { %v221_v43 = vpop.f32.mrb[0].mxu0 }
  0xf2   :  { %v222_v44 = vadd.f32 %v221_v43, %v52_v41  ;;  %v223_v45 = vpop.f32.mrb[1].mxu0  ;;  %v823_v41 = vld [vmem:[%s7423_s3 + $0x1140] sm:$0xff]  ;;  %v836_v43 = vld [vmem:[%s7423_s3 + $0x11a8] sm:$0xff] }
  0xf3   :  { %v224_v47 = vadd.f32 %v223_v45, %v56_v42  ;;  %v225_v48 = vpop.f32.mrb[2].mxu0  ;;  %v5802_v3 = vpop.f32.mrb[0].mxu1  ;;  %v835_v42 = vld [vmem:[%s7423_s3 + $0x11a0] sm:$0xff]  ;;  %v5291_v45 = vcombine.low %v799_v30, %v811_v31  ;;  %v405_v30 = vld [vmem:[%s7423_s3 + $0x430] sm:$0xff]  ;;  %v394_v31 = vld [vmem:[%s7423_s3 + $0x3d8] sm:$0xff] }
  0xf4   :  { %v226_v52 = vpop.f32.mrb[3].mxu0  ;;  %v5781_v54 = vpack.c.bf16 %v222_v44, %v222_v44  ;;  %v5363_v7 = vpop.f32.mrb[1].mxu1 }
  0xf5   :  { %v5779_v53 = vpack.c.bf16 %v224_v47, %v224_v47  ;;  %v265_v8 = vpop.f32.mrb[2].mxu1  ;;  %v5316_v47 = vcombine.high %v823_v41, %v835_v42  ;;  %v322_v7 = vld [vmem:[%s7423_s3 + $0x198] sm:$0xff] }
  0xf6   :  { %v5364_v11 = vpop.f32.mrb[3].mxu1  ;;  %v334_v8 = vld [vmem:[%s7423_s3 + $0x1f8] sm:$0xff] }
  0xf7   :  { %3759 = vmatprep.mubr.bf16.mxu0 %v5779_v53  ;;  %3841 = vmatprep.mubr.bf16.mxu1 %v5779_v53  ;;  %v4816_v11 = vcombine.high %v321_v5, %v333_v6 }
  0xf8   :  { %3760 = vmatmul.mubr.bf16.vlgmr.msra.gmra.mrb[4].mxu0 %v5781_v54  ;;  %3842 = vmatmul.mubr.bf16.vlgmr.msra.gmra.mrb[4].mxu1 %v5781_v54 }
  0xf9   :  { %3769 = vmatpush1.bf16.msra.mxu0 %v5147_v33  ;;  %3851 = vmatpush1.bf16.msra.mxu1 %v5149_v34  ;;  %v812_v33 = vld [vmem:[%s7423_s3 + $0x10e8] sm:$0xff]  ;;  %v59_v34 = vsub.s32 2, %v5756_v37 }
  0xfa   :  { %3770 = vmatprep.subr.bf16.mxu0 %v5172_v55  ;;  %3852 = vmatprep.subr.bf16.mxu1 %v5174_v56  ;;  %v5294_v40 = vcombine.high %v800_v32, %v812_v33  ;;  %v824_v37 = vld [vmem:[%s7423_s3 + $0x1148] sm:$0xff]  ;;  %v5293_v46 = vcombine.low %v800_v32, %v812_v33  ;;  %v5315_v55 = vcombine.low %v823_v41, %v835_v42  ;;  %v406_v32 = vld [vmem:[%s7423_s3 + $0x438] sm:$0xff] }
  0xfb   :  { %3800 = vmatprep.mubr.bf16.mxu0 %v5444_v1  ;;  %3882 = vmatprep.mubr.bf16.mxu1 %v5444_v1  ;;  %v60_v44 = vrot.slane %v5762_v39, %v59_v34  ;;  %v5318_v48 = vcombine.high %v824_v37, %v836_v43  ;;  %v274_v39 = vld [vmem:[%s7423_s3 + $0x18] sm:$0xff]  ;;  %v5317_v56 = vcombine.low %v824_v37, %v836_v43 }
  0xfc   :  { %v4770_v58 = vcombine.high %v274_v39, %v286_v51  ;;  %v4769_v2 = vcombine.low %v274_v39, %v286_v51  ;;  %v4865_v34 = vcombine.low %v370_v23, %v382_v24  ;;  %v418_v41 = vld [vmem:[%s7423_s3 + $0x498] sm:$0xff]  ;;  %v4889_v43 = vcombine.low %v394_v31, %v406_v32 }
  0xfd   :  { %3771 = vmatpush1.bf16.msra.mxu0 %v5171_v61  ;;  %3853 = vmatpush1.bf16.msra.mxu1 %v5173_v62  ;;  %v263_v52 = vadd.f32 %v5802_v3, %v60_v44  ;;  %v309_v61 = vld [vmem:[%s7423_s3 + $0x130] sm:$0xff]  ;;  %v298_v62 = vld [vmem:[%s7423_s3 + $0xd8] sm:$0xff] }
  0xfe   :  { %3772 = vmatprep.subr.bf16.mxu0 %v5196_v63  ;;  %3854 = vmatprep.subr.bf16.mxu1 %v5198_v0  ;;  %v310_v63 = vld [vmem:[%s7423_s3 + $0x138] sm:$0xff]  ;;  %v4767_v0 = vcombine.low %v273_v49, %v285_v50  ;;  %v4792_v3 = vcombine.high %v297_v59, %v309_v61 }
  0xff   :  { %v5881_v60 = vpack.c.bf16 %v263_v52, %v263_v52  ;;  %v4794_v4 = vcombine.high %v298_v62, %v310_v63  ;;  %v430_v42 = vld [vmem:[%s7423_s3 + $0x4f8] sm:$0xff] }
 0x100   :  { %v454_v49 = vld [vmem:[%s7423_s3 + $0x5b8] sm:$0xff]  ;;  %v4913_v39 = vcombine.low %v418_v41, %v430_v42 }
 0x101   :  { %3773 = vmatpush1.bf16.msra.mxu0 %v5195_v9  ;;  %3855 = vmatpush1.bf16.msra.mxu1 %v5197_v10  ;;  %v4791_v9 = vcombine.low %v297_v59, %v309_v61  ;;  %v4793_v10 = vcombine.low %v298_v62, %v310_v63 }
 0x102   :  { %3774 = vmatprep.subr.bf16.mxu0 %v5220_v12  ;;  %3856 = vmatprep.subr.bf16.mxu1 %v5222_v13  ;;  %v4818_v12 = vcombine.high %v322_v7, %v334_v8  ;;  %v345_v13 = vld [vmem:[%s7423_s3 + $0x250] sm:$0xff] }
 0x103   :  { %v4839_v25 = vcombine.low %v345_v13, %v357_v14 }
 0x105   :  { %3775 = vmatpush1.bf16.msra.mxu0 %v5219_v18  ;;  %3857 = vmatpush1.bf16.msra.mxu1 %v5221_v19  ;;  %v4817_v18 = vcombine.low %v322_v7, %v334_v8  ;;  %v4840_v19 = vcombine.high %v345_v13, %v357_v14 }
 0x106   :  { %3776 = vmatprep.subr.bf16.mxu0 %v5244_v20  ;;  %3858 = vmatprep.subr.bf16.mxu1 %v5246_v21  ;;  %v4842_v20 = vcombine.high %v346_v15, %v358_v16  ;;  %v369_v21 = vld [vmem:[%s7423_s3 + $0x310] sm:$0xff] }
 0x107   :  { %v4863_v33 = vcombine.low %v369_v21, %v381_v22 }
 0x109   :  { %3777 = vmatpush1.bf16.msra.mxu0 %v5243_v26  ;;  %3859 = vmatpush1.bf16.msra.mxu1 %v5245_v27  ;;  %v4841_v26 = vcombine.low %v346_v15, %v358_v16  ;;  %v4864_v27 = vcombine.high %v369_v21, %v381_v22 }
 0x10a   :  { %3778 = vmatprep.subr.bf16.mxu0 %v5268_v28  ;;  %3860 = vmatprep.subr.bf16.mxu1 %v5270_v29  ;;  %v4866_v28 = vcombine.high %v370_v23, %v382_v24  ;;  %v393_v29 = vld [vmem:[%s7423_s3 + $0x3d0] sm:$0xff] }
 0x10b   :  { %v4887_v37 = vcombine.low %v393_v29, %v405_v30 }
 0x10d   :  { %3779 = vmatpush1.bf16.msra.mxu0 %v5267_v35  ;;  %3861 = vmatpush1.bf16.msra.mxu1 %v5269_v36  ;;  %v4888_v35 = vcombine.high %v393_v29, %v405_v30  ;;  %v4890_v36 = vcombine.high %v394_v31, %v406_v32 }
 0x10e   :  { %3780 = vmatprep.subr.bf16.mxu0 %v5292_v38  ;;  %3862 = vmatprep.subr.bf16.mxu1 %v5294_v40  ;;  %v417_v38 = vld [vmem:[%s7423_s3 + $0x490] sm:$0xff] }
 0x10f   :  { %v429_v40 = vld [vmem:[%s7423_s3 + $0x4f0] sm:$0xff] }
 0x110   :  { %v4912_v44 = vcombine.high %v417_v38, %v429_v40  ;;  %v4911_v50 = vcombine.low %v417_v38, %v429_v40 }
 0x111   :  { %3781 = vmatpush1.bf16.msra.mxu0 %v5291_v45  ;;  %3863 = vmatpush1.bf16.msra.mxu1 %v5293_v46  ;;  %v4914_v45 = vcombine.high %v418_v41, %v430_v42  ;;  %v441_v46 = vld [vmem:[%s7423_s3 + $0x550] sm:$0xff] }
 0x112   :  { %3782 = vmatprep.subr.bf16.mxu0 %v5316_v47  ;;  %3864 = vmatprep.subr.bf16.mxu1 %v5318_v48  ;;  %v453_v47 = vld [vmem:[%s7423_s3 + $0x5b0] sm:$0xff]  ;;  %v442_v48 = vld [vmem:[%s7423_s3 + $0x558] sm:$0xff] }
 0x113   :  { %v4936_v51 = vcombine.high %v441_v46, %v453_v47  ;;  %v4938_v52 = vcombine.high %v442_v48, %v454_v49  ;;  %v4935_v59 = vcombine.low %v441_v46, %v453_v47  ;;  %v4937_v61 = vcombine.low %v442_v48, %v454_v49 }
 0x115   :  { %3783 = vmatpush1.bf16.msra.mxu0 %v5315_v55  ;;  %3865 = vmatpush1.bf16.msra.mxu1 %v5317_v56  ;;  %v465_v55 = vld [vmem:[%s7423_s3 + $0x610] sm:$0xff] }
 0x116   :  { %3891 = vmatprep.subr.bf16.mxu0 %v4768_v57  ;;  %3973 = vmatprep.subr.bf16.mxu1 %v4770_v58  ;;  %v477_v56 = vld [vmem:[%s7423_s3 + $0x670] sm:$0xff]  ;;  %v466_v57 = vld [vmem:[%s7423_s3 + $0x618] sm:$0xff] }
 0x117   :  { %v478_v58 = vld [vmem:[%s7423_s3 + $0x678] sm:$0xff]  ;;  %v4960_v62 = vcombine.high %v465_v55, %v477_v56  ;;  %v4959_v5 = vcombine.low %v465_v55, %v477_v56 }
 0x118   :  { %3801 = vmatmul.mubr.bf16.vlgmr.msra.gmra.mrb[4].mxu0 %v5881_v60  ;;  %3883 = vmatmul.mubr.bf16.vlgmr.msra.gmra.mrb[4].mxu1 %v5881_v60  ;;  %v4962_v63 = vcombine.high %v466_v57, %v478_v58  ;;  %v4961_v6 = vcombine.low %v466_v57, %v478_v58 }
 0x119   :  { %3892 = vmatpush1.bf16.msra.mxu0 %v4767_v0  ;;  %3923 = vmatprep.mubr.bf16.mxu0 %v5779_v53  ;;  %v489_v0 = vld [vmem:[%s7423_s3 + $0x6d0] sm:$0xff] }
 0x11a   :  { %3974 = vmatpush1.bf16.msra.mxu1 %v4769_v2  ;;  %4005 = vmatprep.mubr.bf16.mxu1 %v5779_v53  ;;  %v501_v2 = vld [vmem:[%s7423_s3 + $0x730] sm:$0xff] }
 0x11b   :  { %3893 = vmatprep.subr.bf16.mxu0 %v4792_v3  ;;  %3975 = vmatprep.subr.bf16.mxu1 %v4794_v4  ;;  %v490_v3 = vld [vmem:[%s7423_s3 + $0x6d8] sm:$0xff]  ;;  %v4984_v7 = vcombine.high %v489_v0, %v501_v2  ;;  %v4983_v13 = vcombine.low %v489_v0, %v501_v2 }
 0x11c   :  { %v502_v4 = vld [vmem:[%s7423_s3 + $0x738] sm:$0xff] }
 0x11d   :  { %3894 = vmatpush1.bf16.msra.mxu0 %v4791_v9  ;;  %v4986_v8 = vcombine.high %v490_v3, %v502_v4  ;;  %v513_v9 = vld [vmem:[%s7423_s3 + $0x790] sm:$0xff]  ;;  %v4985_v14 = vcombine.low %v490_v3, %v502_v4 }
 0x11e   :  { %3976 = vmatpush1.bf16.msra.mxu1 %v4793_v10  ;;  %3895 = vmatprep.subr.bf16.mxu0 %v4816_v11  ;;  %v525_v10 = vld [vmem:[%s7423_s3 + $0x7f0] sm:$0xff]  ;;  %v514_v11 = vld [vmem:[%s7423_s3 + $0x798] sm:$0xff] }
 0x11f   :  { %3977 = vmatprep.subr.bf16.mxu1 %v4818_v12  ;;  %v526_v12 = vld [vmem:[%s7423_s3 + $0x7f8] sm:$0xff]  ;;  %v5008_v15 = vcombine.high %v513_v9, %v525_v10  ;;  %v5007_v21 = vcombine.low %v513_v9, %v525_v10 }
 0x120   :  { %v5010_v16 = vcombine.high %v514_v11, %v526_v12  ;;  %v5009_v22 = vcombine.low %v514_v11, %v526_v12 }
 0x121   :  { %3896 = vmatpush1.bf16.msra.mxu0 %v4815_v17  ;;  %v537_v17 = vld [vmem:[%s7423_s3 + $0x850] sm:$0xff] }
 0x122   :  { %3978 = vmatpush1.bf16.msra.mxu1 %v4817_v18  ;;  %3897 = vmatprep.subr.bf16.mxu0 %v4840_v19  ;;  %v549_v18 = vld [vmem:[%s7423_s3 + $0x8b0] sm:$0xff]  ;;  %v538_v19 = vld [vmem:[%s7423_s3 + $0x858] sm:$0xff] }
 0x123   :  { %3979 = vmatprep.subr.bf16.mxu1 %v4842_v20  ;;  %v550_v20 = vld [vmem:[%s7423_s3 + $0x8b8] sm:$0xff]  ;;  %v5032_v23 = vcombine.high %v537_v17, %v549_v18  ;;  %v5031_v29 = vcombine.low %v537_v17, %v549_v18 }
 0x124   :  { %v5034_v24 = vcombine.high %v538_v19, %v550_v20  ;;  %v5033_v30 = vcombine.low %v538_v19, %v550_v20 }
 0x125   :  { %3898 = vmatpush1.bf16.msra.mxu0 %v4839_v25  ;;  %v561_v25 = vld [vmem:[%s7423_s3 + $0x910] sm:$0xff] }
 0x126   :  { %3980 = vmatpush1.bf16.msra.mxu1 %v4841_v26  ;;  %3899 = vmatprep.subr.bf16.mxu0 %v4864_v27  ;;  %v573_v26 = vld [vmem:[%s7423_s3 + $0x970] sm:$0xff]  ;;  %v562_v27 = vld [vmem:[%s7423_s3 + $0x918] sm:$0xff] }
 0x127   :  { %3981 = vmatprep.subr.bf16.mxu1 %v4866_v28  ;;  %v574_v28 = vld [vmem:[%s7423_s3 + $0x978] sm:$0xff]  ;;  %v5056_v31 = vcombine.high %v561_v25, %v573_v26  ;;  %v5055_v38 = vcombine.low %v561_v25, %v573_v26 }
 0x128   :  { %v5058_v32 = vcombine.high %v562_v27, %v574_v28  ;;  %v5057_v40 = vcombine.low %v562_v27, %v574_v28 }
 0x129   :  { %3900 = vmatpush1.bf16.msra.mxu0 %v4863_v33  ;;  %v585_v33 = vld [vmem:[%s7423_s3 + $0x9d0] sm:$0xff] }
 0x12a   :  { %3982 = vmatpush1.bf16.msra.mxu1 %v4865_v34  ;;  %3901 = vmatprep.subr.bf16.mxu0 %v4888_v35  ;;  %v597_v34 = vld [vmem:[%s7423_s3 + $0xa30] sm:$0xff]  ;;  %v586_v35 = vld [vmem:[%s7423_s3 + $0x9d8] sm:$0xff] }
 0x12b   :  { %3983 = vmatprep.subr.bf16.mxu1 %v4890_v36  ;;  %v598_v36 = vld [vmem:[%s7423_s3 + $0xa38] sm:$0xff]  ;;  %v5080_v41 = vcombine.high %v585_v33, %v597_v34  ;;  %v5079_v46 = vcombine.low %v585_v33, %v597_v34 }
 0x12c   :  { %v5082_v42 = vcombine.high %v586_v35, %v598_v36  ;;  %v5081_v47 = vcombine.low %v586_v35, %v598_v36 }
 0x12d   :  { %3902 = vmatpush1.bf16.msra.mxu0 %v4887_v37  ;;  %v609_v37 = vld [vmem:[%s7423_s3 + $0xa90] sm:$0xff] }
 0x12e   :  { %3984 = vmatpush1.bf16.msra.mxu1 %v4889_v43  ;;  %3903 = vmatprep.subr.bf16.mxu0 %v4912_v44  ;;  %v621_v43 = vld [vmem:[%s7423_s3 + $0xaf0] sm:$0xff]  ;;  %v610_v44 = vld [vmem:[%s7423_s3 + $0xa98] sm:$0xff] }
 0x12f   :  { %3985 = vmatprep.subr.bf16.mxu1 %v4914_v45  ;;  %v622_v45 = vld [vmem:[%s7423_s3 + $0xaf8] sm:$0xff]  ;;  %v5104_v48 = vcombine.high %v609_v37, %v621_v43  ;;  %v5103_v55 = vcombine.low %v609_v37, %v621_v43 }
 0x130   :  { %v5106_v49 = vcombine.high %v610_v44, %v622_v45  ;;  %v5105_v56 = vcombine.low %v610_v44, %v622_v45 }
 0x131   :  { %3904 = vmatpush1.bf16.msra.mxu0 %v4911_v50  ;;  %v633_v50 = vld [vmem:[%s7423_s3 + $0xb50] sm:$0xff] }
 0x132   :  { %3986 = vmatpush1.bf16.msra.mxu1 %v4913_v39  ;;  %3905 = vmatprep.subr.bf16.mxu0 %v4936_v51  ;;  %v645_v39 = vld [vmem:[%s7423_s3 + $0xbb0] sm:$0xff]  ;;  %v634_v51 = vld [vmem:[%s7423_s3 + $0xb58] sm:$0xff] }
 0x133   :  { %3987 = vmatprep.subr.bf16.mxu1 %v4938_v52  ;;  %v646_v52 = vld [vmem:[%s7423_s3 + $0xbb8] sm:$0xff]  ;;  %v5128_v57 = vcombine.high %v633_v50, %v645_v39  ;;  %v5127_v0 = vcombine.low %v633_v50, %v645_v39 }
 0x134   :  { %v5130_v58 = vcombine.high %v634_v51, %v646_v52  ;;  %v5129_v2 = vcombine.low %v634_v51, %v646_v52 }
 0x135   :  { %3906 = vmatpush1.bf16.msra.mxu0 %v4935_v59  ;;  %v657_v59 = vld [vmem:[%s7423_s3 + $0xc10] sm:$0xff] }
 0x136   :  { %3988 = vmatpush1.bf16.msra.mxu1 %v4937_v61  ;;  %3907 = vmatprep.subr.bf16.mxu0 %v4960_v62  ;;  %v669_v61 = vld [vmem:[%s7423_s3 + $0xc70] sm:$0xff]  ;;  %v658_v62 = vld [vmem:[%s7423_s3 + $0xc18] sm:$0xff] }
 0x137   :  { %3989 = vmatprep.subr.bf16.mxu1 %v4962_v63  ;;  %v670_v63 = vld [vmem:[%s7423_s3 + $0xc78] sm:$0xff]  ;;  %v5152_v3 = vcombine.high %v657_v59, %v669_v61  ;;  %v5151_v9 = vcombine.low %v657_v59, %v669_v61 }
 0x138   :  { %v5154_v4 = vcombine.high %v658_v62, %v670_v63  ;;  %v5153_v10 = vcombine.low %v658_v62, %v670_v63 }
 0x139   :  { %3908 = vmatpush1.bf16.msra.mxu0 %v4959_v5  ;;  %v681_v5 = vld [vmem:[%s7423_s3 + $0xcd0] sm:$0xff] }
 0x13a   :  { %3990 = vmatpush1.bf16.msra.mxu1 %v4961_v6  ;;  %3909 = vmatprep.subr.bf16.mxu0 %v4984_v7  ;;  %v693_v6 = vld [vmem:[%s7423_s3 + $0xd30] sm:$0xff]  ;;  %v682_v7 = vld [vmem:[%s7423_s3 + $0xcd8] sm:$0xff] }
 0x13b   :  { %3991 = vmatprep.subr.bf16.mxu1 %v4986_v8  ;;  %v694_v8 = vld [vmem:[%s7423_s3 + $0xd38] sm:$0xff]  ;;  %v5176_v11 = vcombine.high %v681_v5, %v693_v6  ;;  %v5175_v17 = vcombine.low %v681_v5, %v693_v6 }
 0x13c   :  { %v5178_v12 = vcombine.high %v682_v7, %v694_v8  ;;  %v5177_v18 = vcombine.low %v682_v7, %v694_v8 }
 0x13d   :  { %3910 = vmatpush1.bf16.msra.mxu0 %v4983_v13  ;;  %v705_v13 = vld [vmem:[%s7423_s3 + $0xd90] sm:$0xff] }
 0x13e   :  { %3992 = vmatpush1.bf16.msra.mxu1 %v4985_v14  ;;  %3911 = vmatprep.subr.bf16.mxu0 %v5008_v15  ;;  %v717_v14 = vld [vmem:[%s7423_s3 + $0xdf0] sm:$0xff]  ;;  %v706_v15 = vld [vmem:[%s7423_s3 + $0xd98] sm:$0xff] }
 0x13f   :  { %3993 = vmatprep.subr.bf16.mxu1 %v5010_v16  ;;  %v718_v16 = vld [vmem:[%s7423_s3 + $0xdf8] sm:$0xff]  ;;  %v5200_v19 = vcombine.high %v705_v13, %v717_v14  ;;  %v5199_v25 = vcombine.low %v705_v13, %v717_v14  ;;  %v312_v13 = vld [vmem:[%s7423_s3 + $0x148] sm:$0xff] }
 0x140   :  { %v5202_v20 = vcombine.high %v706_v15, %v718_v16  ;;  %v5201_v26 = vcombine.low %v706_v15, %v718_v16  ;;  %v323_v16 = vld [vmem:[%s7423_s3 + $0x1a0] sm:$0xff] }
 0x141   :  { %3912 = vmatpush1.bf16.msra.mxu0 %v5007_v21  ;;  %v729_v21 = vld [vmem:[%s7423_s3 + $0xe50] sm:$0xff] }
 0x142   :  { %3994 = vmatpush1.bf16.msra.mxu1 %v5009_v22  ;;  %3913 = vmatprep.subr.bf16.mxu0 %v5032_v23  ;;  %v741_v22 = vld [vmem:[%s7423_s3 + $0xeb0] sm:$0xff]  ;;  %v730_v23 = vld [vmem:[%s7423_s3 + $0xe58] sm:$0xff] }
 0x143   :  { %3995 = vmatprep.subr.bf16.mxu1 %v5034_v24  ;;  %v742_v24 = vld [vmem:[%s7423_s3 + $0xeb8] sm:$0xff]  ;;  %v5224_v27 = vcombine.high %v729_v21, %v741_v22  ;;  %v5223_v33 = vcombine.low %v729_v21, %v741_v22 }
 0x144   :  { %v5226_v28 = vcombine.high %v730_v23, %v742_v24  ;;  %v5225_v34 = vcombine.low %v730_v23, %v742_v24 }
 0x145   :  { %3914 = vmatpush1.bf16.msra.mxu0 %v5031_v29  ;;  %v753_v29 = vld [vmem:[%s7423_s3 + $0xf10] sm:$0xff] }
 0x146   :  { %3996 = vmatpush1.bf16.msra.mxu1 %v5033_v30  ;;  %3915 = vmatprep.subr.bf16.mxu0 %v5056_v31  ;;  %v765_v30 = vld [vmem:[%s7423_s3 + $0xf70] sm:$0xff]  ;;  %v754_v31 = vld [vmem:[%s7423_s3 + $0xf18] sm:$0xff] }
 0x147   :  { %3997 = vmatprep.subr.bf16.mxu1 %v5058_v32  ;;  %v766_v32 = vld [vmem:[%s7423_s3 + $0xf78] sm:$0xff]  ;;  %v5248_v35 = vcombine.high %v753_v29, %v765_v30  ;;  %v5247_v37 = vcombine.low %v753_v29, %v765_v30 }
 0x148   :  { %v5250_v36 = vcombine.high %v754_v31, %v766_v32  ;;  %v5249_v43 = vcombine.low %v754_v31, %v766_v32 }
 0x149   :  { %3916 = vmatpush1.bf16.msra.mxu0 %v5055_v38  ;;  %v777_v38 = vld [vmem:[%s7423_s3 + $0xfd0] sm:$0xff] }
 0x14a   :  { %3998 = vmatpush1.bf16.msra.mxu1 %v5057_v40  ;;  %3917 = vmatprep.subr.bf16.mxu0 %v5080_v41  ;;  %v789_v40 = vld [vmem:[%s7423_s3 + $0x1030] sm:$0xff]  ;;  %v778_v41 = vld [vmem:[%s7423_s3 + $0xfd8] sm:$0xff] }
 0x14b   :  { %3999 = vmatprep.subr.bf16.mxu1 %v5082_v42  ;;  %v790_v42 = vld [vmem:[%s7423_s3 + $0x1038] sm:$0xff]  ;;  %v5272_v44 = vcombine.high %v777_v38, %v789_v40  ;;  %v5271_v50 = vcombine.low %v777_v38, %v789_v40 }
 0x14c   :  { %v5274_v45 = vcombine.high %v778_v41, %v790_v42  ;;  %v5273_v39 = vcombine.low %v778_v41, %v790_v42 }
 0x14d   :  { %3918 = vmatpush1.bf16.msra.mxu0 %v5079_v46  ;;  %v801_v46 = vld [vmem:[%s7423_s3 + $0x1090] sm:$0xff] }
 0x14e   :  { %4000 = vmatpush1.bf16.msra.mxu1 %v5081_v47  ;;  %3919 = vmatprep.subr.bf16.mxu0 %v5104_v48  ;;  %v813_v47 = vld [vmem:[%s7423_s3 + $0x10f0] sm:$0xff]  ;;  %v802_v48 = vld [vmem:[%s7423_s3 + $0x1098] sm:$0xff] }
 0x14f   :  { %4001 = vmatprep.subr.bf16.mxu1 %v5106_v49  ;;  %v814_v49 = vld [vmem:[%s7423_s3 + $0x10f8] sm:$0xff]  ;;  %v5296_v51 = vcombine.high %v801_v46, %v813_v47  ;;  %v5295_v59 = vcombine.low %v801_v46, %v813_v47 }
 0x150   :  { %v5298_v52 = vcombine.high %v802_v48, %v814_v49  ;;  %v5297_v61 = vcombine.low %v802_v48, %v814_v49 }
 0x151   :  { %3920 = vmatpush1.bf16.msra.mxu0 %v5103_v55  ;;  %v825_v55 = vld [vmem:[%s7423_s3 + $0x1150] sm:$0xff] }
 0x152   :  { %4002 = vmatpush1.bf16.msra.mxu1 %v5105_v56  ;;  %3921 = vmatprep.subr.bf16.mxu0 %v5128_v57  ;;  %v837_v56 = vld [vmem:[%s7423_s3 + $0x11b0] sm:$0xff]  ;;  %v826_v57 = vld [vmem:[%s7423_s3 + $0x1158] sm:$0xff] }
 0x153   :  { %4003 = vmatprep.subr.bf16.mxu1 %v5130_v58  ;;  %v838_v58 = vld [vmem:[%s7423_s3 + $0x11b8] sm:$0xff]  ;;  %v5320_v62 = vcombine.high %v825_v55, %v837_v56  ;;  %v5319_v5 = vcombine.low %v825_v55, %v837_v56 }
 0x154   :  { %v5322_v63 = vcombine.high %v826_v57, %v838_v58  ;;  %v5321_v6 = vcombine.low %v826_v57, %v838_v58 }
 0x155   :  { %3922 = vmatpush1.bf16.msra.mxu0 %v5127_v0  ;;  %v275_v0 = vld [vmem:[%s7423_s3 + $0x20] sm:$0xff] }
 0x156   :  { %4004 = vmatpush1.bf16.msra.mxu1 %v5129_v2  ;;  %3932 = vmatprep.subr.bf16.mxu0 %v5152_v3  ;;  %v287_v2 = vld [vmem:[%s7423_s3 + $0x80] sm:$0xff]  ;;  %v276_v3 = vld [vmem:[%s7423_s3 + $0x28] sm:$0xff] }
 0x157   :  { %4014 = vmatprep.subr.bf16.mxu1 %v5154_v4  ;;  %v288_v4 = vld [vmem:[%s7423_s3 + $0x88] sm:$0xff]  ;;  %v4772_v7 = vcombine.high %v275_v0, %v287_v2 }
 0x158   :  { %3924 = vmatmul.mubr.bf16.vlgmr.msra.gmra.mrb[8].mxu0 %v5781_v54  ;;  %v4774_v8 = vcombine.high %v276_v3, %v288_v4  ;;  %v4773_v14 = vcombine.low %v276_v3, %v288_v4 }
 0x159   :  { %4006 = vmatmul.mubr.bf16.vlgmr.msra.gmra.mrb[8].mxu1 %v5781_v54  ;;  %3933 = vmatpush1.bf16.msra.mxu0 %v5151_v9  ;;  %v299_v9 = vld [vmem:[%s7423_s3 + $0xe0] sm:$0xff] }
 0x15a   :  { %4015 = vmatpush1.bf16.msra.mxu1 %v5153_v10  ;;  %3934 = vmatprep.subr.bf16.mxu0 %v5176_v11  ;;  %v311_v10 = vld [vmem:[%s7423_s3 + $0x140] sm:$0xff]  ;;  %v4771_v11 = vcombine.low %v275_v0, %v287_v2 }
 0x15b   :  { %4016 = vmatprep.subr.bf16.mxu1 %v5178_v12  ;;  %3964 = vmatprep.mubr.bf16.mxu0 %v5444_v1  ;;  %v300_v12 = vld [vmem:[%s7423_s3 + $0xe8] sm:$0xff]  ;;  %v4796_v15 = vcombine.high %v299_v9, %v311_v10  ;;  %v4795_v21 = vcombine.low %v299_v9, %v311_v10 }
 0x15c   :  { %4046 = vmatprep.mubr.bf16.mxu1 %v5444_v1  ;;  %v4797_v22 = vcombine.low %v300_v12, %v312_v13 }
 0x15d   :  { %3935 = vmatpush1.bf16.msra.mxu0 %v5175_v17  ;;  %v335_v17 = vld [vmem:[%s7423_s3 + $0x200] sm:$0xff] }
 0x15e   :  { %4017 = vmatpush1.bf16.msra.mxu1 %v5177_v18  ;;  %3936 = vmatprep.subr.bf16.mxu0 %v5200_v19  ;;  %v4798_v18 = vcombine.high %v300_v12, %v312_v13  ;;  %v324_v19 = vld [vmem:[%s7423_s3 + $0x1a8] sm:$0xff]  ;;  %v4820_v23 = vcombine.high %v323_v16, %v335_v17  ;;  %v4819_v29 = vcombine.low %v323_v16, %v335_v17  ;;  %v491_v13 = vld [vmem:[%s7423_s3 + $0x6e0] sm:$0xff] }
 0x15f   :  { %4018 = vmatprep.subr.bf16.mxu1 %v5202_v20  ;;  %v336_v20 = vld [vmem:[%s7423_s3 + $0x208] sm:$0xff] }
 0x160   :  { %v4822_v24 = vcombine.high %v324_v19, %v336_v20  ;;  %v4821_v30 = vcombine.low %v324_v19, %v336_v20  ;;  %v504_v16 = vld [vmem:[%s7423_s3 + $0x748] sm:$0xff] }
 0x161   :  { %3937 = vmatpush1.bf16.msra.mxu0 %v5199_v25  ;;  %v347_v25 = vld [vmem:[%s7423_s3 + $0x260] sm:$0xff] }
 0x162   :  { %4019 = vmatpush1.bf16.msra.mxu1 %v5201_v26  ;;  %3938 = vmatprep.subr.bf16.mxu0 %v5224_v27  ;;  %v359_v26 = vld [vmem:[%s7423_s3 + $0x2c0] sm:$0xff]  ;;  %v348_v27 = vld [vmem:[%s7423_s3 + $0x268] sm:$0xff] }
 0x163   :  { %4020 = vmatprep.subr.bf16.mxu1 %v5226_v28  ;;  %v360_v28 = vld [vmem:[%s7423_s3 + $0x2c8] sm:$0xff]  ;;  %v4844_v31 = vcombine.high %v347_v25, %v359_v26  ;;  %v4843_v38 = vcombine.low %v347_v25, %v359_v26 }
 0x164   :  { %v4846_v32 = vcombine.high %v348_v27, %v360_v28  ;;  %v4845_v40 = vcombine.low %v348_v27, %v360_v28 }
 0x165   :  { %3939 = vmatpush1.bf16.msra.mxu0 %v5223_v33  ;;  %v371_v33 = vld [vmem:[%s7423_s3 + $0x320] sm:$0xff] }
 0x166   :  { %4021 = vmatpush1.bf16.msra.mxu1 %v5225_v34  ;;  %3940 = vmatprep.subr.bf16.mxu0 %v5248_v35  ;;  %v383_v34 = vld [vmem:[%s7423_s3 + $0x380] sm:$0xff]  ;;  %v372_v35 = vld [vmem:[%s7423_s3 + $0x328] sm:$0xff] }
 0x167   :  { %4022 = vmatprep.subr.bf16.mxu1 %v5250_v36  ;;  %v384_v36 = vld [vmem:[%s7423_s3 + $0x388] sm:$0xff]  ;;  %v4868_v41 = vcombine.high %v371_v33, %v383_v34  ;;  %v4867_v46 = vcombine.low %v371_v33, %v383_v34 }
 0x168   :  { %v4870_v42 = vcombine.high %v372_v35, %v384_v36  ;;  %v4869_v47 = vcombine.low %v372_v35, %v384_v36 }
 0x169   :  { %3941 = vmatpush1.bf16.msra.mxu0 %v5247_v37  ;;  %v395_v37 = vld [vmem:[%s7423_s3 + $0x3e0] sm:$0xff] }
 0x16a   :  { %4023 = vmatpush1.bf16.msra.mxu1 %v5249_v43  ;;  %3942 = vmatprep.subr.bf16.mxu0 %v5272_v44  ;;  %v407_v43 = vld [vmem:[%s7423_s3 + $0x440] sm:$0xff]  ;;  %v396_v44 = vld [vmem:[%s7423_s3 + $0x3e8] sm:$0xff] }
 0x16b   :  { %4024 = vmatprep.subr.bf16.mxu1 %v5274_v45  ;;  %v408_v45 = vld [vmem:[%s7423_s3 + $0x448] sm:$0xff]  ;;  %v4892_v48 = vcombine.high %v395_v37, %v407_v43  ;;  %v4891_v55 = vcombine.low %v395_v37, %v407_v43 }
 0x16c   :  { %v4894_v49 = vcombine.high %v396_v44, %v408_v45  ;;  %v4893_v56 = vcombine.low %v396_v44, %v408_v45 }
 0x16d   :  { %3943 = vmatpush1.bf16.msra.mxu0 %v5271_v50  ;;  %v419_v50 = vld [vmem:[%s7423_s3 + $0x4a0] sm:$0xff] }
 0x16e   :  { %4025 = vmatpush1.bf16.msra.mxu1 %v5273_v39  ;;  %3944 = vmatprep.subr.bf16.mxu0 %v5296_v51  ;;  %v431_v39 = vld [vmem:[%s7423_s3 + $0x500] sm:$0xff]  ;;  %v420_v51 = vld [vmem:[%s7423_s3 + $0x4a8] sm:$0xff] }
 0x16f   :  { %4026 = vmatprep.subr.bf16.mxu1 %v5298_v52  ;;  %v432_v52 = vld [vmem:[%s7423_s3 + $0x508] sm:$0xff]  ;;  %v4916_v57 = vcombine.high %v419_v50, %v431_v39  ;;  %v4915_v0 = vcombine.low %v419_v50, %v431_v39 }
 0x170   :  { %v4918_v58 = vcombine.high %v420_v51, %v432_v52  ;;  %v4917_v2 = vcombine.low %v420_v51, %v432_v52 }
 0x171   :  { %3945 = vmatpush1.bf16.msra.mxu0 %v5295_v59  ;;  %v443_v59 = vld [vmem:[%s7423_s3 + $0x560] sm:$0xff] }
 0x172   :  { %4027 = vmatpush1.bf16.msra.mxu1 %v5297_v61  ;;  %3946 = vmatprep.subr.bf16.mxu0 %v5320_v62  ;;  %v455_v61 = vld [vmem:[%s7423_s3 + $0x5c0] sm:$0xff]  ;;  %v444_v62 = vld [vmem:[%s7423_s3 + $0x568] sm:$0xff] }
 0x173   :  { %4028 = vmatprep.subr.bf16.mxu1 %v5322_v63  ;;  %v456_v63 = vld [vmem:[%s7423_s3 + $0x5c8] sm:$0xff]  ;;  %v4940_v3 = vcombine.high %v443_v59, %v455_v61  ;;  %v4939_v9 = vcombine.low %v443_v59, %v455_v61 }
 0x174   :  { %v4942_v4 = vcombine.high %v444_v62, %v456_v63  ;;  %v4941_v10 = vcombine.low %v444_v62, %v456_v63 }
 0x175   :  { %3947 = vmatpush1.bf16.msra.mxu0 %v5319_v5  ;;  %v467_v5 = vld [vmem:[%s7423_s3 + $0x620] sm:$0xff] }
 0x176   :  { %4029 = vmatpush1.bf16.msra.mxu1 %v5321_v6  ;;  %4055 = vmatprep.subr.bf16.mxu0 %v4772_v7  ;;  %v479_v6 = vld [vmem:[%s7423_s3 + $0x680] sm:$0xff]  ;;  %v468_v7 = vld [vmem:[%s7423_s3 + $0x628] sm:$0xff] }
 0x177   :  { %4137 = vmatprep.subr.bf16.mxu1 %v4774_v8  ;;  %v480_v8 = vld [vmem:[%s7423_s3 + $0x688] sm:$0xff]  ;;  %v4963_v17 = vcombine.low %v467_v5, %v479_v6 }
 0x178   :  { %3965 = vmatmul.mubr.bf16.vlgmr.msra.gmra.mrb[8].mxu0 %v5881_v60  ;;  %v4966_v12 = vcombine.high %v468_v7, %v480_v8 }
 0x179   :  { %4047 = vmatmul.mubr.bf16.vlgmr.msra.gmra.mrb[8].mxu1 %v5881_v60  ;;  %4056 = vmatpush1.bf16.msra.mxu0 %v4771_v11  ;;  %v4964_v11 = vcombine.high %v467_v5, %v479_v6 }
 0x17a   :  { %4087 = vmatprep.mubr.bf16.mxu0 %v5779_v53  ;;  %4138 = vmatpush1.bf16.msra.mxu1 %v4773_v14  ;;  %v503_v14 = vld [vmem:[%s7423_s3 + $0x740] sm:$0xff] }
 0x17b   :  { %4169 = vmatprep.mubr.bf16.mxu1 %v5779_v53  ;;  %4057 = vmatprep.subr.bf16.mxu0 %v4796_v15  ;;  %v492_v15 = vld [vmem:[%s7423_s3 + $0x6e8] sm:$0xff]  ;;  %v4988_v19 = vcombine.high %v491_v13, %v503_v14  ;;  %v4987_v25 = vcombine.low %v491_v13, %v503_v14 }
 0x17c   :  { %4139 = vmatprep.subr.bf16.mxu1 %v4798_v18  ;;  %v4965_v18 = vcombine.low %v468_v7, %v480_v8  ;;  %v4990_v20 = vcombine.high %v492_v15, %v504_v16  ;;  %v4989_v26 = vcombine.low %v492_v15, %v504_v16 }
 0x17d   :  { %4058 = vmatpush1.bf16.msra.mxu0 %v4795_v21  ;;  %v515_v21 = vld [vmem:[%s7423_s3 + $0x7a0] sm:$0xff] }
 0x17e   :  { %4140 = vmatpush1.bf16.msra.mxu1 %v4797_v22  ;;  %4059 = vmatprep.subr.bf16.mxu0 %v4820_v23  ;;  %v527_v22 = vld [vmem:[%s7423_s3 + $0x800] sm:$0xff]  ;;  %v516_v23 = vld [vmem:[%s7423_s3 + $0x7a8] sm:$0xff] }
 0x17f   :  { %4141 = vmatprep.subr.bf16.mxu1 %v4822_v24  ;;  %v528_v24 = vld [vmem:[%s7423_s3 + $0x808] sm:$0xff]  ;;  %v5012_v27 = vcombine.high %v515_v21, %v527_v22  ;;  %v5011_v33 = vcombine.low %v515_v21, %v527_v22 }
 0x180   :  { %v5014_v28 = vcombine.high %v516_v23, %v528_v24  ;;  %v5013_v34 = vcombine.low %v516_v23, %v528_v24 }
 0x181   :  { %4060 = vmatpush1.bf16.msra.mxu0 %v4819_v29  ;;  %v539_v29 = vld [vmem:[%s7423_s3 + $0x860] sm:$0xff] }
 0x182   :  { %4142 = vmatpush1.bf16.msra.mxu1 %v4821_v30  ;;  %4061 = vmatprep.subr.bf16.mxu0 %v4844_v31  ;;  %v551_v30 = vld [vmem:[%s7423_s3 + $0x8c0] sm:$0xff]  ;;  %v540_v31 = vld [vmem:[%s7423_s3 + $0x868] sm:$0xff] }
 0x183   :  { %4143 = vmatprep.subr.bf16.mxu1 %v4846_v32  ;;  %v552_v32 = vld [vmem:[%s7423_s3 + $0x8c8] sm:$0xff]  ;;  %v5036_v35 = vcombine.high %v539_v29, %v551_v30  ;;  %v5035_v37 = vcombine.low %v539_v29, %v551_v30 }
 0x184   :  { %v5038_v36 = vcombine.high %v540_v31, %v552_v32  ;;  %v5037_v43 = vcombine.low %v540_v31, %v552_v32 }
 0x185   :  { %4062 = vmatpush1.bf16.msra.mxu0 %v4843_v38  ;;  %v563_v38 = vld [vmem:[%s7423_s3 + $0x920] sm:$0xff] }
 0x186   :  { %4144 = vmatpush1.bf16.msra.mxu1 %v4845_v40  ;;  %4063 = vmatprep.subr.bf16.mxu0 %v4868_v41  ;;  %v575_v40 = vld [vmem:[%s7423_s3 + $0x980] sm:$0xff]  ;;  %v564_v41 = vld [vmem:[%s7423_s3 + $0x928] sm:$0xff] }
 0x187   :  { %4145 = vmatprep.subr.bf16.mxu1 %v4870_v42  ;;  %v576_v42 = vld [vmem:[%s7423_s3 + $0x988] sm:$0xff]  ;;  %v5060_v44 = vcombine.high %v563_v38, %v575_v40  ;;  %v5059_v50 = vcombine.low %v563_v38, %v575_v40 }
 0x188   :  { %v5062_v45 = vcombine.high %v564_v41, %v576_v42  ;;  %v5061_v39 = vcombine.low %v564_v41, %v576_v42 }
 0x189   :  { %4064 = vmatpush1.bf16.msra.mxu0 %v4867_v46  ;;  %v587_v46 = vld [vmem:[%s7423_s3 + $0x9e0] sm:$0xff] }
 0x18a   :  { %4146 = vmatpush1.bf16.msra.mxu1 %v4869_v47  ;;  %4065 = vmatprep.subr.bf16.mxu0 %v4892_v48  ;;  %v599_v47 = vld [vmem:[%s7423_s3 + $0xa40] sm:$0xff]  ;;  %v588_v48 = vld [vmem:[%s7423_s3 + $0x9e8] sm:$0xff] }
 0x18b   :  { %4147 = vmatprep.subr.bf16.mxu1 %v4894_v49  ;;  %v600_v49 = vld [vmem:[%s7423_s3 + $0xa48] sm:$0xff]  ;;  %v5084_v51 = vcombine.high %v587_v46, %v599_v47  ;;  %v5083_v59 = vcombine.low %v587_v46, %v599_v47 }
 0x18c   :  { %v5086_v52 = vcombine.high %v588_v48, %v600_v49  ;;  %v5085_v61 = vcombine.low %v588_v48, %v600_v49 }
 0x18d   :  { %4066 = vmatpush1.bf16.msra.mxu0 %v4891_v55  ;;  %v611_v55 = vld [vmem:[%s7423_s3 + $0xaa0] sm:$0xff] }
 0x18e   :  { %4148 = vmatpush1.bf16.msra.mxu1 %v4893_v56  ;;  %4067 = vmatprep.subr.bf16.mxu0 %v4916_v57  ;;  %v623_v56 = vld [vmem:[%s7423_s3 + $0xb00] sm:$0xff]  ;;  %v612_v57 = vld [vmem:[%s7423_s3 + $0xaa8] sm:$0xff] }
 0x18f   :  { %4149 = vmatprep.subr.bf16.mxu1 %v4918_v58  ;;  %v624_v58 = vld [vmem:[%s7423_s3 + $0xb08] sm:$0xff]  ;;  %v5108_v62 = vcombine.high %v611_v55, %v623_v56  ;;  %v5107_v5 = vcombine.low %v611_v55, %v623_v56 }
 0x190   :  { %v5110_v63 = vcombine.high %v612_v57, %v624_v58  ;;  %v5109_v6 = vcombine.low %v612_v57, %v624_v58 }
 0x191   :  { %4068 = vmatpush1.bf16.msra.mxu0 %v4915_v0  ;;  %v635_v0 = vld [vmem:[%s7423_s3 + $0xb60] sm:$0xff] }
 0x192   :  { %4150 = vmatpush1.bf16.msra.mxu1 %v4917_v2  ;;  %4069 = vmatprep.subr.bf16.mxu0 %v4940_v3  ;;  %v647_v2 = vld [vmem:[%s7423_s3 + $0xbc0] sm:$0xff]  ;;  %v636_v3 = vld [vmem:[%s7423_s3 + $0xb68] sm:$0xff] }
 0x193   :  { %4151 = vmatprep.subr.bf16.mxu1 %v4942_v4  ;;  %v648_v4 = vld [vmem:[%s7423_s3 + $0xbc8] sm:$0xff]  ;;  %v5132_v7 = vcombine.high %v635_v0, %v647_v2  ;;  %v5131_v13 = vcombine.low %v635_v0, %v647_v2 }
 0x194   :  { %v5134_v8 = vcombine.high %v636_v3, %v648_v4  ;;  %v5133_v14 = vcombine.low %v636_v3, %v648_v4 }
 0x195   :  { %4070 = vmatpush1.bf16.msra.mxu0 %v4939_v9  ;;  %v659_v9 = vld [vmem:[%s7423_s3 + $0xc20] sm:$0xff] }
 0x196   :  { %4152 = vmatpush1.bf16.msra.mxu1 %v4941_v10  ;;  %4071 = vmatprep.subr.bf16.mxu0 %v4964_v11  ;;  %v671_v10 = vld [vmem:[%s7423_s3 + $0xc80] sm:$0xff]  ;;  %v660_v11 = vld [vmem:[%s7423_s3 + $0xc28] sm:$0xff] }
 0x197   :  { %4153 = vmatprep.subr.bf16.mxu1 %v4966_v12  ;;  %v672_v12 = vld [vmem:[%s7423_s3 + $0xc88] sm:$0xff]  ;;  %v5156_v15 = vcombine.high %v659_v9, %v671_v10  ;;  %v5155_v21 = vcombine.low %v659_v9, %v671_v10 }
 0x198   :  { %v5158_v16 = vcombine.high %v660_v11, %v672_v12  ;;  %v5157_v22 = vcombine.low %v660_v11, %v672_v12 }
 0x199   :  { %4072 = vmatpush1.bf16.msra.mxu0 %v4963_v17  ;;  %v683_v17 = vld [vmem:[%s7423_s3 + $0xce0] sm:$0xff] }
 0x19a   :  { %4154 = vmatpush1.bf16.msra.mxu1 %v4965_v18  ;;  %4073 = vmatprep.subr.bf16.mxu0 %v4988_v19  ;;  %v695_v18 = vld [vmem:[%s7423_s3 + $0xd40] sm:$0xff]  ;;  %v684_v19 = vld [vmem:[%s7423_s3 + $0xce8] sm:$0xff] }
 0x19b   :  { %4155 = vmatprep.subr.bf16.mxu1 %v4990_v20  ;;  %v696_v20 = vld [vmem:[%s7423_s3 + $0xd48] sm:$0xff]  ;;  %v5180_v23 = vcombine.high %v683_v17, %v695_v18  ;;  %v5179_v29 = vcombine.low %v683_v17, %v695_v18 }
 0x19c   :  { %v5182_v24 = vcombine.high %v684_v19, %v696_v20  ;;  %v5181_v30 = vcombine.low %v684_v19, %v696_v20 }
 0x19d   :  { %4074 = vmatpush1.bf16.msra.mxu0 %v4987_v25  ;;  %v707_v25 = vld [vmem:[%s7423_s3 + $0xda0] sm:$0xff] }
 0x19e   :  { %4156 = vmatpush1.bf16.msra.mxu1 %v4989_v26  ;;  %4075 = vmatprep.subr.bf16.mxu0 %v5012_v27  ;;  %v719_v26 = vld [vmem:[%s7423_s3 + $0xe00] sm:$0xff]  ;;  %v708_v27 = vld [vmem:[%s7423_s3 + $0xda8] sm:$0xff] }
 0x19f   :  { %4157 = vmatprep.subr.bf16.mxu1 %v5014_v28  ;;  %v720_v28 = vld [vmem:[%s7423_s3 + $0xe08] sm:$0xff]  ;;  %v5204_v31 = vcombine.high %v707_v25, %v719_v26  ;;  %v5203_v38 = vcombine.low %v707_v25, %v719_v26  ;;  %v314_v25 = vld [vmem:[%s7423_s3 + $0x158] sm:$0xff] }
 0x1a0   :  { %v5206_v32 = vcombine.high %v708_v27, %v720_v28  ;;  %v5205_v40 = vcombine.low %v708_v27, %v720_v28  ;;  %v325_v28 = vld [vmem:[%s7423_s3 + $0x1b0] sm:$0xff] }
 0x1a1   :  { %4076 = vmatpush1.bf16.msra.mxu0 %v5011_v33  ;;  %v731_v33 = vld [vmem:[%s7423_s3 + $0xe60] sm:$0xff] }
 0x1a2   :  { %4158 = vmatpush1.bf16.msra.mxu1 %v5013_v34  ;;  %4077 = vmatprep.subr.bf16.mxu0 %v5036_v35  ;;  %v743_v34 = vld [vmem:[%s7423_s3 + $0xec0] sm:$0xff]  ;;  %v732_v35 = vld [vmem:[%s7423_s3 + $0xe68] sm:$0xff] }
 0x1a3   :  { %4159 = vmatprep.subr.bf16.mxu1 %v5038_v36  ;;  %v744_v36 = vld [vmem:[%s7423_s3 + $0xec8] sm:$0xff]  ;;  %v5228_v41 = vcombine.high %v731_v33, %v743_v34  ;;  %v5227_v46 = vcombine.low %v731_v33, %v743_v34 }
 0x1a4   :  { %v5230_v42 = vcombine.high %v732_v35, %v744_v36  ;;  %v5229_v47 = vcombine.low %v732_v35, %v744_v36 }
 0x1a5   :  { %4078 = vmatpush1.bf16.msra.mxu0 %v5035_v37  ;;  %v755_v37 = vld [vmem:[%s7423_s3 + $0xf20] sm:$0xff] }
 0x1a6   :  { %4160 = vmatpush1.bf16.msra.mxu1 %v5037_v43  ;;  %4079 = vmatprep.subr.bf16.mxu0 %v5060_v44  ;;  %v767_v43 = vld [vmem:[%s7423_s3 + $0xf80] sm:$0xff]  ;;  %v756_v44 = vld [vmem:[%s7423_s3 + $0xf28] sm:$0xff] }
 0x1a7   :  { %4161 = vmatprep.subr.bf16.mxu1 %v5062_v45  ;;  %v768_v45 = vld [vmem:[%s7423_s3 + $0xf88] sm:$0xff]  ;;  %v5252_v48 = vcombine.high %v755_v37, %v767_v43  ;;  %v5251_v55 = vcombine.low %v755_v37, %v767_v43 }
 0x1a8   :  { %v5254_v49 = vcombine.high %v756_v44, %v768_v45  ;;  %v5253_v56 = vcombine.low %v756_v44, %v768_v45 }
 0x1a9   :  { %4080 = vmatpush1.bf16.msra.mxu0 %v5059_v50  ;;  %v779_v50 = vld [vmem:[%s7423_s3 + $0xfe0] sm:$0xff] }
 0x1aa   :  { %4162 = vmatpush1.bf16.msra.mxu1 %v5061_v39  ;;  %4081 = vmatprep.subr.bf16.mxu0 %v5084_v51  ;;  %v791_v39 = vld [vmem:[%s7423_s3 + $0x1040] sm:$0xff]  ;;  %v780_v51 = vld [vmem:[%s7423_s3 + $0xfe8] sm:$0xff] }
 0x1ab   :  { %4163 = vmatprep.subr.bf16.mxu1 %v5086_v52  ;;  %v792_v52 = vld [vmem:[%s7423_s3 + $0x1048] sm:$0xff]  ;;  %v5276_v57 = vcombine.high %v779_v50, %v791_v39  ;;  %v5275_v0 = vcombine.low %v779_v50, %v791_v39 }
 0x1ac   :  { %v5278_v58 = vcombine.high %v780_v51, %v792_v52  ;;  %v5277_v2 = vcombine.low %v780_v51, %v792_v52 }
 0x1ad   :  { %4082 = vmatpush1.bf16.msra.mxu0 %v5083_v59  ;;  %v803_v59 = vld [vmem:[%s7423_s3 + $0x10a0] sm:$0xff] }
 0x1ae   :  { %4164 = vmatpush1.bf16.msra.mxu1 %v5085_v61  ;;  %4083 = vmatprep.subr.bf16.mxu0 %v5108_v62  ;;  %v815_v61 = vld [vmem:[%s7423_s3 + $0x1100] sm:$0xff]  ;;  %v804_v62 = vld [vmem:[%s7423_s3 + $0x10a8] sm:$0xff] }
 0x1af   :  { %4165 = vmatprep.subr.bf16.mxu1 %v5110_v63  ;;  %v816_v63 = vld [vmem:[%s7423_s3 + $0x1108] sm:$0xff]  ;;  %v5300_v3 = vcombine.high %v803_v59, %v815_v61  ;;  %v5299_v9 = vcombine.low %v803_v59, %v815_v61 }
 0x1b0   :  { %v5302_v4 = vcombine.high %v804_v62, %v816_v63  ;;  %v5301_v10 = vcombine.low %v804_v62, %v816_v63 }
 0x1b1   :  { %4084 = vmatpush1.bf16.msra.mxu0 %v5107_v5  ;;  %v827_v5 = vld [vmem:[%s7423_s3 + $0x1160] sm:$0xff] }
 0x1b2   :  { %4166 = vmatpush1.bf16.msra.mxu1 %v5109_v6  ;;  %4085 = vmatprep.subr.bf16.mxu0 %v5132_v7  ;;  %v839_v6 = vld [vmem:[%s7423_s3 + $0x11c0] sm:$0xff]  ;;  %v828_v7 = vld [vmem:[%s7423_s3 + $0x1168] sm:$0xff] }
 0x1b3   :  { %4167 = vmatprep.subr.bf16.mxu1 %v5134_v8  ;;  %v840_v8 = vld [vmem:[%s7423_s3 + $0x11c8] sm:$0xff]  ;;  %v5324_v11 = vcombine.high %v827_v5, %v839_v6  ;;  %v5323_v17 = vcombine.low %v827_v5, %v839_v6 }
 0x1b4   :  { %v5326_v12 = vcombine.high %v828_v7, %v840_v8  ;;  %v5325_v18 = vcombine.low %v828_v7, %v840_v8 }
 0x1b5   :  { %4086 = vmatpush1.bf16.msra.mxu0 %v5131_v13  ;;  %v277_v13 = vld [vmem:[%s7423_s3 + $0x30] sm:$0xff] }
 0x1b6   :  { %4168 = vmatpush1.bf16.msra.mxu1 %v5133_v14  ;;  %4096 = vmatprep.subr.bf16.mxu0 %v5156_v15  ;;  %v289_v14 = vld [vmem:[%s7423_s3 + $0x90] sm:$0xff]  ;;  %v278_v15 = vld [vmem:[%s7423_s3 + $0x38] sm:$0xff] }
 0x1b7   :  { %4178 = vmatprep.subr.bf16.mxu1 %v5158_v16  ;;  %v290_v16 = vld [vmem:[%s7423_s3 + $0x98] sm:$0xff]  ;;  %v4776_v19 = vcombine.high %v277_v13, %v289_v14 }
 0x1b8   :  { %4088 = vmatmul.mubr.bf16.vlgmr.msra.gmra.mrb[12].mxu0 %v5781_v54  ;;  %v4778_v20 = vcombine.high %v278_v15, %v290_v16  ;;  %v4777_v26 = vcombine.low %v278_v15, %v290_v16  ;;  %v446_v15 = vld [vmem:[%s7423_s3 + $0x578] sm:$0xff] }
 0x1b9   :  { %4170 = vmatmul.mubr.bf16.vlgmr.msra.gmra.mrb[12].mxu1 %v5781_v54  ;;  %4097 = vmatpush1.bf16.msra.mxu0 %v5155_v21  ;;  %v301_v21 = vld [vmem:[%s7423_s3 + $0xf0] sm:$0xff]  ;;  %v458_v16 = vld [vmem:[%s7423_s3 + $0x5d8] sm:$0xff] }
 0x1ba   :  { %4179 = vmatpush1.bf16.msra.mxu1 %v5157_v22  ;;  %4098 = vmatprep.subr.bf16.mxu0 %v5180_v23  ;;  %v313_v22 = vld [vmem:[%s7423_s3 + $0x150] sm:$0xff]  ;;  %v4775_v23 = vcombine.low %v277_v13, %v289_v14 }
 0x1bb   :  { %4180 = vmatprep.subr.bf16.mxu1 %v5182_v24  ;;  %4128 = vmatprep.mubr.bf16.mxu0 %v5444_v1  ;;  %v302_v24 = vld [vmem:[%s7423_s3 + $0xf8] sm:$0xff]  ;;  %v4800_v27 = vcombine.high %v301_v21, %v313_v22  ;;  %v4799_v33 = vcombine.low %v301_v21, %v313_v22 }
 0x1bc   :  { %4210 = vmatprep.mubr.bf16.mxu1 %v5444_v1  ;;  %v4801_v34 = vcombine.low %v302_v24, %v314_v25 }
 0x1bd   :  { %4099 = vmatpush1.bf16.msra.mxu0 %v5179_v29  ;;  %v337_v29 = vld [vmem:[%s7423_s3 + $0x210] sm:$0xff] }
 0x1be   :  { %4181 = vmatpush1.bf16.msra.mxu1 %v5181_v30  ;;  %4100 = vmatprep.subr.bf16.mxu0 %v5204_v31  ;;  %v4802_v30 = vcombine.high %v302_v24, %v314_v25  ;;  %v326_v31 = vld [vmem:[%s7423_s3 + $0x1b8] sm:$0xff]  ;;  %v4824_v35 = vcombine.high %v325_v28, %v337_v29  ;;  %v4823_v37 = vcombine.low %v325_v28, %v337_v29  ;;  %v469_v25 = vld [vmem:[%s7423_s3 + $0x630] sm:$0xff] }
 0x1bf   :  { %4182 = vmatprep.subr.bf16.mxu1 %v5206_v32  ;;  %v338_v32 = vld [vmem:[%s7423_s3 + $0x218] sm:$0xff]  ;;  %v4946_v24 = vcombine.high %v446_v15, %v458_v16 }
 0x1c0   :  { %v4826_v36 = vcombine.high %v326_v31, %v338_v32  ;;  %v4825_v43 = vcombine.low %v326_v31, %v338_v32  ;;  %v482_v28 = vld [vmem:[%s7423_s3 + $0x698] sm:$0xff] }
 0x1c1   :  { %4101 = vmatpush1.bf16.msra.mxu0 %v5203_v38  ;;  %v349_v38 = vld [vmem:[%s7423_s3 + $0x270] sm:$0xff] }
 0x1c2   :  { %4183 = vmatpush1.bf16.msra.mxu1 %v5205_v40  ;;  %4102 = vmatprep.subr.bf16.mxu0 %v5228_v41  ;;  %v361_v40 = vld [vmem:[%s7423_s3 + $0x2d0] sm:$0xff]  ;;  %v350_v41 = vld [vmem:[%s7423_s3 + $0x278] sm:$0xff] }
 0x1c3   :  { %4184 = vmatprep.subr.bf16.mxu1 %v5230_v42  ;;  %v362_v42 = vld [vmem:[%s7423_s3 + $0x2d8] sm:$0xff]  ;;  %v4848_v44 = vcombine.high %v349_v38, %v361_v40  ;;  %v4847_v50 = vcombine.low %v349_v38, %v361_v40 }
 0x1c4   :  { %v4850_v45 = vcombine.high %v350_v41, %v362_v42  ;;  %v4849_v39 = vcombine.low %v350_v41, %v362_v42 }
 0x1c5   :  { %4103 = vmatpush1.bf16.msra.mxu0 %v5227_v46  ;;  %v373_v46 = vld [vmem:[%s7423_s3 + $0x330] sm:$0xff] }
 0x1c6   :  { %4185 = vmatpush1.bf16.msra.mxu1 %v5229_v47  ;;  %4104 = vmatprep.subr.bf16.mxu0 %v5252_v48  ;;  %v385_v47 = vld [vmem:[%s7423_s3 + $0x390] sm:$0xff]  ;;  %v374_v48 = vld [vmem:[%s7423_s3 + $0x338] sm:$0xff] }
 0x1c7   :  { %4186 = vmatprep.subr.bf16.mxu1 %v5254_v49  ;;  %v386_v49 = vld [vmem:[%s7423_s3 + $0x398] sm:$0xff]  ;;  %v4872_v51 = vcombine.high %v373_v46, %v385_v47  ;;  %v4871_v59 = vcombine.low %v373_v46, %v385_v47 }
 0x1c8   :  { %v4874_v52 = vcombine.high %v374_v48, %v386_v49  ;;  %v4873_v61 = vcombine.low %v374_v48, %v386_v49 }
 0x1c9   :  { %4105 = vmatpush1.bf16.msra.mxu0 %v5251_v55  ;;  %v397_v55 = vld [vmem:[%s7423_s3 + $0x3f0] sm:$0xff] }
 0x1ca   :  { %4187 = vmatpush1.bf16.msra.mxu1 %v5253_v56  ;;  %4106 = vmatprep.subr.bf16.mxu0 %v5276_v57  ;;  %v409_v56 = vld [vmem:[%s7423_s3 + $0x450] sm:$0xff]  ;;  %v398_v57 = vld [vmem:[%s7423_s3 + $0x3f8] sm:$0xff] }
 0x1cb   :  { %4188 = vmatprep.subr.bf16.mxu1 %v5278_v58  ;;  %v410_v58 = vld [vmem:[%s7423_s3 + $0x458] sm:$0xff]  ;;  %v4896_v62 = vcombine.high %v397_v55, %v409_v56  ;;  %v4895_v5 = vcombine.low %v397_v55, %v409_v56 }
 0x1cc   :  { %v4898_v63 = vcombine.high %v398_v57, %v410_v58  ;;  %v4897_v6 = vcombine.low %v398_v57, %v410_v58 }
 0x1cd   :  { %4107 = vmatpush1.bf16.msra.mxu0 %v5275_v0  ;;  %v421_v0 = vld [vmem:[%s7423_s3 + $0x4b0] sm:$0xff] }
 0x1ce   :  { %4189 = vmatpush1.bf16.msra.mxu1 %v5277_v2  ;;  %4108 = vmatprep.subr.bf16.mxu0 %v5300_v3  ;;  %v433_v2 = vld [vmem:[%s7423_s3 + $0x510] sm:$0xff]  ;;  %v422_v3 = vld [vmem:[%s7423_s3 + $0x4b8] sm:$0xff] }
 0x1cf   :  { %4190 = vmatprep.subr.bf16.mxu1 %v5302_v4  ;;  %v434_v4 = vld [vmem:[%s7423_s3 + $0x518] sm:$0xff]  ;;  %v4920_v7 = vcombine.high %v421_v0, %v433_v2 }
 0x1d0   :  { %v4921_v22 = vcombine.low %v422_v3, %v434_v4 }
 0x1d1   :  { %4109 = vmatpush1.bf16.msra.mxu0 %v5299_v9 }
 0x1d2   :  { %4191 = vmatpush1.bf16.msra.mxu1 %v5301_v10  ;;  %4110 = vmatprep.subr.bf16.mxu0 %v5324_v11  ;;  %v4922_v10 = vcombine.high %v422_v3, %v434_v4  ;;  %v445_v11 = vld [vmem:[%s7423_s3 + $0x570] sm:$0xff] }
 0x1d3   :  { %4192 = vmatprep.subr.bf16.mxu1 %v5326_v12  ;;  %v457_v12 = vld [vmem:[%s7423_s3 + $0x5d0] sm:$0xff] }
 0x1d4   :  { %v4943_v29 = vcombine.low %v445_v11, %v457_v12 }
 0x1d5   :  { %4111 = vmatpush1.bf16.msra.mxu0 %v5323_v17 }
 0x1d6   :  { %4193 = vmatpush1.bf16.msra.mxu1 %v5325_v18  ;;  %4219 = vmatprep.subr.bf16.mxu0 %v4776_v19  ;;  %v4919_v19 = vcombine.low %v421_v0, %v433_v2 }
 0x1d7   :  { %4301 = vmatprep.subr.bf16.mxu1 %v4778_v20 }
 0x1d8   :  { %4129 = vmatmul.mubr.bf16.vlgmr.msra.gmra.mrb[12].mxu0 %v5881_v60 }
 0x1d9   :  { %4211 = vmatmul.mubr.bf16.vlgmr.msra.gmra.mrb[12].mxu1 %v5881_v60  ;;  %4220 = vmatpush1.bf16.msra.mxu0 %v4775_v23  ;;  %v4944_v23 = vcombine.high %v445_v11, %v457_v12 }
 0x1da   :  { %4251 = vmatprep.mubr.bf16.mxu0 %v5779_v53  ;;  %4302 = vmatpush1.bf16.msra.mxu1 %v4777_v26  ;;  %v481_v26 = vld [vmem:[%s7423_s3 + $0x690] sm:$0xff] }
 0x1db   :  { %4333 = vmatprep.mubr.bf16.mxu1 %v5779_v53  ;;  %4221 = vmatprep.subr.bf16.mxu0 %v4800_v27  ;;  %v470_v27 = vld [vmem:[%s7423_s3 + $0x638] sm:$0xff]  ;;  %v4968_v31 = vcombine.high %v469_v25, %v481_v26  ;;  %v4967_v38 = vcombine.low %v469_v25, %v481_v26 }
 0x1dc   :  { %4303 = vmatprep.subr.bf16.mxu1 %v4802_v30  ;;  %v4945_v30 = vcombine.low %v446_v15, %v458_v16  ;;  %v4970_v32 = vcombine.high %v470_v27, %v482_v28  ;;  %v4969_v40 = vcombine.low %v470_v27, %v482_v28  ;;  %v614_v15 = vld [vmem:[%s7423_s3 + $0xab8] sm:$0xff] }
 0x1dd   :  { %4222 = vmatpush1.bf16.msra.mxu0 %v4799_v33  ;;  %v493_v33 = vld [vmem:[%s7423_s3 + $0x6f0] sm:$0xff]  ;;  %v626_v16 = vld [vmem:[%s7423_s3 + $0xb18] sm:$0xff] }
 0x1de   :  { %4304 = vmatpush1.bf16.msra.mxu1 %v4801_v34  ;;  %4223 = vmatprep.subr.bf16.mxu0 %v4824_v35  ;;  %v505_v34 = vld [vmem:[%s7423_s3 + $0x750] sm:$0xff]  ;;  %v494_v35 = vld [vmem:[%s7423_s3 + $0x6f8] sm:$0xff]  ;;  %v5113_v26 = vcombine.low %v614_v15, %v626_v16 }
 0x1df   :  { %4305 = vmatprep.subr.bf16.mxu1 %v4826_v36  ;;  %v506_v36 = vld [vmem:[%s7423_s3 + $0x758] sm:$0xff]  ;;  %v4992_v41 = vcombine.high %v493_v33, %v505_v34  ;;  %v4991_v46 = vcombine.low %v493_v33, %v505_v34 }
 0x1e0   :  { %v4994_v42 = vcombine.high %v494_v35, %v506_v36  ;;  %v4993_v47 = vcombine.low %v494_v35, %v506_v36 }
 0x1e1   :  { %4224 = vmatpush1.bf16.msra.mxu0 %v4823_v37  ;;  %v517_v37 = vld [vmem:[%s7423_s3 + $0x7b0] sm:$0xff] }
 0x1e2   :  { %4306 = vmatpush1.bf16.msra.mxu1 %v4825_v43  ;;  %4225 = vmatprep.subr.bf16.mxu0 %v4848_v44  ;;  %v529_v43 = vld [vmem:[%s7423_s3 + $0x810] sm:$0xff]  ;;  %v518_v44 = vld [vmem:[%s7423_s3 + $0x7b8] sm:$0xff] }
 0x1e3   :  { %4307 = vmatprep.subr.bf16.mxu1 %v4850_v45  ;;  %v530_v45 = vld [vmem:[%s7423_s3 + $0x818] sm:$0xff]  ;;  %v5016_v48 = vcombine.high %v517_v37, %v529_v43  ;;  %v5015_v55 = vcombine.low %v517_v37, %v529_v43 }
 0x1e4   :  { %v5018_v49 = vcombine.high %v518_v44, %v530_v45  ;;  %v5017_v56 = vcombine.low %v518_v44, %v530_v45 }
 0x1e5   :  { %4226 = vmatpush1.bf16.msra.mxu0 %v4847_v50  ;;  %v541_v50 = vld [vmem:[%s7423_s3 + $0x870] sm:$0xff] }
 0x1e6   :  { %4308 = vmatpush1.bf16.msra.mxu1 %v4849_v39  ;;  %4227 = vmatprep.subr.bf16.mxu0 %v4872_v51  ;;  %v553_v39 = vld [vmem:[%s7423_s3 + $0x8d0] sm:$0xff]  ;;  %v542_v51 = vld [vmem:[%s7423_s3 + $0x878] sm:$0xff] }
 0x1e7   :  { %4309 = vmatprep.subr.bf16.mxu1 %v4874_v52  ;;  %v554_v52 = vld [vmem:[%s7423_s3 + $0x8d8] sm:$0xff]  ;;  %v5040_v57 = vcombine.high %v541_v50, %v553_v39  ;;  %v5039_v0 = vcombine.low %v541_v50, %v553_v39 }
 0x1e8   :  { %v5042_v58 = vcombine.high %v542_v51, %v554_v52  ;;  %v5041_v2 = vcombine.low %v542_v51, %v554_v52 }
 0x1e9   :  { %4228 = vmatpush1.bf16.msra.mxu0 %v4871_v59  ;;  %v565_v59 = vld [vmem:[%s7423_s3 + $0x930] sm:$0xff] }
 0x1ea   :  { %4310 = vmatpush1.bf16.msra.mxu1 %v4873_v61  ;;  %4229 = vmatprep.subr.bf16.mxu0 %v4896_v62  ;;  %v577_v61 = vld [vmem:[%s7423_s3 + $0x990] sm:$0xff]  ;;  %v566_v62 = vld [vmem:[%s7423_s3 + $0x938] sm:$0xff] }
 0x1eb   :  { %v3802_v8 = vpop.f32.mrb[4].mxu0  ;;  %v3884_v9 = vpop.f32.mrb[4].mxu1  ;;  %4311 = vmatprep.subr.bf16.mxu1 %v4898_v63  ;;  %v578_v63 = vld [vmem:[%s7423_s3 + $0x998] sm:$0xff]  ;;  %v5064_v3 = vcombine.high %v565_v59, %v577_v61 }
 0x1ec   :  { %4711 = vst [vmem:[%s7426_s4] sm:$0xff] %v3802_v8  ;;  %4713 = vst [vmem:[%s7426_s4 + $0x10] sm:$0xff] %v3884_v9  ;;  %v3804_v13 = vpop.f32.mrb[5].mxu0  ;;  %v3886_v14 = vpop.f32.mrb[5].mxu1  ;;  %v5066_v4 = vcombine.high %v566_v62, %v578_v63  ;;  %v602_v8 = vld [vmem:[%s7423_s3 + $0xa58] sm:$0xff]  ;;  %v5063_v9 = vcombine.low %v565_v59, %v577_v61 }
 0x1ed   :  { %4712 = vst [vmem:[%s7426_s4 + $0x8] sm:$0xff] %v3804_v13  ;;  %4714 = vst [vmem:[%s7426_s4 + $0x18] sm:$0xff] %v3886_v14  ;;  %v3806_v17 = vpop.f32.mrb[6].mxu0  ;;  %v3888_v18 = vpop.f32.mrb[6].mxu1  ;;  %4230 = vmatpush1.bf16.msra.mxu0 %v4895_v5  ;;  %v589_v5 = vld [vmem:[%s7423_s3 + $0x9f0] sm:$0xff] }
 0x1ee   :  { %4312 = vmatpush1.bf16.msra.mxu1 %v4897_v6  ;;  %v3807_v20 = vpop.f32.mrb[7].mxu0  ;;  %v3889_v21 = vpop.f32.mrb[7].mxu1  ;;  %4231 = vmatprep.subr.bf16.mxu0 %v4920_v7  ;;  %v601_v6 = vld [vmem:[%s7423_s3 + $0xa50] sm:$0xff]  ;;  %v590_v7 = vld [vmem:[%s7423_s3 + $0x9f8] sm:$0xff] }
 0x1ef   :  { %4313 = vmatprep.subr.bf16.mxu1 %v4922_v10  ;;  %v5065_v10 = vcombine.low %v566_v62, %v578_v63  ;;  %v5088_v11 = vcombine.high %v589_v5, %v601_v6  ;;  %v5090_v12 = vcombine.high %v590_v7, %v602_v8  ;;  %v613_v13 = vld [vmem:[%s7423_s3 + $0xab0] sm:$0xff]  ;;  %v5087_v17 = vcombine.low %v589_v5, %v601_v6 }
 0x1f0   :  { %v625_v14 = vld [vmem:[%s7423_s3 + $0xb10] sm:$0xff]  ;;  %v5089_v18 = vcombine.low %v590_v7, %v602_v8  ;;  %v5114_v20 = vcombine.high %v614_v15, %v626_v16 }
 0x1f1   :  { %4232 = vmatpush1.bf16.msra.mxu0 %v4919_v19  ;;  %v5112_v19 = vcombine.high %v613_v13, %v625_v14  ;;  %v637_v21 = vld [vmem:[%s7423_s3 + $0xb70] sm:$0xff]  ;;  %v5111_v25 = vcombine.low %v613_v13, %v625_v14 }
 0x1f2   :  { %4314 = vmatpush1.bf16.msra.mxu1 %v4921_v22  ;;  %4233 = vmatprep.subr.bf16.mxu0 %v4944_v23  ;;  %v649_v22 = vld [vmem:[%s7423_s3 + $0xbd0] sm:$0xff]  ;;  %v638_v23 = vld [vmem:[%s7423_s3 + $0xb78] sm:$0xff] }
 0x1f3   :  { %4315 = vmatprep.subr.bf16.mxu1 %v4946_v24  ;;  %v650_v24 = vld [vmem:[%s7423_s3 + $0xbd8] sm:$0xff]  ;;  %v5136_v27 = vcombine.high %v637_v21, %v649_v22  ;;  %v5135_v33 = vcombine.low %v637_v21, %v649_v22 }
 0x1f4   :  { %v5138_v28 = vcombine.high %v638_v23, %v650_v24  ;;  %v5137_v34 = vcombine.low %v638_v23, %v650_v24 }
 0x1f5   :  { %4234 = vmatpush1.bf16.msra.mxu0 %v4943_v29  ;;  %v661_v29 = vld [vmem:[%s7423_s3 + $0xc30] sm:$0xff] }
 0x1f6   :  { %4316 = vmatpush1.bf16.msra.mxu1 %v4945_v30  ;;  %4235 = vmatprep.subr.bf16.mxu0 %v4968_v31  ;;  %v673_v30 = vld [vmem:[%s7423_s3 + $0xc90] sm:$0xff]  ;;  %v662_v31 = vld [vmem:[%s7423_s3 + $0xc38] sm:$0xff] }
 0x1f7   :  { %4317 = vmatprep.subr.bf16.mxu1 %v4970_v32  ;;  %v674_v32 = vld [vmem:[%s7423_s3 + $0xc98] sm:$0xff]  ;;  %v5160_v35 = vcombine.high %v661_v29, %v673_v30  ;;  %v5159_v37 = vcombine.low %v661_v29, %v673_v30 }
 0x1f8   :  { %v5162_v36 = vcombine.high %v662_v31, %v674_v32  ;;  %v5161_v43 = vcombine.low %v662_v31, %v674_v32 }
 0x1f9   :  { %4236 = vmatpush1.bf16.msra.mxu0 %v4967_v38  ;;  %v685_v38 = vld [vmem:[%s7423_s3 + $0xcf0] sm:$0xff] }
 0x1fa   :  { %4318 = vmatpush1.bf16.msra.mxu1 %v4969_v40  ;;  %4237 = vmatprep.subr.bf16.mxu0 %v4992_v41  ;;  %v697_v40 = vld [vmem:[%s7423_s3 + $0xd50] sm:$0xff]  ;;  %v686_v41 = vld [vmem:[%s7423_s3 + $0xcf8] sm:$0xff] }
 0x1fb   :  { %4319 = vmatprep.subr.bf16.mxu1 %v4994_v42  ;;  %v698_v42 = vld [vmem:[%s7423_s3 + $0xd58] sm:$0xff]  ;;  %v5184_v44 = vcombine.high %v685_v38, %v697_v40  ;;  %v5183_v50 = vcombine.low %v685_v38, %v697_v40 }
 0x1fc   :  { %v5186_v45 = vcombine.high %v686_v41, %v698_v42  ;;  %v5185_v39 = vcombine.low %v686_v41, %v698_v42 }
 0x1fd   :  { %4238 = vmatpush1.bf16.msra.mxu0 %v4991_v46  ;;  %v709_v46 = vld [vmem:[%s7423_s3 + $0xdb0] sm:$0xff] }
 0x1fe   :  { %4320 = vmatpush1.bf16.msra.mxu1 %v4993_v47  ;;  %4239 = vmatprep.subr.bf16.mxu0 %v5016_v48  ;;  %v721_v47 = vld [vmem:[%s7423_s3 + $0xe10] sm:$0xff]  ;;  %v710_v48 = vld [vmem:[%s7423_s3 + $0xdb8] sm:$0xff] }
 0x1ff   :  { %4321 = vmatprep.subr.bf16.mxu1 %v5018_v49  ;;  %v722_v49 = vld [vmem:[%s7423_s3 + $0xe18] sm:$0xff]  ;;  %v5208_v51 = vcombine.high %v709_v46, %v721_v47  ;;  %v5207_v59 = vcombine.low %v709_v46, %v721_v47  ;;  %v316_v46 = vld [vmem:[%s7423_s3 + $0x168] sm:$0xff] }
 0x200   :  { %v5210_v52 = vcombine.high %v710_v48, %v722_v49  ;;  %v5209_v61 = vcombine.low %v710_v48, %v722_v49  ;;  %v327_v49 = vld [vmem:[%s7423_s3 + $0x1c0] sm:$0xff] }
 0x201   :  { %4240 = vmatpush1.bf16.msra.mxu0 %v5015_v55  ;;  %v733_v55 = vld [vmem:[%s7423_s3 + $0xe70] sm:$0xff] }
 0x202   :  { %4322 = vmatpush1.bf16.msra.mxu1 %v5017_v56  ;;  %4241 = vmatprep.subr.bf16.mxu0 %v5040_v57  ;;  %v745_v56 = vld [vmem:[%s7423_s3 + $0xed0] sm:$0xff]  ;;  %v734_v57 = vld [vmem:[%s7423_s3 + $0xe78] sm:$0xff] }
 0x203   :  { %4323 = vmatprep.subr.bf16.mxu1 %v5042_v58  ;;  %v746_v58 = vld [vmem:[%s7423_s3 + $0xed8] sm:$0xff]  ;;  %v5232_v62 = vcombine.high %v733_v55, %v745_v56  ;;  %v5231_v5 = vcombine.low %v733_v55, %v745_v56 }
 0x204   :  { %v5234_v63 = vcombine.high %v734_v57, %v746_v58  ;;  %v5233_v6 = vcombine.low %v734_v57, %v746_v58 }
 0x205   :  { %4242 = vmatpush1.bf16.msra.mxu0 %v5039_v0  ;;  %v757_v0 = vld [vmem:[%s7423_s3 + $0xf30] sm:$0xff] }
 0x206   :  { %4324 = vmatpush1.bf16.msra.mxu1 %v5041_v2  ;;  %4243 = vmatprep.subr.bf16.mxu0 %v5064_v3  ;;  %v769_v2 = vld [vmem:[%s7423_s3 + $0xf90] sm:$0xff]  ;;  %v758_v3 = vld [vmem:[%s7423_s3 + $0xf38] sm:$0xff] }
 0x207   :  { %4325 = vmatprep.subr.bf16.mxu1 %v5066_v4  ;;  %v770_v4 = vld [vmem:[%s7423_s3 + $0xf98] sm:$0xff]  ;;  %v5256_v7 = vcombine.high %v757_v0, %v769_v2  ;;  %v5255_v13 = vcombine.low %v757_v0, %v769_v2 }
 0x208   :  { %v5258_v8 = vcombine.high %v758_v3, %v770_v4  ;;  %v5257_v14 = vcombine.low %v758_v3, %v770_v4 }
 0x209   :  { %4244 = vmatpush1.bf16.msra.mxu0 %v5063_v9  ;;  %v781_v9 = vld [vmem:[%s7423_s3 + $0xff0] sm:$0xff] }
 0x20a   :  { %4326 = vmatpush1.bf16.msra.mxu1 %v5065_v10  ;;  %4245 = vmatprep.subr.bf16.mxu0 %v5088_v11  ;;  %v793_v10 = vld [vmem:[%s7423_s3 + $0x1050] sm:$0xff]  ;;  %v782_v11 = vld [vmem:[%s7423_s3 + $0xff8] sm:$0xff] }
 0x20b   :  { %4327 = vmatprep.subr.bf16.mxu1 %v5090_v12  ;;  %v794_v12 = vld [vmem:[%s7423_s3 + $0x1058] sm:$0xff]  ;;  %v5280_v15 = vcombine.high %v781_v9, %v793_v10  ;;  %v5279_v21 = vcombine.low %v781_v9, %v793_v10 }
 0x20c   :  { %v5282_v16 = vcombine.high %v782_v11, %v794_v12  ;;  %v5281_v22 = vcombine.low %v782_v11, %v794_v12 }
 0x20d   :  { %4246 = vmatpush1.bf16.msra.mxu0 %v5087_v17  ;;  %v805_v17 = vld [vmem:[%s7423_s3 + $0x10b0] sm:$0xff] }
 0x20e   :  { %4328 = vmatpush1.bf16.msra.mxu1 %v5089_v18  ;;  %4247 = vmatprep.subr.bf16.mxu0 %v5112_v19  ;;  %v817_v18 = vld [vmem:[%s7423_s3 + $0x1110] sm:$0xff]  ;;  %v806_v19 = vld [vmem:[%s7423_s3 + $0x10b8] sm:$0xff] }
 0x20f   :  { %4329 = vmatprep.subr.bf16.mxu1 %v5114_v20  ;;  %v818_v20 = vld [vmem:[%s7423_s3 + $0x1118] sm:$0xff]  ;;  %v5304_v23 = vcombine.high %v805_v17, %v817_v18  ;;  %v5303_v29 = vcombine.low %v805_v17, %v817_v18 }
 0x210   :  { %v5306_v24 = vcombine.high %v806_v19, %v818_v20  ;;  %v5305_v30 = vcombine.low %v806_v19, %v818_v20 }
 0x211   :  { %4248 = vmatpush1.bf16.msra.mxu0 %v5111_v25  ;;  %v829_v25 = vld [vmem:[%s7423_s3 + $0x1170] sm:$0xff] }
 0x212   :  { %4330 = vmatpush1.bf16.msra.mxu1 %v5113_v26  ;;  %4249 = vmatprep.subr.bf16.mxu0 %v5136_v27  ;;  %v841_v26 = vld [vmem:[%s7423_s3 + $0x11d0] sm:$0xff]  ;;  %v830_v27 = vld [vmem:[%s7423_s3 + $0x1178] sm:$0xff] }
 0x213   :  { %4331 = vmatprep.subr.bf16.mxu1 %v5138_v28  ;;  %v842_v28 = vld [vmem:[%s7423_s3 + $0x11d8] sm:$0xff]  ;;  %v5328_v31 = vcombine.high %v829_v25, %v841_v26  ;;  %v5327_v38 = vcombine.low %v829_v25, %v841_v26 }
 0x214   :  { %v5330_v32 = vcombine.high %v830_v27, %v842_v28  ;;  %v5329_v40 = vcombine.low %v830_v27, %v842_v28 }
 0x215   :  { %4250 = vmatpush1.bf16.msra.mxu0 %v5135_v33  ;;  %v279_v33 = vld [vmem:[%s7423_s3 + $0x40] sm:$0xff] }
 0x216   :  { %4332 = vmatpush1.bf16.msra.mxu1 %v5137_v34  ;;  %4260 = vmatprep.subr.bf16.mxu0 %v5160_v35  ;;  %v291_v34 = vld [vmem:[%s7423_s3 + $0xa0] sm:$0xff]  ;;  %v280_v35 = vld [vmem:[%s7423_s3 + $0x48] sm:$0xff] }
 0x217   :  { %4342 = vmatprep.subr.bf16.mxu1 %v5162_v36  ;;  %v292_v36 = vld [vmem:[%s7423_s3 + $0xa8] sm:$0xff]  ;;  %v4780_v41 = vcombine.high %v279_v33, %v291_v34 }
 0x218   :  { %4252 = vmatmul.mubr.bf16.vlgmr.msra.gmra.mrb[16].mxu0 %v5781_v54  ;;  %v4782_v42 = vcombine.high %v280_v35, %v292_v36  ;;  %v4781_v47 = vcombine.low %v280_v35, %v292_v36  ;;  %v460_v35 = vld [vmem:[%s7423_s3 + $0x5e8] sm:$0xff] }
 0x219   :  { %4334 = vmatmul.mubr.bf16.vlgmr.msra.gmra.mrb[16].mxu1 %v5781_v54  ;;  %4261 = vmatpush1.bf16.msra.mxu0 %v5159_v37  ;;  %v303_v37 = vld [vmem:[%s7423_s3 + $0x100] sm:$0xff] }
 0x21a   :  { %4343 = vmatpush1.bf16.msra.mxu1 %v5161_v43  ;;  %4262 = vmatprep.subr.bf16.mxu0 %v5184_v44  ;;  %v315_v43 = vld [vmem:[%s7423_s3 + $0x160] sm:$0xff]  ;;  %v4779_v44 = vcombine.low %v279_v33, %v291_v34  ;;  %v448_v34 = vld [vmem:[%s7423_s3 + $0x588] sm:$0xff] }
 0x21b   :  { %4344 = vmatprep.subr.bf16.mxu1 %v5186_v45  ;;  %4292 = vmatprep.mubr.bf16.mxu0 %v5444_v1  ;;  %v304_v45 = vld [vmem:[%s7423_s3 + $0x108] sm:$0xff]  ;;  %v4804_v48 = vcombine.high %v303_v37, %v315_v43  ;;  %v4803_v55 = vcombine.low %v303_v37, %v315_v43 }
 0x21c   :  { %4374 = vmatprep.mubr.bf16.mxu1 %v5444_v1  ;;  %v4805_v56 = vcombine.low %v304_v45, %v316_v46 }
 0x21d   :  { %4263 = vmatpush1.bf16.msra.mxu0 %v5183_v50  ;;  %v339_v50 = vld [vmem:[%s7423_s3 + $0x220] sm:$0xff] }
 0x21e   :  { %4345 = vmatpush1.bf16.msra.mxu1 %v5185_v39  ;;  %4264 = vmatprep.subr.bf16.mxu0 %v5208_v51  ;;  %v4806_v39 = vcombine.high %v304_v45, %v316_v46  ;;  %v328_v51 = vld [vmem:[%s7423_s3 + $0x1c8] sm:$0xff]  ;;  %v4828_v57 = vcombine.high %v327_v49, %v339_v50  ;;  %v4827_v0 = vcombine.low %v327_v49, %v339_v50  ;;  %v471_v46 = vld [vmem:[%s7423_s3 + $0x640] sm:$0xff] }
 0x21f   :  { %4346 = vmatprep.subr.bf16.mxu1 %v5210_v52  ;;  %v340_v52 = vld [vmem:[%s7423_s3 + $0x228] sm:$0xff]  ;;  %v4950_v45 = vcombine.high %v448_v34, %v460_v35 }
 0x220   :  { %v4830_v58 = vcombine.high %v328_v51, %v340_v52  ;;  %v4829_v2 = vcombine.low %v328_v51, %v340_v52  ;;  %v484_v49 = vld [vmem:[%s7423_s3 + $0x6a8] sm:$0xff] }
 0x221   :  { %4265 = vmatpush1.bf16.msra.mxu0 %v5207_v59  ;;  %v351_v59 = vld [vmem:[%s7423_s3 + $0x280] sm:$0xff] }
 0x222   :  { %4347 = vmatpush1.bf16.msra.mxu1 %v5209_v61  ;;  %4266 = vmatprep.subr.bf16.mxu0 %v5232_v62  ;;  %v363_v61 = vld [vmem:[%s7423_s3 + $0x2e0] sm:$0xff]  ;;  %v352_v62 = vld [vmem:[%s7423_s3 + $0x288] sm:$0xff] }
 0x223   :  { %4348 = vmatprep.subr.bf16.mxu1 %v5234_v63  ;;  %v364_v63 = vld [vmem:[%s7423_s3 + $0x2e8] sm:$0xff]  ;;  %v4852_v3 = vcombine.high %v351_v59, %v363_v61  ;;  %v4851_v9 = vcombine.low %v351_v59, %v363_v61 }
 0x224   :  { %v4854_v4 = vcombine.high %v352_v62, %v364_v63  ;;  %v4853_v10 = vcombine.low %v352_v62, %v364_v63 }
 0x225   :  { %4267 = vmatpush1.bf16.msra.mxu0 %v5231_v5  ;;  %v375_v5 = vld [vmem:[%s7423_s3 + $0x340] sm:$0xff] }
 0x226   :  { %4349 = vmatpush1.bf16.msra.mxu1 %v5233_v6  ;;  %4268 = vmatprep.subr.bf16.mxu0 %v5256_v7  ;;  %v387_v6 = vld [vmem:[%s7423_s3 + $0x3a0] sm:$0xff]  ;;  %v376_v7 = vld [vmem:[%s7423_s3 + $0x348] sm:$0xff] }
 0x227   :  { %4350 = vmatprep.subr.bf16.mxu1 %v5258_v8  ;;  %v388_v8 = vld [vmem:[%s7423_s3 + $0x3a8] sm:$0xff]  ;;  %v4876_v11 = vcombine.high %v375_v5, %v387_v6  ;;  %v4875_v17 = vcombine.low %v375_v5, %v387_v6 }
 0x228   :  { %v4878_v12 = vcombine.high %v376_v7, %v388_v8  ;;  %v4877_v18 = vcombine.low %v376_v7, %v388_v8 }
 0x229   :  { %4269 = vmatpush1.bf16.msra.mxu0 %v5255_v13  ;;  %v399_v13 = vld [vmem:[%s7423_s3 + $0x400] sm:$0xff] }
 0x22a   :  { %4351 = vmatpush1.bf16.msra.mxu1 %v5257_v14  ;;  %4270 = vmatprep.subr.bf16.mxu0 %v5280_v15  ;;  %v411_v14 = vld [vmem:[%s7423_s3 + $0x460] sm:$0xff]  ;;  %v400_v15 = vld [vmem:[%s7423_s3 + $0x408] sm:$0xff] }
 0x22b   :  { %4352 = vmatprep.subr.bf16.mxu1 %v5282_v16  ;;  %v412_v16 = vld [vmem:[%s7423_s3 + $0x468] sm:$0xff]  ;;  %v4900_v19 = vcombine.high %v399_v13, %v411_v14  ;;  %v4899_v25 = vcombine.low %v399_v13, %v411_v14 }
 0x22c   :  { %v4902_v20 = vcombine.high %v400_v15, %v412_v16  ;;  %v4901_v26 = vcombine.low %v400_v15, %v412_v16 }
 0x22d   :  { %4271 = vmatpush1.bf16.msra.mxu0 %v5279_v21  ;;  %v423_v21 = vld [vmem:[%s7423_s3 + $0x4c0] sm:$0xff] }
 0x22e   :  { %4353 = vmatpush1.bf16.msra.mxu1 %v5281_v22  ;;  %4272 = vmatprep.subr.bf16.mxu0 %v5304_v23  ;;  %v435_v22 = vld [vmem:[%s7423_s3 + $0x520] sm:$0xff]  ;;  %v424_v23 = vld [vmem:[%s7423_s3 + $0x4c8] sm:$0xff] }
 0x22f   :  { %4354 = vmatprep.subr.bf16.mxu1 %v5306_v24  ;;  %v436_v24 = vld [vmem:[%s7423_s3 + $0x528] sm:$0xff]  ;;  %v4924_v27 = vcombine.high %v423_v21, %v435_v22 }
 0x230   :  { %v4925_v37 = vcombine.low %v424_v23, %v436_v24 }
 0x231   :  { %4273 = vmatpush1.bf16.msra.mxu0 %v5303_v29  ;;  %v4926_v29 = vcombine.high %v424_v23, %v436_v24 }
 0x232   :  { %4355 = vmatpush1.bf16.msra.mxu1 %v5305_v30  ;;  %4274 = vmatprep.subr.bf16.mxu0 %v5328_v31  ;;  %v447_v30 = vld [vmem:[%s7423_s3 + $0x580] sm:$0xff] }
 0x233   :  { %4356 = vmatprep.subr.bf16.mxu1 %v5330_v32  ;;  %v459_v31 = vld [vmem:[%s7423_s3 + $0x5e0] sm:$0xff] }
 0x234   :  { %v4948_v43 = vcombine.high %v447_v30, %v459_v31  ;;  %v4947_v50 = vcombine.low %v447_v30, %v459_v31 }
 0x235   :  { %4275 = vmatpush1.bf16.msra.mxu0 %v5327_v38 }
 0x236   :  { %4357 = vmatpush1.bf16.msra.mxu1 %v5329_v40  ;;  %4383 = vmatprep.subr.bf16.mxu0 %v4780_v41  ;;  %v4923_v40 = vcombine.low %v423_v21, %v435_v22 }
 0x237   :  { %4465 = vmatprep.subr.bf16.mxu1 %v4782_v42 }
 0x238   :  { %4293 = vmatmul.mubr.bf16.vlgmr.msra.gmra.mrb[16].mxu0 %v5881_v60 }
 0x239   :  { %4375 = vmatmul.mubr.bf16.vlgmr.msra.gmra.mrb[16].mxu1 %v5881_v60  ;;  %4384 = vmatpush1.bf16.msra.mxu0 %v4779_v44 }
 0x23a   :  { %4415 = vmatprep.mubr.bf16.mxu0 %v5779_v53  ;;  %4466 = vmatpush1.bf16.msra.mxu1 %v4781_v47  ;;  %v483_v47 = vld [vmem:[%s7423_s3 + $0x6a0] sm:$0xff] }
 0x23b   :  { %4497 = vmatprep.mubr.bf16.mxu1 %v5779_v53  ;;  %4385 = vmatprep.subr.bf16.mxu0 %v4804_v48  ;;  %v472_v48 = vld [vmem:[%s7423_s3 + $0x648] sm:$0xff]  ;;  %v4972_v51 = vcombine.high %v471_v46, %v483_v47  ;;  %v4971_v59 = vcombine.low %v471_v46, %v483_v47 }
 0x23c   :  { %4467 = vmatprep.subr.bf16.mxu1 %v4806_v39  ;;  %v4949_v39 = vcombine.low %v448_v34, %v460_v35  ;;  %v4974_v52 = vcombine.high %v472_v48, %v484_v49  ;;  %v4973_v61 = vcombine.low %v472_v48, %v484_v49  ;;  %v627_v34 = vld [vmem:[%s7423_s3 + $0xb20] sm:$0xff]  ;;  %v616_v35 = vld [vmem:[%s7423_s3 + $0xac8] sm:$0xff] }
 0x23d   :  { %4386 = vmatpush1.bf16.msra.mxu0 %v4803_v55  ;;  %v495_v55 = vld [vmem:[%s7423_s3 + $0x700] sm:$0xff] }
 0x23e   :  { %4468 = vmatpush1.bf16.msra.mxu1 %v4805_v56  ;;  %4387 = vmatprep.subr.bf16.mxu0 %v4828_v57  ;;  %v507_v56 = vld [vmem:[%s7423_s3 + $0x760] sm:$0xff]  ;;  %v496_v57 = vld [vmem:[%s7423_s3 + $0x708] sm:$0xff] }
 0x23f   :  { %4469 = vmatprep.subr.bf16.mxu1 %v4830_v58  ;;  %v508_v58 = vld [vmem:[%s7423_s3 + $0x768] sm:$0xff]  ;;  %v4996_v62 = vcombine.high %v495_v55, %v507_v56  ;;  %v4995_v5 = vcombine.low %v495_v55, %v507_v56 }
 0x240   :  { %v4998_v63 = vcombine.high %v496_v57, %v508_v58  ;;  %v4997_v6 = vcombine.low %v496_v57, %v508_v58 }
 0x241   :  { %4388 = vmatpush1.bf16.msra.mxu0 %v4827_v0  ;;  %v519_v0 = vld [vmem:[%s7423_s3 + $0x7c0] sm:$0xff] }
 0x242   :  { %4470 = vmatpush1.bf16.msra.mxu1 %v4829_v2  ;;  %4389 = vmatprep.subr.bf16.mxu0 %v4852_v3  ;;  %v531_v2 = vld [vmem:[%s7423_s3 + $0x820] sm:$0xff]  ;;  %v520_v3 = vld [vmem:[%s7423_s3 + $0x7c8] sm:$0xff] }
 0x243   :  { %4471 = vmatprep.subr.bf16.mxu1 %v4854_v4  ;;  %v532_v4 = vld [vmem:[%s7423_s3 + $0x828] sm:$0xff]  ;;  %v5020_v7 = vcombine.high %v519_v0, %v531_v2  ;;  %v5019_v13 = vcombine.low %v519_v0, %v531_v2 }
 0x244   :  { %v5022_v8 = vcombine.high %v520_v3, %v532_v4  ;;  %v5021_v14 = vcombine.low %v520_v3, %v532_v4 }
 0x245   :  { %4390 = vmatpush1.bf16.msra.mxu0 %v4851_v9  ;;  %v543_v9 = vld [vmem:[%s7423_s3 + $0x880] sm:$0xff] }
 0x246   :  { %4472 = vmatpush1.bf16.msra.mxu1 %v4853_v10  ;;  %4391 = vmatprep.subr.bf16.mxu0 %v4876_v11  ;;  %v555_v10 = vld [vmem:[%s7423_s3 + $0x8e0] sm:$0xff]  ;;  %v544_v11 = vld [vmem:[%s7423_s3 + $0x888] sm:$0xff] }
 0x247   :  { %4473 = vmatprep.subr.bf16.mxu1 %v4878_v12  ;;  %v556_v12 = vld [vmem:[%s7423_s3 + $0x8e8] sm:$0xff]  ;;  %v5044_v15 = vcombine.high %v543_v9, %v555_v10  ;;  %v5043_v21 = vcombine.low %v543_v9, %v555_v10 }
 0x248   :  { %v5046_v16 = vcombine.high %v544_v11, %v556_v12  ;;  %v5045_v22 = vcombine.low %v544_v11, %v556_v12 }
 0x249   :  { %4392 = vmatpush1.bf16.msra.mxu0 %v4875_v17  ;;  %v567_v17 = vld [vmem:[%s7423_s3 + $0x940] sm:$0xff] }
 0x24a   :  { %4474 = vmatpush1.bf16.msra.mxu1 %v4877_v18  ;;  %4393 = vmatprep.subr.bf16.mxu0 %v4900_v19  ;;  %v579_v18 = vld [vmem:[%s7423_s3 + $0x9a0] sm:$0xff]  ;;  %v568_v19 = vld [vmem:[%s7423_s3 + $0x948] sm:$0xff] }
 0x24b   :  { %v3966_v28 = vpop.f32.mrb[8].mxu0  ;;  %4475 = vmatprep.subr.bf16.mxu1 %v4902_v20  ;;  %v580_v20 = vld [vmem:[%s7423_s3 + $0x9a8] sm:$0xff]  ;;  %v5068_v23 = vcombine.high %v567_v17, %v579_v18 }
 0x24c   :  { %4715 = vst [vmem:[%s7426_s4 + $0x20] sm:$0xff] %v3966_v28  ;;  %v4048_v32 = vpop.f32.mrb[8].mxu1  ;;  %v3968_v33 = vpop.f32.mrb[9].mxu0  ;;  %v5070_v24 = vcombine.high %v568_v19, %v580_v20  ;;  %v604_v28 = vld [vmem:[%s7423_s3 + $0xa68] sm:$0xff]  ;;  %v5069_v30 = vcombine.low %v568_v19, %v580_v20 }
 0x24d   :  { %4717 = vst [vmem:[%s7426_s4 + $0x30] sm:$0xff] %v4048_v32  ;;  %4716 = vst [vmem:[%s7426_s4 + $0x28] sm:$0xff] %v3968_v33  ;;  %v4050_v36 = vpop.f32.mrb[9].mxu1  ;;  %v3970_v38 = vpop.f32.mrb[10].mxu0  ;;  %4394 = vmatpush1.bf16.msra.mxu0 %v4899_v25  ;;  %v591_v25 = vld [vmem:[%s7423_s3 + $0xa00] sm:$0xff] }
 0x24e   :  { %4718 = vst [vmem:[%s7426_s4 + $0x38] sm:$0xff] %v4050_v36  ;;  %v4052_v41 = vpop.f32.mrb[10].mxu1  ;;  %4476 = vmatpush1.bf16.msra.mxu1 %v4901_v26  ;;  %v3971_v42 = vpop.f32.mrb[11].mxu0  ;;  %4395 = vmatprep.subr.bf16.mxu0 %v4924_v27  ;;  %v603_v26 = vld [vmem:[%s7423_s3 + $0xa60] sm:$0xff]  ;;  %v592_v27 = vld [vmem:[%s7423_s3 + $0xa08] sm:$0xff] }
 0x24f   :  { %v4053_v44 = vpop.f32.mrb[11].mxu1  ;;  %4477 = vmatprep.subr.bf16.mxu1 %v4926_v29  ;;  %v5067_v29 = vcombine.low %v567_v17, %v579_v18  ;;  %v5092_v31 = vcombine.high %v591_v25, %v603_v26  ;;  %v5094_v32 = vcombine.high %v592_v27, %v604_v28  ;;  %v615_v33 = vld [vmem:[%s7423_s3 + $0xac0] sm:$0xff]  ;;  %v628_v36 = vld [vmem:[%s7423_s3 + $0xb28] sm:$0xff]  ;;  %v5091_v38 = vcombine.low %v591_v25, %v603_v26 }
 0x250   :  { %v5116_v41 = vcombine.high %v615_v33, %v627_v34  ;;  %v5118_v42 = vcombine.high %v616_v35, %v628_v36  ;;  %v640_v44 = vld [vmem:[%s7423_s3 + $0xb88] sm:$0xff]  ;;  %v5115_v46 = vcombine.low %v615_v33, %v627_v34  ;;  %v5117_v47 = vcombine.low %v616_v35, %v628_v36 }
 0x251   :  { %4396 = vmatpush1.bf16.msra.mxu0 %v4923_v40  ;;  %v5093_v40 = vcombine.low %v592_v27, %v604_v28 }
 0x252   :  { %4478 = vmatpush1.bf16.msra.mxu1 %v4925_v37  ;;  %4397 = vmatprep.subr.bf16.mxu0 %v4948_v43  ;;  %v639_v37 = vld [vmem:[%s7423_s3 + $0xb80] sm:$0xff] }
 0x253   :  { %4479 = vmatprep.subr.bf16.mxu1 %v4950_v45  ;;  %v651_v43 = vld [vmem:[%s7423_s3 + $0xbe0] sm:$0xff]  ;;  %v652_v45 = vld [vmem:[%s7423_s3 + $0xbe8] sm:$0xff] }
 0x254   :  { %v5140_v48 = vcombine.high %v639_v37, %v651_v43  ;;  %v5142_v49 = vcombine.high %v640_v44, %v652_v45  ;;  %v5139_v55 = vcombine.low %v639_v37, %v651_v43  ;;  %v5141_v56 = vcombine.low %v640_v44, %v652_v45 }
 0x255   :  { %4398 = vmatpush1.bf16.msra.mxu0 %v4947_v50  ;;  %v663_v50 = vld [vmem:[%s7423_s3 + $0xc40] sm:$0xff] }
 0x256   :  { %4480 = vmatpush1.bf16.msra.mxu1 %v4949_v39  ;;  %4399 = vmatprep.subr.bf16.mxu0 %v4972_v51  ;;  %v675_v39 = vld [vmem:[%s7423_s3 + $0xca0] sm:$0xff]  ;;  %v664_v51 = vld [vmem:[%s7423_s3 + $0xc48] sm:$0xff] }
 0x257   :  { %4481 = vmatprep.subr.bf16.mxu1 %v4974_v52  ;;  %v676_v52 = vld [vmem:[%s7423_s3 + $0xca8] sm:$0xff]  ;;  %v5164_v57 = vcombine.high %v663_v50, %v675_v39  ;;  %v5163_v0 = vcombine.low %v663_v50, %v675_v39 }
 0x258   :  { %v5166_v58 = vcombine.high %v664_v51, %v676_v52  ;;  %v5165_v2 = vcombine.low %v664_v51, %v676_v52 }
 0x259   :  { %4400 = vmatpush1.bf16.msra.mxu0 %v4971_v59  ;;  %v687_v59 = vld [vmem:[%s7423_s3 + $0xd00] sm:$0xff] }
 0x25a   :  { %4482 = vmatpush1.bf16.msra.mxu1 %v4973_v61  ;;  %4401 = vmatprep.subr.bf16.mxu0 %v4996_v62  ;;  %v699_v61 = vld [vmem:[%s7423_s3 + $0xd60] sm:$0xff]  ;;  %v688_v62 = vld [vmem:[%s7423_s3 + $0xd08] sm:$0xff] }
 0x25b   :  { %4483 = vmatprep.subr.bf16.mxu1 %v4998_v63  ;;  %v700_v63 = vld [vmem:[%s7423_s3 + $0xd68] sm:$0xff]  ;;  %v5188_v3 = vcombine.high %v687_v59, %v699_v61  ;;  %v5187_v9 = vcombine.low %v687_v59, %v699_v61 }
 0x25c   :  { %v5190_v4 = vcombine.high %v688_v62, %v700_v63  ;;  %v5189_v10 = vcombine.low %v688_v62, %v700_v63 }
 0x25d   :  { %4402 = vmatpush1.bf16.msra.mxu0 %v4995_v5  ;;  %v711_v5 = vld [vmem:[%s7423_s3 + $0xdc0] sm:$0xff] }
 0x25e   :  { %4484 = vmatpush1.bf16.msra.mxu1 %v4997_v6  ;;  %4403 = vmatprep.subr.bf16.mxu0 %v5020_v7  ;;  %v723_v6 = vld [vmem:[%s7423_s3 + $0xe20] sm:$0xff]  ;;  %v712_v7 = vld [vmem:[%s7423_s3 + $0xdc8] sm:$0xff] }
 0x25f   :  { %4485 = vmatprep.subr.bf16.mxu1 %v5022_v8  ;;  %v724_v8 = vld [vmem:[%s7423_s3 + $0xe28] sm:$0xff]  ;;  %v5212_v11 = vcombine.high %v711_v5, %v723_v6  ;;  %v5211_v17 = vcombine.low %v711_v5, %v723_v6  ;;  %v318_v5 = vld [vmem:[%s7423_s3 + $0x178] sm:$0xff] }
 0x260   :  { %v5214_v12 = vcombine.high %v712_v7, %v724_v8  ;;  %v5213_v18 = vcombine.low %v712_v7, %v724_v8  ;;  %v329_v8 = vld [vmem:[%s7423_s3 + $0x1d0] sm:$0xff] }
 0x261   :  { %4404 = vmatpush1.bf16.msra.mxu0 %v5019_v13  ;;  %v735_v13 = vld [vmem:[%s7423_s3 + $0xe80] sm:$0xff] }
 0x262   :  { %4486 = vmatpush1.bf16.msra.mxu1 %v5021_v14  ;;  %4405 = vmatprep.subr.bf16.mxu0 %v5044_v15  ;;  %v747_v14 = vld [vmem:[%s7423_s3 + $0xee0] sm:$0xff]  ;;  %v736_v15 = vld [vmem:[%s7423_s3 + $0xe88] sm:$0xff] }
 0x263   :  { %4487 = vmatprep.subr.bf16.mxu1 %v5046_v16  ;;  %v748_v16 = vld [vmem:[%s7423_s3 + $0xee8] sm:$0xff]  ;;  %v5236_v19 = vcombine.high %v735_v13, %v747_v14  ;;  %v5235_v25 = vcombine.low %v735_v13, %v747_v14 }
 0x264   :  { %v5238_v20 = vcombine.high %v736_v15, %v748_v16  ;;  %v5237_v26 = vcombine.low %v736_v15, %v748_v16 }
 0x265   :  { %4406 = vmatpush1.bf16.msra.mxu0 %v5043_v21  ;;  %v759_v21 = vld [vmem:[%s7423_s3 + $0xf40] sm:$0xff] }
 0x266   :  { %4488 = vmatpush1.bf16.msra.mxu1 %v5045_v22  ;;  %4407 = vmatprep.subr.bf16.mxu0 %v5068_v23  ;;  %v771_v22 = vld [vmem:[%s7423_s3 + $0xfa0] sm:$0xff]  ;;  %v760_v23 = vld [vmem:[%s7423_s3 + $0xf48] sm:$0xff] }
 0x267   :  { %4489 = vmatprep.subr.bf16.mxu1 %v5070_v24  ;;  %v772_v24 = vld [vmem:[%s7423_s3 + $0xfa8] sm:$0xff]  ;;  %v5260_v27 = vcombine.high %v759_v21, %v771_v22  ;;  %v5259_v33 = vcombine.low %v759_v21, %v771_v22 }
 0x268   :  { %v5262_v28 = vcombine.high %v760_v23, %v772_v24  ;;  %v5261_v34 = vcombine.low %v760_v23, %v772_v24  ;;  %v377_v24 = vld [vmem:[%s7423_s3 + $0x350] sm:$0xff] }
 0x269   :  { %4408 = vmatpush1.bf16.msra.mxu0 %v5067_v29  ;;  %v783_v29 = vld [vmem:[%s7423_s3 + $0x1000] sm:$0xff] }
 0x26a   :  { %4490 = vmatpush1.bf16.msra.mxu1 %v5069_v30  ;;  %4409 = vmatprep.subr.bf16.mxu0 %v5092_v31  ;;  %v795_v30 = vld [vmem:[%s7423_s3 + $0x1060] sm:$0xff]  ;;  %v784_v31 = vld [vmem:[%s7423_s3 + $0x1008] sm:$0xff] }
 0x26b   :  { %4491 = vmatprep.subr.bf16.mxu1 %v5094_v32  ;;  %v796_v32 = vld [vmem:[%s7423_s3 + $0x1068] sm:$0xff]  ;;  %v5284_v35 = vcombine.high %v783_v29, %v795_v30  ;;  %v5283_v37 = vcombine.low %v783_v29, %v795_v30 }
 0x26c   :  { %v5286_v36 = vcombine.high %v784_v31, %v796_v32  ;;  %v5285_v43 = vcombine.low %v784_v31, %v796_v32  ;;  %v401_v32 = vld [vmem:[%s7423_s3 + $0x410] sm:$0xff] }
 0x26d   :  { %4410 = vmatpush1.bf16.msra.mxu0 %v5091_v38  ;;  %v807_v38 = vld [vmem:[%s7423_s3 + $0x10c0] sm:$0xff] }
 0x26e   :  { %4492 = vmatpush1.bf16.msra.mxu1 %v5093_v40  ;;  %4411 = vmatprep.subr.bf16.mxu0 %v5116_v41  ;;  %v819_v40 = vld [vmem:[%s7423_s3 + $0x1120] sm:$0xff]  ;;  %v808_v41 = vld [vmem:[%s7423_s3 + $0x10c8] sm:$0xff] }
 0x26f   :  { %4493 = vmatprep.subr.bf16.mxu1 %v5118_v42  ;;  %v820_v42 = vld [vmem:[%s7423_s3 + $0x1128] sm:$0xff]  ;;  %v5308_v44 = vcombine.high %v807_v38, %v819_v40  ;;  %v5307_v50 = vcombine.low %v807_v38, %v819_v40 }
 0x270   :  { %v5310_v45 = vcombine.high %v808_v41, %v820_v42  ;;  %v5309_v39 = vcombine.low %v808_v41, %v820_v42  ;;  %v425_v42 = vld [vmem:[%s7423_s3 + $0x4d0] sm:$0xff] }
 0x271   :  { %4412 = vmatpush1.bf16.msra.mxu0 %v5115_v46  ;;  %v831_v46 = vld [vmem:[%s7423_s3 + $0x1180] sm:$0xff] }
 0x272   :  { %4494 = vmatpush1.bf16.msra.mxu1 %v5117_v47  ;;  %4413 = vmatprep.subr.bf16.mxu0 %v5140_v48  ;;  %v843_v47 = vld [vmem:[%s7423_s3 + $0x11e0] sm:$0xff]  ;;  %v832_v48 = vld [vmem:[%s7423_s3 + $0x1188] sm:$0xff] }
 0x273   :  { %4495 = vmatprep.subr.bf16.mxu1 %v5142_v49  ;;  %v844_v49 = vld [vmem:[%s7423_s3 + $0x11e8] sm:$0xff]  ;;  %v5332_v51 = vcombine.high %v831_v46, %v843_v47  ;;  %v5331_v59 = vcombine.low %v831_v46, %v843_v47 }
 0x274   :  { %v5334_v52 = vcombine.high %v832_v48, %v844_v49  ;;  %v5333_v61 = vcombine.low %v832_v48, %v844_v49 }
 0x275   :  { %4414 = vmatpush1.bf16.msra.mxu0 %v5139_v55  ;;  %v281_v55 = vld [vmem:[%s7423_s3 + $0x50] sm:$0xff] }
 0x276   :  { %4496 = vmatpush1.bf16.msra.mxu1 %v5141_v56  ;;  %4424 = vmatprep.subr.bf16.mxu0 %v5164_v57  ;;  %v293_v56 = vld [vmem:[%s7423_s3 + $0xb0] sm:$0xff]  ;;  %v282_v57 = vld [vmem:[%s7423_s3 + $0x58] sm:$0xff] }
 0x277   :  { %4506 = vmatprep.subr.bf16.mxu1 %v5166_v58  ;;  %v294_v58 = vld [vmem:[%s7423_s3 + $0xb8] sm:$0xff]  ;;  %v4784_v62 = vcombine.high %v281_v55, %v293_v56 }
 0x278   :  { %4416 = vmatmul.mubr.bf16.vlgmr.msra.gmra.mrb[20].mxu0 %v5781_v54  ;;  %v4786_v63 = vcombine.high %v282_v57, %v294_v58  ;;  %v4785_v6 = vcombine.low %v282_v57, %v294_v58 }
 0x279   :  { %4498 = vmatmul.mubr.bf16.vlgmr.msra.gmra.mrb[20].mxu1 %v5781_v54  ;;  %4425 = vmatpush1.bf16.msra.mxu0 %v5163_v0  ;;  %v305_v0 = vld [vmem:[%s7423_s3 + $0x110] sm:$0xff] }
 0x27a   :  { %4507 = vmatpush1.bf16.msra.mxu1 %v5165_v2  ;;  %4426 = vmatprep.subr.bf16.mxu0 %v5188_v3  ;;  %v317_v2 = vld [vmem:[%s7423_s3 + $0x170] sm:$0xff]  ;;  %v4783_v3 = vcombine.low %v281_v55, %v293_v56  ;;  %v450_v55 = vld [vmem:[%s7423_s3 + $0x598] sm:$0xff] }
 0x27b   :  { %4508 = vmatprep.subr.bf16.mxu1 %v5190_v4  ;;  %4456 = vmatprep.mubr.bf16.mxu0 %v5444_v1  ;;  %v306_v4 = vld [vmem:[%s7423_s3 + $0x118] sm:$0xff]  ;;  %v4808_v7 = vcombine.high %v305_v0, %v317_v2  ;;  %v4807_v13 = vcombine.low %v305_v0, %v317_v2 }
 0x27c   :  { %4538 = vmatprep.mubr.bf16.mxu1 %v5444_v1  ;;  %v4809_v14 = vcombine.low %v306_v4, %v318_v5  ;;  %v462_v56 = vld [vmem:[%s7423_s3 + $0x5f8] sm:$0xff] }
 0x27d   :  { %4427 = vmatpush1.bf16.msra.mxu0 %v5187_v9  ;;  %v341_v9 = vld [vmem:[%s7423_s3 + $0x230] sm:$0xff] }
 0x27e   :  { %4509 = vmatpush1.bf16.msra.mxu1 %v5189_v10  ;;  %4428 = vmatprep.subr.bf16.mxu0 %v5212_v11  ;;  %v4810_v10 = vcombine.high %v306_v4, %v318_v5  ;;  %v330_v11 = vld [vmem:[%s7423_s3 + $0x1d8] sm:$0xff]  ;;  %v4832_v15 = vcombine.high %v329_v8, %v341_v9  ;;  %v473_v4 = vld [vmem:[%s7423_s3 + $0x650] sm:$0xff] }
 0x27f   :  { %4510 = vmatprep.subr.bf16.mxu1 %v5214_v12  ;;  %v342_v12 = vld [vmem:[%s7423_s3 + $0x238] sm:$0xff]  ;;  %v485_v5 = vld [vmem:[%s7423_s3 + $0x6b0] sm:$0xff] }
 0x280   :  { %v4834_v16 = vcombine.high %v330_v11, %v342_v12  ;;  %v4833_v21 = vcombine.low %v330_v11, %v342_v12  ;;  %v497_v12 = vld [vmem:[%s7423_s3 + $0x710] sm:$0xff] }
 0x281   :  { %4429 = vmatpush1.bf16.msra.mxu0 %v5211_v17  ;;  %v353_v17 = vld [vmem:[%s7423_s3 + $0x290] sm:$0xff] }
 0x282   :  { %4511 = vmatpush1.bf16.msra.mxu1 %v5213_v18  ;;  %4430 = vmatprep.subr.bf16.mxu0 %v5236_v19  ;;  %v365_v18 = vld [vmem:[%s7423_s3 + $0x2f0] sm:$0xff]  ;;  %v354_v19 = vld [vmem:[%s7423_s3 + $0x298] sm:$0xff] }
 0x283   :  { %4512 = vmatprep.subr.bf16.mxu1 %v5238_v20  ;;  %v366_v20 = vld [vmem:[%s7423_s3 + $0x2f8] sm:$0xff]  ;;  %v4856_v22 = vcombine.high %v353_v17, %v365_v18 }
 0x284   :  { %v4858_v23 = vcombine.high %v354_v19, %v366_v20  ;;  %v4857_v29 = vcombine.low %v354_v19, %v366_v20  ;;  %v521_v20 = vld [vmem:[%s7423_s3 + $0x7d0] sm:$0xff] }
 0x285   :  { %4431 = vmatpush1.bf16.msra.mxu0 %v5235_v25  ;;  %v389_v25 = vld [vmem:[%s7423_s3 + $0x3b0] sm:$0xff] }
 0x286   :  { %4513 = vmatpush1.bf16.msra.mxu1 %v5237_v26  ;;  %4432 = vmatprep.subr.bf16.mxu0 %v5260_v27  ;;  %v378_v26 = vld [vmem:[%s7423_s3 + $0x358] sm:$0xff]  ;;  %v4880_v30 = vcombine.high %v377_v24, %v389_v25 }
 0x287   :  { %4514 = vmatprep.subr.bf16.mxu1 %v5262_v28  ;;  %v390_v27 = vld [vmem:[%s7423_s3 + $0x3b8] sm:$0xff]  ;;  %v4855_v28 = vcombine.low %v353_v17, %v365_v18 }
 0x288   :  { %v4882_v31 = vcombine.high %v378_v26, %v390_v27  ;;  %v4881_v38 = vcombine.low %v378_v26, %v390_v27  ;;  %v545_v27 = vld [vmem:[%s7423_s3 + $0x890] sm:$0xff] }
 0x289   :  { %4433 = vmatpush1.bf16.msra.mxu0 %v5259_v33  ;;  %v413_v33 = vld [vmem:[%s7423_s3 + $0x470] sm:$0xff] }
 0x28a   :  { %4515 = vmatpush1.bf16.msra.mxu1 %v5261_v34  ;;  %4434 = vmatprep.subr.bf16.mxu0 %v5284_v35  ;;  %v402_v34 = vld [vmem:[%s7423_s3 + $0x418] sm:$0xff]  ;;  %v4904_v40 = vcombine.high %v401_v32, %v413_v33 }
 0x28b   :  { %4516 = vmatprep.subr.bf16.mxu1 %v5286_v36  ;;  %v414_v35 = vld [vmem:[%s7423_s3 + $0x478] sm:$0xff]  ;;  %v4879_v36 = vcombine.low %v377_v24, %v389_v25 }
 0x28c   :  { %v4906_v41 = vcombine.high %v402_v34, %v414_v35  ;;  %v4905_v46 = vcombine.low %v402_v34, %v414_v35  ;;  %v569_v35 = vld [vmem:[%s7423_s3 + $0x950] sm:$0xff] }
 0x28d   :  { %4435 = vmatpush1.bf16.msra.mxu0 %v5283_v37  ;;  %v437_v37 = vld [vmem:[%s7423_s3 + $0x530] sm:$0xff] }
 0x28e   :  { %4517 = vmatpush1.bf16.msra.mxu1 %v5285_v43  ;;  %4436 = vmatprep.subr.bf16.mxu0 %v5308_v44  ;;  %v426_v43 = vld [vmem:[%s7423_s3 + $0x4d8] sm:$0xff]  ;;  %v4928_v47 = vcombine.high %v425_v42, %v437_v37 }
 0x28f   :  { %4518 = vmatprep.subr.bf16.mxu1 %v5310_v45  ;;  %v438_v44 = vld [vmem:[%s7423_s3 + $0x538] sm:$0xff]  ;;  %v4903_v45 = vcombine.low %v401_v32, %v413_v33 }
 0x290   :  { %v4930_v49 = vcombine.high %v426_v43, %v438_v44 }
 0x291   :  { %4437 = vmatpush1.bf16.msra.mxu0 %v5307_v50  ;;  %v449_v50 = vld [vmem:[%s7423_s3 + $0x590] sm:$0xff] }
 0x292   :  { %4519 = vmatpush1.bf16.msra.mxu1 %v5309_v39  ;;  %4438 = vmatprep.subr.bf16.mxu0 %v5332_v51  ;;  %v461_v39 = vld [vmem:[%s7423_s3 + $0x5f0] sm:$0xff] }
 0x293   :  { %4520 = vmatprep.subr.bf16.mxu1 %v5334_v52  ;;  %v4952_v0 = vcombine.high %v449_v50, %v461_v39 }
 0x295   :  { %4439 = vmatpush1.bf16.msra.mxu0 %v5331_v59  ;;  %v4927_v59 = vcombine.low %v425_v42, %v437_v37 }
 0x296   :  { %4521 = vmatpush1.bf16.msra.mxu1 %v5333_v61  ;;  %4547 = vmatprep.subr.bf16.mxu0 %v4784_v62 }
 0x297   :  { %4629 = vmatprep.subr.bf16.mxu1 %v4786_v63  ;;  %v4929_v63 = vcombine.low %v426_v43, %v438_v44  ;;  %v593_v44 = vld [vmem:[%s7423_s3 + $0xa10] sm:$0xff] }
 0x298   :  { %4457 = vmatmul.mubr.bf16.vlgmr.msra.gmra.mrb[20].mxu0 %v5881_v60 }
 0x299   :  { %4539 = vmatmul.mubr.bf16.vlgmr.msra.gmra.mrb[20].mxu1 %v5881_v60  ;;  %4548 = vmatpush1.bf16.msra.mxu0 %v4783_v3  ;;  %v4954_v3 = vcombine.high %v450_v55, %v462_v56 }
 0x29a   :  { %4579 = vmatprep.mubr.bf16.mxu0 %v5779_v53  ;;  %4630 = vmatpush1.bf16.msra.mxu1 %v4785_v6  ;;  %v474_v6 = vld [vmem:[%s7423_s3 + $0x658] sm:$0xff] }
 0x29b   :  { %4661 = vmatprep.mubr.bf16.mxu1 %v5779_v53  ;;  %4549 = vmatprep.subr.bf16.mxu0 %v4808_v7  ;;  %v4831_v53 = vcombine.low %v329_v8, %v341_v9  ;;  %v486_v7 = vld [vmem:[%s7423_s3 + $0x6b8] sm:$0xff]  ;;  %v4951_v8 = vcombine.low %v449_v50, %v461_v39  ;;  %v4953_v9 = vcombine.low %v450_v55, %v462_v56 }
 0x29c   :  { %4631 = vmatprep.subr.bf16.mxu1 %v4810_v10  ;;  %v4976_v10 = vcombine.high %v473_v4, %v485_v5  ;;  %v4978_v11 = vcombine.high %v474_v6, %v486_v7  ;;  %v4977_v17 = vcombine.low %v474_v6, %v486_v7  ;;  %v618_v55 = vld [vmem:[%s7423_s3 + $0xad8] sm:$0xff]  ;;  %v665_v7 = vld [vmem:[%s7423_s3 + $0xc50] sm:$0xff] }
 0x29d   :  { %4550 = vmatpush1.bf16.msra.mxu0 %v4807_v13  ;;  %v509_v13 = vld [vmem:[%s7423_s3 + $0x770] sm:$0xff]  ;;  %v630_v56 = vld [vmem:[%s7423_s3 + $0xb38] sm:$0xff] }
 0x29e   :  { %4632 = vmatpush1.bf16.msra.mxu1 %v4809_v14  ;;  %4551 = vmatprep.subr.bf16.mxu0 %v4832_v15  ;;  %v498_v14 = vld [vmem:[%s7423_s3 + $0x718] sm:$0xff]  ;;  %v5000_v18 = vcombine.high %v497_v12, %v509_v13 }
 0x29f   :  { %4633 = vmatprep.subr.bf16.mxu1 %v4834_v16  ;;  %v510_v15 = vld [vmem:[%s7423_s3 + $0x778] sm:$0xff]  ;;  %v4975_v16 = vcombine.low %v473_v4, %v485_v5  ;;  %v5121_v4 = vcombine.low %v618_v55, %v630_v56 }
 0x2a0   :  { %v5002_v19 = vcombine.high %v498_v14, %v510_v15  ;;  %v5001_v24 = vcombine.low %v498_v14, %v510_v15  ;;  %v689_v15 = vld [vmem:[%s7423_s3 + $0xd10] sm:$0xff] }
 0x2a1   :  { %4552 = vmatpush1.bf16.msra.mxu0 %v4831_v53  ;;  %v533_v53 = vld [vmem:[%s7423_s3 + $0x830] sm:$0xff] }
 0x2a2   :  { %4634 = vmatpush1.bf16.msra.mxu1 %v4833_v21  ;;  %4553 = vmatprep.subr.bf16.mxu0 %v4856_v22  ;;  %v522_v21 = vld [vmem:[%s7423_s3 + $0x7d8] sm:$0xff]  ;;  %v5024_v25 = vcombine.high %v521_v20, %v533_v53 }
 0x2a3   :  { %4635 = vmatprep.subr.bf16.mxu1 %v4858_v23  ;;  %v534_v22 = vld [vmem:[%s7423_s3 + $0x838] sm:$0xff]  ;;  %v4999_v23 = vcombine.low %v497_v12, %v509_v13 }
 0x2a4   :  { %v5026_v26 = vcombine.high %v522_v21, %v534_v22  ;;  %v5025_v32 = vcombine.low %v522_v21, %v534_v22  ;;  %v713_v22 = vld [vmem:[%s7423_s3 + $0xdd0] sm:$0xff] }
 0x2a5   :  { %4554 = vmatpush1.bf16.msra.mxu0 %v4855_v28  ;;  %v557_v28 = vld [vmem:[%s7423_s3 + $0x8f0] sm:$0xff] }
 0x2a6   :  { %4636 = vmatpush1.bf16.msra.mxu1 %v4857_v29  ;;  %4555 = vmatprep.subr.bf16.mxu0 %v4880_v30  ;;  %v546_v29 = vld [vmem:[%s7423_s3 + $0x898] sm:$0xff]  ;;  %v5048_v33 = vcombine.high %v545_v27, %v557_v28 }
 0x2a7   :  { %4637 = vmatprep.subr.bf16.mxu1 %v4882_v31  ;;  %v558_v30 = vld [vmem:[%s7423_s3 + $0x8f8] sm:$0xff]  ;;  %v5023_v31 = vcombine.low %v521_v20, %v533_v53 }
 0x2a8   :  { %v5050_v34 = vcombine.high %v546_v29, %v558_v30  ;;  %v5049_v42 = vcombine.low %v546_v29, %v558_v30  ;;  %v737_v30 = vld [vmem:[%s7423_s3 + $0xe90] sm:$0xff] }
 0x2a9   :  { %4556 = vmatpush1.bf16.msra.mxu0 %v4879_v36  ;;  %v581_v36 = vld [vmem:[%s7423_s3 + $0x9b0] sm:$0xff] }
 0x2aa   :  { %4638 = vmatpush1.bf16.msra.mxu1 %v4881_v38  ;;  %4557 = vmatprep.subr.bf16.mxu0 %v4904_v40  ;;  %v570_v38 = vld [vmem:[%s7423_s3 + $0x958] sm:$0xff]  ;;  %v5072_v37 = vcombine.high %v569_v35, %v581_v36 }
 0x2ab   :  { %v4130_v48 = vpop.f32.mrb[12].mxu0  ;;  %4639 = vmatprep.subr.bf16.mxu1 %v4906_v41  ;;  %v582_v40 = vld [vmem:[%s7423_s3 + $0x9b8] sm:$0xff]  ;;  %v5047_v41 = vcombine.low %v545_v27, %v557_v28 }
 0x2ac   :  { %4719 = vst [vmem:[%s7426_s4 + $0x40] sm:$0xff] %v4130_v48  ;;  %v4212_v51 = vpop.f32.mrb[12].mxu1  ;;  %v4132_v52 = vpop.f32.mrb[13].mxu0  ;;  %v5074_v43 = vcombine.high %v570_v38, %v582_v40  ;;  %v5071_v48 = vcombine.low %v569_v35, %v581_v36 }
 0x2ad   :  { %4721 = vst [vmem:[%s7426_s4 + $0x50] sm:$0xff] %v4212_v51  ;;  %4720 = vst [vmem:[%s7426_s4 + $0x48] sm:$0xff] %v4132_v52  ;;  %v4214_v57 = vpop.f32.mrb[13].mxu1  ;;  %v4134_v58 = vpop.f32.mrb[14].mxu0  ;;  %4558 = vmatpush1.bf16.msra.mxu0 %v4903_v45  ;;  %v605_v45 = vld [vmem:[%s7423_s3 + $0xa70] sm:$0xff] }
 0x2ae   :  { %4722 = vst [vmem:[%s7426_s4 + $0x58] sm:$0xff] %v4214_v57  ;;  %v4216_v61 = vpop.f32.mrb[14].mxu1  ;;  %4640 = vmatpush1.bf16.msra.mxu1 %v4905_v46  ;;  %v4135_v62 = vpop.f32.mrb[15].mxu0  ;;  %4559 = vmatprep.subr.bf16.mxu0 %v4928_v47  ;;  %v594_v46 = vld [vmem:[%s7423_s3 + $0xa18] sm:$0xff]  ;;  %v5096_v50 = vcombine.high %v593_v44, %v605_v45  ;;  %v617_v51 = vld [vmem:[%s7423_s3 + $0xad0] sm:$0xff]  ;;  %v5095_v57 = vcombine.low %v593_v44, %v605_v45 }
 0x2af   :  { %v4217_v2 = vpop.f32.mrb[15].mxu1  ;;  %4641 = vmatprep.subr.bf16.mxu1 %v4930_v49  ;;  %v606_v47 = vld [vmem:[%s7423_s3 + $0xa78] sm:$0xff]  ;;  %v5073_v49 = vcombine.low %v570_v38, %v582_v40  ;;  %v629_v52 = vld [vmem:[%s7423_s3 + $0xb30] sm:$0xff]  ;;  %v5122_v61 = vcombine.high %v618_v55, %v630_v56 }
 0x2b0   :  { %v5098_v39 = vcombine.high %v594_v46, %v606_v47  ;;  %v5097_v58 = vcombine.low %v594_v46, %v606_v47  ;;  %v641_v62 = vld [vmem:[%s7423_s3 + $0xb90] sm:$0xff]  ;;  %v654_v2 = vld [vmem:[%s7423_s3 + $0xbf8] sm:$0xff] }
 0x2b1   :  { %4560 = vmatpush1.bf16.msra.mxu0 %v4927_v59  ;;  %v5120_v59 = vcombine.high %v617_v51, %v629_v52  ;;  %v761_v38 = vld [vmem:[%s7423_s3 + $0xf50] sm:$0xff]  ;;  %v786_v47 = vld [vmem:[%s7423_s3 + $0x1018] sm:$0xff] }
 0x2b2   :  { %4642 = vmatpush1.bf16.msra.mxu1 %v4929_v63  ;;  %4561 = vmatprep.subr.bf16.mxu0 %v4952_v0  ;;  %v653_v63 = vld [vmem:[%s7423_s3 + $0xbf0] sm:$0xff]  ;;  %v642_v0 = vld [vmem:[%s7423_s3 + $0xb98] sm:$0xff] }
 0x2b3   :  { %4643 = vmatprep.subr.bf16.mxu1 %v4954_v3  ;;  %v5119_v3 = vcombine.low %v617_v51, %v629_v52  ;;  %v5144_v5 = vcombine.high %v641_v62, %v653_v63  ;;  %v5146_v6 = vcombine.high %v642_v0, %v654_v2  ;;  %v5145_v12 = vcombine.low %v642_v0, %v654_v2  ;;  %v773_v40 = vld [vmem:[%s7423_s3 + $0xfb0] sm:$0xff]  ;;  %v810_v56 = vld [vmem:[%s7423_s3 + $0x10d8] sm:$0xff] }
 0x2b4   :  { %v785_v45 = vld [vmem:[%s7423_s3 + $0x1010] sm:$0xff]  ;;  %v834_v2 = vld [vmem:[%s7423_s3 + $0x1198] sm:$0xff] }
 0x2b5   :  { %4562 = vmatpush1.bf16.msra.mxu0 %v4951_v8  ;;  %v677_v8 = vld [vmem:[%s7423_s3 + $0xcb0] sm:$0xff] }
 0x2b6   :  { %4644 = vmatpush1.bf16.msra.mxu1 %v4953_v9  ;;  %4563 = vmatprep.subr.bf16.mxu0 %v4976_v10  ;;  %v666_v9 = vld [vmem:[%s7423_s3 + $0xc58] sm:$0xff]  ;;  %v5168_v13 = vcombine.high %v665_v7, %v677_v8  ;;  %v797_v46 = vld [vmem:[%s7423_s3 + $0x1070] sm:$0xff] }
 0x2b7   :  { %4645 = vmatprep.subr.bf16.mxu1 %v4978_v11  ;;  %v678_v10 = vld [vmem:[%s7423_s3 + $0xcb8] sm:$0xff]  ;;  %v5143_v11 = vcombine.low %v641_v62, %v653_v63  ;;  %v809_v52 = vld [vmem:[%s7423_s3 + $0x10d0] sm:$0xff] }
 0x2b8   :  { %v5170_v14 = vcombine.high %v666_v9, %v678_v10  ;;  %v5169_v20 = vcombine.low %v666_v9, %v678_v10  ;;  %v821_v55 = vld [vmem:[%s7423_s3 + $0x1130] sm:$0xff] }
 0x2b9   :  { %4564 = vmatpush1.bf16.msra.mxu0 %v4975_v16  ;;  %v701_v16 = vld [vmem:[%s7423_s3 + $0xd70] sm:$0xff] }
 0x2ba   :  { %4646 = vmatpush1.bf16.msra.mxu1 %v4977_v17  ;;  %4565 = vmatprep.subr.bf16.mxu0 %v5000_v18  ;;  %v690_v17 = vld [vmem:[%s7423_s3 + $0xd18] sm:$0xff]  ;;  %v5192_v53 = vcombine.high %v689_v15, %v701_v16  ;;  %v833_v63 = vld [vmem:[%s7423_s3 + $0x1190] sm:$0xff] }
 0x2bb   :  { %4647 = vmatprep.subr.bf16.mxu1 %v5002_v19  ;;  %v702_v18 = vld [vmem:[%s7423_s3 + $0xd78] sm:$0xff]  ;;  %v5167_v19 = vcombine.low %v665_v7, %v677_v8  ;;  %v845_v0 = vld [vmem:[%s7423_s3 + $0x11f0] sm:$0xff] }
 0x2bc   :  { %v5194_v21 = vcombine.high %v690_v17, %v702_v18  ;;  %v5193_v27 = vcombine.low %v690_v17, %v702_v18  ;;  %v5335_v8 = vcombine.low %v833_v63, %v845_v0 }
 0x2bd   :  { %4566 = vmatpush1.bf16.msra.mxu0 %v4999_v23  ;;  %v725_v23 = vld [vmem:[%s7423_s3 + $0xe30] sm:$0xff] }
 0x2be   :  { %4648 = vmatpush1.bf16.msra.mxu1 %v5001_v24  ;;  %4567 = vmatprep.subr.bf16.mxu0 %v5024_v25  ;;  %v714_v24 = vld [vmem:[%s7423_s3 + $0xdd8] sm:$0xff]  ;;  %v5216_v28 = vcombine.high %v713_v22, %v725_v23 }
 0x2bf   :  { %4649 = vmatprep.subr.bf16.mxu1 %v5026_v26  ;;  %v726_v25 = vld [vmem:[%s7423_s3 + $0xe38] sm:$0xff]  ;;  %v5191_v26 = vcombine.low %v689_v15, %v701_v16 }
 0x2c0   :  { %v5218_v29 = vcombine.high %v714_v24, %v726_v25 }
 0x2c1   :  { %4568 = vmatpush1.bf16.msra.mxu0 %v5023_v31  ;;  %v749_v31 = vld [vmem:[%s7423_s3 + $0xef0] sm:$0xff] }
 0x2c2   :  { %4650 = vmatpush1.bf16.msra.mxu1 %v5025_v32  ;;  %4569 = vmatprep.subr.bf16.mxu0 %v5048_v33  ;;  %v750_v32 = vld [vmem:[%s7423_s3 + $0xef8] sm:$0xff]  ;;  %v5215_v33 = vcombine.low %v713_v22, %v725_v23  ;;  %v5240_v35 = vcombine.high %v737_v30, %v749_v31 }
 0x2c3   :  { %4651 = vmatprep.subr.bf16.mxu1 %v5050_v34  ;;  %v5217_v34 = vcombine.low %v714_v24, %v726_v25 }
 0x2c5   :  { %4570 = vmatpush1.bf16.msra.mxu0 %v5047_v41  ;;  %v774_v41 = vld [vmem:[%s7423_s3 + $0xfb8] sm:$0xff] }
 0x2c6   :  { %4652 = vmatpush1.bf16.msra.mxu1 %v5049_v42  ;;  %4571 = vmatprep.subr.bf16.mxu0 %v5072_v37  ;;  %v5239_v42 = vcombine.low %v737_v30, %v749_v31 }
 0x2c7   :  { %4653 = vmatprep.subr.bf16.mxu1 %v5074_v43  ;;  %v5264_v43 = vcombine.high %v761_v38, %v773_v40 }
 0x2c9   :  { %4572 = vmatpush1.bf16.msra.mxu0 %v5071_v48  ;;  %v798_v48 = vld [vmem:[%s7423_s3 + $0x1078] sm:$0xff] }
 0x2ca   :  { %4654 = vmatpush1.bf16.msra.mxu1 %v5073_v49  ;;  %4573 = vmatprep.subr.bf16.mxu0 %v5096_v50  ;;  %v5263_v49 = vcombine.low %v761_v38, %v773_v40  ;;  %v5290_v51 = vcombine.high %v786_v47, %v798_v48 }
 0x2cb   :  { %4655 = vmatprep.subr.bf16.mxu1 %v5098_v39  ;;  %v5288_v39 = vcombine.high %v785_v45, %v797_v46 }
 0x2cd   :  { %4574 = vmatpush1.bf16.msra.mxu0 %v5095_v57  ;;  %v822_v57 = vld [vmem:[%s7423_s3 + $0x1138] sm:$0xff] }
 0x2ce   :  { %4656 = vmatpush1.bf16.msra.mxu1 %v5097_v58  ;;  %4575 = vmatprep.subr.bf16.mxu0 %v5120_v59  ;;  %v5287_v58 = vcombine.low %v785_v45, %v797_v46  ;;  %v5289_v59 = vcombine.low %v786_v47, %v798_v48  ;;  %v5314_v62 = vcombine.high %v810_v56, %v822_v57 }
 0x2cf   :  { %4657 = vmatprep.subr.bf16.mxu1 %v5122_v61  ;;  %v5312_v61 = vcombine.high %v809_v52, %v821_v55 }
 0x2d1   :  { %4576 = vmatpush1.bf16.msra.mxu0 %v5119_v3  ;;  %v846_v3 = vld [vmem:[%s7423_s3 + $0x11f8] sm:$0xff] }
 0x2d2   :  { %4658 = vmatpush1.bf16.msra.mxu1 %v5121_v4  ;;  %4577 = vmatprep.subr.bf16.mxu0 %v5144_v5  ;;  %v5311_v4 = vcombine.low %v809_v52, %v821_v55  ;;  %v5313_v5 = vcombine.low %v810_v56, %v822_v57  ;;  %v5338_v7 = vcombine.high %v834_v2, %v846_v3 }
 0x2d3   :  { %4659 = vmatprep.subr.bf16.mxu1 %v5146_v6  ;;  %v5336_v6 = vcombine.high %v833_v63, %v845_v0  ;;  %v5337_v9 = vcombine.low %v834_v2, %v846_v3 }
 0x2d5   :  { %4578 = vmatpush1.bf16.msra.mxu0 %v5143_v11 }
 0x2d6   :  { %4660 = vmatpush1.bf16.msra.mxu1 %v5145_v12  ;;  %4588 = vmatprep.subr.bf16.mxu0 %v5168_v13 }
 0x2d7   :  { %4670 = vmatprep.subr.bf16.mxu1 %v5170_v14 }
 0x2d8   :  { %4580 = vmatmul.mubr.bf16.vlgmr.msra.gmra.mrb[24].mxu0 %v5781_v54 }
 0x2d9   :  { %4662 = vmatmul.mubr.bf16.vlgmr.msra.gmra.mrb[24].mxu1 %v5781_v54  ;;  %4589 = vmatpush1.bf16.msra.mxu0 %v5167_v19  ;;  %v738_v54 = vld [vmem:[%s7423_s3 + $0xe98] sm:$0xff] }
 0x2da   :  { %4671 = vmatpush1.bf16.msra.mxu1 %v5169_v20  ;;  %4590 = vmatprep.subr.bf16.mxu0 %v5192_v53  ;;  %v5242_v36 = vcombine.high %v738_v54, %v750_v32  ;;  %v5241_v37 = vcombine.low %v738_v54, %v750_v32 }
 0x2db   :  { %4672 = vmatprep.subr.bf16.mxu1 %v5194_v21  ;;  %4620 = vmatprep.mubr.bf16.mxu0 %v5444_v1 }
 0x2dc   :  { %4702 = vmatprep.mubr.bf16.mxu1 %v5444_v1  ;;  %v762_v1 = vld [vmem:[%s7423_s3 + $0xf58] sm:$0xff] }
 0x2dd   :  { %4591 = vmatpush1.bf16.msra.mxu0 %v5191_v26  ;;  %v5266_v44 = vcombine.high %v762_v1, %v774_v41  ;;  %v5265_v50 = vcombine.low %v762_v1, %v774_v41 }
 0x2de   :  { %4673 = vmatpush1.bf16.msra.mxu1 %v5193_v27  ;;  %4592 = vmatprep.subr.bf16.mxu0 %v5216_v28 }
 0x2df   :  { %4674 = vmatprep.subr.bf16.mxu1 %v5218_v29 }
 0x2e1   :  { %4593 = vmatpush1.bf16.msra.mxu0 %v5215_v33 }
 0x2e2   :  { %4675 = vmatpush1.bf16.msra.mxu1 %v5217_v34  ;;  %4594 = vmatprep.subr.bf16.mxu0 %v5240_v35 }
 0x2e3   :  { %4676 = vmatprep.subr.bf16.mxu1 %v5242_v36 }
 0x2e5   :  { %4595 = vmatpush1.bf16.msra.mxu0 %v5239_v42 }
 0x2e6   :  { %4677 = vmatpush1.bf16.msra.mxu1 %v5241_v37  ;;  %4596 = vmatprep.subr.bf16.mxu0 %v5264_v43 }
 0x2e7   :  { %4678 = vmatprep.subr.bf16.mxu1 %v5266_v44 }
 0x2e9   :  { %4597 = vmatpush1.bf16.msra.mxu0 %v5263_v49 }
 0x2ea   :  { %4679 = vmatpush1.bf16.msra.mxu1 %v5265_v50  ;;  %4598 = vmatprep.subr.bf16.mxu0 %v5288_v39 }
 0x2eb   :  { %4680 = vmatprep.subr.bf16.mxu1 %v5290_v51 }
 0x2ed   :  { %4599 = vmatpush1.bf16.msra.mxu0 %v5287_v58 }
 0x2ee   :  { %4681 = vmatpush1.bf16.msra.mxu1 %v5289_v59  ;;  %4600 = vmatprep.subr.bf16.mxu0 %v5312_v61 }
 0x2ef   :  { %4682 = vmatprep.subr.bf16.mxu1 %v5314_v62 }
 0x2f1   :  { %4601 = vmatpush1.bf16.msra.mxu0 %v5311_v4 }
 0x2f2   :  { %4683 = vmatpush1.bf16.msra.mxu1 %v5313_v5  ;;  %4602 = vmatprep.subr.bf16.mxu0 %v5336_v6 }
 0x2f3   :  { %4684 = vmatprep.subr.bf16.mxu1 %v5338_v7 }
 0x2f5   :  { %4603 = vmatpush1.bf16.msra.mxu0 %v5335_v8 }
 0x2f6   :  { %4685 = vmatpush1.bf16.msra.mxu1 %v5337_v9 }
 0x2f8   :  { %4621 = vmatmul.mubr.bf16.vlgmr.msra.gmra.mrb[24].mxu0 %v5881_v60 }
 0x2f9   :  { %4703 = vmatmul.mubr.bf16.vlgmr.msra.gmra.mrb[24].mxu1 %v5881_v60 }
 0x30b   :  { %v4294_v10 = vpop.f32.mrb[16].mxu0 }
 0x30c   :  { %4723 = vst [vmem:[%s7426_s4 + $0x60] sm:$0xff] %v4294_v10  ;;  %v4376_v11 = vpop.f32.mrb[16].mxu1  ;;  %v4296_v12 = vpop.f32.mrb[17].mxu0 }
 0x30d   :  { %4725 = vst [vmem:[%s7426_s4 + $0x70] sm:$0xff] %v4376_v11  ;;  %4724 = vst [vmem:[%s7426_s4 + $0x68] sm:$0xff] %v4296_v12  ;;  %v4378_v13 = vpop.f32.mrb[17].mxu1  ;;  %v4298_v14 = vpop.f32.mrb[18].mxu0 }
 0x30e   :  { %4726 = vst [vmem:[%s7426_s4 + $0x78] sm:$0xff] %v4378_v13  ;;  %v4380_v60 = vpop.f32.mrb[18].mxu1  ;;  %v4299_v15 = vpop.f32.mrb[19].mxu0 }
 0x30f   :  { %v4381_v16 = vpop.f32.mrb[19].mxu1 }
 0x36b   :  { %v4458_v17 = vpop.f32.mrb[20].mxu0 }
 0x36c   :  { %4727 = vst [vmem:[%s7426_s4 + $0x80] sm:$0xff] %v4458_v17  ;;  %v4540_v18 = vpop.f32.mrb[20].mxu1  ;;  %v4460_v19 = vpop.f32.mrb[21].mxu0 }
 0x36d   :  { %4729 = vst [vmem:[%s7426_s4 + $0x90] sm:$0xff] %v4540_v18  ;;  %4728 = vst [vmem:[%s7426_s4 + $0x88] sm:$0xff] %v4460_v19  ;;  %v4542_v20 = vpop.f32.mrb[21].mxu1  ;;  %v4462_v53 = vpop.f32.mrb[22].mxu0 }
 0x36e   :  { %4730 = vst [vmem:[%s7426_s4 + $0x98] sm:$0xff] %v4542_v20  ;;  %v4544_v21 = vpop.f32.mrb[22].mxu1  ;;  %v4463_v22 = vpop.f32.mrb[23].mxu0 }
 0x36f   :  { %v4545_v23 = vpop.f32.mrb[23].mxu1 }
 0x3cb   :  { %v4622_v24 = vpop.f32.mrb[24].mxu0 }
 0x3cc   :  { %4731 = vst [vmem:[%s7426_s4 + $0xa0] sm:$0xff] %v4622_v24  ;;  %v4704_v25 = vpop.f32.mrb[24].mxu1  ;;  %v4624_v26 = vpop.f32.mrb[25].mxu0 }
 0x3cd   :  { %4733 = vst [vmem:[%s7426_s4 + $0xb0] sm:$0xff] %v4704_v25  ;;  %4732 = vst [vmem:[%s7426_s4 + $0xa8] sm:$0xff] %v4624_v26  ;;  %v4706_v27 = vpop.f32.mrb[25].mxu1  ;;  %v4626_v28 = vpop.f32.mrb[26].mxu0 }
 0x3ce   :  { %4734 = vst [vmem:[%s7426_s4 + $0xb8] sm:$0xff] %v4706_v27  ;;  %v4708_v29 = vpop.f32.mrb[26].mxu1  ;;  %v4627_v30 = vpop.f32.mrb[27].mxu0 }
 0x3cf   :  { %v4709_v31 = vpop.f32.mrb[27].mxu1 }

// kernel: generator_forward.11
= control target key start
LH: loop header
LB: loop body
LE: loop exit
PB: predicated region body
PF: predicated region fallthrough
CT: control target
= control target key end

     0   :  { %s1331_s12 = smov 0   ;;  %s1333_s13 = smov 0   ;;  %s1460_s0 = inlined_call_operand.vmem [shape: bf16[4,32,768], index: 0, kind: input, shape index: {}]   ;;  %s1461_s1 = inlined_call_operand.vmem [shape: bf16[4,768,128], index: 1, kind: input, shape index: {}]   ;;  %s1462_s2 = inlined_call_operand.vmem [shape: f32[4,32,128], index: 2, kind: output, shape index: {0}]   ;;  %s1463_s3 = inlined_call_operand.vmem [shape: f32[1,2,128], index: 3, kind: output, shape index: {1}]  }
   0x1   :  { %s1335_s14 = smov 0  }
   0x2 LB: > { %s23_s15 = sadd.s32 1, %s1305_s13  ;;  %p1024_p0 = scmp.ge.s32.totalorder %s1309_s14, 1  ;;  %s1309_s14 = sphi %s1335_s14, %s14_s14   ;;  %s1305_s13 = sphi %s1333_s13, %s1465_s13   ;;  %s1301_s12 = sphi %s1331_s12, %s1464_s12  }
   0x3   : > { %p24_p1 = scmp.ge.s32.totalorder %s23_s15, 4  ;;  %p172_p2 = scmp.lt.s32.totalorder %s1309_s14, 5 }
   0x5   : > { %s1467_s15 = smov (%p24_p1, %s23_s15), 0  ;;  %p173_p3 = pnand %p1024_p0, %p172_p2 }
   0x6   : > { %p215_p4 = scmp.lt.s32.totalorder (!%p173_p3), %s1301_s12, 3  ;;  %p1089_p5 = scmp.ne.s32.totalorder (!%p173_p3), %s1301_s12, 0 }
   0x7   : > { %176 = sbr.rel (%p173_p3) target bundleno = 335 (0x14f), region = 28 }
   0xe   : > { %s1353_s16 = scalar_select %p215_p4, %s1301_s12, 3 }
  0x10   : > { %s1196_s17 = smul.u32 384, %s1353_s16  ;;  %s1094_s25 = sshll.u32 %s1353_s16, 5 }
  0x11   : > { %s1195_s21 = smul.u32 96, %s1353_s16  ;;  %s238_s28 = scalar_lea.vmem %s1462_s2, %s1094_s25 }
  0x12   : > { %s1359_s20 = scalar_lea.vmem %s1461_s1, %s1196_s17 }
  0x13   : > { %v1221_v0 = vld [vmem:[%s1359_s20 + $0x40] sm:$0xff]   ;;  %v1225_v4 = vld [vmem:[%s1359_s20 + $0x48] sm:$0xff]   ;;  %v1229_v8 = vld [vmem:[%s1359_s20 + $0x50] sm:$0xff]   ;;  %s1395_s24 = scalar_lea.vmem %s1460_s0, %s1195_s21 }
  0x14   : > { %v1222_v1 = vld [vmem:[%s1359_s20 + $0xc0] sm:$0xff]   ;;  %1095 = vmatprep.subr.bf16.mxu0 %v1221_v0  ;;  %v1226_v5 = vld [vmem:[%s1359_s20 + $0xc8] sm:$0xff]   ;;  %v1230_v9 = vld [vmem:[%s1359_s20 + $0xd0] sm:$0xff]  }
  0x15   : > { %v1223_v2 = vld [vmem:[%s1359_s20] sm:$0xff]   ;;  %1123 = vmatprep.subr.bf16.mxu1 %v1222_v1  ;;  %v1227_v6 = vld [vmem:[%s1359_s20 + $0x8] sm:$0xff]   ;;  %v1231_v10 = vld [vmem:[%s1359_s20 + $0x10] sm:$0xff]  }
  0x16   : > { %v1224_v3 = vld [vmem:[%s1359_s20 + $0x80] sm:$0xff]   ;;  %1096 = vmatpush3.bf16.msra.mxu0 %v1223_v2  ;;  %v1228_v7 = vld [vmem:[%s1359_s20 + $0x88] sm:$0xff]   ;;  %v1232_v11 = vld [vmem:[%s1359_s20 + $0x90] sm:$0xff]  }
  0x17   : > { %1124 = vmatpush3.bf16.msra.mxu1 %v1224_v3  ;;  %1097 = vmatprep.subr.bf16.mxu0 %v1225_v4  ;;  %v1233_v12 = vld [vmem:[%s1359_s20 + $0x58] sm:$0xff]   ;;  %v1237_v16 = vld [vmem:[%s1359_s20 + $0x60] sm:$0xff]   ;;  %v1241_v20 = vld [vmem:[%s1359_s20 + $0x68] sm:$0xff]  }
  0x18   : > { %1125 = vmatprep.subr.bf16.mxu1 %v1226_v5  ;;  %v1234_v13 = vld [vmem:[%s1359_s20 + $0xd8] sm:$0xff]   ;;  %v1238_v17 = vld [vmem:[%s1359_s20 + $0xe0] sm:$0xff]   ;;  %v1242_v21 = vld [vmem:[%s1359_s20 + $0xe8] sm:$0xff]  }
  0x19   : > { %v1235_v14 = vld [vmem:[%s1359_s20 + $0x18] sm:$0xff]   ;;  %v1239_v18 = vld [vmem:[%s1359_s20 + $0x20] sm:$0xff]   ;;  %v1243_v22 = vld [vmem:[%s1359_s20 + $0x28] sm:$0xff]  }
  0x1a   : > { %1098 = vmatpush3.bf16.msra.mxu0 %v1227_v6  ;;  %v1236_v15 = vld [vmem:[%s1359_s20 + $0x98] sm:$0xff]   ;;  %v1240_v19 = vld [vmem:[%s1359_s20 + $0xa0] sm:$0xff]   ;;  %v1244_v23 = vld [vmem:[%s1359_s20 + $0xa8] sm:$0xff]  }
  0x1b   : > { %1126 = vmatpush3.bf16.msra.mxu1 %v1228_v7  ;;  %1099 = vmatprep.subr.bf16.mxu0 %v1229_v8  ;;  %v1245_v24 = vld [vmem:[%s1359_s20 + $0x70] sm:$0xff]   ;;  %v1249_v28 = vld [vmem:[%s1359_s20 + $0x78] sm:$0xff]   ;;  %v1256_v34 = vld [vmem:[%s1395_s24 + $0x8] ss:$24 sps:$4 sm:$0xff]  }
  0x1c   : > { %1127 = vmatprep.subr.bf16.mxu1 %v1230_v9  ;;  %v1246_v25 = vld [vmem:[%s1359_s20 + $0xf0] sm:$0xff]   ;;  %v1250_v29 = vld [vmem:[%s1359_s20 + $0xf8] sm:$0xff]   ;;  %v1258_v35 = vld [vmem:[%s1395_s24 + $0xc] ss:$24 sps:$4 sm:$0xff]  }
  0x1d   : > { %v1247_v26 = vld [vmem:[%s1359_s20 + $0x30] sm:$0xff]   ;;  %v1251_v30 = vld [vmem:[%s1359_s20 + $0x38] sm:$0xff]   ;;  %v1259_v36 = vld [vmem:[%s1359_s20 + $0x140] sm:$0xff]   ;;  %782 = vmatprep.mubr.bf16.mxu1 %v1258_v35 }
  0x1e   : > { %1100 = vmatpush3.bf16.msra.mxu0 %v1231_v10  ;;  %v1248_v27 = vld [vmem:[%s1359_s20 + $0xb0] sm:$0xff]   ;;  %v1252_v31 = vld [vmem:[%s1359_s20 + $0xb8] sm:$0xff]   ;;  %v1260_v37 = vld [vmem:[%s1359_s20 + $0x100] sm:$0xff]  }
  0x1f   : > { %1128 = vmatpush3.bf16.msra.mxu1 %v1232_v11  ;;  %1101 = vmatprep.subr.bf16.mxu0 %v1233_v12  ;;  %v1253_v32 = vld [vmem:[%s1395_s24] ss:$24 sps:$4 sm:$0xff]   ;;  %v1255_v33 = vld [vmem:[%s1395_s24 + $0x4] ss:$24 sps:$4 sm:$0xff]   ;;  %v1261_v38 = vld [vmem:[%s1359_s20 + $0x148] sm:$0xff]  }
  0x20   : > { %1129 = vmatprep.subr.bf16.mxu1 %v1234_v13  ;;  %733 = vmatprep.mubr.bf16.mxu0 %v1255_v33  ;;  %v1262_v39 = vld [vmem:[%s1359_s20 + $0x108] sm:$0xff]   ;;  %v1263_v40 = vld [vmem:[%s1359_s20 + $0x150] sm:$0xff]   ;;  %v1265_v42 = vld [vmem:[%s1359_s20 + $0x158] sm:$0xff]  }
  0x21   : > { %v1264_v41 = vld [vmem:[%s1359_s20 + $0x110] sm:$0xff]   ;;  %v1266_v43 = vld [vmem:[%s1359_s20 + $0x118] sm:$0xff]   ;;  %v1267_v46 = vld [vmem:[%s1359_s20 + $0x160] sm:$0xff]  }
  0x22   : > { %1102 = vmatpush3.bf16.msra.mxu0 %v1235_v14  ;;  %v1269_v44 = vld [vmem:[%s1395_s24 + $0x34] ss:$24 sps:$4 sm:$0xff]   ;;  %v1274_v47 = vld [vmem:[%s1395_s24 + $0x30] ss:$24 sps:$4 sm:$0xff]   ;;  %v1268_v49 = vld [vmem:[%s1359_s20 + $0x120] sm:$0xff]  }
  0x23   : > { %1130 = vmatpush3.bf16.msra.mxu1 %v1236_v15  ;;  %1103 = vmatprep.subr.bf16.mxu0 %v1237_v16  ;;  %v1271_v45 = vld [vmem:[%s1395_s24 + $0x3c] ss:$24 sps:$4 sm:$0xff]   ;;  %v1275_v48 = vld [vmem:[%s1395_s24 + $0x38] ss:$24 sps:$4 sm:$0xff]   ;;  %v1273_v50 = vld [vmem:[%s1359_s20 + $0x168] sm:$0xff]  }
  0x24   : > { %1131 = vmatprep.subr.bf16.mxu1 %v1238_v17  ;;  %v1276_v51 = vld [vmem:[%s1359_s20 + $0x128] sm:$0xff]   ;;  %v1277_v53 = vld [vmem:[%s1359_s20 + $0x170] sm:$0xff]   ;;  %v1286_v54 = vld [vmem:[%s1395_s24 + $0x44] ss:$24 sps:$4 sm:$0xff]  }
  0x25   : > { %v1283_v52 = vld [vmem:[%s1395_s24 + $0x14] ss:$24 sps:$4 sm:$0xff]   ;;  %v1279_v56 = vld [vmem:[%s1359_s20 + $0x178] sm:$0xff]   ;;  %v1281_v58 = vld [vmem:[%s1395_s24 + $0x10] ss:$24 sps:$4 sm:$0xff]  }
  0x26   : > { %1104 = vmatpush3.bf16.msra.mxu0 %v1239_v18  ;;  %v1278_v55 = vld [vmem:[%s1359_s20 + $0x130] sm:$0xff]   ;;  %v1280_v57 = vld [vmem:[%s1359_s20 + $0x138] sm:$0xff]  }
  0x27   : > { %1132 = vmatpush3.bf16.msra.mxu1 %v1240_v19  ;;  %1105 = vmatprep.subr.bf16.mxu0 %v1241_v20  ;;  %v1284_v59 = vld [vmem:[%s1395_s24 + $0x40] ss:$24 sps:$4 sm:$0xff]  }
  0x28   : > { %1133 = vmatprep.subr.bf16.mxu1 %v1242_v21 }
  0x2a   : > { %1106 = vmatpush3.bf16.msra.mxu0 %v1243_v22 }
  0x2b   : > { %1134 = vmatpush3.bf16.msra.mxu1 %v1244_v23  ;;  %1107 = vmatprep.subr.bf16.mxu0 %v1245_v24 }
  0x2c   : > { %1135 = vmatprep.subr.bf16.mxu1 %v1246_v25 }
  0x2e   : > { %1108 = vmatpush3.bf16.msra.mxu0 %v1247_v26 }
  0x2f   : > { %1136 = vmatpush3.bf16.msra.mxu1 %v1248_v27  ;;  %1109 = vmatprep.subr.bf16.mxu0 %v1249_v28 }
  0x30   : > { %1137 = vmatprep.subr.bf16.mxu1 %v1250_v29 }
  0x32   : > { %1110 = vmatpush3.bf16.msra.mxu0 %v1251_v30 }
  0x33   : > { %1138 = vmatpush3.bf16.msra.mxu1 %v1252_v31  ;;  %1151 = vmatprep.subr.bf16.mxu0 %v1259_v36 }
  0x34   : > { %1179 = vmatprep.subr.bf16.mxu1 %v1259_v36 }
  0x35   : > { %734 = vmatmul.mubr.bf16.vlgmr.msra.gmra.mrb[0].mxu0 %v1253_v32 }
  0x36   : > { %783 = vmatmul.mubr.bf16.vlgmr.msra.gmra.mrb[0].mxu1 %v1256_v34  ;;  %1152 = vmatpush3.bf16.msra.mxu0 %v1260_v37 }
  0x37   : > { %1187 = vmatpush3.bf16.msra.mxu1 %v1260_v37  ;;  %1153 = vmatprep.subr.bf16.mxu0 %v1261_v38 }
  0x38   : > { %1180 = vmatprep.subr.bf16.mxu1 %v1261_v38  ;;  %741 = vmatprep.mubr.bf16.mxu0 %v1269_v44 }
  0x39   : > { %790 = vmatprep.mubr.bf16.mxu1 %v1271_v45 }
  0x3a   : > { %1154 = vmatpush3.bf16.msra.mxu0 %v1262_v39 }
  0x3b   : > { %1188 = vmatpush3.bf16.msra.mxu1 %v1262_v39  ;;  %1155 = vmatprep.subr.bf16.mxu0 %v1263_v40 }
  0x3c   : > { %1181 = vmatprep.subr.bf16.mxu1 %v1263_v40 }
  0x3d   : > { %742 = vmatmul.mubr.bf16.gmra.mrb[4].mxu0 %v1274_v47 }
  0x3e   : > { %1156 = vmatpush3.bf16.msra.mxu0 %v1264_v41  ;;  %791 = vmatmul.mubr.bf16.gmra.mrb[4].mxu1 %v1275_v48 }
  0x3f   : > { %1189 = vmatpush3.bf16.msra.mxu1 %v1264_v41  ;;  %1157 = vmatprep.subr.bf16.mxu0 %v1265_v42 }
  0x40   : > { %1182 = vmatprep.subr.bf16.mxu1 %v1265_v42  ;;  %831 = vmatprep.mubr.bf16.mxu0 %v1283_v52 }
  0x41   : > { %839 = vmatprep.mubr.bf16.mxu1 %v1286_v54 }
  0x42   : > { %1158 = vmatpush3.bf16.msra.mxu0 %v1266_v43 }
  0x43   : > { %1190 = vmatpush3.bf16.msra.mxu1 %v1266_v43  ;;  %1159 = vmatprep.subr.bf16.mxu0 %v1267_v46 }
  0x44   : > { %1183 = vmatprep.subr.bf16.mxu1 %v1267_v46 }
  0x46   : > { %1160 = vmatpush3.bf16.msra.mxu0 %v1268_v49 }
  0x47   : > { %1191 = vmatpush3.bf16.msra.mxu1 %v1268_v49  ;;  %1161 = vmatprep.subr.bf16.mxu0 %v1273_v50 }
  0x48   : > { %1184 = vmatprep.subr.bf16.mxu1 %v1273_v50 }
  0x4a   : > { %1162 = vmatpush3.bf16.msra.mxu0 %v1276_v51 }
  0x4b   : > { %1192 = vmatpush3.bf16.msra.mxu1 %v1276_v51  ;;  %1163 = vmatprep.subr.bf16.mxu0 %v1277_v53 }
  0x4c   : > { %1185 = vmatprep.subr.bf16.mxu1 %v1277_v53 }
  0x4e   : > { %1164 = vmatpush3.bf16.msra.mxu0 %v1278_v55 }
  0x4f   : > { %1193 = vmatpush3.bf16.msra.mxu1 %v1278_v55  ;;  %1165 = vmatprep.subr.bf16.mxu0 %v1279_v56 }
  0x50   : > { %1186 = vmatprep.subr.bf16.mxu1 %v1279_v56 }
  0x52   : > { %1166 = vmatpush3.bf16.msra.mxu0 %v1280_v57 }
  0x53   : > { %1194 = vmatpush3.bf16.msra.mxu1 %v1280_v57 }
  0x55   : > { %832 = vmatmul.mubr.bf16.vlgmr.msra.gmra.mrb[8].mxu0 %v1281_v58 }
  0x56   : > { %840 = vmatmul.mubr.bf16.vlgmr.msra.gmra.mrb[8].mxu1 %v1284_v59 }
 0x108   : > { %v1111_v60 = vpop.f32.mrb[0].mxu0 }
 0x109   : > { %v1139_v61 = vpop.f32.mrb[0].mxu1  ;;  %v1112_v62 = vpop.f32.mrb[1].mxu0 }
 0x10a   : > { %v1113_v63 = vadd.f32 %v1112_v62, %v1111_v60  ;;  %v1140_v0 = vpop.f32.mrb[1].mxu1  ;;  %v1114_v1 = vpop.f32.mrb[2].mxu0 }
 0x10b   : > { %v1141_v2 = vadd.f32 %v1140_v0, %v1139_v61  ;;  %v1142_v3 = vpop.f32.mrb[2].mxu1  ;;  %v1115_v4 = vpop.f32.mrb[3].mxu0 }
 0x10c   : > { %v1116_v5 = vadd.f32 %v1115_v4, %v1114_v1  ;;  %v1143_v6 = vpop.f32.mrb[3].mxu1 }
 0x10d   : > { %v785_v7 = vadd.f32 %v1141_v2, %v1113_v63  ;;  %v1144_v8 = vadd.f32 %v1143_v6, %v1142_v3 }
 0x10f   : > { %v788_v9 = vadd.f32 %v1144_v8, %v1116_v5 }
 0x110   : > { %v1117_v10 = vpop.f32.mrb[4].mxu0 }
 0x111   : > { %v1145_v11 = vpop.f32.mrb[4].mxu1  ;;  %v1118_v12 = vpop.f32.mrb[5].mxu0 }
 0x112   : > { %v1119_v13 = vadd.f32 %v1118_v12, %v1117_v10  ;;  %v1146_v14 = vpop.f32.mrb[5].mxu1  ;;  %v1120_v15 = vpop.f32.mrb[6].mxu0 }
 0x113   : > { %v1147_v16 = vadd.f32 %v1146_v14, %v1145_v11  ;;  %v1148_v17 = vpop.f32.mrb[6].mxu1  ;;  %v1121_v18 = vpop.f32.mrb[7].mxu0 }
 0x114   : > { %v1122_v19 = vadd.f32 %v1121_v18, %v1120_v15  ;;  %v1149_v20 = vpop.f32.mrb[7].mxu1 }
 0x115   : > { %v793_v21 = vadd.f32 %v1147_v16, %v1119_v13  ;;  %v1150_v22 = vadd.f32 %v1149_v20, %v1148_v17 }
 0x117   : > { %v796_v23 = vadd.f32 %v1150_v22, %v1122_v19 }
 0x128   : > { %v1167_v24 = vpop.f32.mrb[8].mxu0 }
 0x129   : > { %v1173_v25 = vpop.f32.mrb[8].mxu1  ;;  %v1168_v26 = vpop.f32.mrb[9].mxu0 }
 0x12a   : > { %v1169_v27 = vadd.f32 %v1168_v26, %v1167_v24  ;;  %v1174_v28 = vpop.f32.mrb[9].mxu1  ;;  %v1170_v29 = vpop.f32.mrb[10].mxu0 }
 0x12b   : > { %v1175_v30 = vadd.f32 %v1174_v28, %v1173_v25  ;;  %v1176_v31 = vpop.f32.mrb[10].mxu1  ;;  %v1171_v32 = vpop.f32.mrb[11].mxu0 }
 0x12c   : > { %v834_v33 = vadd.f32 %v1169_v27, %v785_v7  ;;  %v1172_v34 = vadd.f32 %v1171_v32, %v1170_v29  ;;  %v1177_v35 = vpop.f32.mrb[11].mxu1 }
 0x12d   : > { %v842_v36 = vadd.f32 %v1175_v30, %v793_v21  ;;  %v1178_v37 = vadd.f32 %v1177_v35, %v1176_v31 }
 0x12e   : > { %848 = vst [vmem:[%s238_s28] sm:$0xff] %v834_v33  ;;  %v837_v38 = vadd.f32 %v1172_v34, %v788_v9  ;;  %v861_v40 = vmul.f32 %v834_v33, %v834_v33 }
 0x12f   : > { %850 = vst [vmem:[%s238_s28 + $0x10] sm:$0xff] %v842_v36  ;;  %v845_v39 = vadd.f32 %v1178_v37, %v796_v23  ;;  %v863_v43 = vmul.f32 %v842_v36, %v842_v36 }
 0x130   : > { %849 = vst [vmem:[%s238_s28 + $0x8] sm:$0xff] %v837_v38  ;;  %v852_v41 = vadd.f32 %v837_v38, %v834_v33  ;;  %v862_v42 = vmul.f32 %v837_v38, %v837_v38 }
 0x131   : > { %851 = vst [vmem:[%s238_s28 + $0x18] sm:$0xff] %v845_v39  ;;  %v864_v47 = vmul.f32 %v845_v39, %v845_v39 }
 0x132   : > { %v865_v44 = vadd.f32 %v862_v42, %v861_v40  ;;  %v853_v45 = vadd.f32 %v852_v41, %v842_v36 }
 0x134   : > { %v854_v46 = vadd.f32 %v853_v45, %v845_v39  ;;  %v866_v48 = vadd.f32 %v865_v44, %v863_v43 }
 0x136   : > { %v855_v49 = vrot.slane %v854_v46, 4  ;;  %v867_v50 = vadd.f32 %v866_v48, %v864_v47 }
 0x138   : > { %v856_v51 = vadd.f32 %v855_v49, %v854_v46  ;;  %v868_v52 = vrot.slane %v867_v50, 4 }
 0x13a   : > { %v857_v53 = vrot.slane %v856_v51, 2  ;;  %v869_v54 = vadd.f32 %v868_v52, %v867_v50 }
 0x13c   : > { %v858_v55 = vadd.f32 %v857_v53, %v856_v51  ;;  %v870_v56 = vrot.slane %v869_v54, 2  ;;  %877 = sbr.rel (%p1089_p5) target bundleno = 325 (0x145), region = 32 }
 0x13e   : > { %v859_v57 = vrot.slane %v858_v55, 1  ;;  %v871_v58 = vadd.f32 %v870_v56, %v869_v54 }
 0x140   : > { %v860_v59 = vadd.f32 %v859_v57, %v858_v55  ;;  %v872_v60 = vrot.slane %v871_v58, 1 }
 0x142   : > { %v873_v61 = vadd.f32 %v872_v60, %v871_v58  ;;  %878 = vst [vmem:[%s1463_s3] sm:$0x1] (!%p1089_p5), %v860_v59 }
 0x144   : > { %879 = vst [vmem:[%s1463_s3 + $0x1] sm:$0x1] %v873_v61 }
 0x145 PF: > { %p1090_p6 = scmp.eq.s32.totalorder %s1301_s12, 0 }
 0x147   : > { %883 = sbr.rel (%p1090_p6) target bundleno = 335 (0x14f), region = 36 }
 0x14b   : > { %v884_v62 = vld [vmem:[%s1463_s3] sm:$0x1] (!%p1090_p6)  ;;  %v887_v63 = vld [vmem:[%s1463_s3 + $0x1] sm:$0x1] (!%p1090_p6) }
 0x14c   : > { %v885_v0 = vadd.f32 (!%p1090_p6), %v884_v62, %v860_v59  ;;  %v888_v1 = vadd.f32 (!%p1090_p6), %v887_v63, %v873_v61 }
 0x14e   : > { %886 = vst [vmem:[%s1463_s3] sm:$0x1] %v885_v0  ;;  %889 = vst [vmem:[%s1463_s3 + $0x1] sm:$0x1] %v888_v1 }
 0x14f PF: > { %s14_s14 = sadd.s32 1, %s1309_s14   ;;  %s1464_s12 = smov %s1305_s13 }
 0x150   : > { %p11_p7 = scmp.ge.s32.totalorder %s14_s14, 6   ;;  %s1465_s13 = smov %s1467_s15 }
 0x152   :  { %13 = sbr.rel (!%p11_p7) target bundleno = 2 (0x2), region = 81 }

// kernel: generator_forward.12
= control target key start
LH: loop header
LB: loop body
LE: loop exit
PB: predicated region body
PF: predicated region fallthrough
CT: control target
= control target key end

     0   :  { %v41_v5 = vlaneseq  ;;  %s415_s1 = inlined_call_operand.vmem [shape: f32[2,128], index: 1, kind: input, shape index: {}]   ;;  %s416_s0 = inlined_call_operand.vmem [shape: f32[128,128], index: 0, kind: input, shape index: {}]   ;;  %s417_s2 = inlined_call_operand.vmem [shape: f32[1,128], index: 2, kind: input, shape index: {}]   ;;  %s418_s3 = inlined_call_operand.vmem [shape: f32[1,128], index: 3, kind: input, shape index: {}]   ;;  %s419_s4 = inlined_call_operand.vmem [shape: bf16[128,128], index: 4, kind: output, shape index: {}]  }
   0x1   :  { %v17_v0 = vld [vmem:[%s415_s1] sm:$0x1]  ;;  %v19_v1 = vld [vmem:[%s415_s1 + $0x1] sm:$0x1]  ;;  %v26_v11 = vld [vmem:[%s416_s0 + $0x8] sm:$0xff] }
   0x2   :  { %v18_v2 = vmul.f32 0.0078125, %v17_v0  ;;  %v20_v3 = vmul.f32 0.0078125, %v19_v1  ;;  %v42_v8 = vshrl.u32 %v41_v5, 7  ;;  %v25_v10 = vld [vmem:[%s416_s0] sm:$0xff]  ;;  %v27_v14 = vld [vmem:[%s416_s0 + $0x10] sm:$0xff]  ;;  %v28_v15 = vld [vmem:[%s416_s0 + $0x18] sm:$0xff] }
   0x3   :  { %v61_v13 = vld [vmem:[%s417_s2] sm:$0x1]  ;;  %v30_v17 = vld [vmem:[%s416_s0 + $0x28] sm:$0xff]  ;;  %v31_v18 = vld [vmem:[%s416_s0 + $0x30] sm:$0xff] }
   0x4   :  { %v21_v4 = vmul.f32 %v18_v2, %v18_v2  ;;  %v43_v9 = vsub.s32 0, %v42_v8  ;;  %v29_v16 = vld [vmem:[%s416_s0 + $0x20] sm:$0xff]  ;;  %v32_v19 = vld [vmem:[%s416_s0 + $0x38] sm:$0xff]  ;;  %v34_v21 = vld [vmem:[%s416_s0 + $0x48] sm:$0xff] }
   0x5   :  { %v33_v20 = vld [vmem:[%s416_s0 + $0x40] sm:$0xff]  ;;  %v35_v25 = vld [vmem:[%s416_s0 + $0x50] sm:$0xff]  ;;  %v36_v26 = vld [vmem:[%s416_s0 + $0x58] sm:$0xff] }
   0x6   :  { %v22_v6 = vsub.f32 %v20_v3, %v21_v4  ;;  %v325_v12 = vrot.slane %v18_v2, %v43_v9  ;;  %v37_v27 = vld [vmem:[%s416_s0 + $0x60] sm:$0xff]  ;;  %v38_v32 = vld [vmem:[%s416_s0 + $0x68] sm:$0xff]  ;;  %v39_v33 = vld [vmem:[%s416_s0 + $0x70] sm:$0xff] }
   0x7   :  { %v40_v34 = vld [vmem:[%s416_s0 + $0x78] sm:$0xff]  ;;  %v206_v43 = vld [vmem:[%s418_s3] ss:$0 sm:$0xff] }
   0x8   :  { %v23_v7 = vadd.f32 1e-05, %v22_v6  ;;  %v45_v23 = vsub.f32 %v25_v10, %v325_v12  ;;  %v46_v24 = vsub.f32 %v26_v11, %v325_v12  ;;  %v47_v29 = vsub.f32 %v27_v14, %v325_v12 }
   0x9   :  { %v48_v30 = vsub.f32 %v28_v15, %v325_v12  ;;  %v49_v31 = vsub.f32 %v29_v16, %v325_v12  ;;  %v50_v35 = vsub.f32 %v30_v17, %v325_v12  ;;  %v51_v36 = vsub.f32 %v31_v18, %v325_v12 }
   0xa   :  { %286 = vrsqrt.f32 %v23_v7  ;;  %v52_v37 = vsub.f32 %v32_v19, %v325_v12  ;;  %v53_v38 = vsub.f32 %v33_v20, %v325_v12  ;;  %v54_v40 = vsub.f32 %v34_v21, %v325_v12 }
   0xb   :  { %v55_v41 = vsub.f32 %v35_v25, %v325_v12  ;;  %v56_v42 = vsub.f32 %v36_v26, %v325_v12  ;;  %v57_v44 = vsub.f32 %v37_v27, %v325_v12  ;;  %v58_v45 = vsub.f32 %v38_v32, %v325_v12 }
   0xc   :  { %v59_v46 = vsub.f32 %v39_v33, %v325_v12  ;;  %v60_v47 = vsub.f32 %v40_v34, %v325_v12 }
  0x14   :  { %v287_v22 = vpop.eup %286 }
  0x15   :  { %v62_v28 = vmul.f32 %v287_v22, %v61_v13 }
  0x17   :  { %v66_v39 = vrot.slane %v62_v28, %v43_v9 }
  0x19   :  { %v67_v48 = vmul.f32 %v66_v39, %v45_v23  ;;  %v68_v49 = vmul.f32 %v66_v39, %v46_v24  ;;  %v69_v50 = vmul.f32 %v66_v39, %v47_v29  ;;  %v70_v51 = vmul.f32 %v66_v39, %v48_v30 }
  0x1a   :  { %v71_v52 = vmul.f32 %v66_v39, %v49_v31  ;;  %v72_v53 = vmul.f32 %v66_v39, %v50_v35  ;;  %v73_v54 = vmul.f32 %v66_v39, %v51_v36  ;;  %v74_v55 = vmul.f32 %v66_v39, %v52_v37 }
  0x1b   :  { %v90_v56 = vadd.f32 %v206_v43, %v67_v48  ;;  %v91_v57 = vadd.f32 %v206_v43, %v68_v49  ;;  %v92_v58 = vadd.f32 %v206_v43, %v69_v50  ;;  %v93_v59 = vadd.f32 %v206_v43, %v70_v51 }
  0x1c   :  { %v94_v60 = vadd.f32 %v206_v43, %v71_v52  ;;  %v95_v61 = vadd.f32 %v206_v43, %v72_v53  ;;  %v96_v62 = vadd.f32 %v206_v43, %v73_v54  ;;  %v97_v63 = vadd.f32 %v206_v43, %v74_v55 }
  0x1d   :  { %v106_v0 = vmax.f32 %v90_v56, 0.0  ;;  %v107_v1 = vmax.f32 %v91_v57, 0.0  ;;  %v108_v2 = vmax.f32 %v92_v58, 0.0  ;;  %v109_v3 = vmax.f32 %v93_v59, 0.0 }
  0x1e   :  { %v110_v4 = vmax.f32 %v94_v60, 0.0  ;;  %v111_v5 = vmax.f32 %v95_v61, 0.0  ;;  %v112_v6 = vmax.f32 %v96_v62, 0.0  ;;  %v113_v7 = vmax.f32 %v97_v63, 0.0 }
  0x1f   :  { %v242_v8 = vpack.c.bf16 %v107_v1, %v106_v0  ;;  %v247_v9 = vpack.c.bf16 %v109_v3, %v108_v2  ;;  %v75_v10 = vmul.f32 %v66_v39, %v53_v38  ;;  %v76_v11 = vmul.f32 %v66_v39, %v54_v40 }
  0x20   :  { %v252_v12 = vpack.c.bf16 %v111_v5, %v110_v4  ;;  %v257_v13 = vpack.c.bf16 %v113_v7, %v112_v6  ;;  %v77_v14 = vmul.f32 %v66_v39, %v55_v41  ;;  %v78_v15 = vmul.f32 %v66_v39, %v56_v42 }
  0x21   :  { %243 = vst [vmem:[%s419_s4] sm:$0xff] %v242_v8   ;;  %279 = vst [vmem:[%s419_s4 + $0x8] sm:$0xff] %v247_v9   ;;  %v98_v16 = vadd.f32 %v206_v43, %v75_v10  ;;  %v99_v17 = vadd.f32 %v206_v43, %v76_v11  ;;  %v79_v18 = vmul.f32 %v66_v39, %v57_v44 }
  0x22   :  { %v80_v19 = vmul.f32 %v66_v39, %v58_v45  ;;  %280 = vst [vmem:[%s419_s4 + $0x10] sm:$0xff] %v252_v12   ;;  %281 = vst [vmem:[%s419_s4 + $0x18] sm:$0xff] %v257_v13   ;;  %v100_v20 = vadd.f32 %v206_v43, %v77_v14  ;;  %v101_v21 = vadd.f32 %v206_v43, %v78_v15 }
  0x23   :  { %v81_v22 = vmul.f32 %v66_v39, %v59_v46  ;;  %v82_v23 = vmul.f32 %v66_v39, %v60_v47  ;;  %v114_v24 = vmax.f32 %v98_v16, 0.0  ;;  %v115_v25 = vmax.f32 %v99_v17, 0.0 }
  0x24   :  { %v102_v26 = vadd.f32 %v206_v43, %v79_v18  ;;  %v103_v27 = vadd.f32 %v206_v43, %v80_v19  ;;  %v116_v28 = vmax.f32 %v100_v20, 0.0  ;;  %v117_v29 = vmax.f32 %v101_v21, 0.0 }
  0x25   :  { %v104_v30 = vadd.f32 %v206_v43, %v81_v22  ;;  %v105_v31 = vadd.f32 %v206_v43, %v82_v23  ;;  %v262_v32 = vpack.c.bf16 %v115_v25, %v114_v24 }
  0x26   :  { %v118_v33 = vmax.f32 %v102_v26, 0.0  ;;  %v119_v34 = vmax.f32 %v103_v27, 0.0  ;;  %v267_v35 = vpack.c.bf16 %v117_v29, %v116_v28 }
  0x27   :  { %v120_v36 = vmax.f32 %v104_v30, 0.0  ;;  %v121_v37 = vmax.f32 %v105_v31, 0.0  ;;  %282 = vst [vmem:[%s419_s4 + $0x20] sm:$0xff] %v262_v32  }
  0x28   :  { %v272_v38 = vpack.c.bf16 %v119_v34, %v118_v33  ;;  %283 = vst [vmem:[%s419_s4 + $0x28] sm:$0xff] %v267_v35  }
  0x29   :  { %v277_v39 = vpack.c.bf16 %v121_v37, %v120_v36 }
  0x2a   :  { %284 = vst [vmem:[%s419_s4 + $0x30] sm:$0xff] %v272_v38  }
  0x2b   :  { %285 = vst [vmem:[%s419_s4 + $0x38] sm:$0xff] %v277_v39  }

// kernel: generator_forward.13
= control target key start
LH: loop header
LB: loop body
LE: loop exit
PB: predicated region body
PF: predicated region fallthrough
CT: control target
= control target key end

     0   :  { %s1311_s12 = smov 0   ;;  %s1313_s13 = smov 0   ;;  %s1455_s0 = inlined_call_operand.vmem [shape: bf16[4,128,384], index: 0, kind: input, shape index: {}]   ;;  %s1456_s1 = inlined_call_operand.vmem [shape: bf16[4,384,128], index: 1, kind: input, shape index: {}]   ;;  %s1457_s2 = inlined_call_operand.vmem [shape: f32[4,128,128], index: 2, kind: output, shape index: {0}]   ;;  %s1458_s3 = inlined_call_operand.vmem [shape: f32[1,2,128], index: 3, kind: output, shape index: {1}]  }
   0x1   :  { %s1315_s14 = smov 0  }
   0x2 LB: > { %s23_s15 = sadd.s32 1, %s1285_s13  ;;  %p1015_p0 = scmp.ge.s32.totalorder %s1289_s14, 1  ;;  %s1289_s14 = sphi %s1315_s14, %s14_s14   ;;  %s1285_s13 = sphi %s1313_s13, %s1460_s13   ;;  %s1281_s12 = sphi %s1311_s12, %s1459_s12  }
   0x3   : > { %p24_p1 = scmp.ge.s32.totalorder %s23_s15, 4  ;;  %p172_p2 = scmp.lt.s32.totalorder %s1289_s14, 5 }
   0x5   : > { %s1462_s15 = smov (%p24_p1, %s23_s15), 0  ;;  %p173_p3 = pnand %p1015_p0, %p172_p2 }
   0x6   : > { %p215_p4 = scmp.lt.s32.totalorder (!%p173_p3), %s1281_s12, 3  ;;  %p1068_p5 = scmp.ne.s32.totalorder (!%p173_p3), %s1281_s12, 0 }
   0x7   : > { %176 = sbr.rel (%p173_p3) target bundleno = 354 (0x162), region = 28 }
   0xe   : > { %s1333_s16 = scalar_select %p215_p4, %s1281_s12, 3 }
  0x10   : > { %s1186_s17 = smul.u32 192, %s1333_s16  ;;  %s1073_s24 = sshll.u32 %s1333_s16, 7 }
  0x11   : > { %s1402_s27 = scalar_lea.vmem %s1457_s2, %s1073_s24 }
  0x12   : > { %s1341_s20 = scalar_lea.vmem %s1456_s1, %s1186_s17  ;;  %s1369_s23 = scalar_lea.vmem %s1455_s0, %s1186_s17 }
  0x13   : > { %v1211_v0 = vld [vmem:[%s1341_s20 + $0x40] sm:$0xff]   ;;  %v1214_v3 = vld [vmem:[%s1341_s20 + $0x48] sm:$0xff]   ;;  %v1217_v6 = vld [vmem:[%s1341_s20 + $0x50] sm:$0xff]  }
  0x14   : > { %v1212_v1 = vld [vmem:[%s1341_s20] sm:$0xff]   ;;  %1074 = vmatprep.subr.bf16.mxu0 %v1211_v0  ;;  %v1215_v4 = vld [vmem:[%s1341_s20 + $0x8] sm:$0xff]   ;;  %v1218_v7 = vld [vmem:[%s1341_s20 + $0x10] sm:$0xff]  }
  0x15   : > { %v1213_v2 = vld [vmem:[%s1341_s20 + $0x80] sm:$0xff]   ;;  %1075 = vmatpush3.bf16.msra.mxu0 %v1212_v1  ;;  %v1216_v5 = vld [vmem:[%s1341_s20 + $0x88] sm:$0xff]   ;;  %v1219_v8 = vld [vmem:[%s1341_s20 + $0x90] sm:$0xff]  }
  0x16   : > { %1154 = vmatprep.subr.bf16.mxu1 %v1213_v2  ;;  %1076 = vmatprep.subr.bf16.mxu0 %v1214_v3  ;;  %v1220_v9 = vld [vmem:[%s1341_s20 + $0x58] sm:$0xff]   ;;  %v1223_v12 = vld [vmem:[%s1341_s20 + $0x60] sm:$0xff]   ;;  %v1226_v15 = vld [vmem:[%s1341_s20 + $0x68] sm:$0xff]  }
  0x17   : > { %1155 = vmatpush3.bf16.msra.mxu1 %v1213_v2  ;;  %v1221_v10 = vld [vmem:[%s1341_s20 + $0x18] sm:$0xff]   ;;  %v1225_v13 = vld [vmem:[%s1341_s20 + $0xa0] sm:$0xff]   ;;  %v1228_v16 = vld [vmem:[%s1341_s20 + $0xa8] sm:$0xff]  }
  0x18   : > { %1156 = vmatprep.subr.bf16.mxu1 %v1216_v5  ;;  %v1222_v11 = vld [vmem:[%s1341_s20 + $0x98] sm:$0xff]   ;;  %v1224_v14 = vld [vmem:[%s1341_s20 + $0x20] sm:$0xff]   ;;  %v1227_v17 = vld [vmem:[%s1341_s20 + $0x28] sm:$0xff]  }
  0x19   : > { %1077 = vmatpush3.bf16.msra.mxu0 %v1215_v4  ;;  %v1229_v18 = vld [vmem:[%s1341_s20 + $0x70] sm:$0xff]   ;;  %v1232_v21 = vld [vmem:[%s1341_s20 + $0x78] sm:$0xff]   ;;  %v1235_v26 = vld [vmem:[%s1369_s23] ss:$12 sps:$4 sm:$0xff]  }
  0x1a   : > { %1078 = vmatprep.subr.bf16.mxu0 %v1217_v6  ;;  %v1230_v19 = vld [vmem:[%s1341_s20 + $0x30] sm:$0xff]   ;;  %v1234_v22 = vld [vmem:[%s1341_s20 + $0xb8] sm:$0xff]   ;;  %v1239_v28 = vld [vmem:[%s1369_s23 + $0x20] ss:$12 sps:$4 sm:$0xff]  }
  0x1b   : > { %1157 = vmatpush3.bf16.msra.mxu1 %v1216_v5  ;;  %v1231_v20 = vld [vmem:[%s1341_s20 + $0xb0] sm:$0xff]   ;;  %v1233_v25 = vld [vmem:[%s1341_s20 + $0x38] sm:$0xff]   ;;  %v1255_v36 = vld [vmem:[%s1369_s23 + $0x80] ss:$12 sps:$4 sm:$0xff]  }
  0x1c   : > { %1158 = vmatprep.subr.bf16.mxu1 %v1219_v8  ;;  %v1237_v23 = vld [vmem:[%s1369_s23 + $0x4] ss:$12 sps:$4 sm:$0xff]   ;;  %v1238_v24 = vld [vmem:[%s1369_s23 + $0x8] ss:$12 sps:$4 sm:$0xff]   ;;  %v1248_v35 = vld [vmem:[%s1369_s23 + $0x4c] ss:$12 sps:$4 sm:$0xff]  }
  0x1d   : > { %1079 = vmatpush3.bf16.msra.mxu0 %v1218_v7  ;;  %629 = vmatprep.mubr.bf16.mxu0 %v1237_v23  ;;  %v1240_v27 = vld [vmem:[%s1369_s23 + $0x1c] ss:$12 sps:$4 sm:$0xff]   ;;  %v1246_v29 = vld [vmem:[%s1369_s23 + $0x38] ss:$12 sps:$4 sm:$0xff]   ;;  %v1243_v31 = vld [vmem:[%s1369_s23 + $0x34] ss:$12 sps:$4 sm:$0xff]  }
  0x1e   : > { %1080 = vmatprep.subr.bf16.mxu0 %v1220_v9  ;;  %1170 = vmatprep.mubr.bf16.mxu1 %v1238_v24  ;;  %v1242_v30 = vld [vmem:[%s1369_s23 + $0x18] ss:$12 sps:$4 sm:$0xff]   ;;  %v1247_v32 = vld [vmem:[%s1369_s23 + $0x50] ss:$12 sps:$4 sm:$0xff]   ;;  %v1254_v33 = vld [vmem:[%s1369_s23 + $0x68] ss:$12 sps:$4 sm:$0xff]  }
  0x1f   : > { %1159 = vmatpush3.bf16.msra.mxu1 %v1219_v8  ;;  %v1245_v34 = vld [vmem:[%s1369_s23 + $0x30] ss:$12 sps:$4 sm:$0xff]   ;;  %v1262_v37 = vld [vmem:[%s1369_s23 + $0x98] ss:$12 sps:$4 sm:$0xff]   ;;  %v1250_v38 = vld [vmem:[%s1369_s23 + $0x48] ss:$12 sps:$4 sm:$0xff]  }
  0x20   : > { %1160 = vmatprep.subr.bf16.mxu1 %v1222_v11  ;;  %v1251_v39 = vld [vmem:[%s1369_s23 + $0x64] ss:$12 sps:$4 sm:$0xff]   ;;  %v1253_v41 = vld [vmem:[%s1369_s23 + $0x60] ss:$12 sps:$4 sm:$0xff]   ;;  %v1256_v42 = vld [vmem:[%s1369_s23 + $0x7c] ss:$12 sps:$4 sm:$0xff]  }
  0x21   : > { %1081 = vmatpush3.bf16.msra.mxu0 %v1221_v10  ;;  %v1263_v40 = vld [vmem:[%s1369_s23 + $0xb0] ss:$12 sps:$4 sm:$0xff]   ;;  %v1258_v43 = vld [vmem:[%s1369_s23 + $0x78] ss:$12 sps:$4 sm:$0xff]   ;;  %v1259_v44 = vld [vmem:[%s1369_s23 + $0x94] ss:$12 sps:$4 sm:$0xff]  }
  0x22   : > { %1082 = vmatprep.subr.bf16.mxu0 %v1223_v12  ;;  %v1261_v45 = vld [vmem:[%s1369_s23 + $0x90] ss:$12 sps:$4 sm:$0xff]   ;;  %v1264_v46 = vld [vmem:[%s1369_s23 + $0xac] ss:$12 sps:$4 sm:$0xff]   ;;  %v1266_v47 = vld [vmem:[%s1369_s23 + $0xa8] ss:$12 sps:$4 sm:$0xff]  }
  0x23   : > { %1161 = vmatpush3.bf16.msra.mxu1 %v1222_v11 }
  0x24   : > { %1162 = vmatprep.subr.bf16.mxu1 %v1225_v13 }
  0x25   : > { %1083 = vmatpush3.bf16.msra.mxu0 %v1224_v14 }
  0x26   : > { %1084 = vmatprep.subr.bf16.mxu0 %v1226_v15 }
  0x27   : > { %1163 = vmatpush3.bf16.msra.mxu1 %v1225_v13 }
  0x28   : > { %1164 = vmatprep.subr.bf16.mxu1 %v1228_v16 }
  0x29   : > { %1085 = vmatpush3.bf16.msra.mxu0 %v1227_v17 }
  0x2a   : > { %1086 = vmatprep.subr.bf16.mxu0 %v1229_v18 }
  0x2b   : > { %1165 = vmatpush3.bf16.msra.mxu1 %v1228_v16 }
  0x2c   : > { %1166 = vmatprep.subr.bf16.mxu1 %v1231_v20 }
  0x2d   : > { %1087 = vmatpush3.bf16.msra.mxu0 %v1230_v19 }
  0x2e   : > { %1088 = vmatprep.subr.bf16.mxu0 %v1232_v21 }
  0x2f   : > { %1167 = vmatpush3.bf16.msra.mxu1 %v1231_v20 }
  0x30   : > { %1168 = vmatprep.subr.bf16.mxu1 %v1234_v22 }
  0x31   : > { %1089 = vmatpush3.bf16.msra.mxu0 %v1233_v25 }
  0x33   : > { %1169 = vmatpush3.bf16.msra.mxu1 %v1234_v22 }
  0x34   : > { %630 = vmatmul.mubr.bf16.vlgmr.msra.gmra.mrb[0].mxu0 %v1235_v26 }
  0x35   : > { %637 = vmatprep.mubr.bf16.mxu0 %v1240_v27 }
  0x36   : > { %1171 = vmatmul.mubr.bf16.vlgmr.msra.gmra.mrb[0].mxu1 %v1239_v28 }
  0x37   : > { %1174 = vmatprep.mubr.bf16.mxu1 %v1246_v29 }
  0x3c   : > { %638 = vmatmul.mubr.bf16.gmra.mrb[4].mxu0 %v1242_v30 }
  0x3d   : > { %645 = vmatprep.mubr.bf16.mxu0 %v1243_v31 }
  0x3e   : > { %1175 = vmatmul.mubr.bf16.gmra.mrb[4].mxu1 %v1247_v32 }
  0x3f   : > { %1178 = vmatprep.mubr.bf16.mxu1 %v1254_v33 }
  0x44   : > { %646 = vmatmul.mubr.bf16.gmra.mrb[8].mxu0 %v1245_v34 }
  0x45   : > { %653 = vmatprep.mubr.bf16.mxu0 %v1248_v35 }
  0x46   : > { %1179 = vmatmul.mubr.bf16.gmra.mrb[8].mxu1 %v1255_v36 }
  0x47   : > { %1182 = vmatprep.mubr.bf16.mxu1 %v1262_v37 }
  0x4c   : > { %654 = vmatmul.mubr.bf16.gmra.mrb[12].mxu0 %v1250_v38 }
  0x4d   : > { %661 = vmatprep.mubr.bf16.mxu0 %v1251_v39 }
  0x4e   : > { %1183 = vmatmul.mubr.bf16.gmra.mrb[12].mxu1 %v1263_v40 }
  0x54   : > { %662 = vmatmul.mubr.bf16.gmra.mrb[16].mxu0 %v1253_v41 }
  0x55   : > { %669 = vmatprep.mubr.bf16.mxu0 %v1256_v42 }
  0x5c   : > { %670 = vmatmul.mubr.bf16.gmra.mrb[20].mxu0 %v1258_v43 }
  0x5d   : > { %677 = vmatprep.mubr.bf16.mxu0 %v1259_v44 }
  0x64   : > { %678 = vmatmul.mubr.bf16.gmra.mrb[24].mxu0 %v1261_v45 }
  0x65   : > { %685 = vmatprep.mubr.bf16.mxu0 %v1264_v46 }
  0x6c   : > { %686 = vmatmul.mubr.bf16.gmra.mrb[28].mxu0 %v1266_v47 }
 0x107   : > { %v1090_v48 = vpop.f32.mrb[0].mxu0 }
 0x108   : > { %v1091_v49 = vpop.f32.mrb[1].mxu0 }
 0x109   : > { %v1092_v50 = vadd.f32 %v1091_v49, %v1090_v48  ;;  %v1093_v51 = vpop.f32.mrb[2].mxu0  ;;  %v1172_v52 = vpop.f32.mrb[0].mxu1 }
 0x10a   : > { %v1094_v53 = vpop.f32.mrb[3].mxu0  ;;  %v728_v54 = vpop.f32.mrb[1].mxu1 }
 0x10b   : > { %v1095_v55 = vadd.f32 %v1094_v53, %v1093_v51  ;;  %v729_v56 = vadd.f32 %v1092_v50, %v728_v54  ;;  %v1173_v57 = vpop.f32.mrb[2].mxu1 }
 0x10c   : > { %v731_v58 = vpop.f32.mrb[3].mxu1 }
 0x10d   : > { %791 = vst [vmem:[%s1402_s27] sm:$0xff] %v729_v56  ;;  %v732_v59 = vadd.f32 %v1095_v55, %v731_v58  ;;  %v828_v60 = vmul.f32 %v729_v56, %v729_v56 }
 0x10f   : > { %792 = vst [vmem:[%s1402_s27 + $0x8] sm:$0xff] %v732_v59  ;;  %v807_v61 = vadd.f32 %v732_v59, %v729_v56  ;;  %v829_v62 = vmul.f32 %v732_v59, %v732_v59  ;;  %v1096_v63 = vpop.f32.mrb[4].mxu0 }
 0x110   : > { %v1097_v0 = vpop.f32.mrb[5].mxu0 }
 0x111   : > { %v844_v1 = vadd.f32 %v829_v62, %v828_v60  ;;  %v1098_v2 = vadd.f32 %v1097_v0, %v1096_v63  ;;  %v1099_v3 = vpop.f32.mrb[6].mxu0  ;;  %v1176_v4 = vpop.f32.mrb[4].mxu1 }
 0x112   : > { %v1100_v5 = vpop.f32.mrb[7].mxu0  ;;  %v744_v6 = vpop.f32.mrb[5].mxu1 }
 0x113   : > { %v737_v7 = vadd.f32 %v1172_v52, %v1098_v2  ;;  %v1101_v8 = vadd.f32 %v1100_v5, %v1099_v3  ;;  %v1177_v9 = vpop.f32.mrb[6].mxu1 }
 0x114   : > { %v747_v10 = vpop.f32.mrb[7].mxu1 }
 0x115   : > { %793 = vst [vmem:[%s1402_s27 + $0x10] sm:$0xff] %v737_v7  ;;  %v808_v11 = vadd.f32 %v807_v61, %v737_v7  ;;  %v830_v12 = vmul.f32 %v737_v7, %v737_v7  ;;  %v740_v13 = vadd.f32 %v1173_v57, %v1101_v8 }
 0x117   : > { %v845_v14 = vadd.f32 %v844_v1, %v830_v12  ;;  %794 = vst [vmem:[%s1402_s27 + $0x18] sm:$0xff] %v740_v13  ;;  %v831_v15 = vmul.f32 %v740_v13, %v740_v13  ;;  %v1102_v16 = vpop.f32.mrb[8].mxu0  ;;  %v809_v17 = vadd.f32 %v808_v11, %v740_v13 }
 0x118   : > { %v1103_v18 = vpop.f32.mrb[9].mxu0 }
 0x119   : > { %v1104_v19 = vadd.f32 %v1103_v18, %v1102_v16  ;;  %v1105_v20 = vpop.f32.mrb[10].mxu0  ;;  %v846_v21 = vadd.f32 %v845_v14, %v831_v15  ;;  %v1180_v22 = vpop.f32.mrb[8].mxu1 }
 0x11a   : > { %v1106_v23 = vpop.f32.mrb[11].mxu0  ;;  %v760_v24 = vpop.f32.mrb[9].mxu1 }
 0x11b   : > { %v1107_v25 = vadd.f32 %v1106_v23, %v1105_v20  ;;  %v745_v26 = vadd.f32 %v1104_v19, %v744_v6  ;;  %v1181_v27 = vpop.f32.mrb[10].mxu1 }
 0x11c   : > { %v763_v28 = vpop.f32.mrb[11].mxu1 }
 0x11d   : > { %795 = vst [vmem:[%s1402_s27 + $0x20] sm:$0xff] %v745_v26  ;;  %v810_v29 = vadd.f32 %v809_v17, %v745_v26  ;;  %v832_v30 = vmul.f32 %v745_v26, %v745_v26  ;;  %v748_v31 = vadd.f32 %v1107_v25, %v747_v10 }
 0x11f   : > { %v847_v32 = vadd.f32 %v846_v21, %v832_v30  ;;  %796 = vst [vmem:[%s1402_s27 + $0x28] sm:$0xff] %v748_v31  ;;  %v811_v33 = vadd.f32 %v810_v29, %v748_v31  ;;  %v833_v34 = vmul.f32 %v748_v31, %v748_v31  ;;  %v1108_v35 = vpop.f32.mrb[12].mxu0 }
 0x120   : > { %v1109_v36 = vpop.f32.mrb[13].mxu0 }
 0x121   : > { %v848_v37 = vadd.f32 %v847_v32, %v833_v34  ;;  %v1110_v38 = vadd.f32 %v1109_v36, %v1108_v35  ;;  %v1111_v39 = vpop.f32.mrb[14].mxu0  ;;  %v1410_v40 = vpop.f32.mrb[12].mxu1 }
 0x122   : > { %v1112_v41 = vpop.f32.mrb[15].mxu0  ;;  %v776_v42 = vpop.f32.mrb[13].mxu1 }
 0x123   : > { %v753_v43 = vadd.f32 %v1176_v4, %v1110_v38  ;;  %v1113_v44 = vadd.f32 %v1112_v41, %v1111_v39  ;;  %v1412_v45 = vpop.f32.mrb[14].mxu1 }
 0x124   : > { %v779_v46 = vpop.f32.mrb[15].mxu1 }
 0x125   : > { %797 = vst [vmem:[%s1402_s27 + $0x30] sm:$0xff] %v753_v43  ;;  %v812_v47 = vadd.f32 %v811_v33, %v753_v43  ;;  %v834_v48 = vmul.f32 %v753_v43, %v753_v43  ;;  %v756_v49 = vadd.f32 %v1177_v9, %v1113_v44 }
 0x127   : > { %v849_v50 = vadd.f32 %v848_v37, %v834_v48  ;;  %798 = vst [vmem:[%s1402_s27 + $0x38] sm:$0xff] %v756_v49  ;;  %v835_v51 = vmul.f32 %v756_v49, %v756_v49  ;;  %v1114_v52 = vpop.f32.mrb[16].mxu0  ;;  %v813_v53 = vadd.f32 %v812_v47, %v756_v49 }
 0x128   : > { %v1115_v54 = vpop.f32.mrb[17].mxu0 }
 0x129   : > { %v1116_v55 = vadd.f32 %v1115_v54, %v1114_v52  ;;  %v1117_v56 = vpop.f32.mrb[18].mxu0  ;;  %v850_v57 = vadd.f32 %v849_v50, %v835_v51 }
 0x12a   : > { %v1118_v58 = vpop.f32.mrb[19].mxu0 }
 0x12b   : > { %v1119_v59 = vadd.f32 %v1118_v58, %v1117_v56  ;;  %v761_v60 = vadd.f32 %v1116_v55, %v760_v24 }
 0x12d   : > { %799 = vst [vmem:[%s1402_s27 + $0x40] sm:$0xff] %v761_v60  ;;  %v814_v61 = vadd.f32 %v813_v53, %v761_v60  ;;  %v836_v62 = vmul.f32 %v761_v60, %v761_v60  ;;  %v764_v63 = vadd.f32 %v1119_v59, %v763_v28 }
 0x12f   : > { %v851_v0 = vadd.f32 %v850_v57, %v836_v62  ;;  %800 = vst [vmem:[%s1402_s27 + $0x48] sm:$0xff] %v764_v63  ;;  %v815_v1 = vadd.f32 %v814_v61, %v764_v63  ;;  %v837_v2 = vmul.f32 %v764_v63, %v764_v63  ;;  %v1120_v3 = vpop.f32.mrb[20].mxu0 }
 0x130   : > { %v1121_v4 = vpop.f32.mrb[21].mxu0 }
 0x131   : > { %v852_v5 = vadd.f32 %v851_v0, %v837_v2  ;;  %v1122_v6 = vadd.f32 %v1121_v4, %v1120_v3  ;;  %v1123_v7 = vpop.f32.mrb[22].mxu0 }
 0x132   : > { %v1124_v8 = vpop.f32.mrb[23].mxu0 }
 0x133   : > { %v769_v9 = vadd.f32 %v1180_v22, %v1122_v6  ;;  %v1125_v10 = vadd.f32 %v1124_v8, %v1123_v7 }
 0x135   : > { %801 = vst [vmem:[%s1402_s27 + $0x50] sm:$0xff] %v769_v9  ;;  %v816_v11 = vadd.f32 %v815_v1, %v769_v9  ;;  %v838_v12 = vmul.f32 %v769_v9, %v769_v9  ;;  %v772_v13 = vadd.f32 %v1181_v27, %v1125_v10 }
 0x137   : > { %v853_v14 = vadd.f32 %v852_v5, %v838_v12  ;;  %802 = vst [vmem:[%s1402_s27 + $0x58] sm:$0xff] %v772_v13  ;;  %v839_v15 = vmul.f32 %v772_v13, %v772_v13  ;;  %v1126_v16 = vpop.f32.mrb[24].mxu0  ;;  %v817_v17 = vadd.f32 %v816_v11, %v772_v13 }
 0x138   : > { %v1127_v18 = vpop.f32.mrb[25].mxu0 }
 0x139   : > { %v1128_v19 = vadd.f32 %v1127_v18, %v1126_v16  ;;  %v1129_v20 = vpop.f32.mrb[26].mxu0  ;;  %v854_v21 = vadd.f32 %v853_v14, %v839_v15 }
 0x13a   : > { %v1130_v23 = vpop.f32.mrb[27].mxu0 }
 0x13b   : > { %v1131_v24 = vadd.f32 %v1130_v23, %v1129_v20  ;;  %v777_v25 = vadd.f32 %v1128_v19, %v776_v42 }
 0x13d   : > { %803 = vst [vmem:[%s1402_s27 + $0x60] sm:$0xff] %v777_v25  ;;  %v818_v22 = vadd.f32 %v817_v17, %v777_v25  ;;  %v840_v26 = vmul.f32 %v777_v25, %v777_v25  ;;  %v780_v28 = vadd.f32 %v1131_v24, %v779_v46 }
 0x13f   : > { %v855_v29 = vadd.f32 %v854_v21, %v840_v26  ;;  %804 = vst [vmem:[%s1402_s27 + $0x68] sm:$0xff] %v780_v28  ;;  %v819_v27 = vadd.f32 %v818_v22, %v780_v28  ;;  %v841_v30 = vmul.f32 %v780_v28, %v780_v28  ;;  %v1132_v31 = vpop.f32.mrb[28].mxu0 }
 0x140   : > { %v1133_v32 = vpop.f32.mrb[29].mxu0 }
 0x141   : > { %v856_v33 = vadd.f32 %v855_v29, %v841_v30  ;;  %v1134_v34 = vadd.f32 %v1133_v32, %v1132_v31  ;;  %v1135_v35 = vpop.f32.mrb[30].mxu0 }
 0x142   : > { %v1136_v36 = vpop.f32.mrb[31].mxu0 }
 0x143   : > { %v785_v37 = vadd.f32 %v1410_v40, %v1134_v34  ;;  %v1137_v38 = vadd.f32 %v1136_v36, %v1135_v35 }
 0x145   : > { %805 = vst [vmem:[%s1402_s27 + $0x70] sm:$0xff] %v785_v37  ;;  %v820_v39 = vadd.f32 %v819_v27, %v785_v37  ;;  %v842_v41 = vmul.f32 %v785_v37, %v785_v37  ;;  %v788_v42 = vadd.f32 %v1412_v45, %v1137_v38 }
 0x147   : > { %v857_v43 = vadd.f32 %v856_v33, %v842_v41  ;;  %806 = vst [vmem:[%s1402_s27 + $0x78] sm:$0xff] %v788_v42  ;;  %v821_v44 = vadd.f32 %v820_v39, %v788_v42  ;;  %v843_v46 = vmul.f32 %v788_v42, %v788_v42 }
 0x149   : > { %v822_v47 = vrot.slane %v821_v44, 4  ;;  %v858_v48 = vadd.f32 %v857_v43, %v843_v46 }
 0x14b   : > { %v823_v49 = vadd.f32 %v822_v47, %v821_v44  ;;  %v859_v50 = vrot.slane %v858_v48, 4 }
 0x14d   : > { %v824_v51 = vrot.slane %v823_v49, 2  ;;  %v860_v52 = vadd.f32 %v859_v50, %v858_v48 }
 0x14f   : > { %v825_v53 = vadd.f32 %v824_v51, %v823_v49  ;;  %v861_v54 = vrot.slane %v860_v52, 2  ;;  %868 = sbr.rel (%p1068_p5) target bundleno = 344 (0x158), region = 32 }
 0x151   : > { %v826_v55 = vrot.slane %v825_v53, 1  ;;  %v862_v40 = vadd.f32 %v861_v54, %v860_v52 }
 0x153   : > { %v827_v56 = vadd.f32 %v826_v55, %v825_v53  ;;  %v863_v57 = vrot.slane %v862_v40, 1 }
 0x155   : > { %v864_v58 = vadd.f32 %v863_v57, %v862_v40  ;;  %869 = vst [vmem:[%s1458_s3] sm:$0x1] (!%p1068_p5), %v827_v56 }
 0x157   : > { %870 = vst [vmem:[%s1458_s3 + $0x1] sm:$0x1] %v864_v58 }
 0x158 PF: > { %p1069_p6 = scmp.eq.s32.totalorder %s1281_s12, 0 }
 0x15a   : > { %874 = sbr.rel (%p1069_p6) target bundleno = 354 (0x162), region = 36 }
 0x15e   : > { %v875_v45 = vld [vmem:[%s1458_s3] sm:$0x1] (!%p1069_p6)  ;;  %v878_v59 = vld [vmem:[%s1458_s3 + $0x1] sm:$0x1] (!%p1069_p6) }
 0x15f   : > { %v876_v60 = vadd.f32 (!%p1069_p6), %v875_v45, %v827_v56  ;;  %v879_v61 = vadd.f32 (!%p1069_p6), %v878_v59, %v864_v58 }
 0x161   : > { %877 = vst [vmem:[%s1458_s3] sm:$0x1] %v876_v60  ;;  %880 = vst [vmem:[%s1458_s3 + $0x1] sm:$0x1] %v879_v61 }
 0x162 PF: > { %s14_s14 = sadd.s32 1, %s1289_s14   ;;  %s1459_s12 = smov %s1285_s13 }
 0x163   : > { %p11_p7 = scmp.ge.s32.totalorder %s14_s14, 6   ;;  %s1460_s13 = smov %s1462_s15 }
 0x165   :  { %13 = sbr.rel (!%p11_p7) target bundleno = 2 (0x2), region = 81 }

// kernel: generator_forward.14
= control target key start
LH: loop header
LB: loop body
LE: loop exit
PB: predicated region body
PF: predicated region fallthrough
CT: control target
= control target key end

     0   :  { %v89_v0 = vlaneseq  ;;  %s1922_s0 = inlined_call_operand.vmem [shape: f32[512,128], index: 0, kind: input, shape index: {}]   ;;  %s1923_s1 = inlined_call_operand.vmem [shape: f32[2,128], index: 1, kind: input, shape index: {}]   ;;  %s1924_s2 = inlined_call_operand.vmem [shape: f32[1,128], index: 2, kind: input, shape index: {}]   ;;  %s1925_s3 = inlined_call_operand.vmem [shape: f32[1,128], index: 3, kind: input, shape index: {}]   ;;  %s1926_s4 = inlined_call_operand.vmem [shape: bf16[512,128], index: 4, kind: output, shape index: {}]  }
   0x1   :  { %v17_v1 = vld [vmem:[%s1923_s1] sm:$0x1]  ;;  %v19_v2 = vld [vmem:[%s1923_s1 + $0x1] sm:$0x1]  ;;  %v1049_v7 = vld [vmem:[%s1922_s0 + $0x8] sm:$0xff] }
   0x2   :  { %v18_v3 = vmul.f32 0.001953125, %v17_v1  ;;  %v20_v4 = vmul.f32 0.001953125, %v19_v2  ;;  %v1039_v5 = vshrl.u32 %v89_v0, 7  ;;  %v1044_v6 = vld [vmem:[%s1922_s0] sm:$0xff]  ;;  %v1054_v8 = vld [vmem:[%s1922_s0 + $0x10] sm:$0xff]  ;;  %v1060_v11 = vld [vmem:[%s1922_s0 + $0x18] sm:$0xff] }
   0x3   :  { %v1065_v12 = vld [vmem:[%s1922_s0 + $0x20] sm:$0xff]  ;;  %v1070_v13 = vld [vmem:[%s1922_s0 + $0x28] sm:$0xff]  ;;  %v1075_v14 = vld [vmem:[%s1922_s0 + $0x30] sm:$0xff] }
   0x4   :  { %v21_v9 = vmul.f32 %v18_v3, %v18_v3  ;;  %v1927_v10 = vsub.s32 0, %v1039_v5  ;;  %v1080_v15 = vld [vmem:[%s1922_s0 + $0x38] sm:$0xff]  ;;  %v1085_v16 = vld [vmem:[%s1922_s0 + $0x40] sm:$0xff]  ;;  %v1090_v17 = vld [vmem:[%s1922_s0 + $0x48] sm:$0xff]  ;;  %v1961_v33 = vsub.s32 0, %v1039_v5 }
   0x5   :  { %v1099_v20 = vld [vmem:[%s1922_s0 + $0x50] sm:$0xff]  ;;  %v1104_v21 = vld [vmem:[%s1922_s0 + $0x58] sm:$0xff]  ;;  %v1109_v22 = vld [vmem:[%s1922_s0 + $0x60] sm:$0xff] }
   0x6   :  { %v22_v18 = vsub.f32 %v20_v4, %v21_v9  ;;  %v1094_v19 = vrot.slane %v18_v3, %v1927_v10  ;;  %v1114_v23 = vld [vmem:[%s1922_s0 + $0x68] sm:$0xff]  ;;  %v1119_v24 = vld [vmem:[%s1922_s0 + $0x70] sm:$0xff]  ;;  %v1124_v25 = vld [vmem:[%s1922_s0 + $0x78] sm:$0xff] }
   0x7   :  { %v1135_v30 = vld [vmem:[%s1922_s0 + $0x80] sm:$0xff]  ;;  %v1140_v31 = vld [vmem:[%s1922_s0 + $0x88] sm:$0xff]  ;;  %v1145_v32 = vld [vmem:[%s1922_s0 + $0x90] sm:$0xff] }
   0x8   :  { %v23_v26 = vadd.f32 1e-05, %v22_v18  ;;  %v1158_v37 = vld [vmem:[%s1922_s0 + $0x98] sm:$0xff]  ;;  %v1163_v38 = vld [vmem:[%s1922_s0 + $0xa0] sm:$0xff]  ;;  %v1168_v39 = vld [vmem:[%s1922_s0 + $0xa8] sm:$0xff]  ;;  %v1968_v34 = vsub.f32 %v1060_v11, %v1094_v19  ;;  %v1972_v11 = vsub.f32 %v1080_v15, %v1094_v19 }
   0x9   :  { %v1179_v43 = vld [vmem:[%s1922_s0 + $0xb0] sm:$0xff]  ;;  %v1184_v44 = vld [vmem:[%s1922_s0 + $0xb8] sm:$0xff]  ;;  %v1189_v45 = vld [vmem:[%s1922_s0 + $0xc0] sm:$0xff] }
   0xa   :  { %1006 = vrsqrt.f32 %v23_v26  ;;  %v1202_v50 = vld [vmem:[%s1922_s0 + $0xc8] sm:$0xff]  ;;  %v1207_v51 = vld [vmem:[%s1922_s0 + $0xd0] sm:$0xff]  ;;  %v1212_v52 = vld [vmem:[%s1922_s0 + $0xd8] sm:$0xff] }
   0xb   :  { %v1225_v57 = vld [vmem:[%s1922_s0 + $0xe0] sm:$0xff]  ;;  %v1230_v58 = vld [vmem:[%s1922_s0 + $0xe8] sm:$0xff]  ;;  %v1235_v59 = vld [vmem:[%s1922_s0 + $0xf0] sm:$0xff] }
   0xc   :  { %v1248_v0 = vld [vmem:[%s1922_s0 + $0xf8] sm:$0xff]  ;;  %v1253_v1 = vld [vmem:[%s1922_s0 + $0x100] sm:$0xff]  ;;  %v1258_v2 = vld [vmem:[%s1922_s0 + $0x108] sm:$0xff] }
   0xd   :  { %v1271_v26 = vld [vmem:[%s1922_s0 + $0x110] sm:$0xff]  ;;  %v1276_v63 = vld [vmem:[%s1922_s0 + $0x118] sm:$0xff]  ;;  %v1281_v4 = vld [vmem:[%s1922_s0 + $0x120] sm:$0xff] }
   0xe   :  { %v1294_v61 = vld [vmem:[%s1922_s0 + $0x128] sm:$0xff]  ;;  %v1299_v60 = vld [vmem:[%s1922_s0 + $0x130] sm:$0xff]  ;;  %v1304_v18 = vld [vmem:[%s1922_s0 + $0x138] sm:$0xff] }
   0xf   :  { %v157_v3 = vld [vmem:[%s1924_s2] sm:$0x1]  ;;  %v1325_v53 = vld [vmem:[%s1922_s0 + $0x148] sm:$0xff]  ;;  %v1330_v9 = vld [vmem:[%s1922_s0 + $0x150] sm:$0xff] }
  0x10   :  { %v1320_v54 = vld [vmem:[%s1922_s0 + $0x140] sm:$0xff]  ;;  %v1343_v48 = vld [vmem:[%s1922_s0 + $0x158] sm:$0xff]  ;;  %v1353_v55 = vld [vmem:[%s1922_s0 + $0x168] sm:$0xff] }
  0x11   :  { %v1348_v47 = vld [vmem:[%s1922_s0 + $0x160] sm:$0xff]  ;;  %v1366_v42 = vld [vmem:[%s1922_s0 + $0x170] sm:$0xff]  ;;  %v1371_v41 = vld [vmem:[%s1922_s0 + $0x178] sm:$0xff] }
  0x12   :  { %1946 = vst [vmem:[#allocation2_spill] sm:$0xff] %v1366_v42  ;;  %1947 = vst [vmem:[#allocation3_spill] sm:$0xff] %v1371_v41  ;;  %v1376_v49 = vld [vmem:[%s1922_s0 + $0x180] sm:$0xff]  ;;  %v1389_v36 = vld [vmem:[%s1922_s0 + $0x188] sm:$0xff] }
  0x13   :  { %1948 = vst [vmem:[#allocation4_spill] sm:$0xff] %v1376_v49  ;;  %1949 = vst [vmem:[#allocation5_spill] sm:$0xff] %v1389_v36  ;;  %v1394_v35 = vld [vmem:[%s1922_s0 + $0x190] sm:$0xff]  ;;  %v1399_v46 = vld [vmem:[%s1922_s0 + $0x198] sm:$0xff] }
  0x14   :  { %1950 = vst [vmem:[#allocation6_spill] sm:$0xff] %v1394_v35  ;;  %1951 = vst [vmem:[#allocation7_spill] sm:$0xff] %v1399_v46  ;;  %v1007_v56 = vpop.eup %1006  ;;  %v1412_v29 = vld [vmem:[%s1922_s0 + $0x1a0] sm:$0xff]  ;;  %v1417_v28 = vld [vmem:[%s1922_s0 + $0x1a8] sm:$0xff] }
  0x15   :  { %1952 = vst [vmem:[#allocation8_spill] sm:$0xff] %v1412_v29  ;;  %1953 = vst [vmem:[#allocation9_spill] sm:$0xff] %v1417_v28  ;;  %v1422_v40 = vld [vmem:[%s1922_s0 + $0x1b0] sm:$0xff]  ;;  %v158_v62 = vmul.f32 %v1007_v56, %v157_v3  ;;  %v1433_v10 = vld [vmem:[%s1922_s0 + $0x1b8] sm:$0xff]  ;;  %v1966_v28 = vsub.f32 %v1049_v7, %v1094_v19  ;;  %v1970_v7 = vsub.f32 %v1070_v13, %v1094_v19 }
  0x16   :  { %1954 = vst [vmem:[#allocation10_spill] sm:$0xff] %v1422_v40  ;;  %1955 = vst [vmem:[#allocation11_spill] sm:$0xff] %v1433_v10  ;;  %v1438_v36 = vld [vmem:[%s1922_s0 + $0x1c0] sm:$0xff]  ;;  %v1443_v56 = vld [vmem:[%s1922_s0 + $0x1c8] sm:$0xff]  ;;  %v1967_v10 = vsub.f32 %v1054_v8, %v1094_v19  ;;  %v1971_v8 = vsub.f32 %v1075_v14, %v1094_v19 }
  0x17   :  { %1956 = vst [vmem:[#allocation12_spill] sm:$0xff] %v1438_v36  ;;  %1957 = vst [vmem:[#allocation13_spill] sm:$0xff] %v1443_v56  ;;  %v1456_v29 = vld [vmem:[%s1922_s0 + $0x1d0] sm:$0xff]  ;;  %v1461_v46 = vld [vmem:[%s1922_s0 + $0x1d8] sm:$0xff]  ;;  %v1470_v3 = vrot.slane %v158_v62, %v1961_v33 }
  0x18   :  { %1958 = vst [vmem:[#allocation14_spill] sm:$0xff] %v1456_v29  ;;  %1959 = vst [vmem:[#allocation15_spill] sm:$0xff] %v1461_v46  ;;  %v1466_v27 = vld [vmem:[%s1922_s0 + $0x1e0] sm:$0xff]  ;;  %v1481_v40 = vld [vmem:[%s1922_s0 + $0x1e8] sm:$0xff]  ;;  %v1965_v29 = vsub.f32 %v1044_v6, %v1094_v19  ;;  %v1969_v6 = vsub.f32 %v1065_v12, %v1094_v19 }
  0x19   :  { %1960 = vst [vmem:[#allocation16_spill] sm:$0xff] %v1466_v27  ;;  %1962 = vst [vmem:[#allocation17_spill] sm:$0xff] %v1481_v40  ;;  %v1486_v5 = vld [vmem:[%s1922_s0 + $0x1f0] sm:$0xff]  ;;  %v1491_v33 = vld [vmem:[%s1922_s0 + $0x1f8] sm:$0xff]  ;;  %v164_v35 = vmul.f32 %v1470_v3, %v1966_v28  ;;  %v165_v36 = vmul.f32 %v1470_v3, %v1967_v10  ;;  %v166_v46 = vmul.f32 %v1470_v3, %v1968_v34 }
  0x1a   :  { %1963 = vst [vmem:[#allocation18_spill] sm:$0xff] %v1486_v5  ;;  %1964 = vst [vmem:[#allocation19_spill] sm:$0xff] %v1491_v33  ;;  %v1496_v62 = vld [vmem:[%s1925_s3] ss:$0 sm:$0xff]  ;;  %v163_v56 = vmul.f32 %v1470_v3, %v1965_v29  ;;  %v167_v29 = vmul.f32 %v1470_v3, %v1969_v6  ;;  %v168_v28 = vmul.f32 %v1470_v3, %v1970_v7 }
  0x1b   :  { %v169_v10 = vmul.f32 %v1470_v3, %v1971_v8  ;;  %v170_v34 = vmul.f32 %v1470_v3, %v1972_v11  ;;  %v235_v12 = vadd.f32 %v1496_v62, %v164_v35  ;;  %v236_v6 = vadd.f32 %v1496_v62, %v165_v36 }
  0x1c   :  { %v234_v33 = vadd.f32 %v1496_v62, %v163_v56  ;;  %v237_v13 = vadd.f32 %v1496_v62, %v166_v46  ;;  %v238_v7 = vadd.f32 %v1496_v62, %v167_v29  ;;  %v239_v5 = vadd.f32 %v1496_v62, %v168_v28 }
  0x1d   :  { %v240_v14 = vadd.f32 %v1496_v62, %v169_v10  ;;  %v241_v8 = vadd.f32 %v1496_v62, %v170_v34  ;;  %v299_v15 = vmax.f32 %v235_v12, 0.0  ;;  %v300_v27 = vmax.f32 %v236_v6, 0.0 }
  0x1e   :  { %v298_v40 = vmax.f32 %v234_v33, 0.0  ;;  %v301_v11 = vmax.f32 %v237_v13, 0.0  ;;  %v302_v49 = vmax.f32 %v238_v7, 0.0  ;;  %v303_v56 = vmax.f32 %v239_v5, 0.0 }
  0x1f   :  { %v304_v41 = vmax.f32 %v240_v14, 0.0  ;;  %v305_v35 = vmax.f32 %v241_v8, 0.0  ;;  %v1973_v46 = vsub.f32 %v1085_v16, %v1094_v19  ;;  %v1974_v28 = vsub.f32 %v1090_v17, %v1094_v19 }
  0x20   :  { %v818_v42 = vpack.c.bf16 %v299_v15, %v298_v40  ;;  %v823_v36 = vpack.c.bf16 %v301_v11, %v300_v27  ;;  %v828_v33 = vpack.c.bf16 %v303_v56, %v302_v49  ;;  %v1975_v12 = vsub.f32 %v1099_v20, %v1094_v19 }
  0x21   :  { %v171_v29 = vmul.f32 %v1470_v3, %v1973_v46  ;;  %v172_v10 = vmul.f32 %v1470_v3, %v1974_v28  ;;  %v833_v34 = vpack.c.bf16 %v305_v35, %v304_v41  ;;  %v1976_v27 = vsub.f32 %v1104_v21, %v1094_v19 }
  0x22   :  { %v173_v5 = vmul.f32 %v1470_v3, %v1975_v12  ;;  %819 = vst [vmem:[%s1926_s4] sm:$0xff] %v818_v42   ;;  %975 = vst [vmem:[%s1926_s4 + $0x8] sm:$0xff] %v823_v36   ;;  %v1977_v20 = vsub.f32 %v1109_v22, %v1094_v19  ;;  %v1978_v21 = vsub.f32 %v1114_v23, %v1094_v19 }
  0x23   :  { %v174_v40 = vmul.f32 %v1470_v3, %v1976_v27  ;;  %v242_v16 = vadd.f32 %v1496_v62, %v171_v29  ;;  %v243_v17 = vadd.f32 %v1496_v62, %v172_v10  ;;  %976 = vst [vmem:[%s1926_s4 + $0x10] sm:$0xff] %v828_v33   ;;  %977 = vst [vmem:[%s1926_s4 + $0x18] sm:$0xff] %v833_v34  }
  0x24   :  { %v175_v41 = vmul.f32 %v1470_v3, %v1977_v20  ;;  %v176_v49 = vmul.f32 %v1470_v3, %v1978_v21  ;;  %v244_v42 = vadd.f32 %v1496_v62, %v173_v5  ;;  %v1979_v22 = vsub.f32 %v1119_v24, %v1094_v19 }
  0x25   :  { %v245_v6 = vadd.f32 %v1496_v62, %v174_v40  ;;  %v1980_v23 = vsub.f32 %v1124_v25, %v1094_v19  ;;  %v306_v14 = vmax.f32 %v242_v16, 0.0  ;;  %v307_v8 = vmax.f32 %v243_v17, 0.0 }
  0x26   :  { %v177_v13 = vmul.f32 %v1470_v3, %v1979_v22  ;;  %v246_v15 = vadd.f32 %v1496_v62, %v175_v41  ;;  %v247_v11 = vadd.f32 %v1496_v62, %v176_v49  ;;  %v308_v56 = vmax.f32 %v244_v42, 0.0 }
  0x27   :  { %v178_v7 = vmul.f32 %v1470_v3, %v1980_v23  ;;  %v309_v35 = vmax.f32 %v245_v6, 0.0  ;;  %v838_v24 = vpack.c.bf16 %v307_v8, %v306_v14  ;;  %v1981_v25 = vsub.f32 %v1135_v30, %v1094_v19 }
  0x28   :  { %v248_v36 = vadd.f32 %v1496_v62, %v177_v13  ;;  %v310_v29 = vmax.f32 %v246_v15, 0.0  ;;  %v311_v28 = vmax.f32 %v247_v11, 0.0  ;;  %v1982_v5 = vsub.f32 %v1140_v31, %v1094_v19 }
  0x29   :  { %v249_v46 = vadd.f32 %v1496_v62, %v178_v7  ;;  %v179_v10 = vmul.f32 %v1470_v3, %v1981_v25  ;;  %v843_v33 = vpack.c.bf16 %v309_v35, %v308_v56  ;;  %978 = vst [vmem:[%s1926_s4 + $0x20] sm:$0xff] %v838_v24   ;;  %v1983_v30 = vsub.f32 %v1145_v32, %v1094_v19 }
  0x2a   :  { %v312_v34 = vmax.f32 %v248_v36, 0.0  ;;  %v180_v27 = vmul.f32 %v1470_v3, %v1982_v5  ;;  %v848_v40 = vpack.c.bf16 %v311_v28, %v310_v29  ;;  %v1984_v20 = vsub.f32 %v1158_v37, %v1094_v19 }
  0x2b   :  { %v313_v12 = vmax.f32 %v249_v46, 0.0  ;;  %v250_v16 = vadd.f32 %v1496_v62, %v179_v10  ;;  %v181_v17 = vmul.f32 %v1470_v3, %v1983_v30  ;;  %979 = vst [vmem:[%s1926_s4 + $0x28] sm:$0xff] %v843_v33   ;;  %v1985_v49 = vsub.f32 %v1163_v38, %v1094_v19 }
  0x2c   :  { %v182_v41 = vmul.f32 %v1470_v3, %v1984_v20  ;;  %v251_v21 = vadd.f32 %v1496_v62, %v180_v27  ;;  %v1986_v32 = vsub.f32 %v1168_v39, %v1094_v19  ;;  %980 = vst [vmem:[%s1926_s4 + $0x30] sm:$0xff] %v848_v40   ;;  %v1987_v23 = vsub.f32 %v1179_v43, %v1094_v19 }
  0x2d   :  { %v853_v31 = vpack.c.bf16 %v313_v12, %v312_v34  ;;  %v183_v42 = vmul.f32 %v1470_v3, %v1985_v49  ;;  %v314_v37 = vmax.f32 %v250_v16, 0.0  ;;  %v252_v22 = vadd.f32 %v1496_v62, %v181_v17 }
  0x2e   :  { %v184_v6 = vmul.f32 %v1470_v3, %v1986_v32  ;;  %v253_v13 = vadd.f32 %v1496_v62, %v182_v41  ;;  %v185_v38 = vmul.f32 %v1470_v3, %v1987_v23  ;;  %v315_v39 = vmax.f32 %v251_v21, 0.0 }
  0x2f   :  { %981 = vst [vmem:[%s1926_s4 + $0x38] sm:$0xff] %v853_v31   ;;  %v254_v7 = vadd.f32 %v1496_v62, %v183_v42  ;;  %v1988_v8 = vsub.f32 %v1184_v44, %v1094_v19  ;;  %v316_v11 = vmax.f32 %v252_v22, 0.0  ;;  %v1989_v35 = vsub.f32 %v1189_v45, %v1094_v19 }
  0x30   :  { %v255_v14 = vadd.f32 %v1496_v62, %v184_v6  ;;  %v317_v56 = vmax.f32 %v253_v13, 0.0  ;;  %v256_v43 = vadd.f32 %v1496_v62, %v185_v38  ;;  %v858_v46 = vpack.c.bf16 %v315_v39, %v314_v37 }
  0x31   :  { %v186_v15 = vmul.f32 %v1470_v3, %v1988_v8  ;;  %v187_v36 = vmul.f32 %v1470_v3, %v1989_v35  ;;  %v318_v24 = vmax.f32 %v254_v7, 0.0  ;;  %v1990_v44 = vsub.f32 %v1202_v50, %v1094_v19 }
  0x32   :  { %v319_v29 = vmax.f32 %v255_v14, 0.0  ;;  %v863_v25 = vpack.c.bf16 %v317_v56, %v316_v11  ;;  %v320_v10 = vmax.f32 %v256_v43, 0.0  ;;  %982 = vst [vmem:[%s1926_s4 + $0x40] sm:$0xff] %v858_v46   ;;  %v1991_v5 = vsub.f32 %v1207_v51, %v1094_v19 }
  0x33   :  { %v257_v28 = vadd.f32 %v1496_v62, %v186_v15  ;;  %v188_v33 = vmul.f32 %v1470_v3, %v1990_v44  ;;  %v258_v34 = vadd.f32 %v1496_v62, %v187_v36  ;;  %v1992_v40 = vsub.f32 %v1212_v52, %v1094_v19 }
  0x34   :  { %v868_v45 = vpack.c.bf16 %v319_v29, %v318_v24  ;;  %v189_v27 = vmul.f32 %v1470_v3, %v1991_v5  ;;  %983 = vst [vmem:[%s1926_s4 + $0x48] sm:$0xff] %v863_v25   ;;  %v1993_v17 = vsub.f32 %v1225_v57, %v1094_v19  ;;  %v1994_v51 = vsub.f32 %v1230_v58, %v1094_v19 }
  0x35   :  { %v321_v12 = vmax.f32 %v257_v28, 0.0  ;;  %v190_v50 = vmul.f32 %v1470_v3, %v1992_v40  ;;  %v259_v16 = vadd.f32 %v1496_v62, %v188_v33  ;;  %v322_v30 = vmax.f32 %v258_v34, 0.0 }
  0x36   :  { %v191_v20 = vmul.f32 %v1470_v3, %v1993_v17  ;;  %v192_v41 = vmul.f32 %v1470_v3, %v1994_v51  ;;  %984 = vst [vmem:[%s1926_s4 + $0x50] sm:$0xff] %v868_v45   ;;  %v260_v31 = vadd.f32 %v1496_v62, %v189_v27  ;;  %v1995_v49 = vsub.f32 %v1235_v59, %v1094_v19 }
  0x37   :  { %v873_v52 = vpack.c.bf16 %v321_v12, %v320_v10  ;;  %v261_v21 = vadd.f32 %v1496_v62, %v190_v50  ;;  %v323_v42 = vmax.f32 %v259_v16, 0.0  ;;  %v1996_v6 = vsub.f32 %v1248_v0, %v1094_v19 }
  0x38   :  { %v193_v57 = vmul.f32 %v1470_v3, %v1995_v49  ;;  %v262_v32 = vadd.f32 %v1496_v62, %v191_v20  ;;  %v263_v58 = vadd.f32 %v1496_v62, %v192_v41  ;;  %v324_v22 = vmax.f32 %v260_v31, 0.0 }
  0x39   :  { %v194_v37 = vmul.f32 %v1470_v3, %v1996_v6  ;;  %985 = vst [vmem:[%s1926_s4 + $0x58] sm:$0xff] %v873_v52   ;;  %v325_v13 = vmax.f32 %v261_v21, 0.0  ;;  %v1997_v23 = vsub.f32 %v1253_v1, %v1094_v19  ;;  %v878_v39 = vpack.c.bf16 %v323_v42, %v322_v30 }
  0x3a   :  { %v264_v59 = vadd.f32 %v1496_v62, %v193_v57  ;;  %v326_v7 = vmax.f32 %v262_v32, 0.0  ;;  %v327_v14 = vmax.f32 %v263_v58, 0.0  ;;  %v1998_v11 = vsub.f32 %v1258_v2, %v1094_v19 }
  0x3b   :  { %v195_v38 = vmul.f32 %v1470_v3, %v1997_v23  ;;  %v265_v0 = vadd.f32 %v1496_v62, %v194_v37  ;;  %v883_v8 = vpack.c.bf16 %v325_v13, %v324_v22  ;;  %986 = vst [vmem:[%s1926_s4 + $0x60] sm:$0xff] %v878_v39   ;;  %v1999_v36 = vsub.f32 %v1271_v26, %v1094_v19 }
  0x3c   :  { %v328_v15 = vmax.f32 %v264_v59, 0.0  ;;  %v196_v56 = vmul.f32 %v1470_v3, %v1998_v11  ;;  %v888_v1 = vpack.c.bf16 %v327_v14, %v326_v7  ;;  %v2000_v24 = vsub.f32 %v1276_v63, %v1094_v19  ;;  %v2011_v7 = vld [vmem:[#allocation2_spill] sm:$0xff] }
  0x3d   :  { %v266_v43 = vadd.f32 %v1496_v62, %v195_v38  ;;  %v329_v35 = vmax.f32 %v265_v0, 0.0  ;;  %v197_v46 = vmul.f32 %v1470_v3, %v1999_v36  ;;  %987 = vst [vmem:[%s1926_s4 + $0x68] sm:$0xff] %v883_v8   ;;  %v2001_v25 = vsub.f32 %v1281_v4, %v1094_v19  ;;  %v2015_v36 = vld [vmem:[#allocation4_spill] sm:$0xff] }
  0x3e   :  { %v198_v2 = vmul.f32 %v1470_v3, %v2000_v24  ;;  %v267_v29 = vadd.f32 %v1496_v62, %v196_v56  ;;  %v2002_v26 = vsub.f32 %v1294_v61, %v1094_v19  ;;  %988 = vst [vmem:[%s1926_s4 + $0x70] sm:$0xff] %v888_v1   ;;  %v2003_v45 = vsub.f32 %v1299_v60, %v1094_v19 }
  0x3f   :  { %v330_v28 = vmax.f32 %v266_v43, 0.0  ;;  %v199_v10 = vmul.f32 %v1470_v3, %v2001_v25  ;;  %v893_v63 = vpack.c.bf16 %v329_v35, %v328_v15  ;;  %v268_v33 = vadd.f32 %v1496_v62, %v197_v46  ;;  %v2013_v15 = vld [vmem:[#allocation3_spill] sm:$0xff] }
  0x40   :  { %v200_v44 = vmul.f32 %v1470_v3, %v2002_v26  ;;  %v269_v34 = vadd.f32 %v1496_v62, %v198_v2  ;;  %v201_v4 = vmul.f32 %v1470_v3, %v2003_v45  ;;  %v331_v12 = vmax.f32 %v267_v29, 0.0 }
  0x41   :  { %v270_v5 = vadd.f32 %v1496_v62, %v199_v10  ;;  %v2004_v27 = vsub.f32 %v1304_v18, %v1094_v19  ;;  %989 = vst [vmem:[%s1926_s4 + $0x78] sm:$0xff] %v893_v63   ;;  %v332_v50 = vmax.f32 %v268_v33, 0.0  ;;  %v2005_v30 = vsub.f32 %v1320_v54, %v1094_v19 }
  0x42   :  { %v271_v61 = vadd.f32 %v1496_v62, %v200_v44  ;;  %v333_v16 = vmax.f32 %v269_v34, 0.0  ;;  %v272_v60 = vadd.f32 %v1496_v62, %v201_v4  ;;  %v898_v20 = vpack.c.bf16 %v331_v12, %v330_v28  ;;  %v2017_v44 = vld [vmem:[#allocation5_spill] sm:$0xff]  ;;  %v2019_v12 = vld [vmem:[#allocation6_spill] sm:$0xff] }
  0x43   :  { %v202_v40 = vmul.f32 %v1470_v3, %v2004_v27  ;;  %v203_v17 = vmul.f32 %v1470_v3, %v2005_v30  ;;  %v334_v51 = vmax.f32 %v270_v5, 0.0  ;;  %v2006_v21 = vsub.f32 %v1325_v53, %v1094_v19  ;;  %v2021_v27 = vld [vmem:[#allocation7_spill] sm:$0xff]  ;;  %v2023_v30 = vld [vmem:[#allocation8_spill] sm:$0xff] }
  0x44   :  { %v335_v41 = vmax.f32 %v271_v61, 0.0  ;;  %v903_v52 = vpack.c.bf16 %v333_v16, %v332_v50  ;;  %v336_v31 = vmax.f32 %v272_v60, 0.0  ;;  %990 = vst [vmem:[%s1926_s4 + $0x80] sm:$0xff] %v898_v20   ;;  %v2007_v32 = vsub.f32 %v1330_v9, %v1094_v19 }
  0x45   :  { %v273_v18 = vadd.f32 %v1496_v62, %v202_v40  ;;  %v204_v49 = vmul.f32 %v1470_v3, %v2006_v21  ;;  %v274_v57 = vadd.f32 %v1496_v62, %v203_v17  ;;  %v2008_v6 = vsub.f32 %v1343_v48, %v1094_v19 }
  0x46   :  { %v908_v54 = vpack.c.bf16 %v335_v41, %v334_v51  ;;  %v205_v58 = vmul.f32 %v1470_v3, %v2007_v32  ;;  %991 = vst [vmem:[%s1926_s4 + $0x88] sm:$0xff] %v903_v52   ;;  %v2009_v13 = vsub.f32 %v1348_v47, %v1094_v19  ;;  %v2010_v9 = vsub.f32 %v1353_v55, %v1094_v19  ;;  %v2025_v51 = vld [vmem:[#allocation9_spill] sm:$0xff] }
  0x47   :  { %v337_v42 = vmax.f32 %v273_v18, 0.0  ;;  %v206_v53 = vmul.f32 %v1470_v3, %v2008_v6  ;;  %v275_v37 = vadd.f32 %v1496_v62, %v204_v49  ;;  %v338_v22 = vmax.f32 %v274_v57, 0.0  ;;  %v2027_v49 = vld [vmem:[#allocation10_spill] sm:$0xff]  ;;  %v2029_v6 = vld [vmem:[#allocation11_spill] sm:$0xff] }
  0x48   :  { %v207_v59 = vmul.f32 %v1470_v3, %v2009_v13  ;;  %v208_v23 = vmul.f32 %v1470_v3, %v2010_v9  ;;  %992 = vst [vmem:[%s1926_s4 + $0x90] sm:$0xff] %v908_v54   ;;  %v276_v38 = vadd.f32 %v1496_v62, %v205_v58  ;;  %v2012_v14 = vsub.f32 %v2011_v7, %v1094_v19  ;;  %v2031_v9 = vld [vmem:[#allocation12_spill] sm:$0xff] }
  0x49   :  { %v913_v48 = vpack.c.bf16 %v337_v42, %v336_v31  ;;  %v277_v39 = vadd.f32 %v1496_v62, %v206_v53  ;;  %v339_v0 = vmax.f32 %v275_v37, 0.0  ;;  %v2014_v11 = vsub.f32 %v2013_v15, %v1094_v19 }
  0x4a   :  { %v209_v47 = vmul.f32 %v1470_v3, %v2012_v14  ;;  %v278_v8 = vadd.f32 %v1496_v62, %v207_v59  ;;  %v279_v55 = vadd.f32 %v1496_v62, %v208_v23  ;;  %v340_v43 = vmax.f32 %v276_v38, 0.0 }
  0x4b   :  { %v210_v56 = vmul.f32 %v1470_v3, %v2014_v11  ;;  %993 = vst [vmem:[%s1926_s4 + $0x98] sm:$0xff] %v913_v48   ;;  %v341_v1 = vmax.f32 %v277_v39, 0.0  ;;  %v2016_v46 = vsub.f32 %v2015_v36, %v1094_v19  ;;  %v918_v2 = vpack.c.bf16 %v339_v0, %v338_v22 }
  0x4c   :  { %v280_v35 = vadd.f32 %v1496_v62, %v209_v47  ;;  %v342_v29 = vmax.f32 %v278_v8, 0.0  ;;  %v343_v28 = vmax.f32 %v279_v55, 0.0  ;;  %v2018_v63 = vsub.f32 %v2017_v44, %v1094_v19  ;;  %v2033_v8 = vld [vmem:[#allocation13_spill] sm:$0xff] }
  0x4d   :  { %v211_v24 = vmul.f32 %v1470_v3, %v2016_v46  ;;  %v281_v25 = vadd.f32 %v1496_v62, %v210_v56  ;;  %v923_v10 = vpack.c.bf16 %v341_v1, %v340_v43  ;;  %994 = vst [vmem:[%s1926_s4 + $0xa0] sm:$0xff] %v918_v2   ;;  %v2020_v5 = vsub.f32 %v2019_v12, %v1094_v19  ;;  %v2035_v1 = vld [vmem:[#allocation14_spill] sm:$0xff]  ;;  %v2037_v46 = vld [vmem:[#allocation15_spill] sm:$0xff]  ;;  %v2041_v44 = vld [vmem:[#allocation17_spill] sm:$0xff] }
  0x4e   :  { %v344_v26 = vmax.f32 %v280_v35, 0.0  ;;  %v212_v33 = vmul.f32 %v1470_v3, %v2018_v63  ;;  %v928_v45 = vpack.c.bf16 %v343_v28, %v342_v29  ;;  %v2022_v40 = vsub.f32 %v2021_v27, %v1094_v19  ;;  %v2043_v12 = vld [vmem:[#allocation18_spill] sm:$0xff] }
  0x4f   :  { %v282_v34 = vadd.f32 %v1496_v62, %v211_v24  ;;  %v345_v4 = vmax.f32 %v281_v25, 0.0  ;;  %v213_v61 = vmul.f32 %v1470_v3, %v2020_v5  ;;  %995 = vst [vmem:[%s1926_s4 + $0xa8] sm:$0xff] %v923_v10   ;;  %v2024_v17 = vsub.f32 %v2023_v30, %v1094_v19  ;;  %v2039_v25 = vld [vmem:[#allocation16_spill] sm:$0xff] }
  0x50   :  { %v214_v50 = vmul.f32 %v1470_v3, %v2022_v40  ;;  %v283_v16 = vadd.f32 %v1496_v62, %v212_v33  ;;  %v2026_v41 = vsub.f32 %v2025_v51, %v1094_v19  ;;  %996 = vst [vmem:[%s1926_s4 + $0xb0] sm:$0xff] %v928_v45   ;;  %v2028_v57 = vsub.f32 %v2027_v49, %v1094_v19 }
  0x51   :  { %v346_v60 = vmax.f32 %v282_v34, 0.0  ;;  %v215_v20 = vmul.f32 %v1470_v3, %v2024_v17  ;;  %v933_v52 = vpack.c.bf16 %v345_v4, %v344_v26  ;;  %v284_v31 = vadd.f32 %v1496_v62, %v213_v61 }
  0x52   :  { %v216_v18 = vmul.f32 %v1470_v3, %v2026_v41  ;;  %v285_v21 = vadd.f32 %v1496_v62, %v214_v50  ;;  %v217_v54 = vmul.f32 %v1470_v3, %v2028_v57  ;;  %v347_v42 = vmax.f32 %v283_v16, 0.0  ;;  %v2045_v16 = vld [vmem:[#allocation19_spill] sm:$0xff] }
  0x53   :  { %v286_v32 = vadd.f32 %v1496_v62, %v215_v20  ;;  %v2030_v53 = vsub.f32 %v2029_v6, %v1094_v19  ;;  %997 = vst [vmem:[%s1926_s4 + $0xb8] sm:$0xff] %v933_v52   ;;  %v348_v22 = vmax.f32 %v284_v31, 0.0  ;;  %v2032_v23 = vsub.f32 %v2031_v9, %v1094_v19 }
  0x54   :  { %v287_v58 = vadd.f32 %v1496_v62, %v216_v18  ;;  %v349_v13 = vmax.f32 %v285_v21, 0.0  ;;  %v288_v59 = vadd.f32 %v1496_v62, %v217_v54  ;;  %v938_v38 = vpack.c.bf16 %v347_v42, %v346_v60 }
  0x55   :  { %v218_v37 = vmul.f32 %v1470_v3, %v2030_v53  ;;  %v219_v48 = vmul.f32 %v1470_v3, %v2032_v23  ;;  %v350_v39 = vmax.f32 %v286_v32, 0.0  ;;  %v2034_v55 = vsub.f32 %v2033_v8, %v1094_v19 }
  0x56   :  { %v351_v7 = vmax.f32 %v287_v58, 0.0  ;;  %v943_v47 = vpack.c.bf16 %v349_v13, %v348_v22  ;;  %v352_v0 = vmax.f32 %v288_v59, 0.0  ;;  %998 = vst [vmem:[%s1926_s4 + $0xc0] sm:$0xff] %v938_v38   ;;  %v2036_v35 = vsub.f32 %v2035_v1, %v1094_v19 }
  0x57   :  { %v289_v14 = vadd.f32 %v1496_v62, %v218_v37  ;;  %v220_v15 = vmul.f32 %v1470_v3, %v2034_v55  ;;  %v290_v11 = vadd.f32 %v1496_v62, %v219_v48  ;;  %v2038_v24 = vsub.f32 %v2037_v46, %v1094_v19 }
  0x58   :  { %v948_v56 = vpack.c.bf16 %v351_v7, %v350_v39  ;;  %v221_v36 = vmul.f32 %v1470_v3, %v2036_v35  ;;  %999 = vst [vmem:[%s1926_s4 + $0xc8] sm:$0xff] %v943_v47   ;;  %v2040_v10 = vsub.f32 %v2039_v25, %v1094_v19  ;;  %v2042_v63 = vsub.f32 %v2041_v44, %v1094_v19 }
  0x59   :  { %v353_v43 = vmax.f32 %v289_v14, 0.0  ;;  %v222_v2 = vmul.f32 %v1470_v3, %v2038_v24  ;;  %v291_v29 = vadd.f32 %v1496_v62, %v220_v15  ;;  %v354_v28 = vmax.f32 %v290_v11, 0.0 }
  0x5a   :  { %v223_v26 = vmul.f32 %v1470_v3, %v2040_v10  ;;  %v224_v33 = vmul.f32 %v1470_v3, %v2042_v63  ;;  %1000 = vst [vmem:[%s1926_s4 + $0xd0] sm:$0xff] %v948_v56   ;;  %v292_v45 = vadd.f32 %v1496_v62, %v221_v36  ;;  %v2044_v5 = vsub.f32 %v2043_v12, %v1094_v19 }
  0x5b   :  { %v953_v34 = vpack.c.bf16 %v353_v43, %v352_v0  ;;  %v293_v4 = vadd.f32 %v1496_v62, %v222_v2  ;;  %v355_v27 = vmax.f32 %v291_v29, 0.0  ;;  %v2046_v60 = vsub.f32 %v2045_v16, %v1094_v19 }
  0x5c   :  { %v225_v61 = vmul.f32 %v1470_v3, %v2044_v5  ;;  %v294_v40 = vadd.f32 %v1496_v62, %v223_v26  ;;  %v295_v50 = vadd.f32 %v1496_v62, %v224_v33  ;;  %v356_v17 = vmax.f32 %v292_v45, 0.0 }
  0x5d   :  { %v226_v30 = vmul.f32 %v1470_v3, %v2046_v60  ;;  %1001 = vst [vmem:[%s1926_s4 + $0xd8] sm:$0xff] %v953_v34   ;;  %v357_v20 = vmax.f32 %v293_v4, 0.0  ;;  %v958_v41 = vpack.c.bf16 %v355_v27, %v354_v28 }
  0x5e   :  { %v296_v51 = vadd.f32 %v1496_v62, %v225_v61  ;;  %v358_v18 = vmax.f32 %v294_v40, 0.0  ;;  %v359_v52 = vmax.f32 %v295_v50, 0.0 }
  0x5f   :  { %v297_v31 = vadd.f32 %v1496_v62, %v226_v30  ;;  %v963_v21 = vpack.c.bf16 %v357_v20, %v356_v17  ;;  %1002 = vst [vmem:[%s1926_s4 + $0xe0] sm:$0xff] %v958_v41  }
  0x60   :  { %v360_v49 = vmax.f32 %v296_v51, 0.0  ;;  %v968_v19 = vpack.c.bf16 %v359_v52, %v358_v18 }
  0x61   :  { %v361_v3 = vmax.f32 %v297_v31, 0.0  ;;  %1003 = vst [vmem:[%s1926_s4 + $0xe8] sm:$0xff] %v963_v21  }
  0x62   :  { %1004 = vst [vmem:[%s1926_s4 + $0xf0] sm:$0xff] %v968_v19  }
  0x63   :  { %v973_v57 = vpack.c.bf16 %v361_v3, %v360_v49 }
  0x65   :  { %1005 = vst [vmem:[%s1926_s4 + $0xf8] sm:$0xff] %v973_v57  }

// kernel: generator_forward.15
= control target key start
LH: loop header
LB: loop body
LE: loop exit
PB: predicated region body
PF: predicated region fallthrough
CT: control target
= control target key end

     0   :  { %s1719_s9 = smov 0   ;;  %s1721_s10 = smov 0   ;;  %s1965_s0 = inlined_call_operand.vmem [shape: bf16[4,512,192], index: 0, kind: input, shape index: {}]   ;;  %s1966_s1 = inlined_call_operand.vmem [shape: bf16[4,192,128], index: 1, kind: input, shape index: {}]   ;;  %s1967_s2 = inlined_call_operand.vmem [shape: f32[4,512,128], index: 2, kind: output, shape index: {}]  }
   0x1   :  { %s1723_s11 = smov 0  }
   0x2 LB: > { %s21_s12 = sadd.s32 1, %s1697_s10  ;;  %p1275_p0 = scmp.ge.s32.totalorder %s1701_s11, 1  ;;  %s1701_s11 = sphi %s1723_s11, %s12_s11   ;;  %s1697_s10 = sphi %s1721_s10, %s1969_s10   ;;  %s1693_s9 = sphi %s1719_s9, %s1968_s9  }
   0x3   : > { %p22_p1 = scmp.ge.s32.totalorder %s21_s12, 4  ;;  %p144_p2 = scmp.lt.s32.totalorder %s1701_s11, 5 }
   0x5   : > { %s1971_s12 = smov (%p22_p1, %s21_s12), 0  ;;  %p145_p3 = pnand %p1275_p0, %p144_p2 }
   0x6   : > { %p181_p4 = scmp.lt.s32.totalorder (!%p145_p3), %s1693_s9, 3  ;;  %v1703_v0 = vmov (!%p145_p3), 0   ;;  %vm655_vm0 = vcmask (!%p145_p3), 523264  }
   0x7   : > { %148 = sbr.rel (%p145_p3) target bundleno = 413 (0x19d), region = 28  ;;  %752 = vmatprep.subr.bf16.mxu0 (!%p145_p3), %v1703_v0  ;;  %1393 = vmatprep.subr.bf16.mxu1 (!%p145_p3), %v1703_v0 }
   0xe   : > { %s1973_s9 = smov (!%p181_p4, %s1693_s9), 3 }
   0xf   : > { %s1391_s13 = sshll.u32 %s1973_s9, 9  ;;  %s1417_s14 = smul.u32 96, %s1973_s9 }
  0x10   : > { %s1748_s17 = scalar_lea.vmem %s1965_s0, %s1391_s13  ;;  %s1890_s23 = scalar_lea.vmem %s1967_s2, %s1391_s13 }
  0x11   : > { %s1753_s20 = scalar_lea.vmem %s1966_s1, %s1417_s14  ;;  %v1457_v5 = vld [vmem:[%s1748_s17 + $0x4] ss:$8 sps:$4 sm:$0xff]   ;;  %v1455_v15 = vld [vmem:[%s1748_s17] ss:$8 sps:$4 sm:$0xff]   ;;  %v1461_v17 = vld [vmem:[%s1748_s17 + $0x14] ss:$8 sps:$4 sm:$0xff]  }
  0x12   : > { %v1443_v1 = vld [vmem:[%s1753_s20] sm:$0xff]   ;;  %v1444_v2 = vld [vmem:[%s1753_s20 + $0x8] sm:$0xff]   ;;  %v1445_v3 = vld [vmem:[%s1753_s20 + $0x10] sm:$0xff]   ;;  %1357 = vmatprep.mubr.msk.bf16.mxu0 %vm655_vm0, %v1457_v5 }
  0x13   : > { %753 = vmatpush1.bf16.msra.mxu0 %v1443_v1  ;;  %1405 = vmatpush1.bf16.msra.mxu1 %v1443_v1  ;;  %v1446_v4 = vld [vmem:[%s1753_s20 + $0x18] sm:$0xff]   ;;  %v1460_v6 = vld [vmem:[%s1748_s17 + $0x104] ss:$8 sps:$4 sm:$0xff]   ;;  %v1449_v9 = vld [vmem:[%s1753_s20 + $0x30] sm:$0xff]  }
  0x14   : > { %754 = vmatprep.subr.bf16.mxu0 %v1703_v0  ;;  %1394 = vmatprep.subr.bf16.mxu1 %v1703_v0  ;;  %v1447_v7 = vld [vmem:[%s1753_s20 + $0x20] sm:$0xff]   ;;  %v1448_v8 = vld [vmem:[%s1753_s20 + $0x28] sm:$0xff]   ;;  %v1450_v10 = vld [vmem:[%s1753_s20 + $0x38] sm:$0xff]  }
  0x15   : > { %1373 = vmatprep.mubr.msk.bf16.mxu1 %vm655_vm0, %v1460_v6  ;;  %v1451_v11 = vld [vmem:[%s1753_s20 + $0x40] sm:$0xff]   ;;  %v1452_v12 = vld [vmem:[%s1753_s20 + $0x48] sm:$0xff]   ;;  %v1453_v13 = vld [vmem:[%s1753_s20 + $0x50] sm:$0xff]  }
  0x16   : > { %v1454_v14 = vld [vmem:[%s1753_s20 + $0x58] sm:$0xff]   ;;  %v1458_v16 = vld [vmem:[%s1748_s17 + $0x100] ss:$8 sps:$4 sm:$0xff]   ;;  %v1467_v21 = vld [vmem:[%s1748_s17 + $0x24] ss:$8 sps:$4 sm:$0xff]  }
  0x17   : > { %755 = vmatpush1.bf16.msra.mxu0 %v1444_v2  ;;  %1406 = vmatpush1.bf16.msra.mxu1 %v1444_v2  ;;  %v1463_v18 = vld [vmem:[%s1748_s17 + $0x114] ss:$8 sps:$4 sm:$0xff]   ;;  %v1465_v19 = vld [vmem:[%s1748_s17 + $0x10] ss:$8 sps:$4 sm:$0xff]   ;;  %v1469_v22 = vld [vmem:[%s1748_s17 + $0x124] ss:$8 sps:$4 sm:$0xff]  }
  0x18   : > { %756 = vmatprep.subr.bf16.mxu0 %v1703_v0  ;;  %1395 = vmatprep.subr.bf16.mxu1 %v1703_v0  ;;  %v1466_v20 = vld [vmem:[%s1748_s17 + $0x110] ss:$8 sps:$4 sm:$0xff]   ;;  %v1471_v23 = vld [vmem:[%s1748_s17 + $0x20] ss:$8 sps:$4 sm:$0xff]   ;;  %v1473_v25 = vld [vmem:[%s1748_s17 + $0x34] ss:$8 sps:$4 sm:$0xff]  }
  0x19   : > { %v1472_v24 = vld [vmem:[%s1748_s17 + $0x120] ss:$8 sps:$4 sm:$0xff]   ;;  %v1475_v26 = vld [vmem:[%s1748_s17 + $0x134] ss:$8 sps:$4 sm:$0xff]   ;;  %v1477_v27 = vld [vmem:[%s1748_s17 + $0x30] ss:$8 sps:$4 sm:$0xff]  }
  0x1a   : > { %v1478_v28 = vld [vmem:[%s1748_s17 + $0x130] ss:$8 sps:$4 sm:$0xff]   ;;  %v1479_v29 = vld [vmem:[%s1748_s17 + $0x44] ss:$8 sps:$4 sm:$0xff]   ;;  %v1483_v31 = vld [vmem:[%s1748_s17 + $0x40] ss:$8 sps:$4 sm:$0xff]  }
  0x1b   : > { %757 = vmatpush1.bf16.msra.mxu0 %v1445_v3  ;;  %1407 = vmatpush1.bf16.msra.mxu1 %v1445_v3  ;;  %v1481_v30 = vld [vmem:[%s1748_s17 + $0x144] ss:$8 sps:$4 sm:$0xff]   ;;  %v1484_v32 = vld [vmem:[%s1748_s17 + $0x140] ss:$8 sps:$4 sm:$0xff]   ;;  %v1485_v33 = vld [vmem:[%s1748_s17 + $0x54] ss:$8 sps:$4 sm:$0xff]  }
  0x1c   : > { %758 = vmatprep.subr.bf16.mxu0 %v1703_v0  ;;  %1396 = vmatprep.subr.bf16.mxu1 %v1703_v0  ;;  %v1487_v34 = vld [vmem:[%s1748_s17 + $0x154] ss:$8 sps:$4 sm:$0xff]   ;;  %v1489_v35 = vld [vmem:[%s1748_s17 + $0x50] ss:$8 sps:$4 sm:$0xff]   ;;  %v1491_v37 = vld [vmem:[%s1748_s17 + $0x64] ss:$8 sps:$4 sm:$0xff]  }
  0x1d   : > { %v1490_v36 = vld [vmem:[%s1748_s17 + $0x150] ss:$8 sps:$4 sm:$0xff]   ;;  %v1493_v38 = vld [vmem:[%s1748_s17 + $0x164] ss:$8 sps:$4 sm:$0xff]   ;;  %v1495_v39 = vld [vmem:[%s1748_s17 + $0x60] ss:$8 sps:$4 sm:$0xff]  }
  0x1e   : > { %v1496_v40 = vld [vmem:[%s1748_s17 + $0x160] ss:$8 sps:$4 sm:$0xff]   ;;  %v1497_v41 = vld [vmem:[%s1748_s17 + $0x74] ss:$8 sps:$4 sm:$0xff]   ;;  %v1501_v43 = vld [vmem:[%s1748_s17 + $0x70] ss:$8 sps:$4 sm:$0xff]  }
  0x1f   : > { %759 = vmatpush1.bf16.msra.mxu0 %v1446_v4  ;;  %1408 = vmatpush1.bf16.msra.mxu1 %v1446_v4  ;;  %v1499_v42 = vld [vmem:[%s1748_s17 + $0x174] ss:$8 sps:$4 sm:$0xff]   ;;  %v1502_v44 = vld [vmem:[%s1748_s17 + $0x170] ss:$8 sps:$4 sm:$0xff]   ;;  %v1503_v45 = vld [vmem:[%s1748_s17 + $0x84] ss:$8 sps:$4 sm:$0xff]  }
  0x20   : > { %760 = vmatprep.subr.bf16.mxu0 %v1703_v0  ;;  %1397 = vmatprep.subr.bf16.mxu1 %v1703_v0  ;;  %v1505_v46 = vld [vmem:[%s1748_s17 + $0x184] ss:$8 sps:$4 sm:$0xff]   ;;  %v1507_v47 = vld [vmem:[%s1748_s17 + $0x80] ss:$8 sps:$4 sm:$0xff]   ;;  %v1509_v49 = vld [vmem:[%s1748_s17 + $0x94] ss:$8 sps:$4 sm:$0xff]  }
  0x21   : > { %v1508_v48 = vld [vmem:[%s1748_s17 + $0x180] ss:$8 sps:$4 sm:$0xff]   ;;  %v1511_v50 = vld [vmem:[%s1748_s17 + $0x194] ss:$8 sps:$4 sm:$0xff]   ;;  %v1513_v51 = vld [vmem:[%s1748_s17 + $0x90] ss:$8 sps:$4 sm:$0xff]  }
  0x22   : > { %v1514_v52 = vld [vmem:[%s1748_s17 + $0x190] ss:$8 sps:$4 sm:$0xff]   ;;  %v1515_v53 = vld [vmem:[%s1748_s17 + $0xa4] ss:$8 sps:$4 sm:$0xff]   ;;  %v1519_v55 = vld [vmem:[%s1748_s17 + $0xa0] ss:$8 sps:$4 sm:$0xff]  }
  0x23   : > { %761 = vmatpush1.bf16.msra.mxu0 %v1447_v7  ;;  %1409 = vmatpush1.bf16.msra.mxu1 %v1447_v7  ;;  %v1517_v54 = vld [vmem:[%s1748_s17 + $0x1a4] ss:$8 sps:$4 sm:$0xff]   ;;  %v1520_v56 = vld [vmem:[%s1748_s17 + $0x1a0] ss:$8 sps:$4 sm:$0xff]   ;;  %v1521_v57 = vld [vmem:[%s1748_s17 + $0xb4] ss:$8 sps:$4 sm:$0xff]  }
  0x24   : > { %762 = vmatprep.subr.bf16.mxu0 %v1703_v0  ;;  %1398 = vmatprep.subr.bf16.mxu1 %v1703_v0  ;;  %v1523_v58 = vld [vmem:[%s1748_s17 + $0x1b4] ss:$8 sps:$4 sm:$0xff]   ;;  %v1525_v59 = vld [vmem:[%s1748_s17 + $0xb0] ss:$8 sps:$4 sm:$0xff]   ;;  %v1527_v61 = vld [vmem:[%s1748_s17 + $0xc4] ss:$8 sps:$4 sm:$0xff]  }
  0x25   : > { %v1526_v60 = vld [vmem:[%s1748_s17 + $0x1b0] ss:$8 sps:$4 sm:$0xff]   ;;  %v1529_v62 = vld [vmem:[%s1748_s17 + $0x1c4] ss:$8 sps:$4 sm:$0xff]   ;;  %v1531_v63 = vld [vmem:[%s1748_s17 + $0xc0] ss:$8 sps:$4 sm:$0xff]  }
  0x26   : > { %v1533_v1 = vld [vmem:[%s1748_s17 + $0xd4] ss:$8 sps:$4 sm:$0xff]   ;;  %v1537_v3 = vld [vmem:[%s1748_s17 + $0xd0] ss:$8 sps:$4 sm:$0xff]   ;;  %v1539_v5 = vld [vmem:[%s1748_s17 + $0xe4] ss:$8 sps:$4 sm:$0xff]  }
  0x27   : > { %763 = vmatpush1.bf16.msra.mxu0 %v1448_v8  ;;  %1410 = vmatpush1.bf16.msra.mxu1 %v1448_v8  ;;  %v1535_v2 = vld [vmem:[%s1748_s17 + $0x1d4] ss:$8 sps:$4 sm:$0xff]   ;;  %v1538_v4 = vld [vmem:[%s1748_s17 + $0x1d0] ss:$8 sps:$4 sm:$0xff]   ;;  %v1541_v6 = vld [vmem:[%s1748_s17 + $0x1e4] ss:$8 sps:$4 sm:$0xff]  }
  0x28   : > { %764 = vmatprep.subr.bf16.mxu0 %v1703_v0  ;;  %1399 = vmatprep.subr.bf16.mxu1 %v1703_v0  ;;  %v1543_v7 = vld [vmem:[%s1748_s17 + $0xe0] ss:$8 sps:$4 sm:$0xff]  }
  0x29   : > { %v1544_v8 = vld [vmem:[%s1748_s17 + $0x1e0] ss:$8 sps:$4 sm:$0xff]  }
  0x2b   : > { %765 = vmatpush1.bf16.msra.mxu0 %v1449_v9  ;;  %1411 = vmatpush1.bf16.msra.mxu1 %v1449_v9  ;;  %v1545_v9 = vld [vmem:[%s1748_s17 + $0xf4] ss:$8 sps:$4 sm:$0xff]  }
  0x2c   : > { %766 = vmatprep.subr.bf16.mxu0 %v1703_v0  ;;  %1400 = vmatprep.subr.bf16.mxu1 %v1703_v0 }
  0x2f   : > { %767 = vmatpush1.bf16.msra.mxu0 %v1450_v10  ;;  %1412 = vmatpush1.bf16.msra.mxu1 %v1450_v10  ;;  %v1547_v10 = vld [vmem:[%s1748_s17 + $0x1f4] ss:$8 sps:$4 sm:$0xff]  }
  0x30   : > { %768 = vmatprep.subr.bf16.mxu0 %v1703_v0  ;;  %1401 = vmatprep.subr.bf16.mxu1 %v1703_v0 }
  0x33   : > { %769 = vmatpush1.bf16.msra.mxu0 %v1451_v11  ;;  %1413 = vmatpush1.bf16.msra.mxu1 %v1451_v11  ;;  %v1549_v11 = vld [vmem:[%s1748_s17 + $0xf0] ss:$8 sps:$4 sm:$0xff]  }
  0x34   : > { %770 = vmatprep.subr.bf16.mxu0 %v1703_v0  ;;  %1402 = vmatprep.subr.bf16.mxu1 %v1703_v0 }
  0x37   : > { %771 = vmatpush1.bf16.msra.mxu0 %v1452_v12  ;;  %1414 = vmatpush1.bf16.msra.mxu1 %v1452_v12  ;;  %v1550_v12 = vld [vmem:[%s1748_s17 + $0x1f0] ss:$8 sps:$4 sm:$0xff]  }
  0x38   : > { %772 = vmatprep.subr.bf16.mxu0 %v1703_v0  ;;  %1403 = vmatprep.subr.bf16.mxu1 %v1703_v0 }
  0x3b   : > { %773 = vmatpush1.bf16.msra.mxu0 %v1453_v13  ;;  %1415 = vmatpush1.bf16.msra.mxu1 %v1453_v13 }
  0x3c   : > { %774 = vmatprep.subr.bf16.mxu0 %v1703_v0  ;;  %1404 = vmatprep.subr.bf16.mxu1 %v1703_v0  ;;  %v1532_v0 = vld [vmem:[%s1748_s17 + $0x1c0] ss:$8 sps:$4 sm:$0xff]  }
  0x3f   : > { %775 = vmatpush1.bf16.msra.mxu0 %v1454_v14  ;;  %1416 = vmatpush1.bf16.msra.mxu1 %v1454_v14 }
  0x42   : > { %785 = vmatmul.mubr.bf16.vlgmr.msra.gmra.mrb[0].mxu0 %v1455_v15  ;;  %913 = vmatmul.mubr.bf16.vlgmr.msra.gmra.mrb[0].mxu1 %v1458_v16 }
  0x43   : > { %1358 = vmatprep.mubr.msk.bf16.mxu0 %vm655_vm0, %v1461_v17  ;;  %1374 = vmatprep.mubr.msk.bf16.mxu1 %vm655_vm0, %v1463_v18 }
  0x4a   : > { %793 = vmatmul.mubr.bf16.gmra.mrb[4].mxu0 %v1465_v19  ;;  %921 = vmatmul.mubr.bf16.gmra.mrb[4].mxu1 %v1466_v20 }
  0x4b   : > { %1359 = vmatprep.mubr.msk.bf16.mxu0 %vm655_vm0, %v1467_v21  ;;  %1375 = vmatprep.mubr.msk.bf16.mxu1 %vm655_vm0, %v1469_v22 }
  0x52   : > { %801 = vmatmul.mubr.bf16.gmra.mrb[8].mxu0 %v1471_v23  ;;  %929 = vmatmul.mubr.bf16.gmra.mrb[8].mxu1 %v1472_v24 }
  0x53   : > { %1360 = vmatprep.mubr.msk.bf16.mxu0 %vm655_vm0, %v1473_v25  ;;  %1376 = vmatprep.mubr.msk.bf16.mxu1 %vm655_vm0, %v1475_v26 }
  0x5a   : > { %809 = vmatmul.mubr.bf16.gmra.mrb[12].mxu0 %v1477_v27  ;;  %937 = vmatmul.mubr.bf16.gmra.mrb[12].mxu1 %v1478_v28 }
  0x5b   : > { %1361 = vmatprep.mubr.msk.bf16.mxu0 %vm655_vm0, %v1479_v29  ;;  %1377 = vmatprep.mubr.msk.bf16.mxu1 %vm655_vm0, %v1481_v30 }
  0x62   : > { %817 = vmatmul.mubr.bf16.gmra.mrb[16].mxu0 %v1483_v31  ;;  %945 = vmatmul.mubr.bf16.gmra.mrb[16].mxu1 %v1484_v32 }
  0x63   : > { %1362 = vmatprep.mubr.msk.bf16.mxu0 %vm655_vm0, %v1485_v33  ;;  %1378 = vmatprep.mubr.msk.bf16.mxu1 %vm655_vm0, %v1487_v34 }
  0x6a   : > { %825 = vmatmul.mubr.bf16.gmra.mrb[20].mxu0 %v1489_v35  ;;  %953 = vmatmul.mubr.bf16.gmra.mrb[20].mxu1 %v1490_v36 }
  0x6b   : > { %1363 = vmatprep.mubr.msk.bf16.mxu0 %vm655_vm0, %v1491_v37  ;;  %1379 = vmatprep.mubr.msk.bf16.mxu1 %vm655_vm0, %v1493_v38 }
  0x72   : > { %833 = vmatmul.mubr.bf16.gmra.mrb[24].mxu0 %v1495_v39  ;;  %961 = vmatmul.mubr.bf16.gmra.mrb[24].mxu1 %v1496_v40 }
  0x73   : > { %1364 = vmatprep.mubr.msk.bf16.mxu0 %vm655_vm0, %v1497_v41  ;;  %1380 = vmatprep.mubr.msk.bf16.mxu1 %vm655_vm0, %v1499_v42 }
  0x7a   : > { %841 = vmatmul.mubr.bf16.gmra.mrb[28].mxu0 %v1501_v43  ;;  %969 = vmatmul.mubr.bf16.gmra.mrb[28].mxu1 %v1502_v44 }
  0x7b   : > { %1365 = vmatprep.mubr.msk.bf16.mxu0 %vm655_vm0, %v1503_v45  ;;  %1381 = vmatprep.mubr.msk.bf16.mxu1 %vm655_vm0, %v1505_v46 }
  0x82   : > { %849 = vmatmul.mubr.bf16.gmra.mrb[32].mxu0 %v1507_v47  ;;  %977 = vmatmul.mubr.bf16.gmra.mrb[32].mxu1 %v1508_v48 }
  0x83   : > { %1366 = vmatprep.mubr.msk.bf16.mxu0 %vm655_vm0, %v1509_v49  ;;  %1382 = vmatprep.mubr.msk.bf16.mxu1 %vm655_vm0, %v1511_v50 }
  0x8a   : > { %857 = vmatmul.mubr.bf16.gmra.mrb[36].mxu0 %v1513_v51  ;;  %985 = vmatmul.mubr.bf16.gmra.mrb[36].mxu1 %v1514_v52 }
  0x8b   : > { %1367 = vmatprep.mubr.msk.bf16.mxu0 %vm655_vm0, %v1515_v53  ;;  %1383 = vmatprep.mubr.msk.bf16.mxu1 %vm655_vm0, %v1517_v54 }
  0x92   : > { %865 = vmatmul.mubr.bf16.gmra.mrb[40].mxu0 %v1519_v55  ;;  %993 = vmatmul.mubr.bf16.gmra.mrb[40].mxu1 %v1520_v56 }
  0x93   : > { %1368 = vmatprep.mubr.msk.bf16.mxu0 %vm655_vm0, %v1521_v57  ;;  %1384 = vmatprep.mubr.msk.bf16.mxu1 %vm655_vm0, %v1523_v58 }
  0x9a   : > { %873 = vmatmul.mubr.bf16.gmra.mrb[44].mxu0 %v1525_v59  ;;  %1001 = vmatmul.mubr.bf16.gmra.mrb[44].mxu1 %v1526_v60 }
  0x9b   : > { %1369 = vmatprep.mubr.msk.bf16.mxu0 %vm655_vm0, %v1527_v61  ;;  %1385 = vmatprep.mubr.msk.bf16.mxu1 %vm655_vm0, %v1529_v62 }
  0xa2   : > { %881 = vmatmul.mubr.bf16.gmra.mrb[48].mxu0 %v1531_v63  ;;  %1009 = vmatmul.mubr.bf16.gmra.mrb[48].mxu1 %v1532_v0 }
  0xa3   : > { %1370 = vmatprep.mubr.msk.bf16.mxu0 %vm655_vm0, %v1533_v1  ;;  %1386 = vmatprep.mubr.msk.bf16.mxu1 %vm655_vm0, %v1535_v2 }
  0xaa   : > { %889 = vmatmul.mubr.bf16.gmra.mrb[52].mxu0 %v1537_v3  ;;  %1017 = vmatmul.mubr.bf16.gmra.mrb[52].mxu1 %v1538_v4 }
  0xab   : > { %1371 = vmatprep.mubr.msk.bf16.mxu0 %vm655_vm0, %v1539_v5  ;;  %1387 = vmatprep.mubr.msk.bf16.mxu1 %vm655_vm0, %v1541_v6 }
  0xb2   : > { %897 = vmatmul.mubr.bf16.gmra.mrb[56].mxu0 %v1543_v7  ;;  %1025 = vmatmul.mubr.bf16.gmra.mrb[56].mxu1 %v1544_v8 }
  0xb3   : > { %1372 = vmatprep.mubr.msk.bf16.mxu0 %vm655_vm0, %v1545_v9  ;;  %1388 = vmatprep.mubr.msk.bf16.mxu1 %vm655_vm0, %v1547_v10 }
  0xba   : > { %905 = vmatmul.mubr.bf16.gmra.mrb[60].mxu0 %v1549_v11  ;;  %1033 = vmatmul.mubr.bf16.gmra.mrb[60].mxu1 %v1550_v12 }
 0x115   : > { %v786_v13 = vpop.f32.mrb[0].mxu0  ;;  %v914_v14 = vpop.f32.mrb[0].mxu1 }
 0x116   : > { %1551 = vtanh.f32 %v786_v13  ;;  %v788_v15 = vpop.f32.mrb[1].mxu0  ;;  %v916_v16 = vpop.f32.mrb[1].mxu1 }
 0x117   : > { %1553 = vtanh.f32 %v914_v14  ;;  %v789_v17 = vpop.f32.mrb[2].mxu0  ;;  %v917_v18 = vpop.f32.mrb[2].mxu1 }
 0x118   : > { %1555 = vtanh.f32 %v789_v17  ;;  %v791_v19 = vpop.f32.mrb[3].mxu0  ;;  %v919_v20 = vpop.f32.mrb[3].mxu1 }
 0x119   : > { %1557 = vtanh.f32 %v917_v18 }
 0x11d   : > { %v794_v21 = vpop.f32.mrb[4].mxu0  ;;  %v922_v22 = vpop.f32.mrb[4].mxu1 }
 0x11e   : > { %1559 = vtanh.f32 %v794_v21  ;;  %v796_v23 = vpop.f32.mrb[5].mxu0  ;;  %v924_v24 = vpop.f32.mrb[5].mxu1 }
 0x11f   : > { %1561 = vtanh.f32 %v922_v22  ;;  %v797_v25 = vpop.f32.mrb[6].mxu0  ;;  %v925_v26 = vpop.f32.mrb[6].mxu1 }
 0x120   : > { %v1552_v27 = vpop.eup %1551  ;;  %1563 = vtanh.f32 %v797_v25  ;;  %v799_v28 = vpop.f32.mrb[7].mxu0 }
 0x121   : > { %v927_v29 = vpop.f32.mrb[7].mxu1  ;;  %v1554_v30 = vpop.eup %1553  ;;  %1105 = vst [vmem:[%s1890_s23] sm:$0xff] %v1552_v27  ;;  %1565 = vtanh.f32 %v925_v26 }
 0x122   : > { %v1556_v31 = vpop.eup %1555  ;;  %1137 = vst [vmem:[%s1890_s23 + $0x100] sm:$0xff] %v1554_v30 }
 0x123   : > { %v1558_v32 = vpop.eup %1557  ;;  %1106 = vst [vmem:[%s1890_s23 + $0x8] sm:$0xff] %v1556_v31 }
 0x124   : > { %1138 = vst [vmem:[%s1890_s23 + $0x108] sm:$0xff] %v1558_v32 }
 0x125   : > { %v802_v33 = vpop.f32.mrb[8].mxu0  ;;  %v930_v34 = vpop.f32.mrb[8].mxu1 }
 0x126   : > { %1567 = vtanh.f32 %v802_v33  ;;  %v804_v35 = vpop.f32.mrb[9].mxu0  ;;  %v932_v36 = vpop.f32.mrb[9].mxu1 }
 0x127   : > { %1569 = vtanh.f32 %v930_v34  ;;  %v805_v37 = vpop.f32.mrb[10].mxu0  ;;  %v933_v38 = vpop.f32.mrb[10].mxu1 }
 0x128   : > { %v1560_v39 = vpop.eup %1559  ;;  %1571 = vtanh.f32 %v805_v37  ;;  %v807_v40 = vpop.f32.mrb[11].mxu0 }
 0x129   : > { %v935_v41 = vpop.f32.mrb[11].mxu1  ;;  %v1562_v42 = vpop.eup %1561  ;;  %1107 = vst [vmem:[%s1890_s23 + $0x10] sm:$0xff] %v1560_v39  ;;  %1573 = vtanh.f32 %v933_v38 }
 0x12a   : > { %v1564_v43 = vpop.eup %1563  ;;  %1139 = vst [vmem:[%s1890_s23 + $0x110] sm:$0xff] %v1562_v42 }
 0x12b   : > { %v1566_v44 = vpop.eup %1565  ;;  %1108 = vst [vmem:[%s1890_s23 + $0x18] sm:$0xff] %v1564_v43 }
 0x12c   : > { %1140 = vst [vmem:[%s1890_s23 + $0x118] sm:$0xff] %v1566_v44 }
 0x12d   : > { %v810_v45 = vpop.f32.mrb[12].mxu0  ;;  %v938_v46 = vpop.f32.mrb[12].mxu1 }
 0x12e   : > { %1575 = vtanh.f32 %v810_v45  ;;  %v812_v47 = vpop.f32.mrb[13].mxu0  ;;  %v940_v48 = vpop.f32.mrb[13].mxu1 }
 0x12f   : > { %1577 = vtanh.f32 %v938_v46  ;;  %v813_v49 = vpop.f32.mrb[14].mxu0  ;;  %v941_v50 = vpop.f32.mrb[14].mxu1 }
 0x130   : > { %v1568_v51 = vpop.eup %1567  ;;  %1579 = vtanh.f32 %v813_v49  ;;  %v815_v52 = vpop.f32.mrb[15].mxu0 }
 0x131   : > { %v943_v53 = vpop.f32.mrb[15].mxu1  ;;  %v1570_v54 = vpop.eup %1569  ;;  %1109 = vst [vmem:[%s1890_s23 + $0x20] sm:$0xff] %v1568_v51  ;;  %1581 = vtanh.f32 %v941_v50 }
 0x132   : > { %v1572_v55 = vpop.eup %1571  ;;  %1141 = vst [vmem:[%s1890_s23 + $0x120] sm:$0xff] %v1570_v54 }
 0x133   : > { %v1574_v56 = vpop.eup %1573  ;;  %1110 = vst [vmem:[%s1890_s23 + $0x28] sm:$0xff] %v1572_v55 }
 0x134   : > { %1142 = vst [vmem:[%s1890_s23 + $0x128] sm:$0xff] %v1574_v56 }
 0x135   : > { %v818_v57 = vpop.f32.mrb[16].mxu0  ;;  %v946_v58 = vpop.f32.mrb[16].mxu1 }
 0x136   : > { %1583 = vtanh.f32 %v818_v57  ;;  %v820_v59 = vpop.f32.mrb[17].mxu0  ;;  %v948_v60 = vpop.f32.mrb[17].mxu1 }
 0x137   : > { %1585 = vtanh.f32 %v946_v58  ;;  %v821_v61 = vpop.f32.mrb[18].mxu0  ;;  %v949_v62 = vpop.f32.mrb[18].mxu1 }
 0x138   : > { %v1576_v63 = vpop.eup %1575  ;;  %1587 = vtanh.f32 %v821_v61  ;;  %v823_v0 = vpop.f32.mrb[19].mxu0 }
 0x139   : > { %v951_v1 = vpop.f32.mrb[19].mxu1  ;;  %v1578_v2 = vpop.eup %1577  ;;  %1111 = vst [vmem:[%s1890_s23 + $0x30] sm:$0xff] %v1576_v63  ;;  %1589 = vtanh.f32 %v949_v62 }
 0x13a   : > { %v1580_v3 = vpop.eup %1579  ;;  %1143 = vst [vmem:[%s1890_s23 + $0x130] sm:$0xff] %v1578_v2 }
 0x13b   : > { %v1582_v4 = vpop.eup %1581  ;;  %1112 = vst [vmem:[%s1890_s23 + $0x38] sm:$0xff] %v1580_v3 }
 0x13c   : > { %1144 = vst [vmem:[%s1890_s23 + $0x138] sm:$0xff] %v1582_v4 }
 0x13d   : > { %v826_v5 = vpop.f32.mrb[20].mxu0  ;;  %v954_v6 = vpop.f32.mrb[20].mxu1 }
 0x13e   : > { %1591 = vtanh.f32 %v826_v5  ;;  %v828_v7 = vpop.f32.mrb[21].mxu0  ;;  %v956_v8 = vpop.f32.mrb[21].mxu1 }
 0x13f   : > { %1593 = vtanh.f32 %v954_v6  ;;  %v829_v9 = vpop.f32.mrb[22].mxu0  ;;  %v957_v10 = vpop.f32.mrb[22].mxu1 }
 0x140   : > { %v1584_v11 = vpop.eup %1583  ;;  %1595 = vtanh.f32 %v829_v9  ;;  %v831_v12 = vpop.f32.mrb[23].mxu0 }
 0x141   : > { %v959_v13 = vpop.f32.mrb[23].mxu1  ;;  %v1586_v14 = vpop.eup %1585  ;;  %1113 = vst [vmem:[%s1890_s23 + $0x40] sm:$0xff] %v1584_v11  ;;  %1597 = vtanh.f32 %v957_v10 }
 0x142   : > { %v1588_v15 = vpop.eup %1587  ;;  %1145 = vst [vmem:[%s1890_s23 + $0x140] sm:$0xff] %v1586_v14 }
 0x143   : > { %v1590_v16 = vpop.eup %1589  ;;  %1114 = vst [vmem:[%s1890_s23 + $0x48] sm:$0xff] %v1588_v15 }
 0x144   : > { %1146 = vst [vmem:[%s1890_s23 + $0x148] sm:$0xff] %v1590_v16 }
 0x145   : > { %v834_v17 = vpop.f32.mrb[24].mxu0  ;;  %v962_v18 = vpop.f32.mrb[24].mxu1 }
 0x146   : > { %1599 = vtanh.f32 %v834_v17  ;;  %v836_v19 = vpop.f32.mrb[25].mxu0  ;;  %v964_v20 = vpop.f32.mrb[25].mxu1 }
 0x147   : > { %1601 = vtanh.f32 %v962_v18  ;;  %v837_v21 = vpop.f32.mrb[26].mxu0  ;;  %v965_v22 = vpop.f32.mrb[26].mxu1 }
 0x148   : > { %v1592_v23 = vpop.eup %1591  ;;  %1603 = vtanh.f32 %v837_v21  ;;  %v839_v24 = vpop.f32.mrb[27].mxu0 }
 0x149   : > { %v967_v25 = vpop.f32.mrb[27].mxu1  ;;  %v1594_v26 = vpop.eup %1593  ;;  %1115 = vst [vmem:[%s1890_s23 + $0x50] sm:$0xff] %v1592_v23  ;;  %1605 = vtanh.f32 %v965_v22 }
 0x14a   : > { %v1596_v27 = vpop.eup %1595  ;;  %1147 = vst [vmem:[%s1890_s23 + $0x150] sm:$0xff] %v1594_v26 }
 0x14b   : > { %v1598_v28 = vpop.eup %1597  ;;  %1116 = vst [vmem:[%s1890_s23 + $0x58] sm:$0xff] %v1596_v27 }
 0x14c   : > { %1148 = vst [vmem:[%s1890_s23 + $0x158] sm:$0xff] %v1598_v28 }
 0x14d   : > { %v842_v29 = vpop.f32.mrb[28].mxu0  ;;  %v970_v30 = vpop.f32.mrb[28].mxu1 }
 0x14e   : > { %1607 = vtanh.f32 %v842_v29  ;;  %v844_v31 = vpop.f32.mrb[29].mxu0  ;;  %v972_v32 = vpop.f32.mrb[29].mxu1 }
 0x14f   : > { %1609 = vtanh.f32 %v970_v30  ;;  %v845_v33 = vpop.f32.mrb[30].mxu0  ;;  %v973_v34 = vpop.f32.mrb[30].mxu1 }
 0x150   : > { %v1600_v35 = vpop.eup %1599  ;;  %1611 = vtanh.f32 %v845_v33  ;;  %v847_v36 = vpop.f32.mrb[31].mxu0 }
 0x151   : > { %v975_v37 = vpop.f32.mrb[31].mxu1  ;;  %v1602_v38 = vpop.eup %1601  ;;  %1117 = vst [vmem:[%s1890_s23 + $0x60] sm:$0xff] %v1600_v35  ;;  %1613 = vtanh.f32 %v973_v34 }
 0x152   : > { %v1604_v39 = vpop.eup %1603  ;;  %1149 = vst [vmem:[%s1890_s23 + $0x160] sm:$0xff] %v1602_v38 }
 0x153   : > { %v1606_v40 = vpop.eup %1605  ;;  %1118 = vst [vmem:[%s1890_s23 + $0x68] sm:$0xff] %v1604_v39 }
 0x154   : > { %1150 = vst [vmem:[%s1890_s23 + $0x168] sm:$0xff] %v1606_v40 }
 0x155   : > { %v850_v41 = vpop.f32.mrb[32].mxu0  ;;  %v978_v42 = vpop.f32.mrb[32].mxu1 }
 0x156   : > { %1615 = vtanh.f32 %v850_v41  ;;  %v852_v43 = vpop.f32.mrb[33].mxu0  ;;  %v980_v44 = vpop.f32.mrb[33].mxu1 }
 0x157   : > { %1617 = vtanh.f32 %v978_v42  ;;  %v853_v45 = vpop.f32.mrb[34].mxu0  ;;  %v981_v46 = vpop.f32.mrb[34].mxu1 }
 0x158   : > { %v1608_v47 = vpop.eup %1607  ;;  %1619 = vtanh.f32 %v853_v45  ;;  %v855_v48 = vpop.f32.mrb[35].mxu0 }
 0x159   : > { %v983_v49 = vpop.f32.mrb[35].mxu1  ;;  %v1610_v50 = vpop.eup %1609  ;;  %1119 = vst [vmem:[%s1890_s23 + $0x70] sm:$0xff] %v1608_v47  ;;  %1621 = vtanh.f32 %v981_v46 }
 0x15a   : > { %v1612_v51 = vpop.eup %1611  ;;  %1151 = vst [vmem:[%s1890_s23 + $0x170] sm:$0xff] %v1610_v50 }
 0x15b   : > { %v1614_v52 = vpop.eup %1613  ;;  %1120 = vst [vmem:[%s1890_s23 + $0x78] sm:$0xff] %v1612_v51 }
 0x15c   : > { %1152 = vst [vmem:[%s1890_s23 + $0x178] sm:$0xff] %v1614_v52 }
 0x15d   : > { %v858_v53 = vpop.f32.mrb[36].mxu0  ;;  %v986_v54 = vpop.f32.mrb[36].mxu1 }
 0x15e   : > { %1623 = vtanh.f32 %v858_v53  ;;  %v860_v55 = vpop.f32.mrb[37].mxu0  ;;  %v988_v56 = vpop.f32.mrb[37].mxu1 }
 0x15f   : > { %1625 = vtanh.f32 %v986_v54  ;;  %v861_v57 = vpop.f32.mrb[38].mxu0  ;;  %v989_v58 = vpop.f32.mrb[38].mxu1 }
 0x160   : > { %v1616_v59 = vpop.eup %1615  ;;  %1627 = vtanh.f32 %v861_v57  ;;  %v863_v60 = vpop.f32.mrb[39].mxu0 }
 0x161   : > { %v991_v61 = vpop.f32.mrb[39].mxu1  ;;  %v1618_v62 = vpop.eup %1617  ;;  %1121 = vst [vmem:[%s1890_s23 + $0x80] sm:$0xff] %v1616_v59  ;;  %1629 = vtanh.f32 %v989_v58 }
 0x162   : > { %v1620_v63 = vpop.eup %1619  ;;  %1153 = vst [vmem:[%s1890_s23 + $0x180] sm:$0xff] %v1618_v62 }
 0x163   : > { %v1622_v0 = vpop.eup %1621  ;;  %1122 = vst [vmem:[%s1890_s23 + $0x88] sm:$0xff] %v1620_v63 }
 0x164   : > { %1154 = vst [vmem:[%s1890_s23 + $0x188] sm:$0xff] %v1622_v0 }
 0x165   : > { %v866_v1 = vpop.f32.mrb[40].mxu0  ;;  %v994_v2 = vpop.f32.mrb[40].mxu1 }
 0x166   : > { %1631 = vtanh.f32 %v866_v1  ;;  %v868_v3 = vpop.f32.mrb[41].mxu0  ;;  %v996_v4 = vpop.f32.mrb[41].mxu1 }
 0x167   : > { %1633 = vtanh.f32 %v994_v2  ;;  %v869_v5 = vpop.f32.mrb[42].mxu0  ;;  %v997_v6 = vpop.f32.mrb[42].mxu1 }
 0x168   : > { %v1624_v7 = vpop.eup %1623  ;;  %1635 = vtanh.f32 %v869_v5  ;;  %v871_v8 = vpop.f32.mrb[43].mxu0 }
 0x169   : > { %v999_v9 = vpop.f32.mrb[43].mxu1  ;;  %v1626_v10 = vpop.eup %1625  ;;  %1123 = vst [vmem:[%s1890_s23 + $0x90] sm:$0xff] %v1624_v7  ;;  %1637 = vtanh.f32 %v997_v6 }
 0x16a   : > { %v1628_v11 = vpop.eup %1627  ;;  %1155 = vst [vmem:[%s1890_s23 + $0x190] sm:$0xff] %v1626_v10 }
 0x16b   : > { %v1630_v12 = vpop.eup %1629  ;;  %1124 = vst [vmem:[%s1890_s23 + $0x98] sm:$0xff] %v1628_v11 }
 0x16c   : > { %1156 = vst [vmem:[%s1890_s23 + $0x198] sm:$0xff] %v1630_v12 }
 0x16d   : > { %v874_v13 = vpop.f32.mrb[44].mxu0  ;;  %v1002_v14 = vpop.f32.mrb[44].mxu1 }
 0x16e   : > { %1639 = vtanh.f32 %v874_v13  ;;  %v876_v15 = vpop.f32.mrb[45].mxu0  ;;  %v1004_v16 = vpop.f32.mrb[45].mxu1 }
 0x16f   : > { %1641 = vtanh.f32 %v1002_v14  ;;  %v877_v17 = vpop.f32.mrb[46].mxu0  ;;  %v1005_v18 = vpop.f32.mrb[46].mxu1 }
 0x170   : > { %v1632_v19 = vpop.eup %1631  ;;  %1643 = vtanh.f32 %v877_v17  ;;  %v879_v20 = vpop.f32.mrb[47].mxu0 }
 0x171   : > { %v1007_v21 = vpop.f32.mrb[47].mxu1  ;;  %v1634_v22 = vpop.eup %1633  ;;  %1125 = vst [vmem:[%s1890_s23 + $0xa0] sm:$0xff] %v1632_v19  ;;  %1645 = vtanh.f32 %v1005_v18 }
 0x172   : > { %v1636_v23 = vpop.eup %1635  ;;  %1157 = vst [vmem:[%s1890_s23 + $0x1a0] sm:$0xff] %v1634_v22 }
 0x173   : > { %v1638_v24 = vpop.eup %1637  ;;  %1126 = vst [vmem:[%s1890_s23 + $0xa8] sm:$0xff] %v1636_v23 }
 0x174   : > { %1158 = vst [vmem:[%s1890_s23 + $0x1a8] sm:$0xff] %v1638_v24 }
 0x175   : > { %v882_v25 = vpop.f32.mrb[48].mxu0  ;;  %v1010_v26 = vpop.f32.mrb[48].mxu1 }
 0x176   : > { %1647 = vtanh.f32 %v882_v25  ;;  %v884_v27 = vpop.f32.mrb[49].mxu0  ;;  %v1012_v28 = vpop.f32.mrb[49].mxu1 }
 0x177   : > { %1649 = vtanh.f32 %v1010_v26  ;;  %v885_v29 = vpop.f32.mrb[50].mxu0  ;;  %v1013_v30 = vpop.f32.mrb[50].mxu1 }
 0x178   : > { %v1640_v31 = vpop.eup %1639  ;;  %1651 = vtanh.f32 %v885_v29  ;;  %v887_v32 = vpop.f32.mrb[51].mxu0 }
 0x179   : > { %v1015_v33 = vpop.f32.mrb[51].mxu1  ;;  %v1642_v34 = vpop.eup %1641  ;;  %1127 = vst [vmem:[%s1890_s23 + $0xb0] sm:$0xff] %v1640_v31  ;;  %1653 = vtanh.f32 %v1013_v30 }
 0x17a   : > { %v1644_v35 = vpop.eup %1643  ;;  %1159 = vst [vmem:[%s1890_s23 + $0x1b0] sm:$0xff] %v1642_v34 }
 0x17b   : > { %v1646_v36 = vpop.eup %1645  ;;  %1128 = vst [vmem:[%s1890_s23 + $0xb8] sm:$0xff] %v1644_v35 }
 0x17c   : > { %1160 = vst [vmem:[%s1890_s23 + $0x1b8] sm:$0xff] %v1646_v36 }
 0x17d   : > { %v890_v37 = vpop.f32.mrb[52].mxu0  ;;  %v1018_v38 = vpop.f32.mrb[52].mxu1 }
 0x17e   : > { %1655 = vtanh.f32 %v890_v37  ;;  %v892_v39 = vpop.f32.mrb[53].mxu0  ;;  %v1020_v40 = vpop.f32.mrb[53].mxu1 }
 0x17f   : > { %1657 = vtanh.f32 %v1018_v38  ;;  %v893_v41 = vpop.f32.mrb[54].mxu0  ;;  %v1021_v42 = vpop.f32.mrb[54].mxu1 }
 0x180   : > { %v1648_v43 = vpop.eup %1647  ;;  %1659 = vtanh.f32 %v893_v41  ;;  %v895_v44 = vpop.f32.mrb[55].mxu0 }
 0x181   : > { %v1023_v45 = vpop.f32.mrb[55].mxu1  ;;  %v1650_v46 = vpop.eup %1649  ;;  %1129 = vst [vmem:[%s1890_s23 + $0xc0] sm:$0xff] %v1648_v43  ;;  %1661 = vtanh.f32 %v1021_v42 }
 0x182   : > { %v1652_v47 = vpop.eup %1651  ;;  %1161 = vst [vmem:[%s1890_s23 + $0x1c0] sm:$0xff] %v1650_v46 }
 0x183   : > { %v1654_v48 = vpop.eup %1653  ;;  %1130 = vst [vmem:[%s1890_s23 + $0xc8] sm:$0xff] %v1652_v47 }
 0x184   : > { %1162 = vst [vmem:[%s1890_s23 + $0x1c8] sm:$0xff] %v1654_v48 }
 0x185   : > { %v898_v49 = vpop.f32.mrb[56].mxu0  ;;  %v1026_v50 = vpop.f32.mrb[56].mxu1 }
 0x186   : > { %1663 = vtanh.f32 %v898_v49  ;;  %v900_v51 = vpop.f32.mrb[57].mxu0  ;;  %v1028_v52 = vpop.f32.mrb[57].mxu1 }
 0x187   : > { %1665 = vtanh.f32 %v1026_v50  ;;  %v901_v53 = vpop.f32.mrb[58].mxu0  ;;  %v1029_v54 = vpop.f32.mrb[58].mxu1 }
 0x188   : > { %v1656_v55 = vpop.eup %1655  ;;  %1667 = vtanh.f32 %v901_v53  ;;  %v903_v56 = vpop.f32.mrb[59].mxu0 }
 0x189   : > { %v1031_v57 = vpop.f32.mrb[59].mxu1  ;;  %v1658_v58 = vpop.eup %1657  ;;  %1131 = vst [vmem:[%s1890_s23 + $0xd0] sm:$0xff] %v1656_v55  ;;  %1669 = vtanh.f32 %v1029_v54 }
 0x18a   : > { %v1660_v59 = vpop.eup %1659  ;;  %1163 = vst [vmem:[%s1890_s23 + $0x1d0] sm:$0xff] %v1658_v58 }
 0x18b   : > { %v1662_v60 = vpop.eup %1661  ;;  %1132 = vst [vmem:[%s1890_s23 + $0xd8] sm:$0xff] %v1660_v59 }
 0x18c   : > { %1164 = vst [vmem:[%s1890_s23 + $0x1d8] sm:$0xff] %v1662_v60 }
 0x18d   : > { %v906_v61 = vpop.f32.mrb[60].mxu0  ;;  %v1034_v62 = vpop.f32.mrb[60].mxu1 }
 0x18e   : > { %1671 = vtanh.f32 %v906_v61  ;;  %v908_v63 = vpop.f32.mrb[61].mxu0  ;;  %v1036_v0 = vpop.f32.mrb[61].mxu1 }
 0x18f   : > { %1673 = vtanh.f32 %v1034_v62  ;;  %v909_v1 = vpop.f32.mrb[62].mxu0  ;;  %v1037_v2 = vpop.f32.mrb[62].mxu1 }
 0x190   : > { %v1664_v3 = vpop.eup %1663  ;;  %1675 = vtanh.f32 %v909_v1  ;;  %v911_v4 = vpop.f32.mrb[63].mxu0 }
 0x191   : > { %v1039_v5 = vpop.f32.mrb[63].mxu1  ;;  %v1666_v6 = vpop.eup %1665  ;;  %1133 = vst [vmem:[%s1890_s23 + $0xe0] sm:$0xff] %v1664_v3  ;;  %1677 = vtanh.f32 %v1037_v2 }
 0x192   : > { %v1668_v7 = vpop.eup %1667  ;;  %1165 = vst [vmem:[%s1890_s23 + $0x1e0] sm:$0xff] %v1666_v6 }
 0x193   : > { %v1670_v8 = vpop.eup %1669  ;;  %1134 = vst [vmem:[%s1890_s23 + $0xe8] sm:$0xff] %v1668_v7 }
 0x194   : > { %1166 = vst [vmem:[%s1890_s23 + $0x1e8] sm:$0xff] %v1670_v8 }
 0x198   : > { %v1672_v9 = vpop.eup %1671 }
 0x199   : > { %v1674_v10 = vpop.eup %1673  ;;  %1135 = vst [vmem:[%s1890_s23 + $0xf0] sm:$0xff] %v1672_v9 }
 0x19a   : > { %v1676_v11 = vpop.eup %1675  ;;  %1167 = vst [vmem:[%s1890_s23 + $0x1f0] sm:$0xff] %v1674_v10 }
 0x19b   : > { %v1678_v12 = vpop.eup %1677  ;;  %1136 = vst [vmem:[%s1890_s23 + $0xf8] sm:$0xff] %v1676_v11 }
 0x19c   : > { %1168 = vst [vmem:[%s1890_s23 + $0x1f8] sm:$0xff] %v1678_v12 }
 0x19d PF: > { %s12_s11 = sadd.s32 1, %s1701_s11   ;;  %s1968_s9 = smov %s1697_s10 }
 0x19e   : > { %p9_p5 = scmp.ge.s32.totalorder %s12_s11, 6   ;;  %s1969_s10 = smov %s1971_s12 }
 0x1a0   :  { %11 = sbr.rel (!%p9_p5) target bundleno = 2 (0x2), region = 61 }

</bundles_post_ra>
